<compile_context>
chip_gen: v7x
topology: tpu7x:2x2x1
jax: 0.10.0
libtpu: 0.0.40
codegen_flags: <defaults>
</compile_context>

<pallas_src>
import functools

import jax
import jax.numpy as jnp
from jax import lax
from jax.experimental import pallas as pl
from jax.experimental.pallas import tpu as pltpu

LEAKY_02 = 0.2     # conv-block LeakyReLU slope
LEAKY_001 = 0.01   # global-head LeakyReLU slope


def _row_tile(n, max_tile=256):
    """Largest row tile <= max_tile dividing n (multiple of 8 unless full)."""
    if n <= max_tile:
        return n
    for t in range(max_tile, 7, -1):
        if n % t == 0 and t % 8 == 0:
            return t
    return n


# ----------------------------------------------------------------------------
# Kernel 1: pairwise "distance" (actually -squared-distance, like the torch
# code): D[i, j] = 2 * x_i . x_j - ||x_i||^2 - ||x_j||^2, tiled over rows.
# ----------------------------------------------------------------------------
def _pairwise_dist_kernel(xr_ref, xa_ref, d_ref):
    xr = xr_ref[0]                                             # (tm, C) rows
    xa = xa_ref[0]                                             # (N,  C) all
    # NT matmul on the MXU: contract channel axis of both operands (no
    # explicit transpose/relayout of xa).
    g = lax.dot_general(xr, xa, (((1,), (1,)), ((), ())),
                        preferred_element_type=jnp.float32)    # (tm, N)
    sq_r = jnp.sum(xr * xr, axis=1, keepdims=True)             # (tm, 1)
    sq_a = jnp.sum(xa * xa, axis=1, keepdims=True)             # (N, 1)
    d_ref[0] = 2.0 * g - sq_r - sq_a.T


def pairwise_neg_sqdist(x):
    B, N, C = x.shape
    tm = _row_tile(N)
    return pl.pallas_call(
        _pairwise_dist_kernel,
        out_shape=jax.ShapeDtypeStruct((B, N, N), jnp.float32),
        grid=(B, N // tm),
        in_specs=[
            pl.BlockSpec((1, tm, C), lambda bb, ii: (bb, ii, 0)),
            pl.BlockSpec((1, N, C), lambda bb, ii: (bb, 0, 0)),
        ],
        out_specs=pl.BlockSpec((1, tm, N), lambda bb, ii: (bb, ii, 0)),
        compiler_params=pltpu.CompilerParams(
            dimension_semantics=("parallel", "parallel")),
    )(x, x)


# ----------------------------------------------------------------------------
# Glue: kNN indices + neighbor gather (stay in plain JAX).
# ----------------------------------------------------------------------------
def knn_idx(x, k):
    d = pairwise_neg_sqdist(x)             # (B, N, N) = -squared distance
    # TODO(synk): top_k (sorting) has no clean Pallas TPU equivalent; plain JAX.
    return lax.top_k(d, k)[1]              # (B, N, k); includes the point itself


def gather_neighbors(feat, idx):
    """feat: (B, N, C), idx: (B, N, K) -> neighbor-major (B, K, N, C)."""
    # TODO(synk): the data-dependent row gather stays in XLA (a per-row DMA
    # gather in Pallas is not profitable at these row sizes).
    b = jnp.arange(feat.shape[0])[:, None, None]
    return feat[b, jnp.transpose(idx, (0, 2, 1))]


# ----------------------------------------------------------------------------
# Kernel 2: edge-conv block 1 (conv1 + conv2 + max over k), raw 3-ch neighbors.
# First conv applied in split form:  x_j @ Wt + (x_i @ (Wb - Wt) + b1).
# ----------------------------------------------------------------------------
def _edge_layer1_kernel(xn_ref, xc_ref, wt_ref, wd_ref, b1_ref, w2_ref, b2_ref,
                        o_ref):
    k = xn_ref.shape[1]
    xc = xc_ref[0]                                             # (tm, Cin) centers
    bc = jnp.dot(xc, wd_ref[...], preferred_element_type=jnp.float32) + b1_ref[...]
    wt = wt_ref[...]
    w2 = w2_ref[...]
    acc = None
    for j in range(k):                                         # static unrolled loop
        h = jnp.dot(xn_ref[0, j], wt, preferred_element_type=jnp.float32) + bc
        h = jnp.maximum(h, LEAKY_02 * h)                       # LeakyReLU(0.2)
        g = jnp.dot(h, w2, preferred_element_type=jnp.float32)
        acc = g if acc is None else jnp.maximum(acc, g)        # running VPU max
    # bias + LeakyReLU are monotone -> hoisted out of the neighbor max (exact).
    out = acc + b2_ref[...]
    o_ref[0] = jnp.maximum(out, LEAKY_02 * out)


def edge_conv_layer1(x_nbr, x, wt, wd, b1, w2, b2):
    B, K, N, Cin = x_nbr.shape
    c_out = w2.shape[1]
    tm = _row_tile(N)
    return pl.pallas_call(
        _edge_layer1_kernel,
        out_shape=jax.ShapeDtypeStruct((B, N, c_out), jnp.float32),
        grid=(B, N // tm),
        in_specs=[
            pl.BlockSpec((1, K, tm, Cin), lambda bb, ii: (bb, 0, ii, 0)),
            pl.BlockSpec((1, tm, Cin), lambda bb, ii: (bb, ii, 0)),
            pl.BlockSpec(wt.shape, lambda bb, ii: (0, 0)),
            pl.BlockSpec(wd.shape, lambda bb, ii: (0, 0)),
            pl.BlockSpec(b1.shape, lambda bb, ii: (0, 0)),
            pl.BlockSpec(w2.shape, lambda bb, ii: (0, 0)),
            pl.BlockSpec(b2.shape, lambda bb, ii: (0, 0)),
        ],
        out_specs=pl.BlockSpec((1, tm, c_out), lambda bb, ii: (bb, ii, 0)),
        compiler_params=pltpu.CompilerParams(
            dimension_semantics=("parallel", "parallel")),
    )(x_nbr, x, wt, wd, b1, w2, b2)


# ----------------------------------------------------------------------------
# Kernel 3: per-point projections for layers 2/3:  A = x @ Wt,  Bc = x @ Wd + b
# ----------------------------------------------------------------------------
def _point_proj_kernel(x_ref, wt_ref, wd_ref, b_ref, a_ref, bc_ref):
    x = x_ref[0]                                               # (tm, C)
    a_ref[0] = jnp.dot(x, wt_ref[...], preferred_element_type=jnp.float32)
    bc_ref[0] = (jnp.dot(x, wd_ref[...], preferred_element_type=jnp.float32)
                 + b_ref[...])


def point_proj(x, wt, wd, bias):
    B, N, C = x.shape
    cm = wt.shape[1]
    tm = _row_tile(N)
    return pl.pallas_call(
        _point_proj_kernel,
        out_shape=(jax.ShapeDtypeStruct((B, N, cm), jnp.float32),
                   jax.ShapeDtypeStruct((B, N, cm), jnp.float32)),
        grid=(B, N // tm),
        in_specs=[
            pl.BlockSpec((1, tm, C), lambda bb, ii: (bb, ii, 0)),
            pl.BlockSpec(wt.shape, lambda bb, ii: (0, 0)),
            pl.BlockSpec(wd.shape, lambda bb, ii: (0, 0)),
            pl.BlockSpec(bias.shape, lambda bb, ii: (0, 0)),
        ],
        out_specs=(
            pl.BlockSpec((1, tm, cm), lambda bb, ii: (bb, ii, 0)),
            pl.BlockSpec((1, tm, cm), lambda bb, ii: (bb, ii, 0)),
        ),
        compiler_params=pltpu.CompilerParams(
            dimension_semantics=("parallel", "parallel")),
    )(x, wt, wd, bias)


# ----------------------------------------------------------------------------
# Kernel 4: edge-conv with pre-projected neighbors + second conv (conv3/4 path).
# First conv per edge is just  A[j] + Bc[i]  (gather done in the wrapper).
# ----------------------------------------------------------------------------
def _edge_pre2_kernel(an_ref, bc_ref, w2_ref, b2_ref, o_ref):
    k = an_ref.shape[1]
    bc = bc_ref[0]                                             # (tm, cm)
    w2 = w2_ref[...]
    acc = None
    for j in range(k):
        h = an_ref[0, j] + bc                                  # first conv = add
        h = jnp.maximum(h, LEAKY_02 * h)
        g = jnp.dot(h, w2, preferred_element_type=jnp.float32)
        acc = g if acc is None else jnp.maximum(acc, g)
    out = acc + b2_ref[...]
    o_ref[0] = jnp.maximum(out, LEAKY_02 * out)


def edge_conv_pre2(a_nbr, bc, w2, b2):
    B, K, N, cm = a_nbr.shape
    c_out = w2.shape[1]
    tm = _row_tile(N)
    return pl.pallas_call(
        _edge_pre2_kernel,
        out_shape=jax.ShapeDtypeStruct((B, N, c_out), jnp.float32),
        grid=(B, N // tm),
        in_specs=[
            pl.BlockSpec((1, K, tm, cm), lambda bb, ii: (bb, 0, ii, 0)),
            pl.BlockSpec((1, tm, cm), lambda bb, ii: (bb, ii, 0)),
            pl.BlockSpec(w2.shape, lambda bb, ii: (0, 0)),
            pl.BlockSpec(b2.shape, lambda bb, ii: (0, 0)),
        ],
        out_specs=pl.BlockSpec((1, tm, c_out), lambda bb, ii: (bb, ii, 0)),
        compiler_params=pltpu.CompilerParams(
            dimension_semantics=("parallel", "parallel")),
    )(a_nbr, bc, w2, b2)


# ----------------------------------------------------------------------------
# Kernel 5: single-conv edge block (conv5 path): max_j LReLU(A[j] + Bc[i]).
# ----------------------------------------------------------------------------
def _edge_pre1_kernel(an_ref, bc_ref, o_ref):
    k = an_ref.shape[1]
    bc = bc_ref[0]
    acc = None
    for j in range(k):
        h = an_ref[0, j] + bc
        acc = h if acc is None else jnp.maximum(acc, h)
    # LeakyReLU commutes with max (monotone) -> applied once after the max.
    o_ref[0] = jnp.maximum(acc, LEAKY_02 * acc)


def edge_conv_pre1(a_nbr, bc):
    B, K, N, cm = a_nbr.shape
    tm = _row_tile(N)
    return pl.pallas_call(
        _edge_pre1_kernel,
        out_shape=jax.ShapeDtypeStruct((B, N, cm), jnp.float32),
        grid=(B, N // tm),
        in_specs=[
            pl.BlockSpec((1, K, tm, cm), lambda bb, ii: (bb, 0, ii, 0)),
            pl.BlockSpec((1, tm, cm), lambda bb, ii: (bb, ii, 0)),
        ],
        out_specs=pl.BlockSpec((1, tm, cm), lambda bb, ii: (bb, ii, 0)),
        compiler_params=pltpu.CompilerParams(
            dimension_semantics=("parallel", "parallel")),
    )(a_nbr, bc)


# ----------------------------------------------------------------------------
# Kernel 6: conv6 on the implicit concat [x1|x2|x3] (split weight -> no HBM
# concat), running global max over point tiles, and the global head
# (Linear -> BN1d(eval) -> LeakyReLU(0.01) -> Linear) folded into the epilogue.
# ----------------------------------------------------------------------------
def _conv6_head_kernel(x1_ref, x2_ref, x3_ref, w6a_ref, w6b_ref, w6c_ref,
                       b6_ref, gw1_ref, gb1_ref, gs_ref, gt_ref, gw2_ref,
                       gb2_ref, local_ref, global_ref, gmax_sc):
    i = pl.program_id(1)
    h = (jnp.dot(x1_ref[0], w6a_ref[...], preferred_element_type=jnp.float32)
         + jnp.dot(x2_ref[0], w6b_ref[...], preferred_element_type=jnp.float32)
         + jnp.dot(x3_ref[0], w6c_ref[...], preferred_element_type=jnp.float32)
         + b6_ref[...])
    h = jnp.maximum(h, LEAKY_02 * h)
    local_ref[0] = h

    @pl.when(i == 0)
    def _():
        gmax_sc[...] = jnp.full_like(gmax_sc, -jnp.inf)

    gmax_sc[...] = jnp.maximum(gmax_sc[...], jnp.max(h, axis=0, keepdims=True))

    @pl.when(i == pl.num_programs(1) - 1)
    def _():
        g = gmax_sc[...]                                       # (1, F)
        z = jnp.dot(g, gw1_ref[...], preferred_element_type=jnp.float32) + gb1_ref[...]
        z = z * gs_ref[...] + gt_ref[...]                      # BN1d (eval, folded)
        z = jnp.maximum(z, LEAKY_001 * z)
        z = jnp.dot(z, gw2_ref[...], preferred_element_type=jnp.float32) + gb2_ref[...]
        global_ref[0] = z


def conv6_and_head(x1, x2, x3, w6a, w6b, w6c, b6, gw1, gb1, gs, gt, gw2, gb2):
    B, N, _ = x1.shape
    F = w6a.shape[1]
    tm = _row_tile(N)

    def wspec(a):
        return pl.BlockSpec(a.shape, lambda bb, ii: (0, 0))

    local_x, global_x = pl.pallas_call(
        _conv6_head_kernel,
        out_shape=(jax.ShapeDtypeStruct((B, N, F), jnp.float32),
                   jax.ShapeDtypeStruct((B, 1, F), jnp.float32)),
        grid=(B, N // tm),
        in_specs=[
            pl.BlockSpec((1, tm, x1.shape[2]), lambda bb, ii: (bb, ii, 0)),
            pl.BlockSpec((1, tm, x2.shape[2]), lambda bb, ii: (bb, ii, 0)),
            pl.BlockSpec((1, tm, x3.shape[2]), lambda bb, ii: (bb, ii, 0)),
            wspec(w6a), wspec(w6b), wspec(w6c), wspec(b6),
            wspec(gw1), wspec(gb1), wspec(gs), wspec(gt), wspec(gw2), wspec(gb2),
        ],
        out_specs=(
            pl.BlockSpec((1, tm, F), lambda bb, ii: (bb, ii, 0)),
            pl.BlockSpec((1, 1, F), lambda bb, ii: (bb, 0, 0)),
        ),
        scratch_shapes=[pltpu.VMEM((1, F), jnp.float32)],
        compiler_params=pltpu.CompilerParams(
            dimension_semantics=("parallel", "arbitrary")),
    )(x1, x2, x3, w6a, w6b, w6c, b6, gw1, gb1, gs, gt, gw2, gb2)
    return local_x, global_x[:, 0, :]


# ----------------------------------------------------------------------------
# Full DGCNN forward (matches the PyTorch module semantics).
# ----------------------------------------------------------------------------
def dgcnn_forward(x, p, k=20, return_intermediates=False):
    c_in = x.shape[-1]

    def split_w(w, c):
        # concat(x_j - x_i, x_i) @ W  ==  x_j @ W[:c] + x_i @ (W[c:] - W[:c])
        return w[:c], w[c:] - w[:c]

    w1t, w1d = split_w(p["w1"], c_in)
    w3t, w3d = split_w(p["w3"], p["w2"].shape[1])
    w5t, w5d = split_w(p["w5"], p["w4"].shape[1])

    # ---- edge-conv block 1 (conv1 + conv2 + max over k) --------------------
    idx = knn_idx(x, k)                                        # (B, N, k)
    x_nbr = gather_neighbors(x, idx)                           # (B, k, N, Cin)
    x1 = edge_conv_layer1(x_nbr, x, w1t, w1d, p["b1"], p["w2"], p["b2"])

    # ---- edge-conv block 2 (conv3 + conv4 + max over k) --------------------
    idx = knn_idx(x1, k)
    a2, bc2 = point_proj(x1, w3t, w3d, p["b3"])
    x2 = edge_conv_pre2(gather_neighbors(a2, idx), bc2, p["w4"], p["b4"])

    # ---- edge-conv block 3 (conv5 + max over k) ----------------------------
    idx = knn_idx(x2, k)
    a3, bc3 = point_proj(x2, w5t, w5d, p["b5"])
    x3 = edge_conv_pre1(gather_neighbors(a3, idx), bc3)

    # ---- conv6 on [x1|x2|x3], global max over points, global head ----------
    c = x1.shape[-1]
    w6a, w6b, w6c = p["w6"][:c], p["w6"][c:2 * c], p["w6"][2 * c:]
    local_x, global_x = conv6_and_head(
        x1, x2, x3, w6a, w6b, w6c, p["b6"],
        p["gw1"], p["gb1"], p["gs"], p["gt"], p["gw2"], p["gb2"])

    # torch returns (global_conv_x, local_x.permute(0, 2, 1)) -> (B,F), (B,N,F)
    if return_intermediates:
        return global_x, local_x, (x1, x2, x3)
    return global_x, local_x


# ----------------------------------------------------------------------------
# Deterministic synthetic parameters (BN folded in eval mode: mean=0, var=1).
# ----------------------------------------------------------------------------
def init_params(key, feat_dim=64, in_dim=3):
    eps = 1e-5
    keys = iter(jax.random.split(key, 24))

    def conv_bn(cin, cout):
        w = jax.random.normal(next(keys), (cin, cout), jnp.float32) * (cin ** -0.5)
        gamma = 1.0 + 0.05 * jax.random.normal(next(keys), (cout,), jnp.float32)
        beta = 0.05 * jax.random.normal(next(keys), (cout,), jnp.float32)
        scale = gamma / jnp.sqrt(1.0 + eps)        # running_var = 1, running_mean = 0
        return w * scale[None, :], beta[None, :]

    p = {}
    p["w1"], p["b1"] = conv_bn(2 * in_dim, 64)     # conv1: 6 -> 64
    p["w2"], p["b2"] = conv_bn(64, 64)             # conv2
    p["w3"], p["b3"] = conv_bn(128, 64)            # conv3
    p["w4"], p["b4"] = conv_bn(64, 64)             # conv4
    p["w5"], p["b5"] = conv_bn(128, 64)            # conv5
    p["w6"], p["b6"] = conv_bn(192, feat_dim)      # conv6 (Conv1d)

    p["gw1"] = jax.random.normal(next(keys), (feat_dim, feat_dim), jnp.float32) * (feat_dim ** -0.5)
    p["gb1"] = 0.05 * jax.random.normal(next(keys), (1, feat_dim), jnp.float32)
    gamma = 1.0 + 0.05 * jax.random.normal(next(keys), (feat_dim,), jnp.float32)
    beta = 0.05 * jax.random.normal(next(keys), (feat_dim,), jnp.float32)
    p["gs"] = (gamma / jnp.sqrt(1.0 + eps))[None, :]
    p["gt"] = beta[None, :]
    p["gw2"] = jax.random.normal(next(keys), (feat_dim, feat_dim), jnp.float32) * (feat_dim ** -0.5)
    p["gb2"] = 0.05 * jax.random.normal(next(keys), (1, feat_dim), jnp.float32)
    return p


# ----------------------------------------------------------------------------
# Layer-wise pure-JAX reference check.  Each reference stage consumes the
# Pallas output of the previous stage, so top_k neighbor selection is
# bit-identical and the comparison exercises only the kernel math.
# ----------------------------------------------------------------------------
def _reference_check(x, p, k, tol=5e-4):
    g_pal, l_pal, (x1, x2, x3) = dgcnn_forward(x, p, k=k, return_intermediates=True)

    def lrelu(v, s):
        return jnp.maximum(v, s * v)

    def edge_ref(feat, convs):
        idx = knn_idx(feat, k)                                   # same kNN path
        nbr = jnp.transpose(gather_neighbors(feat, idx), (0, 2, 1, 3))  # (B,N,K,C)
        ctr = jnp.broadcast_to(feat[:, :, None, :], nbr.shape)
        h = jnp.concatenate([nbr - ctr, ctr], axis=-1)           # (B,N,K,2C)
        for w, b in convs:
            h = lrelu(h @ w + b, LEAKY_02)
        return jnp.max(h, axis=2)

    x1_r = edge_ref(x, [(p["w1"], p["b1"]), (p["w2"], p["b2"])])
    x2_r = edge_ref(x1, [(p["w3"], p["b3"]), (p["w4"], p["b4"])])
    x3_r = edge_ref(x2, [(p["w5"], p["b5"])])
    local_r = lrelu(jnp.concatenate([x1, x2, x3], -1) @ p["w6"] + p["b6"], LEAKY_02)
    g = jnp.max(local_r, axis=1)
    z = lrelu((g @ p["gw1"] + p["gb1"]) * p["gs"] + p["gt"], LEAKY_001)
    global_r = z @ p["gw2"] + p["gb2"]

    for name, a, b in (("x1", x1, x1_r), ("x2", x2, x2_r), ("x3", x3, x3_r),
                       ("local", l_pal, local_r), ("global", g_pal, global_r)):
        err = float(jnp.max(jnp.abs(a - b)))
        assert jnp.allclose(a, b, atol=tol, rtol=tol), (name, err)


if __name__ == "__main__":
    B, N, IN_DIM, FEAT, K = 2, 64, 3, 64, 20
    key = jax.random.PRNGKey(0)
    kx, kp = jax.random.split(key)
    x = jax.random.normal(kx, (B, N, IN_DIM), jnp.float32)
    params = init_params(kp, feat_dim=FEAT, in_dim=IN_DIM)

    fwd = jax.jit(functools.partial(dgcnn_forward, k=K))
    global_x, local_x = fwd(x, params)
    jax.block_until_ready((global_x, local_x))

    assert global_x.shape == (B, FEAT), global_x.shape
    assert local_x.shape == (B, N, FEAT), local_x.shape
    assert jnp.all(jnp.isfinite(global_x)) and jnp.all(jnp.isfinite(local_x))

    _reference_check(x, params, K)
    print("KERNEL_OK")
</pallas_src>

<mosaic_0001>
module attributes {stable_mosaic.version = 11 : i64} {
  func.func @_pairwise_dist_kernel(%arg0: i32, %arg1: i32, %arg2: memref<1x64x3xf32, #tpu.memory_space<vmem>>, %arg3: memref<1x64x3xf32, #tpu.memory_space<vmem>>, %arg4: memref<1x64x64xf32, #tpu.memory_space<vmem>>) attributes {dimension_semantics = [#tpu.dimension_semantics<parallel>, #tpu.dimension_semantics<parallel>], iteration_bounds = array<i64: 2, 1>, scalar_prefetch = 0 : i64, scratch_operands = 0 : i64, tpu.core_type = #tpu.core_type<tc>, window_params = [{transform_indices = @transform_0, window_bounds = array<i64: 1, 64, 3>}, {transform_indices = @transform_1, window_bounds = array<i64: 1, 64, 3>}, {transform_indices = @transform_2, window_bounds = array<i64: 1, 64, 64>}]} {
    %c0 = arith.constant 0 : index
    %c0_0 = arith.constant 0 : index
    %c0_1 = arith.constant 0 : index
    %0 = vector.load %arg2[%c0, %c0_0, %c0_1] : memref<1x64x3xf32, #tpu.memory_space<vmem>>, vector<1x64x3xf32>
    %1 = vector.shape_cast %0 : vector<1x64x3xf32> to vector<64x3xf32>
    %c0_2 = arith.constant 0 : index
    %c0_3 = arith.constant 0 : index
    %c0_4 = arith.constant 0 : index
    %2 = vector.load %arg3[%c0_2, %c0_3, %c0_4] : memref<1x64x3xf32, #tpu.memory_space<vmem>>, vector<1x64x3xf32>
    %3 = vector.shape_cast %2 : vector<1x64x3xf32> to vector<64x3xf32>
    %cst = arith.constant dense<0.000000e+00> : vector<64x64xf32>
    %4 = tpu.matmul %1, %3, %cst {dimension_numbers = #tpu.dot_dimension_numbers<[1], [1], [0], [0], [0, 0, 1, 0], [], []>} : vector<64x3xf32>, vector<64x3xf32>, vector<64x64xf32> -> vector<64x64xf32>
    %5 = arith.mulf %1, %1 : vector<64x3xf32>
    %cst_5 = arith.constant dense<0.000000e+00> : vector<64xf32>
    %6 = vector.multi_reduction <add>, %5, %cst_5 [1] : vector<64x3xf32> to vector<64xf32>
    %7 = vector.shape_cast %6 : vector<64xf32> to vector<64x1xf32>
    %8 = arith.mulf %3, %3 : vector<64x3xf32>
    %cst_6 = arith.constant dense<0.000000e+00> : vector<64xf32>
    %9 = vector.multi_reduction <add>, %8, %cst_6 [1] : vector<64x3xf32> to vector<64xf32>
    %10 = vector.shape_cast %9 : vector<64xf32> to vector<64x1xf32>
    %cst_7 = arith.constant 2.000000e+00 : f32
    %11 = vector.broadcast %cst_7 : f32 to vector<64x64xf32>
    %12 = arith.mulf %11, %4 : vector<64x64xf32>
    %13 = vector.broadcast %7 : vector<64x1xf32> to vector<64x64xf32>
    %14 = arith.subf %12, %13 : vector<64x64xf32>
    %15 = tpu.transpose %10, [1, 0] : vector<64x1xf32> -> vector<1x64xf32>
    %16 = vector.broadcast %15 : vector<1x64xf32> to vector<64x64xf32>
    %17 = arith.subf %14, %16 : vector<64x64xf32>
    %c0_8 = arith.constant 0 : index
    %c0_9 = arith.constant 0 : index
    %c0_10 = arith.constant 0 : index
    %18 = vector.load %arg4[%c0_8, %c0_9, %c0_10] : memref<1x64x64xf32, #tpu.memory_space<vmem>>, vector<1x64x64xf32>
    %19 = vector.shape_cast %18 : vector<1x64x64xf32> to vector<64x64xf32>
    %20 = vector.shape_cast %17 : vector<64x64xf32> to vector<1x64x64xf32>
    tpu.vector_store %arg4[%c0_8, %c0_9, %c0_10], %20 {strides = array<i32>} : memref<1x64x64xf32, #tpu.memory_space<vmem>>, vector<1x64x64xf32>,
    return
  }
  func.func @transform_0(%arg0: i32, %arg1: i32) -> (i32, i32, i32) {
    %c0_i32 = arith.constant 0 : i32
    %c0_i32_0 = arith.constant 0 : i32
    return %arg0, %arg1, %c0_i32 : i32, i32, i32
  }
  func.func @transform_1(%arg0: i32, %arg1: i32) -> (i32, i32, i32) {
    %c0_i32 = arith.constant 0 : i32
    %c0_i32_0 = arith.constant 0 : i32
    %c0_i32_1 = arith.constant 0 : i32
    return %arg0, %c0_i32, %c0_i32_0 : i32, i32, i32
  }
  func.func @transform_2(%arg0: i32, %arg1: i32) -> (i32, i32, i32) {
    %c0_i32 = arith.constant 0 : i32
    %c0_i32_0 = arith.constant 0 : i32
    return %arg0, %arg1, %c0_i32 : i32, i32, i32
  }
}

module attributes {stable_mosaic.version = 11 : i64} {
  func.func @_edge_layer1_kernel(%arg0: i32, %arg1: i32, %arg2: memref<1x20x64x3xf32, #tpu.memory_space<vmem>>, %arg3: memref<1x64x3xf32, #tpu.memory_space<vmem>>, %arg4: memref<3x64xf32, #tpu.memory_space<vmem>>, %arg5: memref<3x64xf32, #tpu.memory_space<vmem>>, %arg6: memref<1x64xf32, #tpu.memory_space<vmem>>, %arg7: memref<64x64xf32, #tpu.memory_space<vmem>>, %arg8: memref<1x64xf32, #tpu.memory_space<vmem>>, %arg9: memref<1x64x64xf32, #tpu.memory_space<vmem>>) attributes {dimension_semantics = [#tpu.dimension_semantics<parallel>, #tpu.dimension_semantics<parallel>], iteration_bounds = array<i64: 2, 1>, scalar_prefetch = 0 : i64, scratch_operands = 0 : i64, tpu.core_type = #tpu.core_type<tc>, window_params = [{transform_indices = @transform_0, window_bounds = array<i64: 1, 20, 64, 3>}, {transform_indices = @transform_1, window_bounds = array<i64: 1, 64, 3>}, {pipeline_mode = #tpu.pipeline_mode<synchronous>, transform_indices = @transform_2, window_bounds = array<i64: 3, 64>}, {pipeline_mode = #tpu.pipeline_mode<synchronous>, transform_indices = @transform_3, window_bounds = array<i64: 3, 64>}, {pipeline_mode = #tpu.pipeline_mode<synchronous>, transform_indices = @transform_4, window_bounds = array<i64: 1, 64>}, {pipeline_mode = #tpu.pipeline_mode<synchronous>, transform_indices = @transform_5, window_bounds = array<i64: 64, 64>}, {pipeline_mode = #tpu.pipeline_mode<synchronous>, transform_indices = @transform_6, window_bounds = array<i64: 1, 64>}, {transform_indices = @transform_7, window_bounds = array<i64: 1, 64, 64>}]} {
    %c0 = arith.constant 0 : index
    %c0_0 = arith.constant 0 : index
    %c0_1 = arith.constant 0 : index
    %0 = vector.load %arg3[%c0, %c0_0, %c0_1] : memref<1x64x3xf32, #tpu.memory_space<vmem>>, vector<1x64x3xf32>
    %1 = vector.shape_cast %0 : vector<1x64x3xf32> to vector<64x3xf32>
    %c0_2 = arith.constant 0 : index
    %c0_3 = arith.constant 0 : index
    %2 = vector.load %arg5[%c0_2, %c0_3] : memref<3x64xf32, #tpu.memory_space<vmem>>, vector<3x64xf32>
    %cst = arith.constant dense<0.000000e+00> : vector<64x64xf32>
    %3 = tpu.matmul %1, %2, %cst {dimension_numbers = #tpu.dot_dimension_numbers<[1], [0], [0], [1], [0, 0, 1, 1], [], []>} : vector<64x3xf32>, vector<3x64xf32>, vector<64x64xf32> -> vector<64x64xf32>
    %c0_4 = arith.constant 0 : index
    %c0_5 = arith.constant 0 : index
    %4 = vector.load %arg6[%c0_4, %c0_5] : memref<1x64xf32, #tpu.memory_space<vmem>>, vector<1x64xf32>
    %5 = vector.broadcast %4 : vector<1x64xf32> to vector<64x64xf32>
    %6 = arith.addf %3, %5 : vector<64x64xf32>
    %c0_6 = arith.constant 0 : index
    %c0_7 = arith.constant 0 : index
    %7 = vector.load %arg4[%c0_6, %c0_7] : memref<3x64xf32, #tpu.memory_space<vmem>>, vector<3x64xf32>
    %c0_8 = arith.constant 0 : index
    %c0_9 = arith.constant 0 : index
    %8 = vector.load %arg7[%c0_8, %c0_9] : memref<64x64xf32, #tpu.memory_space<vmem>>, vector<64x64xf32>
    %c0_10 = arith.constant 0 : index
    %c0_11 = arith.constant 0 : index
    %c0_12 = arith.constant 0 : index
    %c0_13 = arith.constant 0 : index
    %9 = vector.load %arg2[%c0_10, %c0_11, %c0_12, %c0_13] : memref<1x20x64x3xf32, #tpu.memory_space<vmem>>, vector<1x1x64x3xf32>
    %10 = vector.shape_cast %9 : vector<1x1x64x3xf32> to vector<64x3xf32>
    %cst_14 = arith.constant dense<0.000000e+00> : vector<64x64xf32>
    %11 = tpu.matmul %10, %7, %cst_14 {dimension_numbers = #tpu.dot_dimension_numbers<[1], [0], [0], [1], [0, 0, 1, 1], [], []>} : vector<64x3xf32>, vector<3x64xf32>, vector<64x64xf32> -> vector<64x64xf32>
    %12 = arith.addf %11, %6 : vector<64x64xf32>
    %cst_15 = arith.constant 2.000000e-01 : f32
    %13 = vector.broadcast %cst_15 : f32 to vector<64x64xf32>
    %14 = arith.mulf %13, %12 : vector<64x64xf32>
    %15 = arith.maximumf %12, %14 : vector<64x64xf32>
    %cst_16 = arith.constant dense<0.000000e+00> : vector<64x64xf32>
    %16 = tpu.matmul %15, %8, %cst_16 {dimension_numbers = #tpu.dot_dimension_numbers<[1], [0], [0], [1], [0, 0, 1, 1], [], []>} : vector<64x64xf32>, vector<64x64xf32>, vector<64x64xf32> -> vector<64x64xf32>
    %c0_17 = arith.constant 0 : index
    %c1 = arith.constant 1 : index
    %c0_18 = arith.constant 0 : index
    %c0_19 = arith.constant 0 : index
    %17 = vector.load %arg2[%c0_17, %c1, %c0_18, %c0_19] : memref<1x20x64x3xf32, #tpu.memory_space<vmem>>, vector<1x1x64x3xf32>
    %18 = vector.shape_cast %17 : vector<1x1x64x3xf32> to vector<64x3xf32>
    %cst_20 = arith.constant dense<0.000000e+00> : vector<64x64xf32>
    %19 = tpu.matmul %18, %7, %cst_20 {dimension_numbers = #tpu.dot_dimension_numbers<[1], [0], [0], [1], [0, 0, 1, 1], [], []>} : vector<64x3xf32>, vector<3x64xf32>, vector<64x64xf32> -> vector<64x64xf32>
    %20 = arith.addf %19, %6 : vector<64x64xf32>
    %cst_21 = arith.constant 2.000000e-01 : f32
    %21 = vector.broadcast %cst_21 : f32 to vector<64x64xf32>
    %22 = arith.mulf %21, %20 : vector<64x64xf32>
    %23 = arith.maximumf %20, %22 : vector<64x64xf32>
    %cst_22 = arith.constant dense<0.000000e+00> : vector<64x64xf32>
    %24 = tpu.matmul %23, %8, %cst_22 {dimension_numbers = #tpu.dot_dimension_numbers<[1], [0], [0], [1], [0, 0, 1, 1], [], []>} : vector<64x64xf32>, vector<64x64xf32>, vector<64x64xf32> -> vector<64x64xf32>
    %25 = arith.maximumf %16, %24 : vector<64x64xf32>
    %c0_23 = arith.constant 0 : index
    %c2 = arith.constant 2 : index
    %c0_24 = arith.constant 0 : index
    %c0_25 = arith.constant 0 : index
    %26 = vector.load %arg2[%c0_23, %c2, %c0_24, %c0_25] : memref<1x20x64x3xf32, #tpu.memory_space<vmem>>, vector<1x1x64x3xf32>
    %27 = vector.shape_cast %26 : vector<1x1x64x3xf32> to vector<64x3xf32>
    %cst_26 = arith.constant dense<0.000000e+00> : vector<64x64xf32>
    %28 = tpu.matmul %27, %7, %cst_26 {dimension_numbers = #tpu.dot_dimension_numbers<[1], [0], [0], [1], [0, 0, 1, 1], [], []>} : vector<64x3xf32>, vector<3x64xf32>, vector<64x64xf32> -> vector<64x64xf32>
    %29 = arith.addf %28, %6 : vector<64x64xf32>
    %cst_27 = arith.constant 2.000000e-01 : f32
    %30 = vector.broadcast %cst_27 : f32 to vector<64x64xf32>
    %31 = arith.mulf %30, %29 : vector<64x64xf32>
    %32 = arith.maximumf %29, %31 : vector<64x64xf32>
    %cst_28 = arith.constant dense<0.000000e+00> : vector<64x64xf32>
    %33 = tpu.matmul %32, %8, %cst_28 {dimension_numbers = #tpu.dot_dimension_numbers<[1], [0], [0], [1], [0, 0, 1, 1], [], []>} : vector<64x64xf32>, vector<64x64xf32>, vector<64x64xf32> -> vector<64x64xf32>
    %34 = arith.maximumf %25, %33 : vector<64x64xf32>
    %c0_29 = arith.constant 0 : index
    %c3 = arith.constant 3 : index
    %c0_30 = arith.constant 0 : index
    %c0_31 = arith.constant 0 : index
    %35 = vector.load %arg2[%c0_29, %c3, %c0_30, %c0_31] : memref<1x20x64x3xf32, #tpu.memory_space<vmem>>, vector<1x1x64x3xf32>
    %36 = vector.shape_cast %35 : vector<1x1x64x3xf32> to vector<64x3xf32>
    %cst_32 = arith.constant dense<0.000000e+00> : vector<64x64xf32>
    %37 = tpu.matmul %36, %7, %cst_32 {dimension_numbers = #tpu.dot_dimension_numbers<[1], [0], [0], [1], [0, 0, 1, 1], [], []>} : vector<64x3xf32>, vector<3x64xf32>, vector<64x64xf32> -> vector<64x64xf32>
    %38 = arith.addf %37, %6 : vector<64x64xf32>
    %cst_33 = arith.constant 2.000000e-01 : f32
    %39 = vector.broadcast %cst_33 : f32 to vector<64x64xf32>
    %40 = arith.mulf %39, %38 : vector<64x64xf32>
    %41 = arith.maximumf %38, %40 : vector<64x64xf32>
    %cst_34 = arith.constant dense<0.000000e+00> : vector<64x64xf32>
    %42 = tpu.matmul %41, %8, %cst_34 {dimension_numbers = #tpu.dot_dimension_numbers<[1], [0], [0], [1], [0, 0, 1, 1], [], []>} : vector<64x64xf32>, vector<64x64xf32>, vector<64x64xf32> -> vector<64x64xf32>
    %43 = arith.maximumf %34, %42 : vector<64x64xf32>
    %c0_35 = arith.constant 0 : index
    %c4 = arith.constant 4 : index
    %c0_36 = arith.constant 0 : index
    %c0_37 = arith.constant 0 : index
    %44 = vector.load %arg2[%c0_35, %c4, %c0_36, %c0_37] : memref<1x20x64x3xf32, #tpu.memory_space<vmem>>, vector<1x1x64x3xf32>
    %45 = vector.shape_cast %44 : vector<1x1x64x3xf32> to vector<64x3xf32>
    %cst_38 = arith.constant dense<0.000000e+00> : vector<64x64xf32>
    %46 = tpu.matmul %45, %7, %cst_38 {dimension_numbers = #tpu.dot_dimension_numbers<[1], [0], [0], [1], [0, 0, 1, 1], [], []>} : vector<64x3xf32>, vector<3x64xf32>, vector<64x64xf32> -> vector<64x64xf32>
    %47 = arith.addf %46, %6 : vector<64x64xf32>
    %cst_39 = arith.constant 2.000000e-01 : f32
    %48 = vector.broadcast %cst_39 : f32 to vector<64x64xf32>
    %49 = arith.mulf %48, %47 : vector<64x64xf32>
    %50 = arith.maximumf %47, %49 : vector<64x64xf32>
    %cst_40 = arith.constant dense<0.000000e+00> : vector<64x64xf32>
    %51 = tpu.matmul %50, %8, %cst_40 {dimension_numbers = #tpu.dot_dimension_numbers<[1], [0], [0], [1], [0, 0, 1, 1], [], []>} : vector<64x64xf32>, vector<64x64xf32>, vector<64x64xf32> -> vector<64x64xf32>
    %52 = arith.maximumf %43, %51 : vector<64x64xf32>
    %c0_41 = arith.constant 0 : index
    %c5 = arith.constant 5 : index
    %c0_42 = arith.constant 0 : index
    %c0_43 = arith.constant 0 : index
    %53 = vector.load %arg2[%c0_41, %c5, %c0_42, %c0_43] : memref<1x20x64x3xf32, #tpu.memory_space<vmem>>, vector<1x1x64x3xf32>
    %54 = vector.shape_cast %53 : vector<1x1x64x3xf32> to vector<64x3xf32>
    %cst_44 = arith.constant dense<0.000000e+00> : vector<64x64xf32>
    %55 = tpu.matmul %54, %7, %cst_44 {dimension_numbers = #tpu.dot_dimension_numbers<[1], [0], [0], [1], [0, 0, 1, 1], [], []>} : vector<64x3xf32>, vector<3x64xf32>, vector<64x64xf32> -> vector<64x64xf32>
    %56 = arith.addf %55, %6 : vector<64x64xf32>
    %cst_45 = arith.constant 2.000000e-01 : f32
    %57 = vector.broadcast %cst_45 : f32 to vector<64x64xf32>
    %58 = arith.mulf %57, %56 : vector<64x64xf32>
    %59 = arith.maximumf %56, %58 : vector<64x64xf32>
    %cst_46 = arith.constant dense<0.000000e+00> : vector<64x64xf32>
    %60 = tpu.matmul %59, %8, %cst_46 {dimension_numbers = #tpu.dot_dimension_numbers<[1], [0], [0], [1], [0, 0, 1, 1], [], []>} : vector<64x64xf32>, vector<64x64xf32>, vector<64x64xf32> -> vector<64x64xf32>
    %61 = arith.maximumf %52, %60 : vector<64x64xf32>
    %c0_47 = arith.constant 0 : index
    %c6 = arith.constant 6 : index
    %c0_48 = arith.constant 0 : index
    %c0_49 = arith.constant 0 : index
    %62 = vector.load %arg2[%c0_47, %c6, %c0_48, %c0_49] : memref<1x20x64x3xf32, #tpu.memory_space<vmem>>, vector<1x1x64x3xf32>
    %63 = vector.shape_cast %62 : vector<1x1x64x3xf32> to vector<64x3xf32>
    %cst_50 = arith.constant dense<0.000000e+00> : vector<64x64xf32>
    %64 = tpu.matmul %63, %7, %cst_50 {dimension_numbers = #tpu.dot_dimension_numbers<[1], [0], [0], [1], [0, 0, 1, 1], [], []>} : vector<64x3xf32>, vector<3x64xf32>, vector<64x64xf32> -> vector<64x64xf32>
    %65 = arith.addf %64, %6 : vector<64x64xf32>
    %cst_51 = arith.constant 2.000000e-01 : f32
    %66 = vector.broadcast %cst_51 : f32 to vector<64x64xf32>
    %67 = arith.mulf %66, %65 : vector<64x64xf32>
    %68 = arith.maximumf %65, %67 : vector<64x64xf32>
    %cst_52 = arith.constant dense<0.000000e+00> : vector<64x64xf32>
    %69 = tpu.matmul %68, %8, %cst_52 {dimension_numbers = #tpu.dot_dimension_numbers<[1], [0], [0], [1], [0, 0, 1, 1], [], []>} : vector<64x64xf32>, vector<64x64xf32>, vector<64x64xf32> -> vector<64x64xf32>
    %70 = arith.maximumf %61, %69 : vector<64x64xf32>
    %c0_53 = arith.constant 0 : index
    %c7 = arith.constant 7 : index
    %c0_54 = arith.constant 0 : index
    %c0_55 = arith.constant 0 : index
    %71 = vector.load %arg2[%c0_53, %c7, %c0_54, %c0_55] : memref<1x20x64x3xf32, #tpu.memory_space<vmem>>, vector<1x1x64x3xf32>
    %72 = vector.shape_cast %71 : vector<1x1x64x3xf32> to vector<64x3xf32>
    %cst_56 = arith.constant dense<0.000000e+00> : vector<64x64xf32>
    %73 = tpu.matmul %72, %7, %cst_56 {dimension_numbers = #tpu.dot_dimension_numbers<[1], [0], [0], [1], [0, 0, 1, 1], [], []>} : vector<64x3xf32>, vector<3x64xf32>, vector<64x64xf32> -> vector<64x64xf32>
    %74 = arith.addf %73, %6 : vector<64x64xf32>
    %cst_57 = arith.constant 2.000000e-01 : f32
    %75 = vector.broadcast %cst_57 : f32 to vector<64x64xf32>
    %76 = arith.mulf %75, %74 : vector<64x64xf32>
    %77 = arith.maximumf %74, %76 : vector<64x64xf32>
    %cst_58 = arith.constant dense<0.000000e+00> : vector<64x64xf32>
    %78 = tpu.matmul %77, %8, %cst_58 {dimension_numbers = #tpu.dot_dimension_numbers<[1], [0], [0], [1], [0, 0, 1, 1], [], []>} : vector<64x64xf32>, vector<64x64xf32>, vector<64x64xf32> -> vector<64x64xf32>
    %79 = arith.maximumf %70, %78 : vector<64x64xf32>
    %c0_59 = arith.constant 0 : index
    %c8 = arith.constant 8 : index
    %c0_60 = arith.constant 0 : index
    %c0_61 = arith.constant 0 : index
    %80 = vector.load %arg2[%c0_59, %c8, %c0_60, %c0_61] : memref<1x20x64x3xf32, #tpu.memory_space<vmem>>, vector<1x1x64x3xf32>
    %81 = vector.shape_cast %80 : vector<1x1x64x3xf32> to vector<64x3xf32>
    %cst_62 = arith.constant dense<0.000000e+00> : vector<64x64xf32>
    %82 = tpu.matmul %81, %7, %cst_62 {dimension_numbers = #tpu.dot_dimension_numbers<[1], [0], [0], [1], [0, 0, 1, 1], [], []>} : vector<64x3xf32>, vector<3x64xf32>, vector<64x64xf32> -> vector<64x64xf32>
    %83 = arith.addf %82, %6 : vector<64x64xf32>
    %cst_63 = arith.constant 2.000000e-01 : f32
    %84 = vector.broadcast %cst_63 : f32 to vector<64x64xf32>
    %85 = arith.mulf %84, %83 : vector<64x64xf32>
    %86 = arith.maximumf %83, %85 : vector<64x64xf32>
    %cst_64 = arith.constant dense<0.000000e+00> : vector<64x64xf32>
    %87 = tpu.matmul %86, %8, %cst_64 {dimension_numbers = #tpu.dot_dimension_numbers<[1], [0], [0], [1], [0, 0, 1, 1], [], []>} : vector<64x64xf32>, vector<64x64xf32>, vector<64x64xf32> -> vector<64x64xf32>
    %88 = arith.maximumf %79, %87 : vector<64x64xf32>
    %c0_65 = arith.constant 0 : index
    %c9 = arith.constant 9 : index
    %c0_66 = arith.constant 0 : index
    %c0_67 = arith.constant 0 : index
    %89 = vector.load %arg2[%c0_65, %c9, %c0_66, %c0_67] : memref<1x20x64x3xf32, #tpu.memory_space<vmem>>, vector<1x1x64x3xf32>
    %90 = vector.shape_cast %89 : vector<1x1x64x3xf32> to vector<64x3xf32>
    %cst_68 = arith.constant dense<0.000000e+00> : vector<64x64xf32>
    %91 = tpu.matmul %90, %7, %cst_68 {dimension_numbers = #tpu.dot_dimension_numbers<[1], [0], [0], [1], [0, 0, 1, 1], [], []>} : vector<64x3xf32>, vector<3x64xf32>, vector<64x64xf32> -> vector<64x64xf32>
    %92 = arith.addf %91, %6 : vector<64x64xf32>
    %cst_69 = arith.constant 2.000000e-01 : f32
    %93 = vector.broadcast %cst_69 : f32 to vector<64x64xf32>
    %94 = arith.mulf %93, %92 : vector<64x64xf32>
    %95 = arith.maximumf %92, %94 : vector<64x64xf32>
    %cst_70 = arith.constant dense<0.000000e+00> : vector<64x64xf32>
    %96 = tpu.matmul %95, %8, %cst_70 {dimension_numbers = #tpu.dot_dimension_numbers<[1], [0], [0], [1], [0, 0, 1, 1], [], []>} : vector<64x64xf32>, vector<64x64xf32>, vector<64x64xf32> -> vector<64x64xf32>
    %97 = arith.maximumf %88, %96 : vector<64x64xf32>
    %c0_71 = arith.constant 0 : index
    %c10 = arith.constant 10 : index
    %c0_72 = arith.constant 0 : index
    %c0_73 = arith.constant 0 : index
    %98 = vector.load %arg2[%c0_71, %c10, %c0_72, %c0_73] : memref<1x20x64x3xf32, #tpu.memory_space<vmem>>, vector<1x1x64x3xf32>
    %99 = vector.shape_cast %98 : vector<1x1x64x3xf32> to vector<64x3xf32>
    %cst_74 = arith.constant dense<0.000000e+00> : vector<64x64xf32>
    %100 = tpu.matmul %99, %7, %cst_74 {dimension_numbers = #tpu.dot_dimension_numbers<[1], [0], [0], [1], [0, 0, 1, 1], [], []>} : vector<64x3xf32>, vector<3x64xf32>, vector<64x64xf32> -> vector<64x64xf32>
    %101 = arith.addf %100, %6 : vector<64x64xf32>
    %cst_75 = arith.constant 2.000000e-01 : f32
    %102 = vector.broadcast %cst_75 : f32 to vector<64x64xf32>
    %103 = arith.mulf %102, %101 : vector<64x64xf32>
    %104 = arith.maximumf %101, %103 : vector<64x64xf32>
    %cst_76 = arith.constant dense<0.000000e+00> : vector<64x64xf32>
    %105 = tpu.matmul %104, %8, %cst_76 {dimension_numbers = #tpu.dot_dimension_numbers<[1], [0], [0], [1], [0, 0, 1, 1], [], []>} : vector<64x64xf32>, vector<64x64xf32>, vector<64x64xf32> -> vector<64x64xf32>
    %106 = arith.maximumf %97, %105 : vector<64x64xf32>
    %c0_77 = arith.constant 0 : index
    %c11 = arith.constant 11 : index
    %c0_78 = arith.constant 0 : index
    %c0_79 = arith.constant 0 : index
    %107 = vector.load %arg2[%c0_77, %c11, %c0_78, %c0_79] : memref<1x20x64x3xf32, #tpu.memory_space<vmem>>, vector<1x1x64x3xf32>
    %108 = vector.shape_cast %107 : vector<1x1x64x3xf32> to vector<64x3xf32>
    %cst_80 = arith.constant dense<0.000000e+00> : vector<64x64xf32>
    %109 = tpu.matmul %108, %7, %cst_80 {dimension_numbers = #tpu.dot_dimension_numbers<[1], [0], [0], [1], [0, 0, 1, 1], [], []>} : vector<64x3xf32>, vector<3x64xf32>, vector<64x64xf32> -> vector<64x64xf32>
    %110 = arith.addf %109, %6 : vector<64x64xf32>
    %cst_81 = arith.constant 2.000000e-01 : f32
    %111 = vector.broadcast %cst_81 : f32 to vector<64x64xf32>
    %112 = arith.mulf %111, %110 : vector<64x64xf32>
    %113 = arith.maximumf %110, %112 : vector<64x64xf32>
    %cst_82 = arith.constant dense<0.000000e+00> : vector<64x64xf32>
    %114 = tpu.matmul %113, %8, %cst_82 {dimension_numbers = #tpu.dot_dimension_numbers<[1], [0], [0], [1], [0, 0, 1, 1], [], []>} : vector<64x64xf32>, vector<64x64xf32>, vector<64x64xf32> -> vector<64x64xf32>
    %115 = arith.maximumf %106, %114 : vector<64x64xf32>
    %c0_83 = arith.constant 0 : index
    %c12 = arith.constant 12 : index
    %c0_84 = arith.constant 0 : index
    %c0_85 = arith.constant 0 : index
    %116 = vector.load %arg2[%c0_83, %c12, %c0_84, %c0_85] : memref<1x20x64x3xf32, #tpu.memory_space<vmem>>, vector<1x1x64x3xf32>
    %117 = vector.shape_cast %116 : vector<1x1x64x3xf32> to vector<64x3xf32>
    %cst_86 = arith.constant dense<0.000000e+00> : vector<64x64xf32>
    %118 = tpu.matmul %117, %7, %cst_86 {dimension_numbers = #tpu.dot_dimension_numbers<[1], [0], [0], [1], [0, 0, 1, 1], [], []>} : vector<64x3xf32>, vector<3x64xf32>, vector<64x64xf32> -> vector<64x64xf32>
    %119 = arith.addf %118, %6 : vector<64x64xf32>
    %cst_87 = arith.constant 2.000000e-01 : f32
    %120 = vector.broadcast %cst_87 : f32 to vector<64x64xf32>
    %121 = arith.mulf %120, %119 : vector<64x64xf32>
    %122 = arith.maximumf %119, %121 : vector<64x64xf32>
    %cst_88 = arith.constant dense<0.000000e+00> : vector<64x64xf32>
    %123 = tpu.matmul %122, %8, %cst_88 {dimension_numbers = #tpu.dot_dimension_numbers<[1], [0], [0], [1], [0, 0, 1, 1], [], []>} : vector<64x64xf32>, vector<64x64xf32>, vector<64x64xf32> -> vector<64x64xf32>
    %124 = arith.maximumf %115, %123 : vector<64x64xf32>
    %c0_89 = arith.constant 0 : index
    %c13 = arith.constant 13 : index
    %c0_90 = arith.constant 0 : index
    %c0_91 = arith.constant 0 : index
    %125 = vector.load %arg2[%c0_89, %c13, %c0_90, %c0_91] : memref<1x20x64x3xf32, #tpu.memory_space<vmem>>, vector<1x1x64x3xf32>
    %126 = vector.shape_cast %125 : vector<1x1x64x3xf32> to vector<64x3xf32>
    %cst_92 = arith.constant dense<0.000000e+00> : vector<64x64xf32>
    %127 = tpu.matmul %126, %7, %cst_92 {dimension_numbers = #tpu.dot_dimension_numbers<[1], [0], [0], [1], [0, 0, 1, 1], [], []>} : vector<64x3xf32>, vector<3x64xf32>, vector<64x64xf32> -> vector<64x64xf32>
    %128 = arith.addf %127, %6 : vector<64x64xf32>
    %cst_93 = arith.constant 2.000000e-01 : f32
    %129 = vector.broadcast %cst_93 : f32 to vector<64x64xf32>
    %130 = arith.mulf %129, %128 : vector<64x64xf32>
    %131 = arith.maximumf %128, %130 : vector<64x64xf32>
    %cst_94 = arith.constant dense<0.000000e+00> : vector<64x64xf32>
    %132 = tpu.matmul %131, %8, %cst_94 {dimension_numbers = #tpu.dot_dimension_numbers<[1], [0], [0], [1], [0, 0, 1, 1], [], []>} : vector<64x64xf32>, vector<64x64xf32>, vector<64x64xf32> -> vector<64x64xf32>
    %133 = arith.maximumf %124, %132 : vector<64x64xf32>
    %c0_95 = arith.constant 0 : index
    %c14 = arith.constant 14 : index
    %c0_96 = arith.constant 0 : index
    %c0_97 = arith.constant 0 : index
    %134 = vector.load %arg2[%c0_95, %c14, %c0_96, %c0_97] : memref<1x20x64x3xf32, #tpu.memory_space<vmem>>, vector<1x1x64x3xf32>
    %135 = vector.shape_cast %134 : vector<1x1x64x3xf32> to vector<64x3xf32>
    %cst_98 = arith.constant dense<0.000000e+00> : vector<64x64xf32>
    %136 = tpu.matmul %135, %7, %cst_98 {dimension_numbers = #tpu.dot_dimension_numbers<[1], [0], [0], [1], [0, 0, 1, 1], [], []>} : vector<64x3xf32>, vector<3x64xf32>, vector<64x64xf32> -> vector<64x64xf32>
    %137 = arith.addf %136, %6 : vector<64x64xf32>
    %cst_99 = arith.constant 2.000000e-01 : f32
    %138 = vector.broadcast %cst_99 : f32 to vector<64x64xf32>
    %139 = arith.mulf %138, %137 : vector<64x64xf32>
    %140 = arith.maximumf %137, %139 : vector<64x64xf32>
    %cst_100 = arith.constant dense<0.000000e+00> : vector<64x64xf32>
    %141 = tpu.matmul %140, %8, %cst_100 {dimension_numbers = #tpu.dot_dimension_numbers<[1], [0], [0], [1], [0, 0, 1, 1], [], []>} : vector<64x64xf32>, vector<64x64xf32>, vector<64x64xf32> -> vector<64x64xf32>
    %142 = arith.maximumf %133, %141 : vector<64x64xf32>
    %c0_101 = arith.constant 0 : index
    %c15 = arith.constant 15 : index
    %c0_102 = arith.constant 0 : index
    %c0_103 = arith.constant 0 : index
    %143 = vector.load %arg2[%c0_101, %c15, %c0_102, %c0_103] : memref<1x20x64x3xf32, #tpu.memory_space<vmem>>, vector<1x1x64x3xf32>
    %144 = vector.shape_cast %143 : vector<1x1x64x3xf32> to vector<64x3xf32>
    %cst_104 = arith.constant dense<0.000000e+00> : vector<64x64xf32>
    %145 = tpu.matmul %144, %7, %cst_104 {dimension_numbers = #tpu.dot_dimension_numbers<[1], [0], [0], [1], [0, 0, 1, 1], [], []>} : vector<64x3xf32>, vector<3x64xf32>, vector<64x64xf32> -> vector<64x64xf32>
    %146 = arith.addf %145, %6 : vector<64x64xf32>
    %cst_105 = arith.constant 2.000000e-01 : f32
    %147 = vector.broadcast %cst_105 : f32 to vector<64x64xf32>
    %148 = arith.mulf %147, %146 : vector<64x64xf32>
    %149 = arith.maximumf %146, %148 : vector<64x64xf32>
    %cst_106 = arith.constant dense<0.000000e+00> : vector<64x64xf32>
    %150 = tpu.matmul %149, %8, %cst_106 {dimension_numbers = #tpu.dot_dimension_numbers<[1], [0], [0], [1], [0, 0, 1, 1], [], []>} : vector<64x64xf32>, vector<64x64xf32>, vector<64x64xf32> -> vector<64x64xf32>
    %151 = arith.maximumf %142, %150 : vector<64x64xf32>
    %c0_107 = arith.constant 0 : index
    %c16 = arith.constant 16 : index
    %c0_108 = arith.constant 0 : index
    %c0_109 = arith.constant 0 : index
    %152 = vector.load %arg2[%c0_107, %c16, %c0_108, %c0_109] : memref<1x20x64x3xf32, #tpu.memory_space<vmem>>, vector<1x1x64x3xf32>
    %153 = vector.shape_cast %152 : vector<1x1x64x3xf32> to vector<64x3xf32>
    %cst_110 = arith.constant dense<0.000000e+00> : vector<64x64xf32>
    %154 = tpu.matmul %153, %7, %cst_110 {dimension_numbers = #tpu.dot_dimension_numbers<[1], [0], [0], [1], [0, 0, 1, 1], [], []>} : vector<64x3xf32>, vector<3x64xf32>, vector<64x64xf32> -> vector<64x64xf32>
    %155 = arith.addf %154, %6 : vector<64x64xf32>
    %cst_111 = arith.constant 2.000000e-01 : f32
    %156 = vector.broadcast %cst_111 : f32 to vector<64x64xf32>
    %157 = arith.mulf %156, %155 : vector<64x64xf32>
    %158 = arith.maximumf %155, %157 : vector<64x64xf32>
    %cst_112 = arith.constant dense<0.000000e+00> : vector<64x64xf32>
    %159 = tpu.matmul %158, %8, %cst_112 {dimension_numbers = #tpu.dot_dimension_numbers<[1], [0], [0], [1], [0, 0, 1, 1], [], []>} : vector<64x64xf32>, vector<64x64xf32>, vector<64x64xf32> -> vector<64x64xf32>
    %160 = arith.maximumf %151, %159 : vector<64x64xf32>
    %c0_113 = arith.constant 0 : index
    %c17 = arith.constant 17 : index
    %c0_114 = arith.constant 0 : index
    %c0_115 = arith.constant 0 : index
    %161 = vector.load %arg2[%c0_113, %c17, %c0_114, %c0_115] : memref<1x20x64x3xf32, #tpu.memory_space<vmem>>, vector<1x1x64x3xf32>
    %162 = vector.shape_cast %161 : vector<1x1x64x3xf32> to vector<64x3xf32>
    %cst_116 = arith.constant dense<0.000000e+00> : vector<64x64xf32>
    %163 = tpu.matmul %162, %7, %cst_116 {dimension_numbers = #tpu.dot_dimension_numbers<[1], [0], [0], [1], [0, 0, 1, 1], [], []>} : vector<64x3xf32>, vector<3x64xf32>, vector<64x64xf32> -> vector<64x64xf32>
    %164 = arith.addf %163, %6 : vector<64x64xf32>
    %cst_117 = arith.constant 2.000000e-01 : f32
    %165 = vector.broadcast %cst_117 : f32 to vector<64x64xf32>
    %166 = arith.mulf %165, %164 : vector<64x64xf32>
    %167 = arith.maximumf %164, %166 : vector<64x64xf32>
    %cst_118 = arith.constant dense<0.000000e+00> : vector<64x64xf32>
    %168 = tpu.matmul %167, %8, %cst_118 {dimension_numbers = #tpu.dot_dimension_numbers<[1], [0], [0], [1], [0, 0, 1, 1], [], []>} : vector<64x64xf32>, vector<64x64xf32>, vector<64x64xf32> -> vector<64x64xf32>
    %169 = arith.maximumf %160, %168 : vector<64x64xf32>
    %c0_119 = arith.constant 0 : index
    %c18 = arith.constant 18 : index
    %c0_120 = arith.constant 0 : index
    %c0_121 = arith.constant 0 : index
    %170 = vector.load %arg2[%c0_119, %c18, %c0_120, %c0_121] : memref<1x20x64x3xf32, #tpu.memory_space<vmem>>, vector<1x1x64x3xf32>
    %171 = vector.shape_cast %170 : vector<1x1x64x3xf32> to vector<64x3xf32>
    %cst_122 = arith.constant dense<0.000000e+00> : vector<64x64xf32>
    %172 = tpu.matmul %171, %7, %cst_122 {dimension_numbers = #tpu.dot_dimension_numbers<[1], [0], [0], [1], [0, 0, 1, 1], [], []>} : vector<64x3xf32>, vector<3x64xf32>, vector<64x64xf32> -> vector<64x64xf32>
    %173 = arith.addf %172, %6 : vector<64x64xf32>
    %cst_123 = arith.constant 2.000000e-01 : f32
    %174 = vector.broadcast %cst_123 : f32 to vector<64x64xf32>
    %175 = arith.mulf %174, %173 : vector<64x64xf32>
    %176 = arith.maximumf %173, %175 : vector<64x64xf32>
    %cst_124 = arith.constant dense<0.000000e+00> : vector<64x64xf32>
    %177 = tpu.matmul %176, %8, %cst_124 {dimension_numbers = #tpu.dot_dimension_numbers<[1], [0], [0], [1], [0, 0, 1, 1], [], []>} : vector<64x64xf32>, vector<64x64xf32>, vector<64x64xf32> -> vector<64x64xf32>
    %178 = arith.maximumf %169, %177 : vector<64x64xf32>
    %c0_125 = arith.constant 0 : index
    %c19 = arith.constant 19 : index
    %c0_126 = arith.constant 0 : index
    %c0_127 = arith.constant 0 : index
    %179 = vector.load %arg2[%c0_125, %c19, %c0_126, %c0_127] : memref<1x20x64x3xf32, #tpu.memory_space<vmem>>, vector<1x1x64x3xf32>
    %180 = vector.shape_cast %179 : vector<1x1x64x3xf32> to vector<64x3xf32>
    %cst_128 = arith.constant dense<0.000000e+00> : vector<64x64xf32>
    %181 = tpu.matmul %180, %7, %cst_128 {dimension_numbers = #tpu.dot_dimension_numbers<[1], [0], [0], [1], [0, 0, 1, 1], [], []>} : vector<64x3xf32>, vector<3x64xf32>, vector<64x64xf32> -> vector<64x64xf32>
    %182 = arith.addf %181, %6 : vector<64x64xf32>
    %cst_129 = arith.constant 2.000000e-01 : f32
    %183 = vector.broadcast %cst_129 : f32 to vector<64x64xf32>
    %184 = arith.mulf %183, %182 : vector<64x64xf32>
    %185 = arith.maximumf %182, %184 : vector<64x64xf32>
    %cst_130 = arith.constant dense<0.000000e+00> : vector<64x64xf32>
    %186 = tpu.matmul %185, %8, %cst_130 {dimension_numbers = #tpu.dot_dimension_numbers<[1], [0], [0], [1], [0, 0, 1, 1], [], []>} : vector<64x64xf32>, vector<64x64xf32>, vector<64x64xf32> -> vector<64x64xf32>
    %187 = arith.maximumf %178, %186 : vector<64x64xf32>
    %c0_131 = arith.constant 0 : index
    %c0_132 = arith.constant 0 : index
    %188 = vector.load %arg8[%c0_131, %c0_132] : memref<1x64xf32, #tpu.memory_space<vmem>>, vector<1x64xf32>
    %189 = vector.broadcast %188 : vector<1x64xf32> to vector<64x64xf32>
    %190 = arith.addf %187, %189 : vector<64x64xf32>
    %cst_133 = arith.constant 2.000000e-01 : f32
    %191 = vector.broadcast %cst_133 : f32 to vector<64x64xf32>
    %192 = arith.mulf %191, %190 : vector<64x64xf32>
    %193 = arith.maximumf %190, %192 : vector<64x64xf32>
    %c0_134 = arith.constant 0 : index
    %c0_135 = arith.constant 0 : index
    %c0_136 = arith.constant 0 : index
    %194 = vector.load %arg9[%c0_134, %c0_135, %c0_136] : memref<1x64x64xf32, #tpu.memory_space<vmem>>, vector<1x64x64xf32>
    %195 = vector.shape_cast %194 : vector<1x64x64xf32> to vector<64x64xf32>
    %196 = vector.shape_cast %193 : vector<64x64xf32> to vector<1x64x64xf32>
    tpu.vector_store %arg9[%c0_134, %c0_135, %c0_136], %196 {strides = array<i32>} : memref<1x64x64xf32, #tpu.memory_space<vmem>>, vector<1x64x64xf32>,
    return
  }
  func.func @transform_0(%arg0: i32, %arg1: i32) -> (i32, i32, i32, i32) {
    %c0_i32 = arith.constant 0 : i32
    %c0_i32_0 = arith.constant 0 : i32
    %c0_i32_1 = arith.constant 0 : i32
    return %arg0, %c0_i32, %arg1, %c0_i32_0 : i32, i32, i32, i32
  }
  func.func @transform_1(%arg0: i32, %arg1: i32) -> (i32, i32, i32) {
    %c0_i32 = arith.constant 0 : i32
    %c0_i32_0 = arith.constant 0 : i32
    return %arg0, %arg1, %c0_i32 : i32, i32, i32
  }
  func.func @transform_2(%arg0: i32, %arg1: i32) -> (i32, i32) {
    %c0_i32 = arith.constant 0 : i32
    %c0_i32_0 = arith.constant 0 : i32
    %c0_i32_1 = arith.constant 0 : i32
    return %c0_i32, %c0_i32_0 : i32, i32
  }
  func.func @transform_3(%arg0: i32, %arg1: i32) -> (i32, i32) {
    %c0_i32 = arith.constant 0 : i32
    %c0_i32_0 = arith.constant 0 : i32
    %c0_i32_1 = arith.constant 0 : i32
    return %c0_i32, %c0_i32_0 : i32, i32
  }
  func.func @transform_4(%arg0: i32, %arg1: i32) -> (i32, i32) {
    %c0_i32 = arith.constant 0 : i32
    %c0_i32_0 = arith.constant 0 : i32
    %c0_i32_1 = arith.constant 0 : i32
    return %c0_i32, %c0_i32_0 : i32, i32
  }
  func.func @transform_5(%arg0: i32, %arg1: i32) -> (i32, i32) {
    %c0_i32 = arith.constant 0 : i32
    %c0_i32_0 = arith.constant 0 : i32
    %c0_i32_1 = arith.constant 0 : i32
    return %c0_i32, %c0_i32_0 : i32, i32
  }
  func.func @transform_6(%arg0: i32, %arg1: i32) -> (i32, i32) {
    %c0_i32 = arith.constant 0 : i32
    %c0_i32_0 = arith.constant 0 : i32
    %c0_i32_1 = arith.constant 0 : i32
    return %c0_i32, %c0_i32_0 : i32, i32
  }
  func.func @transform_7(%arg0: i32, %arg1: i32) -> (i32, i32, i32) {
    %c0_i32 = arith.constant 0 : i32
    %c0_i32_0 = arith.constant 0 : i32
    return %arg0, %arg1, %c0_i32 : i32, i32, i32
  }
}

module attributes {stable_mosaic.version = 11 : i64} {
  func.func @_point_proj_kernel(%arg0: i32, %arg1: i32, %arg2: memref<1x64x64xf32, #tpu.memory_space<vmem>>, %arg3: memref<64x64xf32, #tpu.memory_space<vmem>>, %arg4: memref<64x64xf32, #tpu.memory_space<vmem>>, %arg5: memref<1x64xf32, #tpu.memory_space<vmem>>, %arg6: memref<1x64x64xf32, #tpu.memory_space<vmem>>, %arg7: memref<1x64x64xf32, #tpu.memory_space<vmem>>) attributes {dimension_semantics = [#tpu.dimension_semantics<parallel>, #tpu.dimension_semantics<parallel>], iteration_bounds = array<i64: 2, 1>, scalar_prefetch = 0 : i64, scratch_operands = 0 : i64, tpu.core_type = #tpu.core_type<tc>, window_params = [{transform_indices = @transform_0, window_bounds = array<i64: 1, 64, 64>}, {pipeline_mode = #tpu.pipeline_mode<synchronous>, transform_indices = @transform_1, window_bounds = array<i64: 64, 64>}, {pipeline_mode = #tpu.pipeline_mode<synchronous>, transform_indices = @transform_2, window_bounds = array<i64: 64, 64>}, {pipeline_mode = #tpu.pipeline_mode<synchronous>, transform_indices = @transform_3, window_bounds = array<i64: 1, 64>}, {transform_indices = @transform_4, window_bounds = array<i64: 1, 64, 64>}, {transform_indices = @transform_5, window_bounds = array<i64: 1, 64, 64>}]} {
    %c0 = arith.constant 0 : index
    %c0_0 = arith.constant 0 : index
    %c0_1 = arith.constant 0 : index
    %0 = vector.load %arg2[%c0, %c0_0, %c0_1] : memref<1x64x64xf32, #tpu.memory_space<vmem>>, vector<1x64x64xf32>
    %1 = vector.shape_cast %0 : vector<1x64x64xf32> to vector<64x64xf32>
    %c0_2 = arith.constant 0 : index
    %c0_3 = arith.constant 0 : index
    %2 = vector.load %arg3[%c0_2, %c0_3] : memref<64x64xf32, #tpu.memory_space<vmem>>, vector<64x64xf32>
    %cst = arith.constant dense<0.000000e+00> : vector<64x64xf32>
    %3 = tpu.matmul %1, %2, %cst {dimension_numbers = #tpu.dot_dimension_numbers<[1], [0], [0], [1], [0, 0, 1, 1], [], []>} : vector<64x64xf32>, vector<64x64xf32>, vector<64x64xf32> -> vector<64x64xf32>
    %c0_4 = arith.constant 0 : index
    %c0_5 = arith.constant 0 : index
    %c0_6 = arith.constant 0 : index
    %4 = vector.load %arg6[%c0_4, %c0_5, %c0_6] : memref<1x64x64xf32, #tpu.memory_space<vmem>>, vector<1x64x64xf32>
    %5 = vector.shape_cast %4 : vector<1x64x64xf32> to vector<64x64xf32>
    %6 = vector.shape_cast %3 : vector<64x64xf32> to vector<1x64x64xf32>
    tpu.vector_store %arg6[%c0_4, %c0_5, %c0_6], %6 {strides = array<i32>} : memref<1x64x64xf32, #tpu.memory_space<vmem>>, vector<1x64x64xf32>,
    %c0_7 = arith.constant 0 : index
    %c0_8 = arith.constant 0 : index
    %7 = vector.load %arg4[%c0_7, %c0_8] : memref<64x64xf32, #tpu.memory_space<vmem>>, vector<64x64xf32>
    %cst_9 = arith.constant dense<0.000000e+00> : vector<64x64xf32>
    %8 = tpu.matmul %1, %7, %cst_9 {dimension_numbers = #tpu.dot_dimension_numbers<[1], [0], [0], [1], [0, 0, 1, 1], [], []>} : vector<64x64xf32>, vector<64x64xf32>, vector<64x64xf32> -> vector<64x64xf32>
    %c0_10 = arith.constant 0 : index
    %c0_11 = arith.constant 0 : index
    %9 = vector.load %arg5[%c0_10, %c0_11] : memref<1x64xf32, #tpu.memory_space<vmem>>, vector<1x64xf32>
    %10 = vector.broadcast %9 : vector<1x64xf32> to vector<64x64xf32>
    %11 = arith.addf %8, %10 : vector<64x64xf32>
    %c0_12 = arith.constant 0 : index
    %c0_13 = arith.constant 0 : index
    %c0_14 = arith.constant 0 : index
    %12 = vector.load %arg7[%c0_12, %c0_13, %c0_14] : memref<1x64x64xf32, #tpu.memory_space<vmem>>, vector<1x64x64xf32>
    %13 = vector.shape_cast %12 : vector<1x64x64xf32> to vector<64x64xf32>
    %14 = vector.shape_cast %11 : vector<64x64xf32> to vector<1x64x64xf32>
    tpu.vector_store %arg7[%c0_12, %c0_13, %c0_14], %14 {strides = array<i32>} : memref<1x64x64xf32, #tpu.memory_space<vmem>>, vector<1x64x64xf32>,
    return
  }
  func.func @transform_0(%arg0: i32, %arg1: i32) -> (i32, i32, i32) {
    %c0_i32 = arith.constant 0 : i32
    %c0_i32_0 = arith.constant 0 : i32
    return %arg0, %arg1, %c0_i32 : i32, i32, i32
  }
  func.func @transform_1(%arg0: i32, %arg1: i32) -> (i32, i32) {
    %c0_i32 = arith.constant 0 : i32
    %c0_i32_0 = arith.constant 0 : i32
    %c0_i32_1 = arith.constant 0 : i32
    return %c0_i32, %c0_i32_0 : i32, i32
  }
  func.func @transform_2(%arg0: i32, %arg1: i32) -> (i32, i32) {
    %c0_i32 = arith.constant 0 : i32
    %c0_i32_0 = arith.constant 0 : i32
    %c0_i32_1 = arith.constant 0 : i32
    return %c0_i32, %c0_i32_0 : i32, i32
  }
  func.func @transform_3(%arg0: i32, %arg1: i32) -> (i32, i32) {
    %c0_i32 = arith.constant 0 : i32
    %c0_i32_0 = arith.constant 0 : i32
    %c0_i32_1 = arith.constant 0 : i32
    return %c0_i32, %c0_i32_0 : i32, i32
  }
  func.func @transform_4(%arg0: i32, %arg1: i32) -> (i32, i32, i32) {
    %c0_i32 = arith.constant 0 : i32
    %c0_i32_0 = arith.constant 0 : i32
    return %arg0, %arg1, %c0_i32 : i32, i32, i32
  }
  func.func @transform_5(%arg0: i32, %arg1: i32) -> (i32, i32, i32) {
    %c0_i32 = arith.constant 0 : i32
    %c0_i32_0 = arith.constant 0 : i32
    return %arg0, %arg1, %c0_i32 : i32, i32, i32
  }
}

module attributes {stable_mosaic.version = 11 : i64} {
  func.func @_pairwise_dist_kernel(%arg0: i32, %arg1: i32, %arg2: memref<1x64x64xf32, #tpu.memory_space<vmem>>, %arg3: memref<1x64x64xf32, #tpu.memory_space<vmem>>, %arg4: memref<1x64x64xf32, #tpu.memory_space<vmem>>) attributes {dimension_semantics = [#tpu.dimension_semantics<parallel>, #tpu.dimension_semantics<parallel>], iteration_bounds = array<i64: 2, 1>, scalar_prefetch = 0 : i64, scratch_operands = 0 : i64, tpu.core_type = #tpu.core_type<tc>, window_params = [{transform_indices = @transform_0, window_bounds = array<i64: 1, 64, 64>}, {transform_indices = @transform_1, window_bounds = array<i64: 1, 64, 64>}, {transform_indices = @transform_2, window_bounds = array<i64: 1, 64, 64>}]} {
    %c0 = arith.constant 0 : index
    %c0_0 = arith.constant 0 : index
    %c0_1 = arith.constant 0 : index
    %0 = vector.load %arg2[%c0, %c0_0, %c0_1] : memref<1x64x64xf32, #tpu.memory_space<vmem>>, vector<1x64x64xf32>
    %1 = vector.shape_cast %0 : vector<1x64x64xf32> to vector<64x64xf32>
    %c0_2 = arith.constant 0 : index
    %c0_3 = arith.constant 0 : index
    %c0_4 = arith.constant 0 : index
    %2 = vector.load %arg3[%c0_2, %c0_3, %c0_4] : memref<1x64x64xf32, #tpu.memory_space<vmem>>, vector<1x64x64xf32>
    %3 = vector.shape_cast %2 : vector<1x64x64xf32> to vector<64x64xf32>
    %cst = arith.constant dense<0.000000e+00> : vector<64x64xf32>
    %4 = tpu.matmul %1, %3, %cst {dimension_numbers = #tpu.dot_dimension_numbers<[1], [1], [0], [0], [0, 0, 1, 0], [], []>} : vector<64x64xf32>, vector<64x64xf32>, vector<64x64xf32> -> vector<64x64xf32>
    %5 = arith.mulf %1, %1 : vector<64x64xf32>
    %cst_5 = arith.constant dense<0.000000e+00> : vector<64xf32>
    %6 = vector.multi_reduction <add>, %5, %cst_5 [1] : vector<64x64xf32> to vector<64xf32>
    %7 = vector.shape_cast %6 : vector<64xf32> to vector<64x1xf32>
    %8 = arith.mulf %3, %3 : vector<64x64xf32>
    %cst_6 = arith.constant dense<0.000000e+00> : vector<64xf32>
    %9 = vector.multi_reduction <add>, %8, %cst_6 [1] : vector<64x64xf32> to vector<64xf32>
    %10 = vector.shape_cast %9 : vector<64xf32> to vector<64x1xf32>
    %cst_7 = arith.constant 2.000000e+00 : f32
    %11 = vector.broadcast %cst_7 : f32 to vector<64x64xf32>
    %12 = arith.mulf %11, %4 : vector<64x64xf32>
    %13 = vector.broadcast %7 : vector<64x1xf32> to vector<64x64xf32>
    %14 = arith.subf %12, %13 : vector<64x64xf32>
    %15 = tpu.transpose %10, [1, 0] : vector<64x1xf32> -> vector<1x64xf32>
    %16 = vector.broadcast %15 : vector<1x64xf32> to vector<64x64xf32>
    %17 = arith.subf %14, %16 : vector<64x64xf32>
    %c0_8 = arith.constant 0 : index
    %c0_9 = arith.constant 0 : index
    %c0_10 = arith.constant 0 : index
    %18 = vector.load %arg4[%c0_8, %c0_9, %c0_10] : memref<1x64x64xf32, #tpu.memory_space<vmem>>, vector<1x64x64xf32>
    %19 = vector.shape_cast %18 : vector<1x64x64xf32> to vector<64x64xf32>
    %20 = vector.shape_cast %17 : vector<64x64xf32> to vector<1x64x64xf32>
    tpu.vector_store %arg4[%c0_8, %c0_9, %c0_10], %20 {strides = array<i32>} : memref<1x64x64xf32, #tpu.memory_space<vmem>>, vector<1x64x64xf32>,
    return
  }
  func.func @transform_0(%arg0: i32, %arg1: i32) -> (i32, i32, i32) {
    %c0_i32 = arith.constant 0 : i32
    %c0_i32_0 = arith.constant 0 : i32
    return %arg0, %arg1, %c0_i32 : i32, i32, i32
  }
  func.func @transform_1(%arg0: i32, %arg1: i32) -> (i32, i32, i32) {
    %c0_i32 = arith.constant 0 : i32
    %c0_i32_0 = arith.constant 0 : i32
    %c0_i32_1 = arith.constant 0 : i32
    return %arg0, %c0_i32, %c0_i32_0 : i32, i32, i32
  }
  func.func @transform_2(%arg0: i32, %arg1: i32) -> (i32, i32, i32) {
    %c0_i32 = arith.constant 0 : i32
    %c0_i32_0 = arith.constant 0 : i32
    return %arg0, %arg1, %c0_i32 : i32, i32, i32
  }
}

module attributes {stable_mosaic.version = 11 : i64} {
  func.func @_edge_pre2_kernel(%arg0: i32, %arg1: i32, %arg2: memref<1x20x64x64xf32, #tpu.memory_space<vmem>>, %arg3: memref<1x64x64xf32, #tpu.memory_space<vmem>>, %arg4: memref<64x64xf32, #tpu.memory_space<vmem>>, %arg5: memref<1x64xf32, #tpu.memory_space<vmem>>, %arg6: memref<1x64x64xf32, #tpu.memory_space<vmem>>) attributes {dimension_semantics = [#tpu.dimension_semantics<parallel>, #tpu.dimension_semantics<parallel>], iteration_bounds = array<i64: 2, 1>, scalar_prefetch = 0 : i64, scratch_operands = 0 : i64, tpu.core_type = #tpu.core_type<tc>, window_params = [{transform_indices = @transform_0, window_bounds = array<i64: 1, 20, 64, 64>}, {transform_indices = @transform_1, window_bounds = array<i64: 1, 64, 64>}, {pipeline_mode = #tpu.pipeline_mode<synchronous>, transform_indices = @transform_2, window_bounds = array<i64: 64, 64>}, {pipeline_mode = #tpu.pipeline_mode<synchronous>, transform_indices = @transform_3, window_bounds = array<i64: 1, 64>}, {transform_indices = @transform_4, window_bounds = array<i64: 1, 64, 64>}]} {
    %c0 = arith.constant 0 : index
    %c0_0 = arith.constant 0 : index
    %c0_1 = arith.constant 0 : index
    %0 = vector.load %arg3[%c0, %c0_0, %c0_1] : memref<1x64x64xf32, #tpu.memory_space<vmem>>, vector<1x64x64xf32>
    %1 = vector.shape_cast %0 : vector<1x64x64xf32> to vector<64x64xf32>
    %c0_2 = arith.constant 0 : index
    %c0_3 = arith.constant 0 : index
    %2 = vector.load %arg4[%c0_2, %c0_3] : memref<64x64xf32, #tpu.memory_space<vmem>>, vector<64x64xf32>
    %c0_4 = arith.constant 0 : index
    %c0_5 = arith.constant 0 : index
    %c0_6 = arith.constant 0 : index
    %c0_7 = arith.constant 0 : index
    %3 = vector.load %arg2[%c0_4, %c0_5, %c0_6, %c0_7] : memref<1x20x64x64xf32, #tpu.memory_space<vmem>>, vector<1x1x64x64xf32>
    %4 = vector.shape_cast %3 : vector<1x1x64x64xf32> to vector<64x64xf32>
    %5 = arith.addf %4, %1 : vector<64x64xf32>
    %cst = arith.constant 2.000000e-01 : f32
    %6 = vector.broadcast %cst : f32 to vector<64x64xf32>
    %7 = arith.mulf %6, %5 : vector<64x64xf32>
    %8 = arith.maximumf %5, %7 : vector<64x64xf32>
    %cst_8 = arith.constant dense<0.000000e+00> : vector<64x64xf32>
    %9 = tpu.matmul %8, %2, %cst_8 {dimension_numbers = #tpu.dot_dimension_numbers<[1], [0], [0], [1], [0, 0, 1, 1], [], []>} : vector<64x64xf32>, vector<64x64xf32>, vector<64x64xf32> -> vector<64x64xf32>
    %c0_9 = arith.constant 0 : index
    %c1 = arith.constant 1 : index
    %c0_10 = arith.constant 0 : index
    %c0_11 = arith.constant 0 : index
    %10 = vector.load %arg2[%c0_9, %c1, %c0_10, %c0_11] : memref<1x20x64x64xf32, #tpu.memory_space<vmem>>, vector<1x1x64x64xf32>
    %11 = vector.shape_cast %10 : vector<1x1x64x64xf32> to vector<64x64xf32>
    %12 = arith.addf %11, %1 : vector<64x64xf32>
    %cst_12 = arith.constant 2.000000e-01 : f32
    %13 = vector.broadcast %cst_12 : f32 to vector<64x64xf32>
    %14 = arith.mulf %13, %12 : vector<64x64xf32>
    %15 = arith.maximumf %12, %14 : vector<64x64xf32>
    %cst_13 = arith.constant dense<0.000000e+00> : vector<64x64xf32>
    %16 = tpu.matmul %15, %2, %cst_13 {dimension_numbers = #tpu.dot_dimension_numbers<[1], [0], [0], [1], [0, 0, 1, 1], [], []>} : vector<64x64xf32>, vector<64x64xf32>, vector<64x64xf32> -> vector<64x64xf32>
    %17 = arith.maximumf %9, %16 : vector<64x64xf32>
    %c0_14 = arith.constant 0 : index
    %c2 = arith.constant 2 : index
    %c0_15 = arith.constant 0 : index
    %c0_16 = arith.constant 0 : index
    %18 = vector.load %arg2[%c0_14, %c2, %c0_15, %c0_16] : memref<1x20x64x64xf32, #tpu.memory_space<vmem>>, vector<1x1x64x64xf32>
    %19 = vector.shape_cast %18 : vector<1x1x64x64xf32> to vector<64x64xf32>
    %20 = arith.addf %19, %1 : vector<64x64xf32>
    %cst_17 = arith.constant 2.000000e-01 : f32
    %21 = vector.broadcast %cst_17 : f32 to vector<64x64xf32>
    %22 = arith.mulf %21, %20 : vector<64x64xf32>
    %23 = arith.maximumf %20, %22 : vector<64x64xf32>
    %cst_18 = arith.constant dense<0.000000e+00> : vector<64x64xf32>
    %24 = tpu.matmul %23, %2, %cst_18 {dimension_numbers = #tpu.dot_dimension_numbers<[1], [0], [0], [1], [0, 0, 1, 1], [], []>} : vector<64x64xf32>, vector<64x64xf32>, vector<64x64xf32> -> vector<64x64xf32>
    %25 = arith.maximumf %17, %24 : vector<64x64xf32>
    %c0_19 = arith.constant 0 : index
    %c3 = arith.constant 3 : index
    %c0_20 = arith.constant 0 : index
    %c0_21 = arith.constant 0 : index
    %26 = vector.load %arg2[%c0_19, %c3, %c0_20, %c0_21] : memref<1x20x64x64xf32, #tpu.memory_space<vmem>>, vector<1x1x64x64xf32>
    %27 = vector.shape_cast %26 : vector<1x1x64x64xf32> to vector<64x64xf32>
    %28 = arith.addf %27, %1 : vector<64x64xf32>
    %cst_22 = arith.constant 2.000000e-01 : f32
    %29 = vector.broadcast %cst_22 : f32 to vector<64x64xf32>
    %30 = arith.mulf %29, %28 : vector<64x64xf32>
    %31 = arith.maximumf %28, %30 : vector<64x64xf32>
    %cst_23 = arith.constant dense<0.000000e+00> : vector<64x64xf32>
    %32 = tpu.matmul %31, %2, %cst_23 {dimension_numbers = #tpu.dot_dimension_numbers<[1], [0], [0], [1], [0, 0, 1, 1], [], []>} : vector<64x64xf32>, vector<64x64xf32>, vector<64x64xf32> -> vector<64x64xf32>
    %33 = arith.maximumf %25, %32 : vector<64x64xf32>
    %c0_24 = arith.constant 0 : index
    %c4 = arith.constant 4 : index
    %c0_25 = arith.constant 0 : index
    %c0_26 = arith.constant 0 : index
    %34 = vector.load %arg2[%c0_24, %c4, %c0_25, %c0_26] : memref<1x20x64x64xf32, #tpu.memory_space<vmem>>, vector<1x1x64x64xf32>
    %35 = vector.shape_cast %34 : vector<1x1x64x64xf32> to vector<64x64xf32>
    %36 = arith.addf %35, %1 : vector<64x64xf32>
    %cst_27 = arith.constant 2.000000e-01 : f32
    %37 = vector.broadcast %cst_27 : f32 to vector<64x64xf32>
    %38 = arith.mulf %37, %36 : vector<64x64xf32>
    %39 = arith.maximumf %36, %38 : vector<64x64xf32>
    %cst_28 = arith.constant dense<0.000000e+00> : vector<64x64xf32>
    %40 = tpu.matmul %39, %2, %cst_28 {dimension_numbers = #tpu.dot_dimension_numbers<[1], [0], [0], [1], [0, 0, 1, 1], [], []>} : vector<64x64xf32>, vector<64x64xf32>, vector<64x64xf32> -> vector<64x64xf32>
    %41 = arith.maximumf %33, %40 : vector<64x64xf32>
    %c0_29 = arith.constant 0 : index
    %c5 = arith.constant 5 : index
    %c0_30 = arith.constant 0 : index
    %c0_31 = arith.constant 0 : index
    %42 = vector.load %arg2[%c0_29, %c5, %c0_30, %c0_31] : memref<1x20x64x64xf32, #tpu.memory_space<vmem>>, vector<1x1x64x64xf32>
    %43 = vector.shape_cast %42 : vector<1x1x64x64xf32> to vector<64x64xf32>
    %44 = arith.addf %43, %1 : vector<64x64xf32>
    %cst_32 = arith.constant 2.000000e-01 : f32
    %45 = vector.broadcast %cst_32 : f32 to vector<64x64xf32>
    %46 = arith.mulf %45, %44 : vector<64x64xf32>
    %47 = arith.maximumf %44, %46 : vector<64x64xf32>
    %cst_33 = arith.constant dense<0.000000e+00> : vector<64x64xf32>
    %48 = tpu.matmul %47, %2, %cst_33 {dimension_numbers = #tpu.dot_dimension_numbers<[1], [0], [0], [1], [0, 0, 1, 1], [], []>} : vector<64x64xf32>, vector<64x64xf32>, vector<64x64xf32> -> vector<64x64xf32>
    %49 = arith.maximumf %41, %48 : vector<64x64xf32>
    %c0_34 = arith.constant 0 : index
    %c6 = arith.constant 6 : index
    %c0_35 = arith.constant 0 : index
    %c0_36 = arith.constant 0 : index
    %50 = vector.load %arg2[%c0_34, %c6, %c0_35, %c0_36] : memref<1x20x64x64xf32, #tpu.memory_space<vmem>>, vector<1x1x64x64xf32>
    %51 = vector.shape_cast %50 : vector<1x1x64x64xf32> to vector<64x64xf32>
    %52 = arith.addf %51, %1 : vector<64x64xf32>
    %cst_37 = arith.constant 2.000000e-01 : f32
    %53 = vector.broadcast %cst_37 : f32 to vector<64x64xf32>
    %54 = arith.mulf %53, %52 : vector<64x64xf32>
    %55 = arith.maximumf %52, %54 : vector<64x64xf32>
    %cst_38 = arith.constant dense<0.000000e+00> : vector<64x64xf32>
    %56 = tpu.matmul %55, %2, %cst_38 {dimension_numbers = #tpu.dot_dimension_numbers<[1], [0], [0], [1], [0, 0, 1, 1], [], []>} : vector<64x64xf32>, vector<64x64xf32>, vector<64x64xf32> -> vector<64x64xf32>
    %57 = arith.maximumf %49, %56 : vector<64x64xf32>
    %c0_39 = arith.constant 0 : index
    %c7 = arith.constant 7 : index
    %c0_40 = arith.constant 0 : index
    %c0_41 = arith.constant 0 : index
    %58 = vector.load %arg2[%c0_39, %c7, %c0_40, %c0_41] : memref<1x20x64x64xf32, #tpu.memory_space<vmem>>, vector<1x1x64x64xf32>
    %59 = vector.shape_cast %58 : vector<1x1x64x64xf32> to vector<64x64xf32>
    %60 = arith.addf %59, %1 : vector<64x64xf32>
    %cst_42 = arith.constant 2.000000e-01 : f32
    %61 = vector.broadcast %cst_42 : f32 to vector<64x64xf32>
    %62 = arith.mulf %61, %60 : vector<64x64xf32>
    %63 = arith.maximumf %60, %62 : vector<64x64xf32>
    %cst_43 = arith.constant dense<0.000000e+00> : vector<64x64xf32>
    %64 = tpu.matmul %63, %2, %cst_43 {dimension_numbers = #tpu.dot_dimension_numbers<[1], [0], [0], [1], [0, 0, 1, 1], [], []>} : vector<64x64xf32>, vector<64x64xf32>, vector<64x64xf32> -> vector<64x64xf32>
    %65 = arith.maximumf %57, %64 : vector<64x64xf32>
    %c0_44 = arith.constant 0 : index
    %c8 = arith.constant 8 : index
    %c0_45 = arith.constant 0 : index
    %c0_46 = arith.constant 0 : index
    %66 = vector.load %arg2[%c0_44, %c8, %c0_45, %c0_46] : memref<1x20x64x64xf32, #tpu.memory_space<vmem>>, vector<1x1x64x64xf32>
    %67 = vector.shape_cast %66 : vector<1x1x64x64xf32> to vector<64x64xf32>
    %68 = arith.addf %67, %1 : vector<64x64xf32>
    %cst_47 = arith.constant 2.000000e-01 : f32
    %69 = vector.broadcast %cst_47 : f32 to vector<64x64xf32>
    %70 = arith.mulf %69, %68 : vector<64x64xf32>
    %71 = arith.maximumf %68, %70 : vector<64x64xf32>
    %cst_48 = arith.constant dense<0.000000e+00> : vector<64x64xf32>
    %72 = tpu.matmul %71, %2, %cst_48 {dimension_numbers = #tpu.dot_dimension_numbers<[1], [0], [0], [1], [0, 0, 1, 1], [], []>} : vector<64x64xf32>, vector<64x64xf32>, vector<64x64xf32> -> vector<64x64xf32>
    %73 = arith.maximumf %65, %72 : vector<64x64xf32>
    %c0_49 = arith.constant 0 : index
    %c9 = arith.constant 9 : index
    %c0_50 = arith.constant 0 : index
    %c0_51 = arith.constant 0 : index
    %74 = vector.load %arg2[%c0_49, %c9, %c0_50, %c0_51] : memref<1x20x64x64xf32, #tpu.memory_space<vmem>>, vector<1x1x64x64xf32>
    %75 = vector.shape_cast %74 : vector<1x1x64x64xf32> to vector<64x64xf32>
    %76 = arith.addf %75, %1 : vector<64x64xf32>
    %cst_52 = arith.constant 2.000000e-01 : f32
    %77 = vector.broadcast %cst_52 : f32 to vector<64x64xf32>
    %78 = arith.mulf %77, %76 : vector<64x64xf32>
    %79 = arith.maximumf %76, %78 : vector<64x64xf32>
    %cst_53 = arith.constant dense<0.000000e+00> : vector<64x64xf32>
    %80 = tpu.matmul %79, %2, %cst_53 {dimension_numbers = #tpu.dot_dimension_numbers<[1], [0], [0], [1], [0, 0, 1, 1], [], []>} : vector<64x64xf32>, vector<64x64xf32>, vector<64x64xf32> -> vector<64x64xf32>
    %81 = arith.maximumf %73, %80 : vector<64x64xf32>
    %c0_54 = arith.constant 0 : index
    %c10 = arith.constant 10 : index
    %c0_55 = arith.constant 0 : index
    %c0_56 = arith.constant 0 : index
    %82 = vector.load %arg2[%c0_54, %c10, %c0_55, %c0_56] : memref<1x20x64x64xf32, #tpu.memory_space<vmem>>, vector<1x1x64x64xf32>
    %83 = vector.shape_cast %82 : vector<1x1x64x64xf32> to vector<64x64xf32>
    %84 = arith.addf %83, %1 : vector<64x64xf32>
    %cst_57 = arith.constant 2.000000e-01 : f32
    %85 = vector.broadcast %cst_57 : f32 to vector<64x64xf32>
    %86 = arith.mulf %85, %84 : vector<64x64xf32>
    %87 = arith.maximumf %84, %86 : vector<64x64xf32>
    %cst_58 = arith.constant dense<0.000000e+00> : vector<64x64xf32>
    %88 = tpu.matmul %87, %2, %cst_58 {dimension_numbers = #tpu.dot_dimension_numbers<[1], [0], [0], [1], [0, 0, 1, 1], [], []>} : vector<64x64xf32>, vector<64x64xf32>, vector<64x64xf32> -> vector<64x64xf32>
    %89 = arith.maximumf %81, %88 : vector<64x64xf32>
    %c0_59 = arith.constant 0 : index
    %c11 = arith.constant 11 : index
    %c0_60 = arith.constant 0 : index
    %c0_61 = arith.constant 0 : index
    %90 = vector.load %arg2[%c0_59, %c11, %c0_60, %c0_61] : memref<1x20x64x64xf32, #tpu.memory_space<vmem>>, vector<1x1x64x64xf32>
    %91 = vector.shape_cast %90 : vector<1x1x64x64xf32> to vector<64x64xf32>
    %92 = arith.addf %91, %1 : vector<64x64xf32>
    %cst_62 = arith.constant 2.000000e-01 : f32
    %93 = vector.broadcast %cst_62 : f32 to vector<64x64xf32>
    %94 = arith.mulf %93, %92 : vector<64x64xf32>
    %95 = arith.maximumf %92, %94 : vector<64x64xf32>
    %cst_63 = arith.constant dense<0.000000e+00> : vector<64x64xf32>
    %96 = tpu.matmul %95, %2, %cst_63 {dimension_numbers = #tpu.dot_dimension_numbers<[1], [0], [0], [1], [0, 0, 1, 1], [], []>} : vector<64x64xf32>, vector<64x64xf32>, vector<64x64xf32> -> vector<64x64xf32>
    %97 = arith.maximumf %89, %96 : vector<64x64xf32>
    %c0_64 = arith.constant 0 : index
    %c12 = arith.constant 12 : index
    %c0_65 = arith.constant 0 : index
    %c0_66 = arith.constant 0 : index
    %98 = vector.load %arg2[%c0_64, %c12, %c0_65, %c0_66] : memref<1x20x64x64xf32, #tpu.memory_space<vmem>>, vector<1x1x64x64xf32>
    %99 = vector.shape_cast %98 : vector<1x1x64x64xf32> to vector<64x64xf32>
    %100 = arith.addf %99, %1 : vector<64x64xf32>
    %cst_67 = arith.constant 2.000000e-01 : f32
    %101 = vector.broadcast %cst_67 : f32 to vector<64x64xf32>
    %102 = arith.mulf %101, %100 : vector<64x64xf32>
    %103 = arith.maximumf %100, %102 : vector<64x64xf32>
    %cst_68 = arith.constant dense<0.000000e+00> : vector<64x64xf32>
    %104 = tpu.matmul %103, %2, %cst_68 {dimension_numbers = #tpu.dot_dimension_numbers<[1], [0], [0], [1], [0, 0, 1, 1], [], []>} : vector<64x64xf32>, vector<64x64xf32>, vector<64x64xf32> -> vector<64x64xf32>
    %105 = arith.maximumf %97, %104 : vector<64x64xf32>
    %c0_69 = arith.constant 0 : index
    %c13 = arith.constant 13 : index
    %c0_70 = arith.constant 0 : index
    %c0_71 = arith.constant 0 : index
    %106 = vector.load %arg2[%c0_69, %c13, %c0_70, %c0_71] : memref<1x20x64x64xf32, #tpu.memory_space<vmem>>, vector<1x1x64x64xf32>
    %107 = vector.shape_cast %106 : vector<1x1x64x64xf32> to vector<64x64xf32>
    %108 = arith.addf %107, %1 : vector<64x64xf32>
    %cst_72 = arith.constant 2.000000e-01 : f32
    %109 = vector.broadcast %cst_72 : f32 to vector<64x64xf32>
    %110 = arith.mulf %109, %108 : vector<64x64xf32>
    %111 = arith.maximumf %108, %110 : vector<64x64xf32>
    %cst_73 = arith.constant dense<0.000000e+00> : vector<64x64xf32>
    %112 = tpu.matmul %111, %2, %cst_73 {dimension_numbers = #tpu.dot_dimension_numbers<[1], [0], [0], [1], [0, 0, 1, 1], [], []>} : vector<64x64xf32>, vector<64x64xf32>, vector<64x64xf32> -> vector<64x64xf32>
    %113 = arith.maximumf %105, %112 : vector<64x64xf32>
    %c0_74 = arith.constant 0 : index
    %c14 = arith.constant 14 : index
    %c0_75 = arith.constant 0 : index
    %c0_76 = arith.constant 0 : index
    %114 = vector.load %arg2[%c0_74, %c14, %c0_75, %c0_76] : memref<1x20x64x64xf32, #tpu.memory_space<vmem>>, vector<1x1x64x64xf32>
    %115 = vector.shape_cast %114 : vector<1x1x64x64xf32> to vector<64x64xf32>
    %116 = arith.addf %115, %1 : vector<64x64xf32>
    %cst_77 = arith.constant 2.000000e-01 : f32
    %117 = vector.broadcast %cst_77 : f32 to vector<64x64xf32>
    %118 = arith.mulf %117, %116 : vector<64x64xf32>
    %119 = arith.maximumf %116, %118 : vector<64x64xf32>
    %cst_78 = arith.constant dense<0.000000e+00> : vector<64x64xf32>
    %120 = tpu.matmul %119, %2, %cst_78 {dimension_numbers = #tpu.dot_dimension_numbers<[1], [0], [0], [1], [0, 0, 1, 1], [], []>} : vector<64x64xf32>, vector<64x64xf32>, vector<64x64xf32> -> vector<64x64xf32>
    %121 = arith.maximumf %113, %120 : vector<64x64xf32>
    %c0_79 = arith.constant 0 : index
    %c15 = arith.constant 15 : index
    %c0_80 = arith.constant 0 : index
    %c0_81 = arith.constant 0 : index
    %122 = vector.load %arg2[%c0_79, %c15, %c0_80, %c0_81] : memref<1x20x64x64xf32, #tpu.memory_space<vmem>>, vector<1x1x64x64xf32>
    %123 = vector.shape_cast %122 : vector<1x1x64x64xf32> to vector<64x64xf32>
    %124 = arith.addf %123, %1 : vector<64x64xf32>
    %cst_82 = arith.constant 2.000000e-01 : f32
    %125 = vector.broadcast %cst_82 : f32 to vector<64x64xf32>
    %126 = arith.mulf %125, %124 : vector<64x64xf32>
    %127 = arith.maximumf %124, %126 : vector<64x64xf32>
    %cst_83 = arith.constant dense<0.000000e+00> : vector<64x64xf32>
    %128 = tpu.matmul %127, %2, %cst_83 {dimension_numbers = #tpu.dot_dimension_numbers<[1], [0], [0], [1], [0, 0, 1, 1], [], []>} : vector<64x64xf32>, vector<64x64xf32>, vector<64x64xf32> -> vector<64x64xf32>
    %129 = arith.maximumf %121, %128 : vector<64x64xf32>
    %c0_84 = arith.constant 0 : index
    %c16 = arith.constant 16 : index
    %c0_85 = arith.constant 0 : index
    %c0_86 = arith.constant 0 : index
    %130 = vector.load %arg2[%c0_84, %c16, %c0_85, %c0_86] : memref<1x20x64x64xf32, #tpu.memory_space<vmem>>, vector<1x1x64x64xf32>
    %131 = vector.shape_cast %130 : vector<1x1x64x64xf32> to vector<64x64xf32>
    %132 = arith.addf %131, %1 : vector<64x64xf32>
    %cst_87 = arith.constant 2.000000e-01 : f32
    %133 = vector.broadcast %cst_87 : f32 to vector<64x64xf32>
    %134 = arith.mulf %133, %132 : vector<64x64xf32>
    %135 = arith.maximumf %132, %134 : vector<64x64xf32>
    %cst_88 = arith.constant dense<0.000000e+00> : vector<64x64xf32>
    %136 = tpu.matmul %135, %2, %cst_88 {dimension_numbers = #tpu.dot_dimension_numbers<[1], [0], [0], [1], [0, 0, 1, 1], [], []>} : vector<64x64xf32>, vector<64x64xf32>, vector<64x64xf32> -> vector<64x64xf32>
    %137 = arith.maximumf %129, %136 : vector<64x64xf32>
    %c0_89 = arith.constant 0 : index
    %c17 = arith.constant 17 : index
    %c0_90 = arith.constant 0 : index
    %c0_91 = arith.constant 0 : index
    %138 = vector.load %arg2[%c0_89, %c17, %c0_90, %c0_91] : memref<1x20x64x64xf32, #tpu.memory_space<vmem>>, vector<1x1x64x64xf32>
    %139 = vector.shape_cast %138 : vector<1x1x64x64xf32> to vector<64x64xf32>
    %140 = arith.addf %139, %1 : vector<64x64xf32>
    %cst_92 = arith.constant 2.000000e-01 : f32
    %141 = vector.broadcast %cst_92 : f32 to vector<64x64xf32>
    %142 = arith.mulf %141, %140 : vector<64x64xf32>
    %143 = arith.maximumf %140, %142 : vector<64x64xf32>
    %cst_93 = arith.constant dense<0.000000e+00> : vector<64x64xf32>
    %144 = tpu.matmul %143, %2, %cst_93 {dimension_numbers = #tpu.dot_dimension_numbers<[1], [0], [0], [1], [0, 0, 1, 1], [], []>} : vector<64x64xf32>, vector<64x64xf32>, vector<64x64xf32> -> vector<64x64xf32>
    %145 = arith.maximumf %137, %144 : vector<64x64xf32>
    %c0_94 = arith.constant 0 : index
    %c18 = arith.constant 18 : index
    %c0_95 = arith.constant 0 : index
    %c0_96 = arith.constant 0 : index
    %146 = vector.load %arg2[%c0_94, %c18, %c0_95, %c0_96] : memref<1x20x64x64xf32, #tpu.memory_space<vmem>>, vector<1x1x64x64xf32>
    %147 = vector.shape_cast %146 : vector<1x1x64x64xf32> to vector<64x64xf32>
    %148 = arith.addf %147, %1 : vector<64x64xf32>
    %cst_97 = arith.constant 2.000000e-01 : f32
    %149 = vector.broadcast %cst_97 : f32 to vector<64x64xf32>
    %150 = arith.mulf %149, %148 : vector<64x64xf32>
    %151 = arith.maximumf %148, %150 : vector<64x64xf32>
    %cst_98 = arith.constant dense<0.000000e+00> : vector<64x64xf32>
    %152 = tpu.matmul %151, %2, %cst_98 {dimension_numbers = #tpu.dot_dimension_numbers<[1], [0], [0], [1], [0, 0, 1, 1], [], []>} : vector<64x64xf32>, vector<64x64xf32>, vector<64x64xf32> -> vector<64x64xf32>
    %153 = arith.maximumf %145, %152 : vector<64x64xf32>
    %c0_99 = arith.constant 0 : index
    %c19 = arith.constant 19 : index
    %c0_100 = arith.constant 0 : index
    %c0_101 = arith.constant 0 : index
    %154 = vector.load %arg2[%c0_99, %c19, %c0_100, %c0_101] : memref<1x20x64x64xf32, #tpu.memory_space<vmem>>, vector<1x1x64x64xf32>
    %155 = vector.shape_cast %154 : vector<1x1x64x64xf32> to vector<64x64xf32>
    %156 = arith.addf %155, %1 : vector<64x64xf32>
    %cst_102 = arith.constant 2.000000e-01 : f32
    %157 = vector.broadcast %cst_102 : f32 to vector<64x64xf32>
    %158 = arith.mulf %157, %156 : vector<64x64xf32>
    %159 = arith.maximumf %156, %158 : vector<64x64xf32>
    %cst_103 = arith.constant dense<0.000000e+00> : vector<64x64xf32>
    %160 = tpu.matmul %159, %2, %cst_103 {dimension_numbers = #tpu.dot_dimension_numbers<[1], [0], [0], [1], [0, 0, 1, 1], [], []>} : vector<64x64xf32>, vector<64x64xf32>, vector<64x64xf32> -> vector<64x64xf32>
    %161 = arith.maximumf %153, %160 : vector<64x64xf32>
    %c0_104 = arith.constant 0 : index
    %c0_105 = arith.constant 0 : index
    %162 = vector.load %arg5[%c0_104, %c0_105] : memref<1x64xf32, #tpu.memory_space<vmem>>, vector<1x64xf32>
    %163 = vector.broadcast %162 : vector<1x64xf32> to vector<64x64xf32>
    %164 = arith.addf %161, %163 : vector<64x64xf32>
    %cst_106 = arith.constant 2.000000e-01 : f32
    %165 = vector.broadcast %cst_106 : f32 to vector<64x64xf32>
    %166 = arith.mulf %165, %164 : vector<64x64xf32>
    %167 = arith.maximumf %164, %166 : vector<64x64xf32>
    %c0_107 = arith.constant 0 : index
    %c0_108 = arith.constant 0 : index
    %c0_109 = arith.constant 0 : index
    %168 = vector.load %arg6[%c0_107, %c0_108, %c0_109] : memref<1x64x64xf32, #tpu.memory_space<vmem>>, vector<1x64x64xf32>
    %169 = vector.shape_cast %168 : vector<1x64x64xf32> to vector<64x64xf32>
    %170 = vector.shape_cast %167 : vector<64x64xf32> to vector<1x64x64xf32>
    tpu.vector_store %arg6[%c0_107, %c0_108, %c0_109], %170 {strides = array<i32>} : memref<1x64x64xf32, #tpu.memory_space<vmem>>, vector<1x64x64xf32>,
    return
  }
  func.func @transform_0(%arg0: i32, %arg1: i32) -> (i32, i32, i32, i32) {
    %c0_i32 = arith.constant 0 : i32
    %c0_i32_0 = arith.constant 0 : i32
    %c0_i32_1 = arith.constant 0 : i32
    return %arg0, %c0_i32, %arg1, %c0_i32_0 : i32, i32, i32, i32
  }
  func.func @transform_1(%arg0: i32, %arg1: i32) -> (i32, i32, i32) {
    %c0_i32 = arith.constant 0 : i32
    %c0_i32_0 = arith.constant 0 : i32
    return %arg0, %arg1, %c0_i32 : i32, i32, i32
  }
  func.func @transform_2(%arg0: i32, %arg1: i32) -> (i32, i32) {
    %c0_i32 = arith.constant 0 : i32
    %c0_i32_0 = arith.constant 0 : i32
    %c0_i32_1 = arith.constant 0 : i32
    return %c0_i32, %c0_i32_0 : i32, i32
  }
  func.func @transform_3(%arg0: i32, %arg1: i32) -> (i32, i32) {
    %c0_i32 = arith.constant 0 : i32
    %c0_i32_0 = arith.constant 0 : i32
    %c0_i32_1 = arith.constant 0 : i32
    return %c0_i32, %c0_i32_0 : i32, i32
  }
  func.func @transform_4(%arg0: i32, %arg1: i32) -> (i32, i32, i32) {
    %c0_i32 = arith.constant 0 : i32
    %c0_i32_0 = arith.constant 0 : i32
    return %arg0, %arg1, %c0_i32 : i32, i32, i32
  }
}

module attributes {stable_mosaic.version = 11 : i64} {
  func.func @_edge_pre1_kernel(%arg0: i32, %arg1: i32, %arg2: memref<1x20x64x64xf32, #tpu.memory_space<vmem>>, %arg3: memref<1x64x64xf32, #tpu.memory_space<vmem>>, %arg4: memref<1x64x64xf32, #tpu.memory_space<vmem>>) attributes {dimension_semantics = [#tpu.dimension_semantics<parallel>, #tpu.dimension_semantics<parallel>], iteration_bounds = array<i64: 2, 1>, scalar_prefetch = 0 : i64, scratch_operands = 0 : i64, tpu.core_type = #tpu.core_type<tc>, window_params = [{transform_indices = @transform_0, window_bounds = array<i64: 1, 20, 64, 64>}, {transform_indices = @transform_1, window_bounds = array<i64: 1, 64, 64>}, {transform_indices = @transform_2, window_bounds = array<i64: 1, 64, 64>}]} {
    %c0 = arith.constant 0 : index
    %c0_0 = arith.constant 0 : index
    %c0_1 = arith.constant 0 : index
    %0 = vector.load %arg3[%c0, %c0_0, %c0_1] : memref<1x64x64xf32, #tpu.memory_space<vmem>>, vector<1x64x64xf32>
    %1 = vector.shape_cast %0 : vector<1x64x64xf32> to vector<64x64xf32>
    %c0_2 = arith.constant 0 : index
    %c0_3 = arith.constant 0 : index
    %c0_4 = arith.constant 0 : index
    %c0_5 = arith.constant 0 : index
    %2 = vector.load %arg2[%c0_2, %c0_3, %c0_4, %c0_5] : memref<1x20x64x64xf32, #tpu.memory_space<vmem>>, vector<1x1x64x64xf32>
    %3 = vector.shape_cast %2 : vector<1x1x64x64xf32> to vector<64x64xf32>
    %4 = arith.addf %3, %1 : vector<64x64xf32>
    %c0_6 = arith.constant 0 : index
    %c1 = arith.constant 1 : index
    %c0_7 = arith.constant 0 : index
    %c0_8 = arith.constant 0 : index
    %5 = vector.load %arg2[%c0_6, %c1, %c0_7, %c0_8] : memref<1x20x64x64xf32, #tpu.memory_space<vmem>>, vector<1x1x64x64xf32>
    %6 = vector.shape_cast %5 : vector<1x1x64x64xf32> to vector<64x64xf32>
    %7 = arith.addf %6, %1 : vector<64x64xf32>
    %8 = arith.maximumf %4, %7 : vector<64x64xf32>
    %c0_9 = arith.constant 0 : index
    %c2 = arith.constant 2 : index
    %c0_10 = arith.constant 0 : index
    %c0_11 = arith.constant 0 : index
    %9 = vector.load %arg2[%c0_9, %c2, %c0_10, %c0_11] : memref<1x20x64x64xf32, #tpu.memory_space<vmem>>, vector<1x1x64x64xf32>
    %10 = vector.shape_cast %9 : vector<1x1x64x64xf32> to vector<64x64xf32>
    %11 = arith.addf %10, %1 : vector<64x64xf32>
    %12 = arith.maximumf %8, %11 : vector<64x64xf32>
    %c0_12 = arith.constant 0 : index
    %c3 = arith.constant 3 : index
    %c0_13 = arith.constant 0 : index
    %c0_14 = arith.constant 0 : index
    %13 = vector.load %arg2[%c0_12, %c3, %c0_13, %c0_14] : memref<1x20x64x64xf32, #tpu.memory_space<vmem>>, vector<1x1x64x64xf32>
    %14 = vector.shape_cast %13 : vector<1x1x64x64xf32> to vector<64x64xf32>
    %15 = arith.addf %14, %1 : vector<64x64xf32>
    %16 = arith.maximumf %12, %15 : vector<64x64xf32>
    %c0_15 = arith.constant 0 : index
    %c4 = arith.constant 4 : index
    %c0_16 = arith.constant 0 : index
    %c0_17 = arith.constant 0 : index
    %17 = vector.load %arg2[%c0_15, %c4, %c0_16, %c0_17] : memref<1x20x64x64xf32, #tpu.memory_space<vmem>>, vector<1x1x64x64xf32>
    %18 = vector.shape_cast %17 : vector<1x1x64x64xf32> to vector<64x64xf32>
    %19 = arith.addf %18, %1 : vector<64x64xf32>
    %20 = arith.maximumf %16, %19 : vector<64x64xf32>
    %c0_18 = arith.constant 0 : index
    %c5 = arith.constant 5 : index
    %c0_19 = arith.constant 0 : index
    %c0_20 = arith.constant 0 : index
    %21 = vector.load %arg2[%c0_18, %c5, %c0_19, %c0_20] : memref<1x20x64x64xf32, #tpu.memory_space<vmem>>, vector<1x1x64x64xf32>
    %22 = vector.shape_cast %21 : vector<1x1x64x64xf32> to vector<64x64xf32>
    %23 = arith.addf %22, %1 : vector<64x64xf32>
    %24 = arith.maximumf %20, %23 : vector<64x64xf32>
    %c0_21 = arith.constant 0 : index
    %c6 = arith.constant 6 : index
    %c0_22 = arith.constant 0 : index
    %c0_23 = arith.constant 0 : index
    %25 = vector.load %arg2[%c0_21, %c6, %c0_22, %c0_23] : memref<1x20x64x64xf32, #tpu.memory_space<vmem>>, vector<1x1x64x64xf32>
    %26 = vector.shape_cast %25 : vector<1x1x64x64xf32> to vector<64x64xf32>
    %27 = arith.addf %26, %1 : vector<64x64xf32>
    %28 = arith.maximumf %24, %27 : vector<64x64xf32>
    %c0_24 = arith.constant 0 : index
    %c7 = arith.constant 7 : index
    %c0_25 = arith.constant 0 : index
    %c0_26 = arith.constant 0 : index
    %29 = vector.load %arg2[%c0_24, %c7, %c0_25, %c0_26] : memref<1x20x64x64xf32, #tpu.memory_space<vmem>>, vector<1x1x64x64xf32>
    %30 = vector.shape_cast %29 : vector<1x1x64x64xf32> to vector<64x64xf32>
    %31 = arith.addf %30, %1 : vector<64x64xf32>
    %32 = arith.maximumf %28, %31 : vector<64x64xf32>
    %c0_27 = arith.constant 0 : index
    %c8 = arith.constant 8 : index
    %c0_28 = arith.constant 0 : index
    %c0_29 = arith.constant 0 : index
    %33 = vector.load %arg2[%c0_27, %c8, %c0_28, %c0_29] : memref<1x20x64x64xf32, #tpu.memory_space<vmem>>, vector<1x1x64x64xf32>
    %34 = vector.shape_cast %33 : vector<1x1x64x64xf32> to vector<64x64xf32>
    %35 = arith.addf %34, %1 : vector<64x64xf32>
    %36 = arith.maximumf %32, %35 : vector<64x64xf32>
    %c0_30 = arith.constant 0 : index
    %c9 = arith.constant 9 : index
    %c0_31 = arith.constant 0 : index
    %c0_32 = arith.constant 0 : index
    %37 = vector.load %arg2[%c0_30, %c9, %c0_31, %c0_32] : memref<1x20x64x64xf32, #tpu.memory_space<vmem>>, vector<1x1x64x64xf32>
    %38 = vector.shape_cast %37 : vector<1x1x64x64xf32> to vector<64x64xf32>
    %39 = arith.addf %38, %1 : vector<64x64xf32>
    %40 = arith.maximumf %36, %39 : vector<64x64xf32>
    %c0_33 = arith.constant 0 : index
    %c10 = arith.constant 10 : index
    %c0_34 = arith.constant 0 : index
    %c0_35 = arith.constant 0 : index
    %41 = vector.load %arg2[%c0_33, %c10, %c0_34, %c0_35] : memref<1x20x64x64xf32, #tpu.memory_space<vmem>>, vector<1x1x64x64xf32>
    %42 = vector.shape_cast %41 : vector<1x1x64x64xf32> to vector<64x64xf32>
    %43 = arith.addf %42, %1 : vector<64x64xf32>
    %44 = arith.maximumf %40, %43 : vector<64x64xf32>
    %c0_36 = arith.constant 0 : index
    %c11 = arith.constant 11 : index
    %c0_37 = arith.constant 0 : index
    %c0_38 = arith.constant 0 : index
    %45 = vector.load %arg2[%c0_36, %c11, %c0_37, %c0_38] : memref<1x20x64x64xf32, #tpu.memory_space<vmem>>, vector<1x1x64x64xf32>
    %46 = vector.shape_cast %45 : vector<1x1x64x64xf32> to vector<64x64xf32>
    %47 = arith.addf %46, %1 : vector<64x64xf32>
    %48 = arith.maximumf %44, %47 : vector<64x64xf32>
    %c0_39 = arith.constant 0 : index
    %c12 = arith.constant 12 : index
    %c0_40 = arith.constant 0 : index
    %c0_41 = arith.constant 0 : index
    %49 = vector.load %arg2[%c0_39, %c12, %c0_40, %c0_41] : memref<1x20x64x64xf32, #tpu.memory_space<vmem>>, vector<1x1x64x64xf32>
    %50 = vector.shape_cast %49 : vector<1x1x64x64xf32> to vector<64x64xf32>
    %51 = arith.addf %50, %1 : vector<64x64xf32>
    %52 = arith.maximumf %48, %51 : vector<64x64xf32>
    %c0_42 = arith.constant 0 : index
    %c13 = arith.constant 13 : index
    %c0_43 = arith.constant 0 : index
    %c0_44 = arith.constant 0 : index
    %53 = vector.load %arg2[%c0_42, %c13, %c0_43, %c0_44] : memref<1x20x64x64xf32, #tpu.memory_space<vmem>>, vector<1x1x64x64xf32>
    %54 = vector.shape_cast %53 : vector<1x1x64x64xf32> to vector<64x64xf32>
    %55 = arith.addf %54, %1 : vector<64x64xf32>
    %56 = arith.maximumf %52, %55 : vector<64x64xf32>
    %c0_45 = arith.constant 0 : index
    %c14 = arith.constant 14 : index
    %c0_46 = arith.constant 0 : index
    %c0_47 = arith.constant 0 : index
    %57 = vector.load %arg2[%c0_45, %c14, %c0_46, %c0_47] : memref<1x20x64x64xf32, #tpu.memory_space<vmem>>, vector<1x1x64x64xf32>
    %58 = vector.shape_cast %57 : vector<1x1x64x64xf32> to vector<64x64xf32>
    %59 = arith.addf %58, %1 : vector<64x64xf32>
    %60 = arith.maximumf %56, %59 : vector<64x64xf32>
    %c0_48 = arith.constant 0 : index
    %c15 = arith.constant 15 : index
    %c0_49 = arith.constant 0 : index
    %c0_50 = arith.constant 0 : index
    %61 = vector.load %arg2[%c0_48, %c15, %c0_49, %c0_50] : memref<1x20x64x64xf32, #tpu.memory_space<vmem>>, vector<1x1x64x64xf32>
    %62 = vector.shape_cast %61 : vector<1x1x64x64xf32> to vector<64x64xf32>
    %63 = arith.addf %62, %1 : vector<64x64xf32>
    %64 = arith.maximumf %60, %63 : vector<64x64xf32>
    %c0_51 = arith.constant 0 : index
    %c16 = arith.constant 16 : index
    %c0_52 = arith.constant 0 : index
    %c0_53 = arith.constant 0 : index
    %65 = vector.load %arg2[%c0_51, %c16, %c0_52, %c0_53] : memref<1x20x64x64xf32, #tpu.memory_space<vmem>>, vector<1x1x64x64xf32>
    %66 = vector.shape_cast %65 : vector<1x1x64x64xf32> to vector<64x64xf32>
    %67 = arith.addf %66, %1 : vector<64x64xf32>
    %68 = arith.maximumf %64, %67 : vector<64x64xf32>
    %c0_54 = arith.constant 0 : index
    %c17 = arith.constant 17 : index
    %c0_55 = arith.constant 0 : index
    %c0_56 = arith.constant 0 : index
    %69 = vector.load %arg2[%c0_54, %c17, %c0_55, %c0_56] : memref<1x20x64x64xf32, #tpu.memory_space<vmem>>, vector<1x1x64x64xf32>
    %70 = vector.shape_cast %69 : vector<1x1x64x64xf32> to vector<64x64xf32>
    %71 = arith.addf %70, %1 : vector<64x64xf32>
    %72 = arith.maximumf %68, %71 : vector<64x64xf32>
    %c0_57 = arith.constant 0 : index
    %c18 = arith.constant 18 : index
    %c0_58 = arith.constant 0 : index
    %c0_59 = arith.constant 0 : index
    %73 = vector.load %arg2[%c0_57, %c18, %c0_58, %c0_59] : memref<1x20x64x64xf32, #tpu.memory_space<vmem>>, vector<1x1x64x64xf32>
    %74 = vector.shape_cast %73 : vector<1x1x64x64xf32> to vector<64x64xf32>
    %75 = arith.addf %74, %1 : vector<64x64xf32>
    %76 = arith.maximumf %72, %75 : vector<64x64xf32>
    %c0_60 = arith.constant 0 : index
    %c19 = arith.constant 19 : index
    %c0_61 = arith.constant 0 : index
    %c0_62 = arith.constant 0 : index
    %77 = vector.load %arg2[%c0_60, %c19, %c0_61, %c0_62] : memref<1x20x64x64xf32, #tpu.memory_space<vmem>>, vector<1x1x64x64xf32>
    %78 = vector.shape_cast %77 : vector<1x1x64x64xf32> to vector<64x64xf32>
    %79 = arith.addf %78, %1 : vector<64x64xf32>
    %80 = arith.maximumf %76, %79 : vector<64x64xf32>
    %cst = arith.constant 2.000000e-01 : f32
    %81 = vector.broadcast %cst : f32 to vector<64x64xf32>
    %82 = arith.mulf %81, %80 : vector<64x64xf32>
    %83 = arith.maximumf %80, %82 : vector<64x64xf32>
    %c0_63 = arith.constant 0 : index
    %c0_64 = arith.constant 0 : index
    %c0_65 = arith.constant 0 : index
    %84 = vector.load %arg4[%c0_63, %c0_64, %c0_65] : memref<1x64x64xf32, #tpu.memory_space<vmem>>, vector<1x64x64xf32>
    %85 = vector.shape_cast %84 : vector<1x64x64xf32> to vector<64x64xf32>
    %86 = vector.shape_cast %83 : vector<64x64xf32> to vector<1x64x64xf32>
    tpu.vector_store %arg4[%c0_63, %c0_64, %c0_65], %86 {strides = array<i32>} : memref<1x64x64xf32, #tpu.memory_space<vmem>>, vector<1x64x64xf32>,
    return
  }
  func.func @transform_0(%arg0: i32, %arg1: i32) -> (i32, i32, i32, i32) {
    %c0_i32 = arith.constant 0 : i32
    %c0_i32_0 = arith.constant 0 : i32
    %c0_i32_1 = arith.constant 0 : i32
    return %arg0, %c0_i32, %arg1, %c0_i32_0 : i32, i32, i32, i32
  }
  func.func @transform_1(%arg0: i32, %arg1: i32) -> (i32, i32, i32) {
    %c0_i32 = arith.constant 0 : i32
    %c0_i32_0 = arith.constant 0 : i32
    return %arg0, %arg1, %c0_i32 : i32, i32, i32
  }
  func.func @transform_2(%arg0: i32, %arg1: i32) -> (i32, i32, i32) {
    %c0_i32 = arith.constant 0 : i32
    %c0_i32_0 = arith.constant 0 : i32
    return %arg0, %arg1, %c0_i32 : i32, i32, i32
  }
}

module attributes {stable_mosaic.version = 11 : i64} {
  func.func @_conv6_head_kernel(%arg0: i32, %arg1: i32, %arg2: memref<1x64x64xf32, #tpu.memory_space<vmem>>, %arg3: memref<1x64x64xf32, #tpu.memory_space<vmem>>, %arg4: memref<1x64x64xf32, #tpu.memory_space<vmem>>, %arg5: memref<64x64xf32, #tpu.memory_space<vmem>>, %arg6: memref<64x64xf32, #tpu.memory_space<vmem>>, %arg7: memref<64x64xf32, #tpu.memory_space<vmem>>, %arg8: memref<1x64xf32, #tpu.memory_space<vmem>>, %arg9: memref<64x64xf32, #tpu.memory_space<vmem>>, %arg10: memref<1x64xf32, #tpu.memory_space<vmem>>, %arg11: memref<1x64xf32, #tpu.memory_space<vmem>>, %arg12: memref<1x64xf32, #tpu.memory_space<vmem>>, %arg13: memref<64x64xf32, #tpu.memory_space<vmem>>, %arg14: memref<1x64xf32, #tpu.memory_space<vmem>>, %arg15: memref<1x64x64xf32, #tpu.memory_space<vmem>>, %arg16: memref<1x1x64xf32, #tpu.memory_space<vmem>>, %arg17: memref<1x64xf32, #tpu.memory_space<vmem>>) attributes {dimension_semantics = [#tpu.dimension_semantics<parallel>, #tpu.dimension_semantics<arbitrary>], iteration_bounds = array<i64: 2, 1>, scalar_prefetch = 0 : i64, scratch_operands = 1 : i64, tpu.core_type = #tpu.core_type<tc>, window_params = [{transform_indices = @transform_0, window_bounds = array<i64: 1, 64, 64>}, {transform_indices = @transform_1, window_bounds = array<i64: 1, 64, 64>}, {transform_indices = @transform_2, window_bounds = array<i64: 1, 64, 64>}, {pipeline_mode = #tpu.pipeline_mode<synchronous>, transform_indices = @transform_3, window_bounds = array<i64: 64, 64>}, {pipeline_mode = #tpu.pipeline_mode<synchronous>, transform_indices = @transform_4, window_bounds = array<i64: 64, 64>}, {pipeline_mode = #tpu.pipeline_mode<synchronous>, transform_indices = @transform_5, window_bounds = array<i64: 64, 64>}, {pipeline_mode = #tpu.pipeline_mode<synchronous>, transform_indices = @transform_6, window_bounds = array<i64: 1, 64>}, {pipeline_mode = #tpu.pipeline_mode<synchronous>, transform_indices = @transform_7, window_bounds = array<i64: 64, 64>}, {pipeline_mode = #tpu.pipeline_mode<synchronous>, transform_indices = @transform_8, window_bounds = array<i64: 1, 64>}, {pipeline_mode = #tpu.pipeline_mode<synchronous>, transform_indices = @transform_9, window_bounds = array<i64: 1, 64>}, {pipeline_mode = #tpu.pipeline_mode<synchronous>, transform_indices = @transform_10, window_bounds = array<i64: 1, 64>}, {pipeline_mode = #tpu.pipeline_mode<synchronous>, transform_indices = @transform_11, window_bounds = array<i64: 64, 64>}, {pipeline_mode = #tpu.pipeline_mode<synchronous>, transform_indices = @transform_12, window_bounds = array<i64: 1, 64>}, {transform_indices = @transform_13, window_bounds = array<i64: 1, 64, 64>}, {transform_indices = @transform_14, window_bounds = array<i64: 1, 1, 64>}]} {
    %c0 = arith.constant 0 : index
    %c0_0 = arith.constant 0 : index
    %c0_1 = arith.constant 0 : index
    %0 = vector.load %arg2[%c0, %c0_0, %c0_1] : memref<1x64x64xf32, #tpu.memory_space<vmem>>, vector<1x64x64xf32>
    %1 = vector.shape_cast %0 : vector<1x64x64xf32> to vector<64x64xf32>
    %c0_2 = arith.constant 0 : index
    %c0_3 = arith.constant 0 : index
    %2 = vector.load %arg5[%c0_2, %c0_3] : memref<64x64xf32, #tpu.memory_space<vmem>>, vector<64x64xf32>
    %cst = arith.constant dense<0.000000e+00> : vector<64x64xf32>
    %3 = tpu.matmul %1, %2, %cst {dimension_numbers = #tpu.dot_dimension_numbers<[1], [0], [0], [1], [0, 0, 1, 1], [], []>} : vector<64x64xf32>, vector<64x64xf32>, vector<64x64xf32> -> vector<64x64xf32>
    %c0_4 = arith.constant 0 : index
    %c0_5 = arith.constant 0 : index
    %c0_6 = arith.constant 0 : index
    %4 = vector.load %arg3[%c0_4, %c0_5, %c0_6] : memref<1x64x64xf32, #tpu.memory_space<vmem>>, vector<1x64x64xf32>
    %5 = vector.shape_cast %4 : vector<1x64x64xf32> to vector<64x64xf32>
    %c0_7 = arith.constant 0 : index
    %c0_8 = arith.constant 0 : index
    %6 = vector.load %arg6[%c0_7, %c0_8] : memref<64x64xf32, #tpu.memory_space<vmem>>, vector<64x64xf32>
    %cst_9 = arith.constant dense<0.000000e+00> : vector<64x64xf32>
    %7 = tpu.matmul %5, %6, %cst_9 {dimension_numbers = #tpu.dot_dimension_numbers<[1], [0], [0], [1], [0, 0, 1, 1], [], []>} : vector<64x64xf32>, vector<64x64xf32>, vector<64x64xf32> -> vector<64x64xf32>
    %8 = arith.addf %3, %7 : vector<64x64xf32>
    %c0_10 = arith.constant 0 : index
    %c0_11 = arith.constant 0 : index
    %c0_12 = arith.constant 0 : index
    %9 = vector.load %arg4[%c0_10, %c0_11, %c0_12] : memref<1x64x64xf32, #tpu.memory_space<vmem>>, vector<1x64x64xf32>
    %10 = vector.shape_cast %9 : vector<1x64x64xf32> to vector<64x64xf32>
    %c0_13 = arith.constant 0 : index
    %c0_14 = arith.constant 0 : index
    %11 = vector.load %arg7[%c0_13, %c0_14] : memref<64x64xf32, #tpu.memory_space<vmem>>, vector<64x64xf32>
    %cst_15 = arith.constant dense<0.000000e+00> : vector<64x64xf32>
    %12 = tpu.matmul %10, %11, %cst_15 {dimension_numbers = #tpu.dot_dimension_numbers<[1], [0], [0], [1], [0, 0, 1, 1], [], []>} : vector<64x64xf32>, vector<64x64xf32>, vector<64x64xf32> -> vector<64x64xf32>
    %13 = arith.addf %8, %12 : vector<64x64xf32>
    %c0_16 = arith.constant 0 : index
    %c0_17 = arith.constant 0 : index
    %14 = vector.load %arg8[%c0_16, %c0_17] : memref<1x64xf32, #tpu.memory_space<vmem>>, vector<1x64xf32>
    %15 = vector.broadcast %14 : vector<1x64xf32> to vector<64x64xf32>
    %16 = arith.addf %13, %15 : vector<64x64xf32>
    %cst_18 = arith.constant 2.000000e-01 : f32
    %17 = vector.broadcast %cst_18 : f32 to vector<64x64xf32>
    %18 = arith.mulf %17, %16 : vector<64x64xf32>
    %19 = arith.maximumf %16, %18 : vector<64x64xf32>
    %c0_19 = arith.constant 0 : index
    %c0_20 = arith.constant 0 : index
    %c0_21 = arith.constant 0 : index
    %20 = vector.load %arg15[%c0_19, %c0_20, %c0_21] : memref<1x64x64xf32, #tpu.memory_space<vmem>>, vector<1x64x64xf32>
    %21 = vector.shape_cast %20 : vector<1x64x64xf32> to vector<64x64xf32>
    %22 = vector.shape_cast %19 : vector<64x64xf32> to vector<1x64x64xf32>
    tpu.vector_store %arg15[%c0_19, %c0_20, %c0_21], %22 {strides = array<i32>} : memref<1x64x64xf32, #tpu.memory_space<vmem>>, vector<1x64x64xf32>,
    %c0_i32 = arith.constant 0 : i32
    %23 = arith.cmpi eq, %arg1, %c0_i32 : i32
    %24 = arith.extui %23 : i1 to i32
    %c0_i32_22 = arith.constant 0 : i32
    %25 = arith.cmpi ne, %24, %c0_i32_22 : i32
    scf.if %25 {
      %cst_30 = arith.constant 0xFF800000 : f32
      %34 = vector.broadcast %cst_30 : f32 to vector<1x64xf32>
      %c0_31 = arith.constant 0 : index
      %c0_32 = arith.constant 0 : index
      %35 = vector.load %arg17[%c0_31, %c0_32] : memref<1x64xf32, #tpu.memory_space<vmem>>, vector<1x64xf32>
      tpu.vector_store %arg17[%c0_31, %c0_32], %34 {strides = array<i32>} : memref<1x64xf32, #tpu.memory_space<vmem>>, vector<1x64xf32>,
    } else {
    }
    %c0_23 = arith.constant 0 : index
    %c0_24 = arith.constant 0 : index
    %26 = vector.load %arg17[%c0_23, %c0_24] : memref<1x64xf32, #tpu.memory_space<vmem>>, vector<1x64xf32>
    %cst_25 = arith.constant dense<0xFF800000> : vector<64xf32>
    %27 = vector.multi_reduction <maximumf>, %19, %cst_25 [0] : vector<64x64xf32> to vector<64xf32>
    %28 = vector.shape_cast %27 : vector<64xf32> to vector<1x64xf32>
    %29 = arith.maximumf %26, %28 : vector<1x64xf32>
    %c0_26 = arith.constant 0 : index
    %c0_27 = arith.constant 0 : index
    %30 = vector.load %arg17[%c0_26, %c0_27] : memref<1x64xf32, #tpu.memory_space<vmem>>, vector<1x64xf32>
    tpu.vector_store %arg17[%c0_26, %c0_27], %29 {strides = array<i32>} : memref<1x64xf32, #tpu.memory_space<vmem>>, vector<1x64xf32>,
    %c0_i32_28 = arith.constant 0 : i32
    %31 = arith.cmpi eq, %arg1, %c0_i32_28 : i32
    %32 = arith.extui %31 : i1 to i32
    %c0_i32_29 = arith.constant 0 : i32
    %33 = arith.cmpi ne, %32, %c0_i32_29 : i32
    scf.if %33 {
      %c0_30 = arith.constant 0 : index
      %c0_31 = arith.constant 0 : index
      %34 = vector.load %arg17[%c0_30, %c0_31] : memref<1x64xf32, #tpu.memory_space<vmem>>, vector<1x64xf32>
      %c0_32 = arith.constant 0 : index
      %c0_33 = arith.constant 0 : index
      %35 = vector.load %arg9[%c0_32, %c0_33] : memref<64x64xf32, #tpu.memory_space<vmem>>, vector<64x64xf32>
      %cst_34 = arith.constant dense<0.000000e+00> : vector<1x64xf32>
      %36 = tpu.matmul %34, %35, %cst_34 {dimension_numbers = #tpu.dot_dimension_numbers<[1], [0], [0], [1], [0, 0, 1, 1], [], []>} : vector<1x64xf32>, vector<64x64xf32>, vector<1x64xf32> -> vector<1x64xf32>
      %c0_35 = arith.constant 0 : index
      %c0_36 = arith.constant 0 : index
      %37 = vector.load %arg10[%c0_35, %c0_36] : memref<1x64xf32, #tpu.memory_space<vmem>>, vector<1x64xf32>
      %38 = arith.addf %36, %37 : vector<1x64xf32>
      %c0_37 = arith.constant 0 : index
      %c0_38 = arith.constant 0 : index
      %39 = vector.load %arg11[%c0_37, %c0_38] : memref<1x64xf32, #tpu.memory_space<vmem>>, vector<1x64xf32>
      %40 = arith.mulf %38, %39 : vector<1x64xf32>
      %c0_39 = arith.constant 0 : index
      %c0_40 = arith.constant 0 : index
      %41 = vector.load %arg12[%c0_39, %c0_40] : memref<1x64xf32, #tpu.memory_space<vmem>>, vector<1x64xf32>
      %42 = arith.addf %40, %41 : vector<1x64xf32>
      %cst_41 = arith.constant 0.00999999977 : f32
      %43 = vector.broadcast %cst_41 : f32 to vector<1x64xf32>
      %44 = arith.mulf %43, %42 : vector<1x64xf32>
      %45 = arith.maximumf %42, %44 : vector<1x64xf32>
      %c0_42 = arith.constant 0 : index
      %c0_43 = arith.constant 0 : index
      %46 = vector.load %arg13[%c0_42, %c0_43] : memref<64x64xf32, #tpu.memory_space<vmem>>, vector<64x64xf32>
      %cst_44 = arith.constant dense<0.000000e+00> : vector<1x64xf32>
      %47 = tpu.matmul %45, %46, %cst_44 {dimension_numbers = #tpu.dot_dimension_numbers<[1], [0], [0], [1], [0, 0, 1, 1], [], []>} : vector<1x64xf32>, vector<64x64xf32>, vector<1x64xf32> -> vector<1x64xf32>
      %c0_45 = arith.constant 0 : index
      %c0_46 = arith.constant 0 : index
      %48 = vector.load %arg14[%c0_45, %c0_46] : memref<1x64xf32, #tpu.memory_space<vmem>>, vector<1x64xf32>
      %49 = arith.addf %47, %48 : vector<1x64xf32>
      %c0_47 = arith.constant 0 : index
      %c0_48 = arith.constant 0 : index
      %c0_49 = arith.constant 0 : index
      %50 = vector.load %arg16[%c0_47, %c0_48, %c0_49] : memref<1x1x64xf32, #tpu.memory_space<vmem>>, vector<1x1x64xf32>
      %51 = vector.shape_cast %50 : vector<1x1x64xf32> to vector<1x64xf32>
      %52 = vector.shape_cast %49 : vector<1x64xf32> to vector<1x1x64xf32>
      tpu.vector_store %arg16[%c0_47, %c0_48, %c0_49], %52 {strides = array<i32>} : memref<1x1x64xf32, #tpu.memory_space<vmem>>, vector<1x1x64xf32>,
    } else {
    }
    return
  }
  func.func @transform_0(%arg0: i32, %arg1: i32) -> (i32, i32, i32) {
    %c0_i32 = arith.constant 0 : i32
    %c0_i32_0 = arith.constant 0 : i32
    return %arg0, %arg1, %c0_i32 : i32, i32, i32
  }
  func.func @transform_1(%arg0: i32, %arg1: i32) -> (i32, i32, i32) {
    %c0_i32 = arith.constant 0 : i32
    %c0_i32_0 = arith.constant 0 : i32
    return %arg0, %arg1, %c0_i32 : i32, i32, i32
  }
  func.func @transform_2(%arg0: i32, %arg1: i32) -> (i32, i32, i32) {
    %c0_i32 = arith.constant 0 : i32
    %c0_i32_0 = arith.constant 0 : i32
    return %arg0, %arg1, %c0_i32 : i32, i32, i32
  }
  func.func @transform_3(%arg0: i32, %arg1: i32) -> (i32, i32) {
    %c0_i32 = arith.constant 0 : i32
    %c0_i32_0 = arith.constant 0 : i32
    %c0_i32_1 = arith.constant 0 : i32
    return %c0_i32, %c0_i32_0 : i32, i32
  }
  func.func @transform_4(%arg0: i32, %arg1: i32) -> (i32, i32) {
    %c0_i32 = arith.constant 0 : i32
    %c0_i32_0 = arith.constant 0 : i32
    %c0_i32_1 = arith.constant 0 : i32
    return %c0_i32, %c0_i32_0 : i32, i32
  }
  func.func @transform_5(%arg0: i32, %arg1: i32) -> (i32, i32) {
    %c0_i32 = arith.constant 0 : i32
    %c0_i32_0 = arith.constant 0 : i32
    %c0_i32_1 = arith.constant 0 : i32
    return %c0_i32, %c0_i32_0 : i32, i32
  }
  func.func @transform_6(%arg0: i32, %arg1: i32) -> (i32, i32) {
    %c0_i32 = arith.constant 0 : i32
    %c0_i32_0 = arith.constant 0 : i32
    %c0_i32_1 = arith.constant 0 : i32
    return %c0_i32, %c0_i32_0 : i32, i32
  }
  func.func @transform_7(%arg0: i32, %arg1: i32) -> (i32, i32) {
    %c0_i32 = arith.constant 0 : i32
    %c0_i32_0 = arith.constant 0 : i32
    %c0_i32_1 = arith.constant 0 : i32
    return %c0_i32, %c0_i32_0 : i32, i32
  }
  func.func @transform_8(%arg0: i32, %arg1: i32) -> (i32, i32) {
    %c0_i32 = arith.constant 0 : i32
    %c0_i32_0 = arith.constant 0 : i32
    %c0_i32_1 = arith.constant 0 : i32
    return %c0_i32, %c0_i32_0 : i32, i32
  }
  func.func @transform_9(%arg0: i32, %arg1: i32) -> (i32, i32) {
    %c0_i32 = arith.constant 0 : i32
    %c0_i32_0 = arith.constant 0 : i32
    %c0_i32_1 = arith.constant 0 : i32
    return %c0_i32, %c0_i32_0 : i32, i32
  }
  func.func @transform_10(%arg0: i32, %arg1: i32) -> (i32, i32) {
    %c0_i32 = arith.constant 0 : i32
    %c0_i32_0 = arith.constant 0 : i32
    %c0_i32_1 = arith.constant 0 : i32
    return %c0_i32, %c0_i32_0 : i32, i32
  }
  func.func @transform_11(%arg0: i32, %arg1: i32) -> (i32, i32) {
    %c0_i32 = arith.constant 0 : i32
    %c0_i32_0 = arith.constant 0 : i32
    %c0_i32_1 = arith.constant 0 : i32
    return %c0_i32, %c0_i32_0 : i32, i32
  }
  func.func @transform_12(%arg0: i32, %arg1: i32) -> (i32, i32) {
    %c0_i32 = arith.constant 0 : i32
    %c0_i32_0 = arith.constant 0 : i32
    %c0_i32_1 = arith.constant 0 : i32
    return %c0_i32, %c0_i32_0 : i32, i32
  }
  func.func @transform_13(%arg0: i32, %arg1: i32) -> (i32, i32, i32) {
    %c0_i32 = arith.constant 0 : i32
    %c0_i32_0 = arith.constant 0 : i32
    return %arg0, %arg1, %c0_i32 : i32, i32, i32
  }
  func.func @transform_14(%arg0: i32, %arg1: i32) -> (i32, i32, i32) {
    %c0_i32 = arith.constant 0 : i32
    %c0_i32_0 = arith.constant 0 : i32
    %c0_i32_1 = arith.constant 0 : i32
    return %arg0, %c0_i32, %c0_i32_0 : i32, i32, i32
  }
}

</mosaic_0001>

<bundles_post_ra>
// kernel: dgcnn_forward.9
= control target key start
LH: loop header
LB: loop body
LE: loop exit
PB: predicated region body
PF: predicated region fallthrough
CT: control target
= control target key end

     0   :  { %s777_s9 = smov 0   ;;  %s779_s10 = smov 0   ;;  %s908_s0 = inlined_call_operand.vmem [shape: f32[2,64,3], index: 0, kind: input, shape index: {}, may-alias: {0,1}]   ;;  %s909_s1 = inlined_call_operand.vmem [shape: f32[2,64,3], index: 1, kind: input, shape index: {}, may-alias: {0,1}]   ;;  %s910_s2 = inlined_call_operand.vmem [shape: f32[2,64,64], index: 2, kind: output, shape index: {}]  }
   0x1   :  { %s781_s11 = smov 0  }
   0x2 LB: > { %s24_s12 = sadd.s32 1, %s756_s10  ;;  %p609_p0 = scmp.ge.s32.totalorder %s760_s11, 1  ;;  %s760_s11 = sphi %s781_s11, %s12_s11   ;;  %s756_s10 = sphi %s779_s10, %s914_s10   ;;  %s752_s9 = sphi %s777_s9, %s913_s9  }
   0x3   : > { %p26_p1 = scmp.ge.s32.totalorder %s24_s12, 2  ;;  %p143_p2 = scmp.lt.s32.totalorder %s760_s11, 3 }
   0x5   : > { %s916_s12 = smov (%p26_p1, %s24_s12), 0  ;;  %p144_p3 = pnand %p609_p0, %p143_p2 }
   0x6   : > { %p179_p4 = scmp.lt.s32.totalorder (!%p144_p3), %s752_s9, 1  ;;  %vm219_vm0 = vcmask (!%p144_p3), 23552   ;;  %vm497_vm2 = vcmask (!%p144_p3), 523264  }
   0x7   : > { %147 = sbr.rel (%p144_p3) target bundleno = 300 (0x12c), region = 28  ;;  %vm805_vm1 = vmpackc.low (!%p144_p3), %vm219_vm0, %vm219_vm0 }
   0xe   : > { %s918_s9 = smov (!%p179_p4, %s752_s9), 1 }
   0xf   : > { %s795_s13 = sshll.u32 %s918_s9, 6 }
  0x10   : > { %s801_s16 = scalar_lea.vmem %s909_s1, %s795_s13  ;;  %s817_s19 = scalar_lea.vmem %s908_s0, %s795_s13 }
  0x11   : > { %v211_v1 = vld [vmem:[%s801_s16] sm:$0xff]  ;;  %v212_v2 = vld [vmem:[%s801_s16 + $0x8] sm:$0xff]  ;;  %v213_v3 = vld [vmem:[%s801_s16 + $0x10] sm:$0xff]  ;;  %s201_s22 = scalar_lea.vmem %s910_s2, %s795_s13 }
  0x12   : > { %v681_v4 = vpack.c.bf16 %v212_v2, %v211_v1  ;;  %v405_v5 = vmul.f32 %v211_v1, %v211_v1  ;;  %v406_v6 = vmul.f32 %v212_v2, %v212_v2  ;;  %v214_v7 = vld [vmem:[%s801_s16 + $0x18] sm:$0xff]  ;;  %v407_v8 = vmul.f32 %v213_v3, %v213_v3  ;;  %v215_v10 = vld [vmem:[%s801_s16 + $0x20] sm:$0xff]  ;;  %v216_v18 = vld [vmem:[%s801_s16 + $0x28] sm:$0xff] }
  0x13   : > { %v687_v9 = vpack.c.bf16 %v214_v7, %v213_v3  ;;  %v408_v13 = vmul.f32 %v214_v7, %v214_v7  ;;  %v203_v14 = vld [vmem:[%s817_s19] sm:$0xff]  ;;  %v409_v17 = vmul.f32 %v215_v10, %v215_v10  ;;  %v217_v19 = vld [vmem:[%s801_s16 + $0x30] sm:$0xff]  ;;  %v410_v21 = vmul.f32 %v216_v18, %v216_v18  ;;  %v218_v25 = vld [vmem:[%s801_s16 + $0x38] sm:$0xff] }
  0x14   : > { %683 = vmatprep.subr.msk.bf16.mxu0 %vm805_vm1, %v681_v4  ;;  %705 = vmatprep.subr.msk.bf16.mxu1 %vm805_vm1, %v681_v4  ;;  %v413_v11 = vsel %vm219_vm0, %v405_v5, 0.0  ;;  %v419_v12 = vsel %vm219_vm0, %v407_v8, 0.0  ;;  %v207_v15 = vld [vmem:[%s817_s19 + $0x20] sm:$0xff]  ;;  %v416_v16 = vsel %vm219_vm0, %v406_v6, 0.0  ;;  %v693_v22 = vpack.c.bf16 %v216_v18, %v215_v10  ;;  %v204_v30 = vld [vmem:[%s817_s19 + $0x8] sm:$0xff]  ;;  %v205_v33 = vld [vmem:[%s817_s19 + $0x10] sm:$0xff] }
  0x15   : > { %414 = vadd.xlane.f32.xlu0 %v413_v11  ;;  %686 = vmatpush3.bf16.xpose.msk.msra.mxu0 %vm805_vm1, %v681_v4  ;;  %v422_v20 = vsel %vm219_vm0, %v408_v13, 0.0  ;;  %v425_v23 = vsel %vm219_vm0, %v409_v17, 0.0  ;;  %v411_v24 = vmul.f32 %v217_v19, %v217_v19  ;;  %v428_v26 = vsel %vm219_vm0, %v410_v21, 0.0  ;;  %v206_v37 = vld [vmem:[%s817_s19 + $0x18] sm:$0xff]  ;;  %v208_v42 = vld [vmem:[%s817_s19 + $0x28] sm:$0xff]  ;;  %v209_v45 = vld [vmem:[%s817_s19 + $0x30] sm:$0xff] }
  0x16   : > { %709 = vmatpush3.bf16.xpose.msk.msra.mxu1 %vm805_vm1, %v681_v4  ;;  %689 = vmatprep.subr.msk.bf16.mxu0 %vm805_vm1, %v687_v9  ;;  %v412_v27 = vmul.f32 %v218_v25, %v218_v25  ;;  %v373_v29 = vmul.f32 %v203_v14, %v203_v14  ;;  %v374_v32 = vmul.f32 %v204_v30, %v204_v30  ;;  %v210_v48 = vld [vmem:[%s817_s19 + $0x38] sm:$0xff] }
  0x17   : > { %706 = vmatprep.subr.msk.bf16.mxu1 %vm805_vm1, %v687_v9  ;;  %420 = vadd.xlane.f32.xlu1 %v419_v12  ;;  %v431_v28 = vsel %vm219_vm0, %v411_v24, 0.0  ;;  %v699_v34 = vpack.c.bf16 %v218_v25, %v217_v19  ;;  %v375_v36 = vmul.f32 %v205_v33, %v205_v33  ;;  %v376_v39 = vmul.f32 %v206_v37, %v206_v37 }
  0x18   : > { %669 = vmatprep.mubr.msk.f32.mxu0 %vm219_vm0, %v203_v14  ;;  %675 = vmatprep.mubr.msk.f32.mxu1 %vm219_vm0, %v207_v15  ;;  %v434_v31 = vsel %vm219_vm0, %v412_v27, 0.0  ;;  %v381_v35 = vsel %vm219_vm0, %v373_v29, 0.0  ;;  %v384_v38 = vsel %vm219_vm0, %v374_v32, 0.0  ;;  %v377_v40 = vmul.f32 %v207_v15, %v207_v15 }
  0x19   : > { %417 = vadd.xlane.f32.xlu0 %v416_v16  ;;  %v387_v41 = vsel %vm219_vm0, %v375_v36, 0.0  ;;  %v390_v43 = vsel %vm219_vm0, %v376_v39, 0.0  ;;  %v378_v44 = vmul.f32 %v208_v42, %v208_v42  ;;  %v379_v47 = vmul.f32 %v209_v45, %v209_v45 }
  0x1a   : > { %v393_v46 = vsel %vm219_vm0, %v377_v40, 0.0  ;;  %v380_v50 = vmul.f32 %v210_v48, %v210_v48 }
  0x1b   : > { %423 = vadd.xlane.f32.xlu1 %v422_v20  ;;  %v396_v49 = vsel %vm219_vm0, %v378_v44, 0.0  ;;  %v399_v51 = vsel %vm219_vm0, %v379_v47, 0.0 }
  0x1c   : > { %v402_v52 = vsel %vm219_vm0, %v380_v50, 0.0 }
  0x1d   : > { %692 = vmatpush3.bf16.xpose.msk.msra.mxu0 %vm805_vm1, %v687_v9  ;;  %426 = vadd.xlane.f32.xlu0 %v425_v23 }
  0x1e   : > { %710 = vmatpush3.bf16.xpose.msk.msra.mxu1 %vm805_vm1, %v687_v9  ;;  %695 = vmatprep.subr.msk.bf16.mxu0 %vm805_vm1, %v693_v22  ;;  %v485_v9 = vlaneseq }
  0x1f   : > { %707 = vmatprep.subr.msk.bf16.mxu1 %vm805_vm1, %v693_v22  ;;  %429 = vadd.xlane.f32.xlu1 %v428_v26 }
  0x20   : > { %v486_v12 = vshrl.u32 %v485_v9, 7 }
  0x21   : > { %432 = vadd.xlane.f32.xlu0 %v431_v28 }
  0x22   : > { %v487_v20 = vsub.s32 0, %v486_v12 }
  0x23   : > { %435 = vadd.xlane.f32.xlu1 %v434_v31 }
  0x25   : > { %698 = vmatpush3.bf16.xpose.msk.msra.mxu0 %vm805_vm1, %v693_v22  ;;  %382 = vadd.xlane.f32.xlu0 %v381_v35 }
  0x26   : > { %711 = vmatpush3.bf16.xpose.msk.msra.mxu1 %vm805_vm1, %v693_v22  ;;  %701 = vmatprep.subr.msk.bf16.mxu0 %vm805_vm1, %v699_v34 }
  0x27   : > { %708 = vmatprep.subr.msk.bf16.mxu1 %vm805_vm1, %v699_v34  ;;  %385 = vadd.xlane.f32.xlu1 %v384_v38 }
  0x29   : > { %388 = vadd.xlane.f32.xlu0 %v387_v41 }
  0x2b   : > { %391 = vadd.xlane.f32.xlu1 %v390_v43 }
  0x2d   : > { %704 = vmatpush3.bf16.xpose.msk.msra.mxu0 %vm805_vm1, %v699_v34  ;;  %394 = vadd.xlane.f32.xlu0 %v393_v46 }
  0x2e   : > { %712 = vmatpush3.bf16.xpose.msk.msra.mxu1 %vm805_vm1, %v699_v34 }
  0x2f   : > { %397 = vadd.xlane.f32.xlu1 %v396_v49 }
  0x31   : > { %400 = vadd.xlane.f32.xlu0 %v399_v51 }
  0x33   : > { %403 = vadd.xlane.f32.xlu1 %v402_v52 }
  0x34   : > { %670 = vmatmul.mubr.msk.f32.vlgmr.msra.gmra.mrb[0].mxu0 %vm219_vm0, %v204_v30 }
  0x35   : > { %676 = vmatmul.mubr.msk.f32.vlgmr.msra.gmra.mrb[0].mxu1 %vm219_vm0, %v208_v42  ;;  %672 = vmatprep.mubr.msk.f32.mxu0 %vm219_vm0, %v205_v33 }
  0x36   : > { %678 = vmatprep.mubr.msk.f32.mxu1 %vm219_vm0, %v209_v45 }
  0x38   : > { %673 = vmatmul.mubr.msk.f32.gmra.mrb[2].mxu0 %vm219_vm0, %v206_v37 }
  0x39   : > { %679 = vmatmul.mubr.msk.f32.gmra.mrb[2].mxu1 %vm219_vm0, %v210_v48 }
  0xa2   : > { %v415_v53 = vpop.xlane.xlu0 %414 }
  0xa3   : > { %453 = vxpose.xlu0.b32.start [1/8] (short) (narrow) %v415_v53, 8 }
  0xa4   : > { %v421_v55 = vpop.xlane.xlu1 %420 }
  0xa6   : > { %v418_v54 = vpop.xlane.xlu0 %417 }
  0xa7   : > { %454 = vxpose.xlu0.b32.cont [2/8] (short) (narrow) %v418_v54, 8 }
  0xa8   : > { %v424_v56 = vpop.xlane.xlu1 %423 }
  0xaa   : > { %v427_v57 = vpop.xlane.xlu0 %426 }
  0xab   : > { %455 = vxpose.xlu0.b32.cont [3/8] (short) (narrow) %v421_v55, 8 }
  0xac   : > { %v430_v58 = vpop.xlane.xlu1 %429 }
  0xae   : > { %v433_v59 = vpop.xlane.xlu0 %432 }
  0xaf   : > { %456 = vxpose.xlu0.b32.cont [4/8] (short) (narrow) %v424_v56, 8 }
  0xb0   : > { %v436_v60 = vpop.xlane.xlu1 %435 }
  0xb2   : > { %v383_v4 = vpop.xlane.xlu0 %382 }
  0xb3   : > { %457 = vxpose.xlu0.b32.cont [5/8] (short) (narrow) %v427_v57, 8 }
  0xb4   : > { %v386_v6 = vpop.xlane.xlu1 %385 }
  0xb6   : > { %v389_v7 = vpop.xlane.xlu0 %388 }
  0xb7   : > { %458 = vxpose.xlu0.b32.cont [6/8] (short) (narrow) %v430_v58, 8 }
  0xb8   : > { %v392_v8 = vpop.xlane.xlu1 %391 }
  0xba   : > { %v395_v10 = vpop.xlane.xlu0 %394 }
  0xbb   : > { %459 = vxpose.xlu0.b32.cont [7/8] (short) (narrow) %v433_v59, 8 }
  0xbc   : > { %v398_v11 = vpop.xlane.xlu1 %397 }
  0xbe   : > { %v401_v13 = vpop.xlane.xlu0 %400 }
  0xbf   : > { %460 = vxpose.xlu0.b32.end [8/8] (short) (narrow) %v436_v60, 8 }
  0xc0   : > { %v404_v19 = vpop.xlane.xlu1 %403 }
 0x107   : > { %v671_v61 = vpop.f32.mrb[0].mxu0 }
 0x108   : > { %v677_v62 = vpop.f32.mrb[0].mxu1  ;;  %v334_v63 = vpop.f32.mrb[1].mxu0  ;;  %v438_v14 = vmul.f32 2.0, %v671_v61 }
 0x109   : > { %v354_v0 = vpop.f32.mrb[1].mxu1  ;;  %v437_v16 = vmul.f32 2.0, %v334_v63  ;;  %v442_v21 = vmul.f32 2.0, %v677_v62 }
 0x10a   : > { %v441_v22 = vmul.f32 2.0, %v354_v0  ;;  %v446_v24 = vsub.f32 %v438_v14, %v386_v6 }
 0x10b   : > { %v674_v1 = vpop.f32.mrb[2].mxu0  ;;  %v445_v27 = vsub.f32 %v437_v16, %v383_v4  ;;  %v450_v33 = vsub.f32 %v442_v21, %v398_v11 }
 0x10c   : > { %v680_v2 = vpop.f32.mrb[2].mxu1  ;;  %v344_v3 = vpop.f32.mrb[3].mxu0  ;;  %v440_v17 = vmul.f32 2.0, %v674_v1  ;;  %v449_v31 = vsub.f32 %v441_v22, %v395_v10 }
 0x10d   : > { %v364_v5 = vpop.f32.mrb[3].mxu1  ;;  %v444_v15 = vmul.f32 2.0, %v680_v2  ;;  %v439_v18 = vmul.f32 2.0, %v344_v3 }
 0x10e   : > { %v443_v23 = vmul.f32 2.0, %v364_v5  ;;  %v448_v29 = vsub.f32 %v440_v17, %v392_v8 }
 0x10f   : > { %v452_v25 = vsub.f32 %v444_v15, %v404_v19  ;;  %v447_v28 = vsub.f32 %v439_v18, %v389_v7 }
 0x110   : > { %v451_v32 = vsub.f32 %v443_v23, %v401_v13 }
 0x123   : > { %v469_v26 = vpop.trf.xlu0 }
 0x124   : > { %v488_v30 = vrot.slane %v469_v26, %v487_v20 }
 0x126   : > { %v489_v34 = vsub.f32 %v445_v27, %v488_v30  ;;  %v490_v35 = vsub.f32 %v446_v24, %v488_v30  ;;  %v491_v36 = vsub.f32 %v447_v28, %v488_v30  ;;  %v492_v37 = vsub.f32 %v448_v29, %v488_v30 }
 0x127   : > { %v493_v38 = vsub.f32 %v449_v31, %v488_v30  ;;  %v494_v39 = vsub.f32 %v450_v33, %v488_v30  ;;  %v495_v40 = vsub.f32 %v451_v32, %v488_v30  ;;  %v496_v41 = vsub.f32 %v452_v25, %v488_v30 }
 0x128   : > { %498 = vst.msk [vmem:[%s201_s22] sm:$0xff] %vm497_vm2, %v489_v34  ;;  %499 = vst.msk [vmem:[%s201_s22 + $0x8] sm:$0xff] %vm497_vm2, %v490_v35 }
 0x129   : > { %500 = vst.msk [vmem:[%s201_s22 + $0x10] sm:$0xff] %vm497_vm2, %v491_v36  ;;  %501 = vst.msk [vmem:[%s201_s22 + $0x18] sm:$0xff] %vm497_vm2, %v492_v37 }
 0x12a   : > { %502 = vst.msk [vmem:[%s201_s22 + $0x20] sm:$0xff] %vm497_vm2, %v493_v38  ;;  %503 = vst.msk [vmem:[%s201_s22 + $0x28] sm:$0xff] %vm497_vm2, %v494_v39 }
 0x12b   : > { %504 = vst.msk [vmem:[%s201_s22 + $0x30] sm:$0xff] %vm497_vm2, %v495_v40  ;;  %505 = vst.msk [vmem:[%s201_s22 + $0x38] sm:$0xff] %vm497_vm2, %v496_v41 }
 0x12c PF: > { %s12_s11 = sadd.s32 1, %s760_s11   ;;  %s913_s9 = smov %s756_s10 }
 0x12d   : > { %p9_p5 = scmp.ge.s32.totalorder %s12_s11, 4   ;;  %s914_s10 = smov %s916_s12 }
 0x12f   :  { %11 = sbr.rel (!%p9_p5) target bundleno = 2 (0x2), region = 61 }

// kernel: sub.4
= control target key start
LH: loop header
LB: loop body
LE: loop exit
PB: predicated region body
PF: predicated region fallthrough
CT: control target
= control target key end

     0   :  { %s188_s0 = inlined_call_operand.vmem [shape: f32[64,64], index: 0, kind: input, shape index: {}]   ;;  %s189_s1 = inlined_call_operand.vmem [shape: f32[64,64], index: 1, kind: input, shape index: {}]   ;;  %s190_s2 = inlined_call_operand.vmem [shape: f32[64,64], index: 2, kind: output, shape index: {}]  }
   0x1   :  { %v3_v0 = vld [vmem:[%s188_s0] sm:$0xff]  ;;  %v80_v2 = vld [vmem:[%s188_s0 + $0x8] sm:$0xff]  ;;  %v83_v5 = vld [vmem:[%s188_s0 + $0x10] sm:$0xff] }
   0x2   :  { %v4_v1 = vld [vmem:[%s189_s1] sm:$0xff]  ;;  %v81_v4 = vld [vmem:[%s189_s1 + $0x8] sm:$0xff]  ;;  %v84_v6 = vld [vmem:[%s189_s1 + $0x10] sm:$0xff] }
   0x3   :  { %v7_v3 = vsub.f32 %v3_v0, %v4_v1  ;;  %v16_v7 = vsub.f32 %v80_v2, %v81_v4  ;;  %v26_v8 = vsub.f32 %v83_v5, %v84_v6  ;;  %v86_v9 = vld [vmem:[%s188_s0 + $0x18] sm:$0xff]  ;;  %v89_v11 = vld [vmem:[%s188_s0 + $0x20] sm:$0xff]  ;;  %v92_v14 = vld [vmem:[%s188_s0 + $0x28] sm:$0xff] }
   0x4   :  { %v87_v10 = vld [vmem:[%s189_s1 + $0x18] sm:$0xff]  ;;  %v90_v13 = vld [vmem:[%s189_s1 + $0x20] sm:$0xff]  ;;  %v93_v15 = vld [vmem:[%s189_s1 + $0x28] sm:$0xff] }
   0x5   :  { %9 = vst [vmem:[%s190_s2] sm:$0xff] %v7_v3  ;;  %v36_v12 = vsub.f32 %v86_v9, %v87_v10  ;;  %82 = vst [vmem:[%s190_s2 + $0x8] sm:$0xff] %v16_v7  ;;  %v46_v16 = vsub.f32 %v89_v11, %v90_v13  ;;  %v56_v17 = vsub.f32 %v92_v14, %v93_v15  ;;  %v95_v18 = vld [vmem:[%s188_s0 + $0x30] sm:$0xff]  ;;  %v98_v20 = vld [vmem:[%s188_s0 + $0x38] sm:$0xff] }
   0x6   :  { %85 = vst [vmem:[%s190_s2 + $0x10] sm:$0xff] %v26_v8  ;;  %v96_v19 = vld [vmem:[%s189_s1 + $0x30] sm:$0xff]  ;;  %v99_v22 = vld [vmem:[%s189_s1 + $0x38] sm:$0xff] }
   0x7   :  { %88 = vst [vmem:[%s190_s2 + $0x18] sm:$0xff] %v36_v12  ;;  %v66_v21 = vsub.f32 %v95_v18, %v96_v19  ;;  %91 = vst [vmem:[%s190_s2 + $0x20] sm:$0xff] %v46_v16  ;;  %v76_v23 = vsub.f32 %v98_v20, %v99_v22 }
   0x8   :  { %94 = vst [vmem:[%s190_s2 + $0x28] sm:$0xff] %v56_v17 }
   0x9   :  { %97 = vst [vmem:[%s190_s2 + $0x30] sm:$0xff] %v66_v21  ;;  %100 = vst [vmem:[%s190_s2 + $0x38] sm:$0xff] %v76_v23 }

// kernel: dgcnn_forward.12
= control target key start
LH: loop header
LB: loop body
LE: loop exit
PB: predicated region body
PF: predicated region fallthrough
CT: control target
= control target key end

     0   :  { %s938_s18 = smov 0   ;;  %s940_s19 = smov 0   ;;  %s1092_s0 = inlined_call_operand.vmem [shape: f32[2,64,64], index: 0, kind: input, shape index: {}]   ;;  %s1093_s1 = inlined_call_operand.vmem [shape: f32[64,64], index: 1, kind: input, shape index: {}]   ;;  %s1094_s2 = inlined_call_operand.vmem [shape: f32[64,64], index: 2, kind: input, shape index: {}]   ;;  %s1095_s3 = inlined_call_operand.vmem [shape: f32[1,64], index: 3, kind: input, shape index: {}]   ;;  %s1096_s4 = inlined_call_operand.vmem [shape: f32[2,64,64], index: 4, kind: output, shape index: {0}]   ;;  %s1097_s5 = inlined_call_operand.vmem [shape: f32[2,64,64], index: 5, kind: output, shape index: {1}]  }
   0x1   :  { %s942_s20 = smov 0  }
   0x2 LB: > { %s28_s21 = sadd.s32 1, %s902_s19  ;;  %p711_p0 = scmp.ge.s32.totalorder %s906_s20, 1  ;;  %s906_s20 = sphi %s942_s20, %s16_s20   ;;  %s902_s19 = sphi %s940_s19, %s1099_s19   ;;  %s898_s18 = sphi %s938_s18, %s1098_s18  }
   0x3   : > { %p30_p1 = scmp.ge.s32.totalorder %s28_s21, 2  ;;  %p213_p2 = scmp.lt.s32.totalorder %s906_s20, 3 }
   0x5   : > { %s1101_s21 = smov (%p30_p1, %s28_s21), 0  ;;  %p214_p3 = pnand %p711_p0, %p213_p2 }
   0x6   : > { %v442_v0 = vld [vmem:[%s1094_s2] sm:$0xff] (!%p214_p3)  ;;  %v443_v1 = vld [vmem:[%s1094_s2 + $0x8] sm:$0xff] (!%p214_p3)  ;;  %p259_p4 = scmp.lt.s32.totalorder (!%p214_p3), %s898_s18, 1  ;;  %v444_v5 = vld [vmem:[%s1094_s2 + $0x10] sm:$0xff] (!%p214_p3)  ;;  %vm304_vm0 = vcmask (!%p214_p3), 523264  }
   0x7   : > { %217 = sbr.rel (%p214_p3) target bundleno = 254 (0xfe), region = 36  ;;  %v296_v2 = vld [vmem:[%s1093_s1] sm:$0xff] (!%p214_p3)  ;;  %v844_v3 = vpack.c.bf16 (!%p214_p3), %v443_v1, %v442_v0  ;;  %v297_v4 = vld [vmem:[%s1093_s1 + $0x8] sm:$0xff] (!%p214_p3)  ;;  %v445_v6 = vld [vmem:[%s1094_s2 + $0x18] sm:$0xff] (!%p214_p3) }
   0x8   : > { %v828_v7 = vpack.c.bf16 (!%p214_p3), %v297_v4, %v296_v2  ;;  %v848_v8 = vpack.c.bf16 (!%p214_p3), %v445_v6, %v444_v5  ;;  %v298_v9 = vld [vmem:[%s1093_s1 + $0x10] sm:$0xff] (!%p214_p3)  ;;  %v299_v10 = vld [vmem:[%s1093_s1 + $0x18] sm:$0xff] (!%p214_p3)  ;;  %v446_v11 = vld [vmem:[%s1094_s2 + $0x20] sm:$0xff] (!%p214_p3) }
   0x9   : > { %845 = vmatprep.subr.bf16.mxu1 (!%p214_p3), %v844_v3  ;;  %v832_v12 = vpack.c.bf16 (!%p214_p3), %v299_v10, %v298_v9  ;;  %v447_v13 = vld [vmem:[%s1094_s2 + $0x28] sm:$0xff] (!%p214_p3)  ;;  %v300_v14 = vld [vmem:[%s1093_s1 + $0x20] sm:$0xff] (!%p214_p3)  ;;  %v448_v18 = vld [vmem:[%s1094_s2 + $0x30] sm:$0xff] (!%p214_p3) }
   0xa   : > { %v301_v15 = vld [vmem:[%s1093_s1 + $0x28] sm:$0xff] (!%p214_p3)  ;;  %829 = vmatprep.subr.bf16.mxu0 (!%p214_p3), %v828_v7  ;;  %847 = vmatpush3.bf16.msra.mxu1 (!%p214_p3), %v844_v3  ;;  %v852_v16 = vpack.c.bf16 (!%p214_p3), %v447_v13, %v446_v11  ;;  %v449_v19 = vld [vmem:[%s1094_s2 + $0x38] sm:$0xff] (!%p214_p3)  ;;  %v302_v21 = vld [vmem:[%s1093_s1 + $0x30] sm:$0xff] (!%p214_p3) }
   0xb   : > { %831 = vmatpush3.bf16.msra.mxu0 (!%p214_p3), %v828_v7  ;;  %849 = vmatprep.subr.bf16.mxu1 (!%p214_p3), %v848_v8  ;;  %v836_v17 = vpack.c.bf16 (!%p214_p3), %v301_v15, %v300_v14  ;;  %v303_v22 = vld [vmem:[%s1093_s1 + $0x38] sm:$0xff] (!%p214_p3)  ;;  %v856_v23 = vpack.c.bf16 (!%p214_p3), %v449_v19, %v448_v18  ;;  %v726_v32 = vld [vmem:[%s1095_s3] ss:$0 sm:$0xff] (!%p214_p3) }
   0xc   : > { %833 = vmatprep.subr.bf16.mxu0 (!%p214_p3), %v832_v12  ;;  %v840_v24 = vpack.c.bf16 (!%p214_p3), %v303_v22, %v302_v21 }
   0xe   : > { %s1103_s18 = smov (!%p259_p4, %s898_s18), 1  ;;  %851 = vmatpush3.bf16.msra.mxu1 %v848_v8 }
   0xf   : > { %s992_s25 = sshll.u32 %s1103_s18, 6  ;;  %835 = vmatpush3.bf16.msra.mxu0 %v832_v12  ;;  %853 = vmatprep.subr.bf16.mxu1 %v852_v16 }
  0x10   : > { %s998_s28 = scalar_lea.vmem %s1092_s0, %s992_s25  ;;  %837 = vmatprep.subr.bf16.mxu0 %v836_v17  ;;  %s1043_s15 = scalar_lea.vmem %s1096_s4, %s992_s25 }
  0x11   : > { %v288_v20 = vld [vmem:[%s998_s28] sm:$0xff]  ;;  %v289_v25 = vld [vmem:[%s998_s28 + $0x8] sm:$0xff]  ;;  %v290_v26 = vld [vmem:[%s998_s28 + $0x10] sm:$0xff]  ;;  %s1049_s22 = scalar_lea.vmem %s1097_s5, %s992_s25 }
  0x12   : > { %816 = vmatprep.mubr.msk.f32.mxu1 %vm304_vm0, %v288_v20  ;;  %788 = vmatprep.mubr.msk.f32.mxu0 %vm304_vm0, %v288_v20  ;;  %v291_v27 = vld [vmem:[%s998_s28 + $0x18] sm:$0xff]  ;;  %v292_v28 = vld [vmem:[%s998_s28 + $0x20] sm:$0xff]  ;;  %v293_v29 = vld [vmem:[%s998_s28 + $0x28] sm:$0xff] }
  0x13   : > { %855 = vmatpush3.bf16.msra.mxu1 %v852_v16  ;;  %839 = vmatpush3.bf16.msra.mxu0 %v836_v17  ;;  %v294_v30 = vld [vmem:[%s998_s28 + $0x30] sm:$0xff]  ;;  %v295_v31 = vld [vmem:[%s998_s28 + $0x38] sm:$0xff] }
  0x14   : > { %857 = vmatprep.subr.bf16.mxu1 %v856_v23  ;;  %841 = vmatprep.subr.bf16.mxu0 %v840_v24 }
  0x17   : > { %859 = vmatpush3.bf16.msra.mxu1 %v856_v23  ;;  %843 = vmatpush3.bf16.msra.mxu0 %v840_v24 }
  0x1a   : > { %817 = vmatmul.mubr.msk.f32.vlgmr.msra.gmra.mrb[0].mxu1 %vm304_vm0, %v289_v25  ;;  %789 = vmatmul.mubr.msk.f32.vlgmr.msra.gmra.mrb[0].mxu0 %vm304_vm0, %v289_v25 }
  0x1b   : > { %819 = vmatprep.mubr.msk.f32.mxu1 %vm304_vm0, %v290_v26  ;;  %791 = vmatprep.mubr.msk.f32.mxu0 %vm304_vm0, %v290_v26 }
  0x1e   : > { %820 = vmatmul.mubr.msk.f32.gmra.mrb[2].mxu1 %vm304_vm0, %v291_v27  ;;  %792 = vmatmul.mubr.msk.f32.gmra.mrb[2].mxu0 %vm304_vm0, %v291_v27 }
  0x1f   : > { %822 = vmatprep.mubr.msk.f32.mxu1 %vm304_vm0, %v292_v28  ;;  %794 = vmatprep.mubr.msk.f32.mxu0 %vm304_vm0, %v292_v28 }
  0x22   : > { %823 = vmatmul.mubr.msk.f32.gmra.mrb[4].mxu1 %vm304_vm0, %v293_v29  ;;  %795 = vmatmul.mubr.msk.f32.gmra.mrb[4].mxu0 %vm304_vm0, %v293_v29 }
  0x23   : > { %825 = vmatprep.mubr.msk.f32.mxu1 %vm304_vm0, %v294_v30  ;;  %797 = vmatprep.mubr.msk.f32.mxu0 %vm304_vm0, %v294_v30 }
  0x26   : > { %826 = vmatmul.mubr.msk.f32.gmra.mrb[6].mxu1 %vm304_vm0, %v295_v31  ;;  %798 = vmatmul.mubr.msk.f32.gmra.mrb[6].mxu0 %vm304_vm0, %v295_v31 }
  0xed   : > { %v818_v33 = vpop.f32.mrb[0].mxu1  ;;  %v790_v35 = vpop.f32.mrb[0].mxu0 }
  0xee   : > { %v529_v34 = vadd.f32 %v818_v33, %v726_v32  ;;  %v523_v36 = vpop.f32.mrb[1].mxu1  ;;  %435 = vst.msk [vmem:[%s1043_s15 + $0x8] sm:$0xff] %vm304_vm0, %v790_v35  ;;  %v395_v38 = vpop.f32.mrb[1].mxu0 }
  0xef   : > { %v524_v37 = vadd.f32 %v726_v32, %v523_v36  ;;  %434 = vst.msk [vmem:[%s1043_s15] sm:$0xff] %vm304_vm0, %v395_v38 }
  0xf0   : > { %563 = vst.msk [vmem:[%s1049_s22 + $0x8] sm:$0xff] %vm304_vm0, %v529_v34 }
  0xf1   : > { %562 = vst.msk [vmem:[%s1049_s22] sm:$0xff] %vm304_vm0, %v524_v37  ;;  %v821_v39 = vpop.f32.mrb[2].mxu1  ;;  %v793_v41 = vpop.f32.mrb[2].mxu0 }
  0xf2   : > { %v539_v40 = vadd.f32 %v821_v39, %v726_v32  ;;  %v533_v42 = vpop.f32.mrb[3].mxu1  ;;  %437 = vst.msk [vmem:[%s1043_s15 + $0x18] sm:$0xff] %vm304_vm0, %v793_v41  ;;  %v405_v44 = vpop.f32.mrb[3].mxu0 }
  0xf3   : > { %v534_v43 = vadd.f32 %v726_v32, %v533_v42  ;;  %436 = vst.msk [vmem:[%s1043_s15 + $0x10] sm:$0xff] %vm304_vm0, %v405_v44 }
  0xf4   : > { %565 = vst.msk [vmem:[%s1049_s22 + $0x18] sm:$0xff] %vm304_vm0, %v539_v40 }
  0xf5   : > { %564 = vst.msk [vmem:[%s1049_s22 + $0x10] sm:$0xff] %vm304_vm0, %v534_v43  ;;  %v824_v45 = vpop.f32.mrb[4].mxu1  ;;  %v796_v47 = vpop.f32.mrb[4].mxu0 }
  0xf6   : > { %v549_v46 = vadd.f32 %v824_v45, %v726_v32  ;;  %v543_v48 = vpop.f32.mrb[5].mxu1  ;;  %439 = vst.msk [vmem:[%s1043_s15 + $0x28] sm:$0xff] %vm304_vm0, %v796_v47  ;;  %v415_v50 = vpop.f32.mrb[5].mxu0 }
  0xf7   : > { %v544_v49 = vadd.f32 %v726_v32, %v543_v48  ;;  %438 = vst.msk [vmem:[%s1043_s15 + $0x20] sm:$0xff] %vm304_vm0, %v415_v50 }
  0xf8   : > { %567 = vst.msk [vmem:[%s1049_s22 + $0x28] sm:$0xff] %vm304_vm0, %v549_v46 }
  0xf9   : > { %566 = vst.msk [vmem:[%s1049_s22 + $0x20] sm:$0xff] %vm304_vm0, %v544_v49  ;;  %v827_v51 = vpop.f32.mrb[6].mxu1  ;;  %v799_v53 = vpop.f32.mrb[6].mxu0 }
  0xfa   : > { %v559_v52 = vadd.f32 %v827_v51, %v726_v32  ;;  %v553_v54 = vpop.f32.mrb[7].mxu1  ;;  %441 = vst.msk [vmem:[%s1043_s15 + $0x38] sm:$0xff] %vm304_vm0, %v799_v53  ;;  %v425_v56 = vpop.f32.mrb[7].mxu0 }
  0xfb   : > { %v554_v55 = vadd.f32 %v726_v32, %v553_v54  ;;  %440 = vst.msk [vmem:[%s1043_s15 + $0x30] sm:$0xff] %vm304_vm0, %v425_v56 }
  0xfc   : > { %569 = vst.msk [vmem:[%s1049_s22 + $0x38] sm:$0xff] %vm304_vm0, %v559_v52 }
  0xfd   : > { %568 = vst.msk [vmem:[%s1049_s22 + $0x30] sm:$0xff] %vm304_vm0, %v554_v55 }
  0xfe PF: > { %s16_s20 = sadd.s32 1, %s906_s20   ;;  %s1098_s18 = smov %s902_s19 }
  0xff   : > { %p13_p5 = scmp.ge.s32.totalorder %s16_s20, 4   ;;  %s1099_s19 = smov %s1101_s21 }
 0x101   :  { %15 = sbr.rel (!%p13_p5) target bundleno = 2 (0x2), region = 78 }

// kernel: dgcnn_forward.11
= control target key start
LH: loop header
LB: loop body
LE: loop exit
PB: predicated region body
PF: predicated region fallthrough
CT: control target
= control target key end

     0   :  { %s776_s9 = smov 0   ;;  %s778_s10 = smov 0   ;;  %s907_s0 = inlined_call_operand.vmem [shape: f32[2,64,64], index: 0, kind: input, shape index: {}, may-alias: {0,1}]   ;;  %s908_s1 = inlined_call_operand.vmem [shape: f32[2,64,64], index: 1, kind: input, shape index: {}, may-alias: {0,1}]   ;;  %s909_s2 = inlined_call_operand.vmem [shape: f32[2,64,64], index: 2, kind: output, shape index: {}]  }
   0x1   :  { %s780_s11 = smov 0  }
   0x2 LB: > { %s24_s12 = sadd.s32 1, %s755_s10  ;;  %p608_p0 = scmp.ge.s32.totalorder %s759_s11, 1  ;;  %s759_s11 = sphi %s780_s11, %s12_s11   ;;  %s755_s10 = sphi %s778_s10, %s913_s10   ;;  %s751_s9 = sphi %s776_s9, %s912_s9  }
   0x3   : > { %p26_p1 = scmp.ge.s32.totalorder %s24_s12, 2  ;;  %p143_p2 = scmp.lt.s32.totalorder %s759_s11, 3 }
   0x5   : > { %s915_s12 = smov (%p26_p1, %s24_s12), 0  ;;  %p144_p3 = pnand %p608_p0, %p143_p2 }
   0x6   : > { %p179_p4 = scmp.lt.s32.totalorder (!%p144_p3), %s751_s9, 1  ;;  %vm219_vm0 = vcmask (!%p144_p3), 523264  }
   0x7   : > { %147 = sbr.rel (%p144_p3) target bundleno = 300 (0x12c), region = 28  ;;  %vm804_vm1 = vmpackc.low (!%p144_p3), %vm219_vm0, %vm219_vm0 }
   0xe   : > { %s917_s9 = smov (!%p179_p4, %s751_s9), 1 }
   0xf   : > { %s794_s13 = sshll.u32 %s917_s9, 6 }
  0x10   : > { %s800_s16 = scalar_lea.vmem %s908_s1, %s794_s13  ;;  %s816_s19 = scalar_lea.vmem %s907_s0, %s794_s13 }
  0x11   : > { %v211_v1 = vld [vmem:[%s800_s16] sm:$0xff]  ;;  %v212_v2 = vld [vmem:[%s800_s16 + $0x8] sm:$0xff]  ;;  %v213_v3 = vld [vmem:[%s800_s16 + $0x10] sm:$0xff]  ;;  %s201_s22 = scalar_lea.vmem %s909_s2, %s794_s13 }
  0x12   : > { %v680_v4 = vpack.c.bf16 %v212_v2, %v211_v1  ;;  %v405_v5 = vmul.f32 %v211_v1, %v211_v1  ;;  %v406_v6 = vmul.f32 %v212_v2, %v212_v2  ;;  %v214_v7 = vld [vmem:[%s800_s16 + $0x18] sm:$0xff]  ;;  %v407_v8 = vmul.f32 %v213_v3, %v213_v3  ;;  %v215_v10 = vld [vmem:[%s800_s16 + $0x20] sm:$0xff]  ;;  %v216_v18 = vld [vmem:[%s800_s16 + $0x28] sm:$0xff] }
  0x13   : > { %v686_v9 = vpack.c.bf16 %v214_v7, %v213_v3  ;;  %v408_v13 = vmul.f32 %v214_v7, %v214_v7  ;;  %v203_v14 = vld [vmem:[%s816_s19] sm:$0xff]  ;;  %v409_v17 = vmul.f32 %v215_v10, %v215_v10  ;;  %v217_v19 = vld [vmem:[%s800_s16 + $0x30] sm:$0xff]  ;;  %v410_v21 = vmul.f32 %v216_v18, %v216_v18  ;;  %v218_v25 = vld [vmem:[%s800_s16 + $0x38] sm:$0xff] }
  0x14   : > { %682 = vmatprep.subr.msk.bf16.mxu0 %vm804_vm1, %v680_v4  ;;  %704 = vmatprep.subr.msk.bf16.mxu1 %vm804_vm1, %v680_v4  ;;  %v413_v11 = vsel %vm219_vm0, %v405_v5, 0.0  ;;  %v419_v12 = vsel %vm219_vm0, %v407_v8, 0.0  ;;  %v207_v15 = vld [vmem:[%s816_s19 + $0x20] sm:$0xff]  ;;  %v416_v16 = vsel %vm219_vm0, %v406_v6, 0.0  ;;  %v692_v22 = vpack.c.bf16 %v216_v18, %v215_v10  ;;  %v204_v30 = vld [vmem:[%s816_s19 + $0x8] sm:$0xff]  ;;  %v205_v33 = vld [vmem:[%s816_s19 + $0x10] sm:$0xff] }
  0x15   : > { %414 = vadd.xlane.f32.xlu0 %v413_v11  ;;  %685 = vmatpush3.bf16.xpose.msk.msra.mxu0 %vm804_vm1, %v680_v4  ;;  %v422_v20 = vsel %vm219_vm0, %v408_v13, 0.0  ;;  %v425_v23 = vsel %vm219_vm0, %v409_v17, 0.0  ;;  %v411_v24 = vmul.f32 %v217_v19, %v217_v19  ;;  %v428_v26 = vsel %vm219_vm0, %v410_v21, 0.0  ;;  %v206_v37 = vld [vmem:[%s816_s19 + $0x18] sm:$0xff]  ;;  %v208_v42 = vld [vmem:[%s816_s19 + $0x28] sm:$0xff]  ;;  %v209_v45 = vld [vmem:[%s816_s19 + $0x30] sm:$0xff] }
  0x16   : > { %708 = vmatpush3.bf16.xpose.msk.msra.mxu1 %vm804_vm1, %v680_v4  ;;  %688 = vmatprep.subr.msk.bf16.mxu0 %vm804_vm1, %v686_v9  ;;  %v412_v27 = vmul.f32 %v218_v25, %v218_v25  ;;  %v373_v29 = vmul.f32 %v203_v14, %v203_v14  ;;  %v374_v32 = vmul.f32 %v204_v30, %v204_v30  ;;  %v210_v48 = vld [vmem:[%s816_s19 + $0x38] sm:$0xff] }
  0x17   : > { %705 = vmatprep.subr.msk.bf16.mxu1 %vm804_vm1, %v686_v9  ;;  %420 = vadd.xlane.f32.xlu1 %v419_v12  ;;  %v431_v28 = vsel %vm219_vm0, %v411_v24, 0.0  ;;  %v698_v34 = vpack.c.bf16 %v218_v25, %v217_v19  ;;  %v375_v36 = vmul.f32 %v205_v33, %v205_v33  ;;  %v376_v39 = vmul.f32 %v206_v37, %v206_v37 }
  0x18   : > { %668 = vmatprep.mubr.msk.f32.mxu0 %vm219_vm0, %v203_v14  ;;  %674 = vmatprep.mubr.msk.f32.mxu1 %vm219_vm0, %v207_v15  ;;  %v434_v31 = vsel %vm219_vm0, %v412_v27, 0.0  ;;  %v381_v35 = vsel %vm219_vm0, %v373_v29, 0.0  ;;  %v384_v38 = vsel %vm219_vm0, %v374_v32, 0.0  ;;  %v377_v40 = vmul.f32 %v207_v15, %v207_v15 }
  0x19   : > { %417 = vadd.xlane.f32.xlu0 %v416_v16  ;;  %v387_v41 = vsel %vm219_vm0, %v375_v36, 0.0  ;;  %v390_v43 = vsel %vm219_vm0, %v376_v39, 0.0  ;;  %v378_v44 = vmul.f32 %v208_v42, %v208_v42  ;;  %v379_v47 = vmul.f32 %v209_v45, %v209_v45 }
  0x1a   : > { %v393_v46 = vsel %vm219_vm0, %v377_v40, 0.0  ;;  %v380_v50 = vmul.f32 %v210_v48, %v210_v48 }
  0x1b   : > { %423 = vadd.xlane.f32.xlu1 %v422_v20  ;;  %v396_v49 = vsel %vm219_vm0, %v378_v44, 0.0  ;;  %v399_v51 = vsel %vm219_vm0, %v379_v47, 0.0 }
  0x1c   : > { %v402_v52 = vsel %vm219_vm0, %v380_v50, 0.0 }
  0x1d   : > { %691 = vmatpush3.bf16.xpose.msk.msra.mxu0 %vm804_vm1, %v686_v9  ;;  %426 = vadd.xlane.f32.xlu0 %v425_v23 }
  0x1e   : > { %709 = vmatpush3.bf16.xpose.msk.msra.mxu1 %vm804_vm1, %v686_v9  ;;  %694 = vmatprep.subr.msk.bf16.mxu0 %vm804_vm1, %v692_v22  ;;  %v485_v9 = vlaneseq }
  0x1f   : > { %706 = vmatprep.subr.msk.bf16.mxu1 %vm804_vm1, %v692_v22  ;;  %429 = vadd.xlane.f32.xlu1 %v428_v26 }
  0x20   : > { %v486_v12 = vshrl.u32 %v485_v9, 7 }
  0x21   : > { %432 = vadd.xlane.f32.xlu0 %v431_v28 }
  0x22   : > { %v487_v20 = vsub.s32 0, %v486_v12 }
  0x23   : > { %435 = vadd.xlane.f32.xlu1 %v434_v31 }
  0x25   : > { %697 = vmatpush3.bf16.xpose.msk.msra.mxu0 %vm804_vm1, %v692_v22  ;;  %382 = vadd.xlane.f32.xlu0 %v381_v35 }
  0x26   : > { %710 = vmatpush3.bf16.xpose.msk.msra.mxu1 %vm804_vm1, %v692_v22  ;;  %700 = vmatprep.subr.msk.bf16.mxu0 %vm804_vm1, %v698_v34 }
  0x27   : > { %707 = vmatprep.subr.msk.bf16.mxu1 %vm804_vm1, %v698_v34  ;;  %385 = vadd.xlane.f32.xlu1 %v384_v38 }
  0x29   : > { %388 = vadd.xlane.f32.xlu0 %v387_v41 }
  0x2b   : > { %391 = vadd.xlane.f32.xlu1 %v390_v43 }
  0x2d   : > { %703 = vmatpush3.bf16.xpose.msk.msra.mxu0 %vm804_vm1, %v698_v34  ;;  %394 = vadd.xlane.f32.xlu0 %v393_v46 }
  0x2e   : > { %711 = vmatpush3.bf16.xpose.msk.msra.mxu1 %vm804_vm1, %v698_v34 }
  0x2f   : > { %397 = vadd.xlane.f32.xlu1 %v396_v49 }
  0x31   : > { %400 = vadd.xlane.f32.xlu0 %v399_v51 }
  0x33   : > { %403 = vadd.xlane.f32.xlu1 %v402_v52 }
  0x34   : > { %669 = vmatmul.mubr.msk.f32.vlgmr.msra.gmra.mrb[0].mxu0 %vm219_vm0, %v204_v30 }
  0x35   : > { %675 = vmatmul.mubr.msk.f32.vlgmr.msra.gmra.mrb[0].mxu1 %vm219_vm0, %v208_v42  ;;  %671 = vmatprep.mubr.msk.f32.mxu0 %vm219_vm0, %v205_v33 }
  0x36   : > { %677 = vmatprep.mubr.msk.f32.mxu1 %vm219_vm0, %v209_v45 }
  0x38   : > { %672 = vmatmul.mubr.msk.f32.gmra.mrb[2].mxu0 %vm219_vm0, %v206_v37 }
  0x39   : > { %678 = vmatmul.mubr.msk.f32.gmra.mrb[2].mxu1 %vm219_vm0, %v210_v48 }
  0xa2   : > { %v415_v53 = vpop.xlane.xlu0 %414 }
  0xa3   : > { %453 = vxpose.xlu0.b32.start [1/8] (short) (narrow) %v415_v53, 8 }
  0xa4   : > { %v421_v55 = vpop.xlane.xlu1 %420 }
  0xa6   : > { %v418_v54 = vpop.xlane.xlu0 %417 }
  0xa7   : > { %454 = vxpose.xlu0.b32.cont [2/8] (short) (narrow) %v418_v54, 8 }
  0xa8   : > { %v424_v56 = vpop.xlane.xlu1 %423 }
  0xaa   : > { %v427_v57 = vpop.xlane.xlu0 %426 }
  0xab   : > { %455 = vxpose.xlu0.b32.cont [3/8] (short) (narrow) %v421_v55, 8 }
  0xac   : > { %v430_v58 = vpop.xlane.xlu1 %429 }
  0xae   : > { %v433_v59 = vpop.xlane.xlu0 %432 }
  0xaf   : > { %456 = vxpose.xlu0.b32.cont [4/8] (short) (narrow) %v424_v56, 8 }
  0xb0   : > { %v436_v60 = vpop.xlane.xlu1 %435 }
  0xb2   : > { %v383_v4 = vpop.xlane.xlu0 %382 }
  0xb3   : > { %457 = vxpose.xlu0.b32.cont [5/8] (short) (narrow) %v427_v57, 8 }
  0xb4   : > { %v386_v6 = vpop.xlane.xlu1 %385 }
  0xb6   : > { %v389_v7 = vpop.xlane.xlu0 %388 }
  0xb7   : > { %458 = vxpose.xlu0.b32.cont [6/8] (short) (narrow) %v430_v58, 8 }
  0xb8   : > { %v392_v8 = vpop.xlane.xlu1 %391 }
  0xba   : > { %v395_v10 = vpop.xlane.xlu0 %394 }
  0xbb   : > { %459 = vxpose.xlu0.b32.cont [7/8] (short) (narrow) %v433_v59, 8 }
  0xbc   : > { %v398_v11 = vpop.xlane.xlu1 %397 }
  0xbe   : > { %v401_v13 = vpop.xlane.xlu0 %400 }
  0xbf   : > { %460 = vxpose.xlu0.b32.end [8/8] (short) (narrow) %v436_v60, 8 }
  0xc0   : > { %v404_v19 = vpop.xlane.xlu1 %403 }
 0x107   : > { %v670_v61 = vpop.f32.mrb[0].mxu0 }
 0x108   : > { %v676_v62 = vpop.f32.mrb[0].mxu1  ;;  %v334_v63 = vpop.f32.mrb[1].mxu0  ;;  %v438_v14 = vmul.f32 2.0, %v670_v61 }
 0x109   : > { %v354_v0 = vpop.f32.mrb[1].mxu1  ;;  %v437_v16 = vmul.f32 2.0, %v334_v63  ;;  %v442_v21 = vmul.f32 2.0, %v676_v62 }
 0x10a   : > { %v441_v22 = vmul.f32 2.0, %v354_v0  ;;  %v446_v24 = vsub.f32 %v438_v14, %v386_v6 }
 0x10b   : > { %v673_v1 = vpop.f32.mrb[2].mxu0  ;;  %v445_v27 = vsub.f32 %v437_v16, %v383_v4  ;;  %v450_v33 = vsub.f32 %v442_v21, %v398_v11 }
 0x10c   : > { %v679_v2 = vpop.f32.mrb[2].mxu1  ;;  %v344_v3 = vpop.f32.mrb[3].mxu0  ;;  %v440_v17 = vmul.f32 2.0, %v673_v1  ;;  %v449_v31 = vsub.f32 %v441_v22, %v395_v10 }
 0x10d   : > { %v364_v5 = vpop.f32.mrb[3].mxu1  ;;  %v444_v15 = vmul.f32 2.0, %v679_v2  ;;  %v439_v18 = vmul.f32 2.0, %v344_v3 }
 0x10e   : > { %v443_v23 = vmul.f32 2.0, %v364_v5  ;;  %v448_v29 = vsub.f32 %v440_v17, %v392_v8 }
 0x10f   : > { %v452_v25 = vsub.f32 %v444_v15, %v404_v19  ;;  %v447_v28 = vsub.f32 %v439_v18, %v389_v7 }
 0x110   : > { %v451_v32 = vsub.f32 %v443_v23, %v401_v13 }
 0x123   : > { %v469_v26 = vpop.trf.xlu0 }
 0x124   : > { %v488_v30 = vrot.slane %v469_v26, %v487_v20 }
 0x126   : > { %v489_v34 = vsub.f32 %v445_v27, %v488_v30  ;;  %v490_v35 = vsub.f32 %v446_v24, %v488_v30  ;;  %v491_v36 = vsub.f32 %v447_v28, %v488_v30  ;;  %v492_v37 = vsub.f32 %v448_v29, %v488_v30 }
 0x127   : > { %v493_v38 = vsub.f32 %v449_v31, %v488_v30  ;;  %v494_v39 = vsub.f32 %v450_v33, %v488_v30  ;;  %v495_v40 = vsub.f32 %v451_v32, %v488_v30  ;;  %v496_v41 = vsub.f32 %v452_v25, %v488_v30 }
 0x128   : > { %497 = vst.msk [vmem:[%s201_s22] sm:$0xff] %vm219_vm0, %v489_v34  ;;  %498 = vst.msk [vmem:[%s201_s22 + $0x8] sm:$0xff] %vm219_vm0, %v490_v35 }
 0x129   : > { %499 = vst.msk [vmem:[%s201_s22 + $0x10] sm:$0xff] %vm219_vm0, %v491_v36  ;;  %500 = vst.msk [vmem:[%s201_s22 + $0x18] sm:$0xff] %vm219_vm0, %v492_v37 }
 0x12a   : > { %501 = vst.msk [vmem:[%s201_s22 + $0x20] sm:$0xff] %vm219_vm0, %v493_v38  ;;  %502 = vst.msk [vmem:[%s201_s22 + $0x28] sm:$0xff] %vm219_vm0, %v494_v39 }
 0x12b   : > { %503 = vst.msk [vmem:[%s201_s22 + $0x30] sm:$0xff] %vm219_vm0, %v495_v40  ;;  %504 = vst.msk [vmem:[%s201_s22 + $0x38] sm:$0xff] %vm219_vm0, %v496_v41 }
 0x12c PF: > { %s12_s11 = sadd.s32 1, %s759_s11   ;;  %s912_s9 = smov %s755_s10 }
 0x12d   : > { %p9_p5 = scmp.ge.s32.totalorder %s12_s11, 4   ;;  %s913_s10 = smov %s915_s12 }
 0x12f   :  { %11 = sbr.rel (!%p9_p5) target bundleno = 2 (0x2), region = 61 }

// kernel: dgcnn_forward.10
= control target key start
LH: loop header
LB: loop body
LE: loop exit
PB: predicated region body
PF: predicated region fallthrough
CT: control target
= control target key end

     0   :  { %s8770_s24 = smov 0   ;;  %s8772_s25 = smov 0   ;;  %s9986_s0 = inlined_call_operand.vmem [shape: f32[2,20,64,3], index: 0, kind: input, shape index: {}]   ;;  %s9987_s1 = inlined_call_operand.vmem [shape: f32[2,64,3], index: 1, kind: input, shape index: {}]   ;;  %s9988_s2 = inlined_call_operand.vmem [shape: f32[3,64], index: 2, kind: input, shape index: {}]   ;;  %s9989_s3 = inlined_call_operand.vmem [shape: f32[3,64], index: 3, kind: input, shape index: {}]   ;;  %s9990_s4 = inlined_call_operand.vmem [shape: f32[1,64], index: 4, kind: input, shape index: {}]   ;;  %s9991_s5 = inlined_call_operand.vmem [shape: f32[64,64], index: 5, kind: input, shape index: {}]   ;;  %s9992_s6 = inlined_call_operand.vmem [shape: f32[1,64], index: 6, kind: input, shape index: {}]   ;;  %s9993_s7 = inlined_call_operand.vmem [shape: f32[2,64,64], index: 7, kind: output, shape index: {}]  }
   0x1   :  { %s8774_s26 = smov 0  }
   0x2 LB: > { %s29_s27 = sadd.s32 1, %s8724_s25  ;;  %p6476_p0 = scmp.ge.s32.totalorder %s8728_s26, 1  ;;  %s8728_s26 = sphi %s8774_s26, %s17_s26   ;;  %s8724_s25 = sphi %s8772_s25, %s9995_s25   ;;  %s8720_s24 = sphi %s8770_s24, %s9994_s24  }
   0x3   : > { %p31_p1 = scmp.ge.s32.totalorder %s29_s27, 2  ;;  %p275_p2 = scmp.lt.s32.totalorder %s8728_s26, 3 }
   0x5   : > { %s9997_s27 = smov (%p31_p1, %s29_s27), 0  ;;  %p276_p3 = pnand %p6476_p0, %p275_p2 }
   0x6   : > { %v362_v0 = vld [vmem:[%s9989_s3] sm:$0x7] (!%p276_p3)  ;;  %vm395_vm0 = vcmask (!%p276_p3), 1042432   ;;  %p325_p4 = scmp.lt.s32.totalorder (!%p276_p3), %s8720_s24, 1  ;;  %vm370_vm1 = vcmask (!%p276_p3), 23552   ;;  %v506_v52 = vld [vmem:[%s9991_s5 + $0x8] sm:$0xff] (!%p276_p3) }
   0x7   : > { %279 = sbr.rel (%p276_p3) target bundleno = 778 (0x30a), region = 48  ;;  %v8794_v1 = vld [vmem:[%s9988_s2] sm:$0x7] (!%p276_p3)  ;;  %7498 = vmatprep.subr.msk.mxu0 (!%p276_p3), %vm395_vm0, %v362_v0  ;;  %v507_v56 = vld [vmem:[%s9991_s5 + $0x10] sm:$0xff] (!%p276_p3)  ;;  %v508_v57 = vld [vmem:[%s9991_s5 + $0x18] sm:$0xff] (!%p276_p3)  ;;  %vm669_vm2 = vcmask (!%p276_p3), 523264  }
   0x8   : > { %7512 = vmatprep.subr.msk.mxu1 (!%p276_p3), %vm395_vm0, %v8794_v1  ;;  %7499 = vmatpush3.msk.msra.mxu0 (!%p276_p3), %vm395_vm0, %v362_v0  ;;  %v505_v51 = vld [vmem:[%s9991_s5] sm:$0xff] (!%p276_p3)  ;;  %v8956_v58 = vpack.c.bf16 (!%p276_p3), %v508_v57, %v507_v56  ;;  %v510_v62 = vld [vmem:[%s9991_s5 + $0x28] sm:$0xff] (!%p276_p3) }
   0x9   : > { %7513 = vmatpush3.msk.msra.mxu1 (!%p276_p3), %vm395_vm0, %v8794_v1  ;;  %v8942_v53 = vpack.c.bf16 (!%p276_p3), %v506_v52, %v505_v51  ;;  %v509_v61 = vld [vmem:[%s9991_s5 + $0x20] sm:$0xff] (!%p276_p3) }
   0xa   : > { %7554 = vmatprep.subr.msk.mxu1 (!%p276_p3), %vm395_vm0, %v8794_v1  ;;  %v8975_v63 = vpack.c.bf16 (!%p276_p3), %v510_v62, %v509_v61 }
   0xb   : > { %8353 = vmatprep.subr.bf16.mxu0 (!%p276_p3), %v8942_v53 }
   0xe   : > { %s9999_s24 = smov (!%p325_p4, %s8720_s24), 1 }
   0xf   : > { %s8680_s9 = smul.u32 1280, %s9999_s24  ;;  %s6987_s10 = sshll.u32 %s9999_s24, 6 }
  0x10   : > { %s8813_s13 = scalar_lea.vmem %s9987_s1, %s6987_s10  ;;  %s9959_s23 = scalar_lea.vmem %s9993_s7, %s6987_s10 }
  0x11   : > { %s8818_s16 = scalar_lea.vmem %s9986_s0, %s8680_s9  ;;  %v354_v2 = vld [vmem:[%s8813_s13] sm:$0xff]  ;;  %v355_v3 = vld [vmem:[%s8813_s13 + $0x8] sm:$0xff]  ;;  %v356_v4 = vld [vmem:[%s8813_s13 + $0x10] sm:$0xff] }
  0x12   : > { %7500 = vmatprep.mubr.msk.f32.mxu0 %vm370_vm1, %v354_v2  ;;  %v513_v5 = vld [vmem:[%s8818_s16] sm:$0xff]  ;;  %v514_v6 = vld [vmem:[%s8818_s16 + $0x8] sm:$0xff]  ;;  %v515_v7 = vld [vmem:[%s8818_s16 + $0x10] sm:$0xff] }
  0x13   : > { %7501 = vmatmul.mubr.msk.f32.vlgmr.msra.gmra.mrb[0].mxu0 %vm370_vm1, %v355_v3  ;;  %7514 = vmatprep.mubr.msk.f32.mxu1 %vm370_vm1, %v513_v5  ;;  %v357_v8 = vld [vmem:[%s8813_s13 + $0x18] sm:$0xff]  ;;  %v358_v10 = vld [vmem:[%s8813_s13 + $0x20] sm:$0xff]  ;;  %v359_v12 = vld [vmem:[%s8813_s13 + $0x28] sm:$0xff] }
  0x14   : > { %7515 = vmatmul.mubr.msk.f32.vlgmr.msra.gmra.mrb[0].mxu1 %vm370_vm1, %v514_v6  ;;  %7503 = vmatprep.mubr.msk.f32.mxu0 %vm370_vm1, %v356_v4  ;;  %v516_v9 = vld [vmem:[%s8818_s16 + $0x18] sm:$0xff]  ;;  %v517_v11 = vld [vmem:[%s8818_s16 + $0x20] sm:$0xff]  ;;  %v518_v13 = vld [vmem:[%s8818_s16 + $0x28] sm:$0xff] }
  0x15   : > { %7555 = vmatpush3.msk.msra.mxu1 %vm395_vm0, %v8794_v1  ;;  %7517 = vmatprep.mubr.msk.f32.mxu1 %vm370_vm1, %v515_v7  ;;  %v360_v14 = vld [vmem:[%s8813_s13 + $0x30] sm:$0xff]  ;;  %v361_v16 = vld [vmem:[%s8813_s13 + $0x38] sm:$0xff]  ;;  %v6509_v18 = vld [vmem:[%s8818_s16 + $0x40] sm:$0xff] }
  0x16   : > { %7596 = vmatprep.subr.msk.mxu1 %vm395_vm0, %v8794_v1  ;;  %v519_v15 = vld [vmem:[%s8818_s16 + $0x30] sm:$0xff]  ;;  %v520_v17 = vld [vmem:[%s8818_s16 + $0x38] sm:$0xff]  ;;  %v6510_v19 = vld [vmem:[%s8818_s16 + $0x48] sm:$0xff]  ;;  %8355 = vmatpush3.bf16.msra.mxu0 %v8942_v53 }
  0x17   : > { %7504 = vmatmul.mubr.msk.f32.gmra.mrb[2].mxu0 %vm370_vm1, %v357_v8  ;;  %v6511_v20 = vld [vmem:[%s8818_s16 + $0x50] sm:$0xff]  ;;  %v6512_v21 = vld [vmem:[%s8818_s16 + $0x58] sm:$0xff]  ;;  %v6513_v22 = vld [vmem:[%s8818_s16 + $0x60] sm:$0xff]  ;;  %8357 = vmatprep.subr.bf16.mxu0 %v8956_v58 }
  0x18   : > { %7518 = vmatmul.mubr.msk.f32.gmra.mrb[2].mxu1 %vm370_vm1, %v516_v9  ;;  %7506 = vmatprep.mubr.msk.f32.mxu0 %vm370_vm1, %v358_v10  ;;  %v6514_v23 = vld [vmem:[%s8818_s16 + $0x68] sm:$0xff]  ;;  %v6515_v24 = vld [vmem:[%s8818_s16 + $0x70] sm:$0xff]  ;;  %v6516_v25 = vld [vmem:[%s8818_s16 + $0x78] sm:$0xff] }
  0x19   : > { %7520 = vmatprep.mubr.msk.f32.mxu1 %vm370_vm1, %v517_v11  ;;  %v6534_v26 = vld [vmem:[%s8818_s16 + $0x80] sm:$0xff]  ;;  %v6535_v27 = vld [vmem:[%s8818_s16 + $0x88] sm:$0xff]  ;;  %v6536_v28 = vld [vmem:[%s8818_s16 + $0x90] sm:$0xff] }
  0x1a   : > { %v6537_v29 = vld [vmem:[%s8818_s16 + $0x98] sm:$0xff]  ;;  %v6538_v30 = vld [vmem:[%s8818_s16 + $0xa0] sm:$0xff]  ;;  %v6539_v31 = vld [vmem:[%s8818_s16 + $0xa8] sm:$0xff]  ;;  %8359 = vmatpush3.bf16.msra.mxu0 %v8956_v58 }
  0x1b   : > { %7507 = vmatmul.mubr.msk.f32.gmra.mrb[4].mxu0 %vm370_vm1, %v359_v12  ;;  %v6540_v32 = vld [vmem:[%s8818_s16 + $0xb0] sm:$0xff]  ;;  %v6541_v33 = vld [vmem:[%s8818_s16 + $0xb8] sm:$0xff]  ;;  %v6559_v34 = vld [vmem:[%s8818_s16 + $0xc0] sm:$0xff]  ;;  %8361 = vmatprep.subr.bf16.mxu0 %v8975_v63 }
  0x1c   : > { %7521 = vmatmul.mubr.msk.f32.gmra.mrb[4].mxu1 %vm370_vm1, %v518_v13  ;;  %7509 = vmatprep.mubr.msk.f32.mxu0 %vm370_vm1, %v360_v14  ;;  %v6560_v35 = vld [vmem:[%s8818_s16 + $0xc8] sm:$0xff]  ;;  %v6561_v36 = vld [vmem:[%s8818_s16 + $0xd0] sm:$0xff]  ;;  %v6562_v37 = vld [vmem:[%s8818_s16 + $0xd8] sm:$0xff] }
  0x1d   : > { %7523 = vmatprep.mubr.msk.f32.mxu1 %vm370_vm1, %v519_v15  ;;  %v6563_v38 = vld [vmem:[%s8818_s16 + $0xe0] sm:$0xff]  ;;  %v6564_v39 = vld [vmem:[%s8818_s16 + $0xe8] sm:$0xff]  ;;  %v6565_v40 = vld [vmem:[%s8818_s16 + $0xf0] sm:$0xff] }
  0x1e   : > { %v6566_v41 = vld [vmem:[%s8818_s16 + $0xf8] sm:$0xff]  ;;  %v6584_v42 = vld [vmem:[%s8818_s16 + $0x100] sm:$0xff]  ;;  %v6585_v43 = vld [vmem:[%s8818_s16 + $0x108] sm:$0xff]  ;;  %8363 = vmatpush3.bf16.msra.mxu0 %v8975_v63 }
  0x1f   : > { %7510 = vmatmul.mubr.msk.f32.gmra.mrb[6].mxu0 %vm370_vm1, %v361_v16  ;;  %v6586_v44 = vld [vmem:[%s8818_s16 + $0x110] sm:$0xff]  ;;  %v6587_v45 = vld [vmem:[%s8818_s16 + $0x118] sm:$0xff]  ;;  %v6588_v46 = vld [vmem:[%s8818_s16 + $0x120] sm:$0xff] }
  0x20   : > { %7524 = vmatmul.mubr.msk.f32.gmra.mrb[6].mxu1 %vm370_vm1, %v520_v17  ;;  %v6589_v47 = vld [vmem:[%s8818_s16 + $0x128] sm:$0xff]  ;;  %v6590_v48 = vld [vmem:[%s8818_s16 + $0x130] sm:$0xff]  ;;  %v6591_v49 = vld [vmem:[%s8818_s16 + $0x138] sm:$0xff] }
  0x21   : > { %7556 = vmatprep.mubr.msk.f32.mxu1 %vm370_vm1, %v6509_v18  ;;  %v6609_v50 = vld [vmem:[%s8818_s16 + $0x140] sm:$0xff]  ;;  %v6610_v54 = vld [vmem:[%s8818_s16 + $0x148] sm:$0xff]  ;;  %v6611_v55 = vld [vmem:[%s8818_s16 + $0x150] sm:$0xff] }
  0x22   : > { %v6612_v59 = vld [vmem:[%s8818_s16 + $0x158] sm:$0xff]  ;;  %v6613_v60 = vld [vmem:[%s8818_s16 + $0x160] sm:$0xff]  ;;  %v6614_v0 = vld [vmem:[%s8818_s16 + $0x168] sm:$0xff] }
  0x23   : > { %v6615_v2 = vld [vmem:[%s8818_s16 + $0x170] sm:$0xff]  ;;  %v512_v4 = vld [vmem:[%s9991_s5 + $0x38] sm:$0xff]  ;;  %v6634_v7 = vld [vmem:[%s8818_s16 + $0x180] sm:$0xff] }
  0x24   : > { %7557 = vmatmul.mubr.msk.f32.vlgmr.msra.gmra.mrb[8].mxu1 %vm370_vm1, %v6510_v19  ;;  %v511_v3 = vld [vmem:[%s9991_s5 + $0x30] sm:$0xff]  ;;  %v6616_v6 = vld [vmem:[%s8818_s16 + $0x178] sm:$0xff]  ;;  %v6635_v8 = vld [vmem:[%s8818_s16 + $0x188] sm:$0xff] }
  0x25   : > { %7597 = vmatpush3.msk.msra.mxu1 %vm395_vm0, %v8794_v1  ;;  %7559 = vmatprep.mubr.msk.f32.mxu1 %vm370_vm1, %v6511_v20  ;;  %v8988_v5 = vpack.c.bf16 %v512_v4, %v511_v3  ;;  %v6636_v9 = vld [vmem:[%s8818_s16 + $0x190] sm:$0xff]  ;;  %v6637_v10 = vld [vmem:[%s8818_s16 + $0x198] sm:$0xff]  ;;  %v6638_v11 = vld [vmem:[%s8818_s16 + $0x1a0] sm:$0xff] }
  0x26   : > { %7638 = vmatprep.subr.msk.mxu1 %vm395_vm0, %v8794_v1  ;;  %v6639_v12 = vld [vmem:[%s8818_s16 + $0x1a8] sm:$0xff]  ;;  %v6640_v13 = vld [vmem:[%s8818_s16 + $0x1b0] sm:$0xff]  ;;  %v6641_v14 = vld [vmem:[%s8818_s16 + $0x1b8] sm:$0xff] }
  0x27   : > { %8365 = vmatprep.subr.bf16.mxu0 %v8988_v5  ;;  %v6659_v15 = vld [vmem:[%s8818_s16 + $0x1c0] sm:$0xff]  ;;  %v6660_v16 = vld [vmem:[%s8818_s16 + $0x1c8] sm:$0xff]  ;;  %v6661_v17 = vld [vmem:[%s8818_s16 + $0x1d0] sm:$0xff] }
  0x28   : > { %7560 = vmatmul.mubr.msk.f32.gmra.mrb[10].mxu1 %vm370_vm1, %v6512_v21  ;;  %8367 = vmatpush3.bf16.msra.mxu0 %v8988_v5  ;;  %v6662_v18 = vld [vmem:[%s8818_s16 + $0x1d8] sm:$0xff]  ;;  %v6663_v19 = vld [vmem:[%s8818_s16 + $0x1e0] sm:$0xff]  ;;  %v6664_v20 = vld [vmem:[%s8818_s16 + $0x1e8] sm:$0xff] }
  0x29   : > { %7562 = vmatprep.mubr.msk.f32.mxu1 %vm370_vm1, %v6513_v22  ;;  %8369 = vmatprep.subr.bf16.mxu0 %v8942_v53  ;;  %v6665_v21 = vld [vmem:[%s8818_s16 + $0x1f0] sm:$0xff]  ;;  %v6666_v22 = vld [vmem:[%s8818_s16 + $0x1f8] sm:$0xff]  ;;  %v6763_v51 = vld [vmem:[%s8818_s16 + $0x2e0] sm:$0xff] }
  0x2a   : > { %v6764_v52 = vld [vmem:[%s8818_s16 + $0x2e8] sm:$0xff]  ;;  %v6784_v56 = vld [vmem:[%s8818_s16 + $0x300] sm:$0xff] }
  0x2b   : > { %v6785_v57 = vld [vmem:[%s8818_s16 + $0x308] sm:$0xff]  ;;  %v6788_v61 = vld [vmem:[%s8818_s16 + $0x320] sm:$0xff] }
  0x2c   : > { %7563 = vmatmul.mubr.msk.f32.gmra.mrb[12].mxu1 %vm370_vm1, %v6514_v23  ;;  %v6684_v23 = vld [vmem:[%s8818_s16 + $0x200] sm:$0xff]  ;;  %v6789_v62 = vld [vmem:[%s8818_s16 + $0x328] sm:$0xff] }
  0x2d   : > { %7565 = vmatprep.mubr.msk.f32.mxu1 %vm370_vm1, %v6515_v24  ;;  %v6685_v24 = vld [vmem:[%s8818_s16 + $0x208] sm:$0xff]  ;;  %v6809_v3 = vld [vmem:[%s8818_s16 + $0x340] sm:$0xff] }
  0x2e   : > { %v6810_v4 = vld [vmem:[%s8818_s16 + $0x348] sm:$0xff] }
  0x30   : > { %7566 = vmatmul.mubr.msk.f32.gmra.mrb[14].mxu1 %vm370_vm1, %v6516_v25  ;;  %v6686_v25 = vld [vmem:[%s8818_s16 + $0x210] sm:$0xff] }
  0x31   : > { %7598 = vmatprep.mubr.msk.f32.mxu1 %vm370_vm1, %v6534_v26  ;;  %v6687_v26 = vld [vmem:[%s8818_s16 + $0x218] sm:$0xff] }
  0x34   : > { %7599 = vmatmul.mubr.msk.f32.vlgmr.msra.gmra.mrb[16].mxu1 %vm370_vm1, %v6535_v27  ;;  %v6688_v27 = vld [vmem:[%s8818_s16 + $0x220] sm:$0xff] }
  0x35   : > { %7639 = vmatpush3.msk.msra.mxu1 %vm395_vm0, %v8794_v1  ;;  %7601 = vmatprep.mubr.msk.f32.mxu1 %vm370_vm1, %v6536_v28  ;;  %v6689_v28 = vld [vmem:[%s8818_s16 + $0x228] sm:$0xff] }
  0x36   : > { %7680 = vmatprep.subr.msk.mxu1 %vm395_vm0, %v8794_v1 }
  0x38   : > { %7602 = vmatmul.mubr.msk.f32.gmra.mrb[18].mxu1 %vm370_vm1, %v6537_v29  ;;  %v6690_v29 = vld [vmem:[%s8818_s16 + $0x230] sm:$0xff] }
  0x39   : > { %7604 = vmatprep.mubr.msk.f32.mxu1 %vm370_vm1, %v6538_v30  ;;  %v6691_v30 = vld [vmem:[%s8818_s16 + $0x238] sm:$0xff] }
  0x3c   : > { %7605 = vmatmul.mubr.msk.f32.gmra.mrb[20].mxu1 %vm370_vm1, %v6539_v31  ;;  %v6709_v31 = vld [vmem:[%s8818_s16 + $0x240] sm:$0xff] }
  0x3d   : > { %7607 = vmatprep.mubr.msk.f32.mxu1 %vm370_vm1, %v6540_v32  ;;  %v6710_v32 = vld [vmem:[%s8818_s16 + $0x248] sm:$0xff] }
  0x40   : > { %7608 = vmatmul.mubr.msk.f32.gmra.mrb[22].mxu1 %vm370_vm1, %v6541_v33  ;;  %v6711_v33 = vld [vmem:[%s8818_s16 + $0x250] sm:$0xff] }
  0x41   : > { %7640 = vmatprep.mubr.msk.f32.mxu1 %vm370_vm1, %v6559_v34  ;;  %v6712_v34 = vld [vmem:[%s8818_s16 + $0x258] sm:$0xff] }
  0x44   : > { %7641 = vmatmul.mubr.msk.f32.vlgmr.msra.gmra.mrb[24].mxu1 %vm370_vm1, %v6560_v35  ;;  %v6713_v35 = vld [vmem:[%s8818_s16 + $0x260] sm:$0xff] }
  0x45   : > { %7681 = vmatpush3.msk.msra.mxu1 %vm395_vm0, %v8794_v1  ;;  %7643 = vmatprep.mubr.msk.f32.mxu1 %vm370_vm1, %v6561_v36  ;;  %v6714_v36 = vld [vmem:[%s8818_s16 + $0x268] sm:$0xff] }
  0x46   : > { %7722 = vmatprep.subr.msk.mxu1 %vm395_vm0, %v8794_v1 }
  0x48   : > { %7644 = vmatmul.mubr.msk.f32.gmra.mrb[26].mxu1 %vm370_vm1, %v6562_v37  ;;  %v6715_v37 = vld [vmem:[%s8818_s16 + $0x270] sm:$0xff] }
  0x49   : > { %7646 = vmatprep.mubr.msk.f32.mxu1 %vm370_vm1, %v6563_v38  ;;  %v6716_v38 = vld [vmem:[%s8818_s16 + $0x278] sm:$0xff] }
  0x4c   : > { %7647 = vmatmul.mubr.msk.f32.gmra.mrb[28].mxu1 %vm370_vm1, %v6564_v39  ;;  %v6734_v39 = vld [vmem:[%s8818_s16 + $0x280] sm:$0xff] }
  0x4d   : > { %7649 = vmatprep.mubr.msk.f32.mxu1 %vm370_vm1, %v6565_v40  ;;  %v6735_v40 = vld [vmem:[%s8818_s16 + $0x288] sm:$0xff] }
  0x50   : > { %7650 = vmatmul.mubr.msk.f32.gmra.mrb[30].mxu1 %vm370_vm1, %v6566_v41  ;;  %v6736_v41 = vld [vmem:[%s8818_s16 + $0x290] sm:$0xff] }
  0x51   : > { %7682 = vmatprep.mubr.msk.f32.mxu1 %vm370_vm1, %v6584_v42  ;;  %v6737_v42 = vld [vmem:[%s8818_s16 + $0x298] sm:$0xff] }
  0x54   : > { %7683 = vmatmul.mubr.msk.f32.vlgmr.msra.gmra.mrb[32].mxu1 %vm370_vm1, %v6585_v43  ;;  %v6738_v43 = vld [vmem:[%s8818_s16 + $0x2a0] sm:$0xff] }
  0x55   : > { %7723 = vmatpush3.msk.msra.mxu1 %vm395_vm0, %v8794_v1  ;;  %7685 = vmatprep.mubr.msk.f32.mxu1 %vm370_vm1, %v6586_v44  ;;  %v6739_v44 = vld [vmem:[%s8818_s16 + $0x2a8] sm:$0xff] }
  0x56   : > { %7764 = vmatprep.subr.msk.mxu1 %vm395_vm0, %v8794_v1 }
  0x58   : > { %7686 = vmatmul.mubr.msk.f32.gmra.mrb[34].mxu1 %vm370_vm1, %v6587_v45  ;;  %v6740_v45 = vld [vmem:[%s8818_s16 + $0x2b0] sm:$0xff] }
  0x59   : > { %7688 = vmatprep.mubr.msk.f32.mxu1 %vm370_vm1, %v6588_v46  ;;  %v6741_v46 = vld [vmem:[%s8818_s16 + $0x2b8] sm:$0xff] }
  0x5c   : > { %7689 = vmatmul.mubr.msk.f32.gmra.mrb[36].mxu1 %vm370_vm1, %v6589_v47  ;;  %v6759_v47 = vld [vmem:[%s8818_s16 + $0x2c0] sm:$0xff] }
  0x5d   : > { %7691 = vmatprep.mubr.msk.f32.mxu1 %vm370_vm1, %v6590_v48  ;;  %v6760_v48 = vld [vmem:[%s8818_s16 + $0x2c8] sm:$0xff] }
  0x60   : > { %7692 = vmatmul.mubr.msk.f32.gmra.mrb[38].mxu1 %vm370_vm1, %v6591_v49  ;;  %v6761_v49 = vld [vmem:[%s8818_s16 + $0x2d0] sm:$0xff] }
  0x61   : > { %7724 = vmatprep.mubr.msk.f32.mxu1 %vm370_vm1, %v6609_v50  ;;  %v6762_v50 = vld [vmem:[%s8818_s16 + $0x2d8] sm:$0xff] }
  0x64   : > { %7725 = vmatmul.mubr.msk.f32.vlgmr.msra.gmra.mrb[40].mxu1 %vm370_vm1, %v6610_v54  ;;  %v6765_v54 = vld [vmem:[%s8818_s16 + $0x2f0] sm:$0xff] }
  0x65   : > { %7765 = vmatpush3.msk.msra.mxu1 %vm395_vm0, %v8794_v1  ;;  %7727 = vmatprep.mubr.msk.f32.mxu1 %vm370_vm1, %v6611_v55  ;;  %v6766_v55 = vld [vmem:[%s8818_s16 + $0x2f8] sm:$0xff] }
  0x66   : > { %7806 = vmatprep.subr.msk.mxu1 %vm395_vm0, %v8794_v1 }
  0x68   : > { %7728 = vmatmul.mubr.msk.f32.gmra.mrb[42].mxu1 %vm370_vm1, %v6612_v59  ;;  %v6786_v59 = vld [vmem:[%s8818_s16 + $0x310] sm:$0xff] }
  0x69   : > { %7730 = vmatprep.mubr.msk.f32.mxu1 %vm370_vm1, %v6613_v60  ;;  %v6787_v60 = vld [vmem:[%s8818_s16 + $0x318] sm:$0xff] }
  0x6c   : > { %7731 = vmatmul.mubr.msk.f32.gmra.mrb[44].mxu1 %vm370_vm1, %v6614_v0  ;;  %v6790_v0 = vld [vmem:[%s8818_s16 + $0x330] sm:$0xff] }
  0x6d   : > { %7733 = vmatprep.mubr.msk.f32.mxu1 %vm370_vm1, %v6615_v2  ;;  %v6791_v2 = vld [vmem:[%s8818_s16 + $0x338] sm:$0xff] }
  0x70   : > { %7734 = vmatmul.mubr.msk.f32.gmra.mrb[46].mxu1 %vm370_vm1, %v6616_v6  ;;  %v6811_v6 = vld [vmem:[%s8818_s16 + $0x350] sm:$0xff] }
  0x71   : > { %7766 = vmatprep.mubr.msk.f32.mxu1 %vm370_vm1, %v6634_v7  ;;  %v6482_v7 = vld [vmem:[%s9990_s4] ss:$0 sm:$0xff] }
  0x74   : > { %7767 = vmatmul.mubr.msk.f32.vlgmr.msra.gmra.mrb[48].mxu1 %vm370_vm1, %v6635_v8  ;;  %v6812_v8 = vld [vmem:[%s8818_s16 + $0x358] sm:$0xff] }
  0x75   : > { %7807 = vmatpush3.msk.msra.mxu1 %vm395_vm0, %v8794_v1  ;;  %7769 = vmatprep.mubr.msk.f32.mxu1 %vm370_vm1, %v6636_v9 }
  0x76   : > { %7848 = vmatprep.subr.msk.mxu1 %vm395_vm0, %v8794_v1 }
  0x78   : > { %7770 = vmatmul.mubr.msk.f32.gmra.mrb[50].mxu1 %vm370_vm1, %v6637_v10  ;;  %v6813_v10 = vld [vmem:[%s8818_s16 + $0x360] sm:$0xff] }
  0x79   : > { %7772 = vmatprep.mubr.msk.f32.mxu1 %vm370_vm1, %v6638_v11 }
  0x7c   : > { %7773 = vmatmul.mubr.msk.f32.gmra.mrb[52].mxu1 %vm370_vm1, %v6639_v12 }
  0x7d   : > { %7775 = vmatprep.mubr.msk.f32.mxu1 %vm370_vm1, %v6640_v13 }
  0x80   : > { %7776 = vmatmul.mubr.msk.f32.gmra.mrb[54].mxu1 %vm370_vm1, %v6641_v14 }
  0x81   : > { %7808 = vmatprep.mubr.msk.f32.mxu1 %vm370_vm1, %v6659_v15 }
  0x84   : > { %7809 = vmatmul.mubr.msk.f32.vlgmr.msra.gmra.mrb[56].mxu1 %vm370_vm1, %v6660_v16 }
  0x85   : > { %7849 = vmatpush3.msk.msra.mxu1 %vm395_vm0, %v8794_v1  ;;  %7811 = vmatprep.mubr.msk.f32.mxu1 %vm370_vm1, %v6661_v17  ;;  %v6814_v17 = vld [vmem:[%s8818_s16 + $0x368] sm:$0xff] }
  0x86   : > { %7890 = vmatprep.subr.msk.mxu1 %vm395_vm0, %v8794_v1 }
  0x88   : > { %7812 = vmatmul.mubr.msk.f32.gmra.mrb[58].mxu1 %vm370_vm1, %v6662_v18 }
  0x89   : > { %7814 = vmatprep.mubr.msk.f32.mxu1 %vm370_vm1, %v6663_v19 }
  0x8c   : > { %7815 = vmatmul.mubr.msk.f32.gmra.mrb[60].mxu1 %vm370_vm1, %v6664_v20  ;;  %v6815_v20 = vld [vmem:[%s8818_s16 + $0x370] sm:$0xff] }
  0x8d   : > { %7817 = vmatprep.mubr.msk.f32.mxu1 %vm370_vm1, %v6665_v21 }
  0x90   : > { %7818 = vmatmul.mubr.msk.f32.gmra.mrb[62].mxu1 %vm370_vm1, %v6666_v22 }
  0x91   : > { %7850 = vmatprep.mubr.msk.f32.mxu1 %vm370_vm1, %v6684_v23 }
  0x94   : > { %7851 = vmatmul.mubr.msk.f32.vlgmr.msra.gmra.mrb[64].mxu1 %vm370_vm1, %v6685_v24 }
  0x95   : > { %7891 = vmatpush3.msk.msra.mxu1 %vm395_vm0, %v8794_v1  ;;  %7853 = vmatprep.mubr.msk.f32.mxu1 %vm370_vm1, %v6686_v25 }
  0x96   : > { %7932 = vmatprep.subr.msk.mxu1 %vm395_vm0, %v8794_v1 }
  0x98   : > { %7854 = vmatmul.mubr.msk.f32.gmra.mrb[66].mxu1 %vm370_vm1, %v6687_v26 }
  0x99   : > { %7856 = vmatprep.mubr.msk.f32.mxu1 %vm370_vm1, %v6688_v27 }
  0x9c   : > { %7857 = vmatmul.mubr.msk.f32.gmra.mrb[68].mxu1 %vm370_vm1, %v6689_v28 }
  0x9d   : > { %7859 = vmatprep.mubr.msk.f32.mxu1 %vm370_vm1, %v6690_v29  ;;  %v6816_v29 = vld [vmem:[%s8818_s16 + $0x378] sm:$0xff] }
  0xa0   : > { %7860 = vmatmul.mubr.msk.f32.gmra.mrb[70].mxu1 %vm370_vm1, %v6691_v30 }
  0xa1   : > { %7892 = vmatprep.mubr.msk.f32.mxu1 %vm370_vm1, %v6709_v31 }
  0xa4   : > { %7893 = vmatmul.mubr.msk.f32.vlgmr.msra.gmra.mrb[72].mxu1 %vm370_vm1, %v6710_v32 }
  0xa5   : > { %7933 = vmatpush3.msk.msra.mxu1 %vm395_vm0, %v8794_v1  ;;  %7895 = vmatprep.mubr.msk.f32.mxu1 %vm370_vm1, %v6711_v33  ;;  %v6834_v33 = vld [vmem:[%s8818_s16 + $0x380] sm:$0xff] }
  0xa6   : > { %7974 = vmatprep.subr.msk.mxu1 %vm395_vm0, %v8794_v1 }
  0xa8   : > { %7896 = vmatmul.mubr.msk.f32.gmra.mrb[74].mxu1 %vm370_vm1, %v6712_v34 }
  0xa9   : > { %7898 = vmatprep.mubr.msk.f32.mxu1 %vm370_vm1, %v6713_v35 }
  0xac   : > { %7899 = vmatmul.mubr.msk.f32.gmra.mrb[76].mxu1 %vm370_vm1, %v6714_v36 }
  0xad   : > { %7901 = vmatprep.mubr.msk.f32.mxu1 %vm370_vm1, %v6715_v37 }
  0xb0   : > { %7902 = vmatmul.mubr.msk.f32.gmra.mrb[78].mxu1 %vm370_vm1, %v6716_v38 }
  0xb1   : > { %7934 = vmatprep.mubr.msk.f32.mxu1 %vm370_vm1, %v6734_v39 }
  0xb4   : > { %7935 = vmatmul.mubr.msk.f32.vlgmr.msra.gmra.mrb[80].mxu1 %vm370_vm1, %v6735_v40 }
  0xb5   : > { %7975 = vmatpush3.msk.msra.mxu1 %vm395_vm0, %v8794_v1  ;;  %7937 = vmatprep.mubr.msk.f32.mxu1 %vm370_vm1, %v6736_v41 }
  0xb6   : > { %8016 = vmatprep.subr.msk.mxu1 %vm395_vm0, %v8794_v1 }
  0xb8   : > { %7938 = vmatmul.mubr.msk.f32.gmra.mrb[82].mxu1 %vm370_vm1, %v6737_v42 }
  0xb9   : > { %7940 = vmatprep.mubr.msk.f32.mxu1 %vm370_vm1, %v6738_v43  ;;  %v6835_v43 = vld [vmem:[%s8818_s16 + $0x388] sm:$0xff] }
  0xbc   : > { %7941 = vmatmul.mubr.msk.f32.gmra.mrb[84].mxu1 %vm370_vm1, %v6739_v44 }
  0xbd   : > { %7943 = vmatprep.mubr.msk.f32.mxu1 %vm370_vm1, %v6740_v45 }
  0xc0   : > { %7944 = vmatmul.mubr.msk.f32.gmra.mrb[86].mxu1 %vm370_vm1, %v6741_v46 }
  0xc1   : > { %7976 = vmatprep.mubr.msk.f32.mxu1 %vm370_vm1, %v6759_v47 }
  0xc4   : > { %7977 = vmatmul.mubr.msk.f32.vlgmr.msra.gmra.mrb[88].mxu1 %vm370_vm1, %v6760_v48 }
  0xc5   : > { %8017 = vmatpush3.msk.msra.mxu1 %vm395_vm0, %v8794_v1  ;;  %7979 = vmatprep.mubr.msk.f32.mxu1 %vm370_vm1, %v6761_v49 }
  0xc6   : > { %8058 = vmatprep.subr.msk.mxu1 %vm395_vm0, %v8794_v1 }
  0xc8   : > { %7980 = vmatmul.mubr.msk.f32.gmra.mrb[90].mxu1 %vm370_vm1, %v6762_v50 }
  0xc9   : > { %7982 = vmatprep.mubr.msk.f32.mxu1 %vm370_vm1, %v6763_v51 }
  0xcc   : > { %7983 = vmatmul.mubr.msk.f32.gmra.mrb[92].mxu1 %vm370_vm1, %v6764_v52  ;;  %v6836_v52 = vld [vmem:[%s8818_s16 + $0x390] sm:$0xff] }
  0xcd   : > { %7985 = vmatprep.mubr.msk.f32.mxu1 %vm370_vm1, %v6765_v54 }
  0xd0   : > { %7986 = vmatmul.mubr.msk.f32.gmra.mrb[94].mxu1 %vm370_vm1, %v6766_v55 }
  0xd1   : > { %8018 = vmatprep.mubr.msk.f32.mxu1 %vm370_vm1, %v6784_v56 }
  0xd4   : > { %8019 = vmatmul.mubr.msk.f32.vlgmr.msra.gmra.mrb[96].mxu1 %vm370_vm1, %v6785_v57 }
  0xd5   : > { %8059 = vmatpush3.msk.msra.mxu1 %vm395_vm0, %v8794_v1  ;;  %8021 = vmatprep.mubr.msk.f32.mxu1 %vm370_vm1, %v6786_v59  ;;  %v6837_v59 = vld [vmem:[%s8818_s16 + $0x398] sm:$0xff] }
  0xd6   : > { %8100 = vmatprep.subr.msk.mxu1 %vm395_vm0, %v8794_v1 }
  0xd8   : > { %8022 = vmatmul.mubr.msk.f32.gmra.mrb[98].mxu1 %vm370_vm1, %v6787_v60 }
  0xd9   : > { %8024 = vmatprep.mubr.msk.f32.mxu1 %vm370_vm1, %v6788_v61 }
  0xdc   : > { %8025 = vmatmul.mubr.msk.f32.gmra.mrb[100].mxu1 %vm370_vm1, %v6789_v62  ;;  %v6838_v62 = vld [vmem:[%s8818_s16 + $0x3a0] sm:$0xff] }
  0xdd   : > { %8027 = vmatprep.mubr.msk.f32.mxu1 %vm370_vm1, %v6790_v0 }
  0xe0   : > { %8028 = vmatmul.mubr.msk.f32.gmra.mrb[102].mxu1 %vm370_vm1, %v6791_v2 }
  0xe1   : > { %8060 = vmatprep.mubr.msk.f32.mxu1 %vm370_vm1, %v6809_v3 }
  0xe4   : > { %8061 = vmatmul.mubr.msk.f32.vlgmr.msra.gmra.mrb[104].mxu1 %vm370_vm1, %v6810_v4 }
  0xe5   : > { %8101 = vmatpush3.msk.msra.mxu1 %vm395_vm0, %v8794_v1  ;;  %8063 = vmatprep.mubr.msk.f32.mxu1 %vm370_vm1, %v6811_v6 }
  0xe6   : > { %v7502_v9 = vpop.f32.mrb[0].mxu0  ;;  %8142 = vmatprep.subr.msk.mxu1 %vm395_vm0, %v8794_v1 }
  0xe7   : > { %v9152_v11 = vadd.f32 %v7502_v9, %v6482_v7  ;;  %v465_v12 = vpop.f32.mrb[1].mxu0  ;;  %v7516_v13 = vpop.f32.mrb[0].mxu1  ;;  %v6839_v9 = vld [vmem:[%s8818_s16 + $0x3a8] sm:$0xff] }
  0xe8   : > { %v9154_v14 = vadd.f32 %v6482_v7, %v465_v12  ;;  %v614_v15 = vpop.f32.mrb[1].mxu1  ;;  %8064 = vmatmul.mubr.msk.f32.gmra.mrb[106].mxu1 %vm370_vm1, %v6812_v8  ;;  %v6840_v12 = vld [vmem:[%s8818_s16 + $0x3b0] sm:$0xff] }
  0xe9   : > { %v620_v16 = vadd.f32 %v7516_v13, %v9152_v11  ;;  %8066 = vmatprep.mubr.msk.f32.mxu1 %vm370_vm1, %v6813_v10 }
  0xea   : > { %v615_v18 = vadd.f32 %v614_v15, %v9154_v14  ;;  %v7505_v19 = vpop.f32.mrb[2].mxu0 }
  0xeb   : > { %v654_v21 = vmul.f32 0.2, %v620_v16  ;;  %v9162_v22 = vadd.f32 %v7505_v19, %v6482_v7  ;;  %v475_v23 = vpop.f32.mrb[3].mxu0  ;;  %v7519_v24 = vpop.f32.mrb[2].mxu1 }
  0xec   : > { %v653_v25 = vmul.f32 0.2, %v615_v18  ;;  %v9164_v26 = vadd.f32 %v6482_v7, %v475_v23  ;;  %v624_v27 = vpop.f32.mrb[3].mxu1  ;;  %8067 = vmatmul.mubr.msk.f32.gmra.mrb[108].mxu1 %vm370_vm1, %v6814_v17  ;;  %v6841_v23 = vld [vmem:[%s8818_s16 + $0x3b8] sm:$0xff] }
  0xed   : > { %v630_v28 = vadd.f32 %v7519_v24, %v9162_v22  ;;  %8069 = vmatprep.mubr.msk.f32.mxu1 %vm370_vm1, %v6815_v20  ;;  %v662_v34 = vmax.f32 %v620_v16, %v654_v21  ;;  %v6859_v24 = vld [vmem:[%s8818_s16 + $0x3c0] sm:$0xff] }
  0xee   : > { %v661_v30 = vmax.f32 %v615_v18, %v653_v25  ;;  %v625_v31 = vadd.f32 %v624_v27, %v9164_v26  ;;  %v7508_v32 = vpop.f32.mrb[4].mxu0 }
  0xef   : > { %v656_v35 = vmul.f32 0.2, %v630_v28  ;;  %v9172_v36 = vadd.f32 %v7508_v32, %v6482_v7  ;;  %v485_v37 = vpop.f32.mrb[5].mxu0  ;;  %v7522_v38 = vpop.f32.mrb[4].mxu1 }
  0xf0   : > { %v655_v39 = vmul.f32 0.2, %v625_v31  ;;  %v9174_v40 = vadd.f32 %v6482_v7, %v485_v37  ;;  %v634_v41 = vpop.f32.mrb[5].mxu1  ;;  %7542 = vmatprep.mubr.msk.f32.mxu0 %vm669_vm2, %v661_v30  ;;  %8070 = vmatmul.mubr.msk.f32.gmra.mrb[110].mxu1 %vm370_vm1, %v6816_v29 }
  0xf1   : > { %v640_v42 = vadd.f32 %v7522_v38, %v9172_v36  ;;  %7543 = vmatmul.mubr.msk.f32.vlgmr.msra.gmra.mrb[8].mxu0 %vm669_vm2, %v662_v34  ;;  %8102 = vmatprep.mubr.msk.f32.mxu1 %vm370_vm1, %v6834_v33  ;;  %v664_v47 = vmax.f32 %v630_v28, %v656_v35  ;;  %v6860_v34 = vld [vmem:[%s8818_s16 + $0x3c8] sm:$0xff] }
  0xf2   : > { %v663_v44 = vmax.f32 %v625_v31, %v655_v39  ;;  %v635_v45 = vadd.f32 %v634_v41, %v9174_v40  ;;  %v7511_v46 = vpop.f32.mrb[6].mxu0  ;;  %8371 = vmatpush3.bf16.msra.mxu0 %v8942_v53  ;;  %v6861_v41 = vld [vmem:[%s8818_s16 + $0x3d0] sm:$0xff] }
  0xf3   : > { %v658_v48 = vmul.f32 0.2, %v640_v42  ;;  %v9184_v49 = vadd.f32 %v7511_v46, %v6482_v7  ;;  %v495_v50 = vpop.f32.mrb[7].mxu0  ;;  %v7525_v51 = vpop.f32.mrb[6].mxu1  ;;  %8373 = vmatprep.subr.bf16.mxu0 %v8956_v58  ;;  %v6862_v46 = vld [vmem:[%s8818_s16 + $0x3d8] sm:$0xff] }
  0xf4   : > { %v657_v54 = vmul.f32 0.2, %v635_v45  ;;  %v9188_v55 = vadd.f32 %v6482_v7, %v495_v50  ;;  %v644_v56 = vpop.f32.mrb[7].mxu1  ;;  %7545 = vmatprep.mubr.msk.f32.mxu0 %vm669_vm2, %v663_v44  ;;  %8103 = vmatmul.mubr.msk.f32.vlgmr.msra.gmra.mrb[112].mxu1 %vm370_vm1, %v6835_v43 }
  0xf5   : > { %v650_v57 = vadd.f32 %v7525_v51, %v9184_v49  ;;  %8143 = vmatpush3.msk.msra.mxu1 %vm395_vm0, %v8794_v1  ;;  %7546 = vmatmul.mubr.msk.f32.gmra.mrb[10].mxu0 %vm669_vm2, %v664_v47  ;;  %v666_v0 = vmax.f32 %v640_v42, %v658_v48  ;;  %v6863_v47 = vld [vmem:[%s8818_s16 + $0x3e0] sm:$0xff] }
  0xf6   : > { %v665_v60 = vmax.f32 %v635_v45, %v657_v54  ;;  %v645_v61 = vadd.f32 %v644_v56, %v9188_v55  ;;  %8375 = vmatpush3.bf16.msra.mxu0 %v8956_v58  ;;  %8105 = vmatprep.mubr.msk.f32.mxu1 %vm370_vm1, %v6836_v52 }
  0xf7   : > { %v660_v2 = vmul.f32 0.2, %v650_v57  ;;  %v7558_v3 = vpop.f32.mrb[8].mxu1  ;;  %8377 = vmatprep.subr.bf16.mxu0 %v8975_v63  ;;  %8184 = vmatprep.subr.msk.mxu1 %vm395_vm0, %v8794_v1 }
  0xf8   : > { %v659_v4 = vmul.f32 0.2, %v645_v61  ;;  %v904_v6 = vadd.f32 %v7558_v3, %v9152_v11  ;;  %7548 = vmatprep.mubr.msk.f32.mxu0 %vm669_vm2, %v665_v60  ;;  %v898_v7 = vpop.f32.mrb[9].mxu1  ;;  %8106 = vmatmul.mubr.msk.f32.gmra.mrb[114].mxu1 %vm370_vm1, %v6837_v59  ;;  %v6864_v60 = vld [vmem:[%s8818_s16 + $0x3e8] sm:$0xff] }
  0xf9   : > { %v899_v8 = vadd.f32 %v898_v7, %v9154_v14  ;;  %7549 = vmatmul.mubr.msk.f32.gmra.mrb[12].mxu0 %vm669_vm2, %v666_v0  ;;  %8108 = vmatprep.mubr.msk.f32.mxu1 %vm370_vm1, %v6838_v62  ;;  %v668_v13 = vmax.f32 %v650_v57, %v660_v2 }
  0xfa   : > { %v667_v10 = vmax.f32 %v645_v61, %v659_v4  ;;  %8379 = vmatpush3.bf16.msra.mxu0 %v8975_v63  ;;  %v938_v15 = vmul.f32 0.2, %v904_v6  ;;  %v6865_v61 = vld [vmem:[%s8818_s16 + $0x3f0] sm:$0xff] }
  0xfb   : > { %v937_v16 = vmul.f32 0.2, %v899_v8  ;;  %v7561_v17 = vpop.f32.mrb[10].mxu1  ;;  %8381 = vmatprep.subr.bf16.mxu0 %v8988_v5 }
  0xfc   : > { %v914_v18 = vadd.f32 %v7561_v17, %v9162_v22  ;;  %7551 = vmatprep.mubr.msk.f32.mxu0 %vm669_vm2, %v667_v10  ;;  %v908_v19 = vpop.f32.mrb[11].mxu1  ;;  %8109 = vmatmul.mubr.msk.f32.gmra.mrb[116].mxu1 %vm370_vm1, %v6839_v9  ;;  %v946_v25 = vmax.f32 %v904_v6, %v938_v15  ;;  %v6866_v9 = vld [vmem:[%s8818_s16 + $0x3f8] sm:$0xff]  ;;  %v6884_v10 = vld [vmem:[%s8818_s16 + $0x400] sm:$0xff] }
  0xfd   : > { %v945_v20 = vmax.f32 %v899_v8, %v937_v16  ;;  %v909_v21 = vadd.f32 %v908_v19, %v9164_v26  ;;  %7552 = vmatmul.mubr.msk.f32.gmra.mrb[14].mxu0 %vm669_vm2, %v668_v13  ;;  %8111 = vmatprep.mubr.msk.f32.mxu1 %vm370_vm1, %v6840_v12 }
  0xfe   : > { %8383 = vmatpush3.bf16.msra.mxu0 %v8988_v5  ;;  %v940_v27 = vmul.f32 0.2, %v914_v18 }
  0xff   : > { %v939_v28 = vmul.f32 0.2, %v909_v21  ;;  %v7564_v29 = vpop.f32.mrb[12].mxu1  ;;  %7584 = vmatprep.mubr.msk.f32.mxu0 %vm669_vm2, %v945_v20  ;;  %8385 = vmatprep.subr.bf16.mxu0 %v8942_v53 }
 0x100   : > { %v924_v30 = vadd.f32 %v7564_v29, %v9172_v36  ;;  %v918_v31 = vpop.f32.mrb[13].mxu1  ;;  %8112 = vmatmul.mubr.msk.f32.gmra.mrb[118].mxu1 %vm370_vm1, %v6841_v23  ;;  %v948_v35 = vmax.f32 %v914_v18, %v940_v27 }
 0x101   : > { %v947_v32 = vmax.f32 %v909_v21, %v939_v28  ;;  %v919_v33 = vadd.f32 %v918_v31, %v9174_v40  ;;  %7585 = vmatmul.mubr.msk.f32.vlgmr.msra.gmra.mrb[16].mxu0 %vm669_vm2, %v946_v25  ;;  %8144 = vmatprep.mubr.msk.f32.mxu1 %vm370_vm1, %v6859_v24  ;;  %v6885_v21 = vld [vmem:[%s8818_s16 + $0x408] sm:$0xff]  ;;  %v6886_v28 = vld [vmem:[%s8818_s16 + $0x410] sm:$0xff] }
 0x102   : > { %8387 = vmatpush3.bf16.msra.mxu0 %v8942_v53  ;;  %v942_v37 = vmul.f32 0.2, %v924_v30 }
 0x103   : > { %v941_v38 = vmul.f32 0.2, %v919_v33  ;;  %v7567_v39 = vpop.f32.mrb[14].mxu1  ;;  %7587 = vmatprep.mubr.msk.f32.mxu0 %vm669_vm2, %v947_v32  ;;  %8389 = vmatprep.subr.bf16.mxu0 %v8956_v58 }
 0x104   : > { %v934_v42 = vadd.f32 %v7567_v39, %v9184_v49  ;;  %v928_v43 = vpop.f32.mrb[15].mxu1  ;;  %8145 = vmatmul.mubr.msk.f32.vlgmr.msra.gmra.mrb[120].mxu1 %vm370_vm1, %v6860_v34  ;;  %v950_v48 = vmax.f32 %v924_v30, %v942_v37  ;;  %v6888_v34 = vld [vmem:[%s8818_s16 + $0x420] sm:$0xff] }
 0x105   : > { %v949_v44 = vmax.f32 %v919_v33, %v941_v38  ;;  %v929_v45 = vadd.f32 %v928_v43, %v9188_v55  ;;  %8185 = vmatpush3.msk.msra.mxu1 %vm395_vm0, %v8794_v1  ;;  %7588 = vmatmul.mubr.msk.f32.gmra.mrb[18].mxu0 %vm669_vm2, %v948_v35  ;;  %v6887_v33 = vld [vmem:[%s8818_s16 + $0x418] sm:$0xff] }
 0x106   : > { %8391 = vmatpush3.bf16.msra.mxu0 %v8956_v58  ;;  %8147 = vmatprep.mubr.msk.f32.mxu1 %vm370_vm1, %v6861_v41  ;;  %v944_v50 = vmul.f32 0.2, %v934_v42 }
 0x107   : > { %v943_v51 = vmul.f32 0.2, %v929_v45  ;;  %7590 = vmatprep.mubr.msk.f32.mxu0 %vm669_vm2, %v949_v44  ;;  %v7600_v52 = vpop.f32.mrb[16].mxu1  ;;  %8393 = vmatprep.subr.bf16.mxu0 %v8975_v63 }
 0x108   : > { %v1195_v54 = vadd.f32 %v7600_v52, %v9152_v11  ;;  %v1189_v56 = vpop.f32.mrb[17].mxu1  ;;  %8148 = vmatmul.mubr.msk.f32.gmra.mrb[122].mxu1 %vm370_vm1, %v6862_v46  ;;  %8226 = vmatprep.subr.msk.mxu1 %vm395_vm0, %v8794_v1  ;;  %v952_v62 = vmax.f32 %v934_v42, %v944_v50  ;;  %v6890_v46 = vld [vmem:[%s8818_s16 + $0x430] sm:$0xff] }
 0x109   : > { %v951_v57 = vmax.f32 %v929_v45, %v943_v51  ;;  %v1190_v59 = vadd.f32 %v1189_v56, %v9154_v14  ;;  %7591 = vmatmul.mubr.msk.f32.gmra.mrb[20].mxu0 %vm669_vm2, %v950_v48  ;;  %8150 = vmatprep.mubr.msk.f32.mxu1 %vm370_vm1, %v6863_v47  ;;  %v6889_v45 = vld [vmem:[%s8818_s16 + $0x428] sm:$0xff] }
 0x10a   : > { %8395 = vmatpush3.bf16.msra.mxu0 %v8975_v63  ;;  %v1229_v0 = vmul.f32 0.2, %v1195_v54 }
 0x10b   : > { %v1228_v2 = vmul.f32 0.2, %v1190_v59  ;;  %7593 = vmatprep.mubr.msk.f32.mxu0 %vm669_vm2, %v951_v57  ;;  %v7603_v3 = vpop.f32.mrb[18].mxu1  ;;  %8397 = vmatprep.subr.bf16.mxu0 %v8988_v5  ;;  %v6891_v57 = vld [vmem:[%s8818_s16 + $0x438] sm:$0xff] }
 0x10c   : > { %v1205_v4 = vadd.f32 %v7603_v3, %v9162_v22  ;;  %v1199_v6 = vpop.f32.mrb[19].mxu1  ;;  %8151 = vmatmul.mubr.msk.f32.gmra.mrb[124].mxu1 %vm370_vm1, %v6864_v60  ;;  %v1237_v12 = vmax.f32 %v1195_v54, %v1229_v0 }
 0x10d   : > { %v1236_v7 = vmax.f32 %v1190_v59, %v1228_v2  ;;  %v1200_v8 = vadd.f32 %v1199_v6, %v9164_v26  ;;  %7594 = vmatmul.mubr.msk.f32.gmra.mrb[22].mxu0 %vm669_vm2, %v952_v62  ;;  %8153 = vmatprep.mubr.msk.f32.mxu1 %vm370_vm1, %v6865_v61  ;;  %v6909_v59 = vld [vmem:[%s8818_s16 + $0x440] sm:$0xff] }
 0x10e   : > { %8399 = vmatpush3.bf16.msra.mxu0 %v8988_v5  ;;  %v1231_v13 = vmul.f32 0.2, %v1205_v4 }
 0x10f   : > { %v1230_v15 = vmul.f32 0.2, %v1200_v8  ;;  %v7606_v16 = vpop.f32.mrb[20].mxu1  ;;  %7626 = vmatprep.mubr.msk.f32.mxu0 %vm669_vm2, %v1236_v7  ;;  %8401 = vmatprep.subr.bf16.mxu0 %v8942_v53  ;;  %v6910_v7 = vld [vmem:[%s8818_s16 + $0x448] sm:$0xff] }
 0x110   : > { %v1215_v17 = vadd.f32 %v7606_v16, %v9172_v36  ;;  %v1209_v18 = vpop.f32.mrb[21].mxu1  ;;  %8154 = vmatmul.mubr.msk.f32.gmra.mrb[126].mxu1 %vm370_vm1, %v6866_v9  ;;  %v1239_v23 = vmax.f32 %v1205_v4, %v1231_v13  ;;  %v6911_v13 = vld [vmem:[%s8818_s16 + $0x450] sm:$0xff] }
 0x111   : > { %v1238_v19 = vmax.f32 %v1200_v8, %v1230_v15  ;;  %v1210_v20 = vadd.f32 %v1209_v18, %v9174_v40  ;;  %7627 = vmatmul.mubr.msk.f32.vlgmr.msra.gmra.mrb[24].mxu0 %vm669_vm2, %v1237_v12  ;;  %8186 = vmatprep.mubr.msk.f32.mxu1 %vm370_vm1, %v6884_v10 }
 0x112   : > { %8403 = vmatpush3.bf16.msra.mxu0 %v8942_v53  ;;  %v1233_v24 = vmul.f32 0.2, %v1215_v17 }
 0x113   : > { %v1232_v25 = vmul.f32 0.2, %v1210_v20  ;;  %v7609_v27 = vpop.f32.mrb[22].mxu1  ;;  %7629 = vmatprep.mubr.msk.f32.mxu0 %vm669_vm2, %v1238_v19  ;;  %8405 = vmatprep.subr.bf16.mxu0 %v8956_v58  ;;  %v9329_v19 = vld [vmem:[%s9988_s2] sm:$0x7] }
 0x114   : > { %v1225_v29 = vadd.f32 %v7609_v27, %v9184_v49  ;;  %v1219_v30 = vpop.f32.mrb[23].mxu1  ;;  %8187 = vmatmul.mubr.msk.f32.vlgmr.msra.gmra.mrb[128].mxu1 %vm370_vm1, %v6885_v21  ;;  %v1241_v35 = vmax.f32 %v1215_v17, %v1233_v24  ;;  %v6913_v21 = vld [vmem:[%s8818_s16 + $0x460] sm:$0xff] }
 0x115   : > { %v1240_v31 = vmax.f32 %v1210_v20, %v1232_v25  ;;  %v1220_v32 = vadd.f32 %v1219_v30, %v9188_v55  ;;  %8227 = vmatpush3.msk.msra.mxu1 %vm395_vm0, %v8794_v1  ;;  %7630 = vmatmul.mubr.msk.f32.gmra.mrb[26].mxu0 %vm669_vm2, %v1239_v23  ;;  %v6912_v20 = vld [vmem:[%s8818_s16 + $0x458] sm:$0xff] }
 0x116   : > { %8407 = vmatpush3.bf16.msra.mxu0 %v8956_v58  ;;  %8189 = vmatprep.mubr.msk.f32.mxu1 %vm370_vm1, %v6886_v28  ;;  %v1235_v37 = vmul.f32 0.2, %v1225_v29 }
 0x117   : > { %v1234_v38 = vmul.f32 0.2, %v1220_v32  ;;  %7632 = vmatprep.mubr.msk.f32.mxu0 %vm669_vm2, %v1240_v31  ;;  %v7642_v39 = vpop.f32.mrb[24].mxu1  ;;  %8409 = vmatprep.subr.bf16.mxu0 %v8975_v63 }
 0x118   : > { %v1486_v41 = vadd.f32 %v7642_v39, %v9152_v11  ;;  %v1480_v42 = vpop.f32.mrb[25].mxu1  ;;  %8190 = vmatmul.mubr.msk.f32.gmra.mrb[130].mxu1 %vm370_vm1, %v6887_v33  ;;  %8268 = vmatprep.subr.msk.mxu1 %vm395_vm0, %v8794_v1  ;;  %v1243_v47 = vmax.f32 %v1225_v29, %v1235_v37  ;;  %v6915_v33 = vld [vmem:[%s8818_s16 + $0x470] sm:$0xff] }
 0x119   : > { %v1242_v43 = vmax.f32 %v1220_v32, %v1234_v38  ;;  %v1481_v44 = vadd.f32 %v1480_v42, %v9154_v14  ;;  %7633 = vmatmul.mubr.msk.f32.gmra.mrb[28].mxu0 %vm669_vm2, %v1241_v35  ;;  %8192 = vmatprep.mubr.msk.f32.mxu1 %vm370_vm1, %v6888_v34  ;;  %v6914_v32 = vld [vmem:[%s8818_s16 + $0x468] sm:$0xff] }
 0x11a   : > { %8411 = vmatpush3.bf16.msra.mxu0 %v8975_v63  ;;  %v1520_v48 = vmul.f32 0.2, %v1486_v41 }
 0x11b   : > { %v1519_v50 = vmul.f32 0.2, %v1481_v44  ;;  %7635 = vmatprep.mubr.msk.f32.mxu0 %vm669_vm2, %v1242_v43  ;;  %v7645_v51 = vpop.f32.mrb[26].mxu1  ;;  %8413 = vmatprep.subr.bf16.mxu0 %v8988_v5 }
 0x11c   : > { %v1496_v1 = vadd.f32 %v7645_v51, %v9162_v22  ;;  %v1490_v52 = vpop.f32.mrb[27].mxu1  ;;  %8193 = vmatmul.mubr.msk.f32.gmra.mrb[132].mxu1 %vm370_vm1, %v6889_v45  ;;  %v1528_v60 = vmax.f32 %v1486_v41, %v1520_v48  ;;  %v6934_v45 = vld [vmem:[%s8818_s16 + $0x480] sm:$0xff] }
 0x11d   : > { %v1527_v54 = vmax.f32 %v1481_v44, %v1519_v50  ;;  %v1491_v56 = vadd.f32 %v1490_v52, %v9164_v26  ;;  %7636 = vmatmul.mubr.msk.f32.gmra.mrb[30].mxu0 %vm669_vm2, %v1243_v47  ;;  %8195 = vmatprep.mubr.msk.f32.mxu1 %vm370_vm1, %v6890_v46  ;;  %v6916_v44 = vld [vmem:[%s8818_s16 + $0x478] sm:$0xff] }
 0x11e   : > { %8415 = vmatpush3.bf16.msra.mxu0 %v8988_v5  ;;  %v1522_v61 = vmul.f32 0.2, %v1496_v1 }
 0x11f   : > { %v1521_v62 = vmul.f32 0.2, %v1491_v56  ;;  %v7648_v0 = vpop.f32.mrb[28].mxu1  ;;  %7668 = vmatprep.mubr.msk.f32.mxu0 %vm669_vm2, %v1527_v54  ;;  %8417 = vmatprep.subr.bf16.mxu0 %v8942_v53 }
 0x120   : > { %v1506_v2 = vadd.f32 %v7648_v0, %v9172_v36  ;;  %v1500_v3 = vpop.f32.mrb[29].mxu1  ;;  %8196 = vmatmul.mubr.msk.f32.gmra.mrb[134].mxu1 %vm370_vm1, %v6891_v57  ;;  %v1530_v8 = vmax.f32 %v1496_v1, %v1522_v61 }
 0x121   : > { %v1529_v4 = vmax.f32 %v1491_v56, %v1521_v62  ;;  %v1501_v6 = vadd.f32 %v1500_v3, %v9174_v40  ;;  %7669 = vmatmul.mubr.msk.f32.vlgmr.msra.gmra.mrb[32].mxu0 %vm669_vm2, %v1528_v60  ;;  %8228 = vmatprep.mubr.msk.f32.mxu1 %vm370_vm1, %v6909_v59  ;;  %v6935_v56 = vld [vmem:[%s8818_s16 + $0x488] sm:$0xff]  ;;  %v6936_v62 = vld [vmem:[%s8818_s16 + $0x490] sm:$0xff] }
 0x122   : > { %8419 = vmatpush3.bf16.msra.mxu0 %v8942_v53  ;;  %v1524_v9 = vmul.f32 0.2, %v1506_v2 }
 0x123   : > { %v1523_v10 = vmul.f32 0.2, %v1501_v6  ;;  %v7651_v12 = vpop.f32.mrb[30].mxu1  ;;  %7671 = vmatprep.mubr.msk.f32.mxu0 %vm669_vm2, %v1529_v4  ;;  %8421 = vmatprep.subr.bf16.mxu0 %v8956_v58 }
 0x124   : > { %v1516_v15 = vadd.f32 %v7651_v12, %v9184_v49  ;;  %v1510_v16 = vpop.f32.mrb[31].mxu1  ;;  %8229 = vmatmul.mubr.msk.f32.vlgmr.msra.gmra.mrb[136].mxu1 %vm370_vm1, %v6910_v7  ;;  %v1532_v23 = vmax.f32 %v1506_v2, %v1524_v9  ;;  %v6938_v7 = vld [vmem:[%s8818_s16 + $0x4a0] sm:$0xff] }
 0x125   : > { %v1531_v17 = vmax.f32 %v1501_v6, %v1523_v10  ;;  %v1511_v18 = vadd.f32 %v1510_v16, %v9188_v55  ;;  %8269 = vmatpush3.msk.msra.mxu1 %vm395_vm0, %v9329_v19  ;;  %7672 = vmatmul.mubr.msk.f32.gmra.mrb[34].mxu0 %vm669_vm2, %v1530_v8  ;;  %v6937_v6 = vld [vmem:[%s8818_s16 + $0x498] sm:$0xff] }
 0x126   : > { %8423 = vmatpush3.bf16.msra.mxu0 %v8956_v58  ;;  %8231 = vmatprep.mubr.msk.f32.mxu1 %vm370_vm1, %v6911_v13  ;;  %v1526_v24 = vmul.f32 0.2, %v1516_v15 }
 0x127   : > { %v1525_v25 = vmul.f32 0.2, %v1511_v18  ;;  %7674 = vmatprep.mubr.msk.f32.mxu0 %vm669_vm2, %v1531_v17  ;;  %v7684_v27 = vpop.f32.mrb[32].mxu1  ;;  %8425 = vmatprep.subr.bf16.mxu0 %v8975_v63 }
 0x128   : > { %v1777_v28 = vadd.f32 %v7684_v27, %v9152_v11  ;;  %v1771_v29 = vpop.f32.mrb[33].mxu1  ;;  %8232 = vmatmul.mubr.msk.f32.gmra.mrb[138].mxu1 %vm370_vm1, %v6912_v20  ;;  %8310 = vmatprep.subr.msk.mxu1 %vm395_vm0, %v9329_v19  ;;  %v1534_v34 = vmax.f32 %v1516_v15, %v1526_v24 }
 0x129   : > { %v1533_v30 = vmax.f32 %v1511_v18, %v1525_v25  ;;  %v1772_v31 = vadd.f32 %v1771_v29, %v9154_v14  ;;  %7675 = vmatmul.mubr.msk.f32.gmra.mrb[36].mxu0 %vm669_vm2, %v1532_v23  ;;  %8234 = vmatprep.mubr.msk.f32.mxu1 %vm370_vm1, %v6913_v21  ;;  %v6939_v18 = vld [vmem:[%s8818_s16 + $0x4a8] sm:$0xff] }
 0x12a   : > { %8427 = vmatpush3.bf16.msra.mxu0 %v8975_v63  ;;  %v1811_v35 = vmul.f32 0.2, %v1777_v28 }
 0x12b   : > { %v1810_v37 = vmul.f32 0.2, %v1772_v31  ;;  %7677 = vmatprep.mubr.msk.f32.mxu0 %vm669_vm2, %v1533_v30  ;;  %v7687_v38 = vpop.f32.mrb[34].mxu1  ;;  %8429 = vmatprep.subr.bf16.mxu0 %v8988_v5  ;;  %v6941_v30 = vld [vmem:[%s8818_s16 + $0x4b8] sm:$0xff] }
 0x12c   : > { %v1787_v39 = vadd.f32 %v7687_v38, %v9162_v22  ;;  %v1781_v41 = vpop.f32.mrb[35].mxu1  ;;  %8235 = vmatmul.mubr.msk.f32.gmra.mrb[140].mxu1 %vm370_vm1, %v6914_v32  ;;  %v1819_v46 = vmax.f32 %v1777_v28, %v1811_v35 }
 0x12d   : > { %v1818_v42 = vmax.f32 %v1772_v31, %v1810_v37  ;;  %v1782_v43 = vadd.f32 %v1781_v41, %v9164_v26  ;;  %7678 = vmatmul.mubr.msk.f32.gmra.mrb[38].mxu0 %vm669_vm2, %v1534_v34  ;;  %8237 = vmatprep.mubr.msk.f32.mxu1 %vm370_vm1, %v6915_v33  ;;  %v6959_v31 = vld [vmem:[%s8818_s16 + $0x4c0] sm:$0xff] }
 0x12e   : > { %8431 = vmatpush3.bf16.msra.mxu0 %v8988_v5  ;;  %v1813_v47 = vmul.f32 0.2, %v1787_v39 }
 0x12f   : > { %v1812_v48 = vmul.f32 0.2, %v1782_v43  ;;  %v7690_v50 = vpop.f32.mrb[36].mxu1  ;;  %7710 = vmatprep.mubr.msk.f32.mxu0 %vm669_vm2, %v1818_v42  ;;  %8433 = vmatprep.subr.bf16.mxu0 %v8942_v53  ;;  %v6960_v42 = vld [vmem:[%s8818_s16 + $0x4c8] sm:$0xff] }
 0x130   : > { %v1797_v51 = vadd.f32 %v7690_v50, %v9172_v36  ;;  %v1791_v1 = vpop.f32.mrb[37].mxu1  ;;  %8238 = vmatmul.mubr.msk.f32.gmra.mrb[142].mxu1 %vm370_vm1, %v6916_v44  ;;  %v1821_v57 = vmax.f32 %v1787_v39, %v1813_v47 }
 0x131   : > { %v1820_v52 = vmax.f32 %v1782_v43, %v1812_v48  ;;  %v1792_v54 = vadd.f32 %v1791_v1, %v9174_v40  ;;  %7711 = vmatmul.mubr.msk.f32.vlgmr.msra.gmra.mrb[40].mxu0 %vm669_vm2, %v1819_v46  ;;  %8270 = vmatprep.mubr.msk.f32.mxu1 %vm370_vm1, %v6934_v45  ;;  %v6961_v43 = vld [vmem:[%s8818_s16 + $0x4d0] sm:$0xff] }
 0x132   : > { %8435 = vmatpush3.bf16.msra.mxu0 %v8942_v53  ;;  %v1815_v59 = vmul.f32 0.2, %v1797_v51 }
 0x133   : > { %v1814_v60 = vmul.f32 0.2, %v1792_v54  ;;  %v7693_v61 = vpop.f32.mrb[38].mxu1  ;;  %7713 = vmatprep.mubr.msk.f32.mxu0 %vm669_vm2, %v1820_v52  ;;  %8437 = vmatprep.subr.bf16.mxu0 %v8956_v58  ;;  %v6962_v52 = vld [vmem:[%s8818_s16 + $0x4d8] sm:$0xff] }
 0x134   : > { %v1807_v0 = vadd.f32 %v7693_v61, %v9184_v49  ;;  %v1801_v2 = vpop.f32.mrb[39].mxu1  ;;  %8271 = vmatmul.mubr.msk.f32.vlgmr.msra.gmra.mrb[144].mxu1 %vm370_vm1, %v6935_v56  ;;  %v1823_v8 = vmax.f32 %v1797_v51, %v1815_v59 }
 0x135   : > { %v1822_v3 = vmax.f32 %v1792_v54, %v1814_v60  ;;  %v1802_v4 = vadd.f32 %v1801_v2, %v9188_v55  ;;  %8311 = vmatpush3.msk.msra.mxu1 %vm395_vm0, %v9329_v19  ;;  %7714 = vmatmul.mubr.msk.f32.gmra.mrb[42].mxu0 %vm669_vm2, %v1821_v57  ;;  %v6940_v19 = vld [vmem:[%s8818_s16 + $0x4b0] sm:$0xff]  ;;  %v6963_v54 = vld [vmem:[%s8818_s16 + $0x4e0] sm:$0xff] }
 0x136   : > { %8439 = vmatpush3.bf16.msra.mxu0 %v8956_v58  ;;  %8273 = vmatprep.mubr.msk.f32.mxu1 %vm370_vm1, %v6936_v62  ;;  %v1817_v9 = vmul.f32 0.2, %v1807_v0 }
 0x137   : > { %v1816_v10 = vmul.f32 0.2, %v1802_v4  ;;  %7716 = vmatprep.mubr.msk.f32.mxu0 %vm669_vm2, %v1822_v3  ;;  %v7726_v12 = vpop.f32.mrb[40].mxu1  ;;  %8441 = vmatprep.subr.bf16.mxu0 %v8975_v63  ;;  %v6964_v3 = vld [vmem:[%s8818_s16 + $0x4e8] sm:$0xff] }
 0x138   : > { %v2068_v13 = vadd.f32 %v7726_v12, %v9152_v11  ;;  %v2062_v15 = vpop.f32.mrb[41].mxu1  ;;  %8274 = vmatmul.mubr.msk.f32.gmra.mrb[146].mxu1 %vm370_vm1, %v6937_v6  ;;  %8672 = vmatprep.subr.bf16.mxu1 %v8942_v53  ;;  %v1825_v20 = vmax.f32 %v1807_v0, %v1817_v9 }
 0x139   : > { %v1824_v16 = vmax.f32 %v1802_v4, %v1816_v10  ;;  %v2063_v17 = vadd.f32 %v2062_v15, %v9154_v14  ;;  %7717 = vmatmul.mubr.msk.f32.gmra.mrb[44].mxu0 %vm669_vm2, %v1823_v8  ;;  %8276 = vmatprep.mubr.msk.f32.mxu1 %vm370_vm1, %v6938_v7  ;;  %v6965_v4 = vld [vmem:[%s8818_s16 + $0x4f0] sm:$0xff] }
 0x13a   : > { %8443 = vmatpush3.bf16.msra.mxu0 %v8975_v63  ;;  %v2102_v21 = vmul.f32 0.2, %v2068_v13 }
 0x13b   : > { %v2101_v23 = vmul.f32 0.2, %v2063_v17  ;;  %7719 = vmatprep.mubr.msk.f32.mxu0 %vm669_vm2, %v1824_v16  ;;  %v7729_v24 = vpop.f32.mrb[42].mxu1  ;;  %8445 = vmatprep.subr.bf16.mxu0 %v8988_v5  ;;  %v6966_v16 = vld [vmem:[%s8818_s16 + $0x4f8] sm:$0xff] }
 0x13c   : > { %v2078_v25 = vadd.f32 %v7729_v24, %v9162_v22  ;;  %v2072_v27 = vpop.f32.mrb[43].mxu1  ;;  %8277 = vmatmul.mubr.msk.f32.gmra.mrb[148].mxu1 %vm370_vm1, %v6939_v18  ;;  %v2110_v32 = vmax.f32 %v2068_v13, %v2102_v21 }
 0x13d   : > { %v2109_v28 = vmax.f32 %v2063_v17, %v2101_v23  ;;  %v2073_v29 = vadd.f32 %v2072_v27, %v9164_v26  ;;  %7720 = vmatmul.mubr.msk.f32.gmra.mrb[46].mxu0 %vm669_vm2, %v1825_v20  ;;  %8279 = vmatprep.mubr.msk.f32.mxu1 %vm370_vm1, %v6940_v19 }
 0x13e   : > { %8447 = vmatpush3.bf16.msra.mxu0 %v8988_v5  ;;  %v2104_v33 = vmul.f32 0.2, %v2078_v25 }
 0x13f   : > { %v2103_v34 = vmul.f32 0.2, %v2073_v29  ;;  %v7732_v35 = vpop.f32.mrb[44].mxu1  ;;  %7752 = vmatprep.mubr.msk.f32.mxu0 %vm669_vm2, %v2109_v28  ;;  %8449 = vmatprep.subr.bf16.mxu0 %v8942_v53 }
 0x140   : > { %v2088_v37 = vadd.f32 %v7732_v35, %v9172_v36  ;;  %v2082_v38 = vpop.f32.mrb[45].mxu1  ;;  %8280 = vmatmul.mubr.msk.f32.gmra.mrb[150].mxu1 %vm370_vm1, %v6941_v30  ;;  %v2112_v44 = vmax.f32 %v2078_v25, %v2104_v33 }
 0x141   : > { %v2111_v39 = vmax.f32 %v2073_v29, %v2103_v34  ;;  %v2083_v41 = vadd.f32 %v2082_v38, %v9174_v40  ;;  %7753 = vmatmul.mubr.msk.f32.vlgmr.msra.gmra.mrb[48].mxu0 %vm669_vm2, %v2110_v32  ;;  %8312 = vmatprep.mubr.msk.f32.mxu1 %vm370_vm1, %v6959_v31 }
 0x142   : > { %8451 = vmatpush3.bf16.msra.mxu0 %v8942_v53  ;;  %v2106_v45 = vmul.f32 0.2, %v2088_v37 }
 0x143   : > { %v2105_v46 = vmul.f32 0.2, %v2083_v41  ;;  %v7735_v47 = vpop.f32.mrb[46].mxu1  ;;  %7755 = vmatprep.mubr.msk.f32.mxu0 %vm669_vm2, %v2111_v39  ;;  %8453 = vmatprep.subr.bf16.mxu0 %v8956_v58 }
 0x144   : > { %v2098_v48 = vadd.f32 %v7735_v47, %v9184_v49  ;;  %v2092_v50 = vpop.f32.mrb[47].mxu1  ;;  %8313 = vmatmul.mubr.msk.f32.vlgmr.msra.gmra.mrb[152].mxu1 %vm370_vm1, %v6960_v42  ;;  %v2114_v56 = vmax.f32 %v2088_v37, %v2106_v45 }
 0x145   : > { %v2113_v51 = vmax.f32 %v2083_v41, %v2105_v46  ;;  %v2093_v1 = vadd.f32 %v2092_v50, %v9188_v55  ;;  %7756 = vmatmul.mubr.msk.f32.gmra.mrb[50].mxu0 %vm669_vm2, %v2112_v44  ;;  %8315 = vmatprep.mubr.msk.f32.mxu1 %vm370_vm1, %v6961_v43 }
 0x146   : > { %8455 = vmatpush3.bf16.msra.mxu0 %v8956_v58  ;;  %8676 = vmatpush3.bf16.msra.mxu1 %v8942_v53  ;;  %v2108_v57 = vmul.f32 0.2, %v2098_v48 }
 0x147   : > { %v2107_v59 = vmul.f32 0.2, %v2093_v1  ;;  %7758 = vmatprep.mubr.msk.f32.mxu0 %vm669_vm2, %v2113_v51  ;;  %v7768_v60 = vpop.f32.mrb[48].mxu1  ;;  %8457 = vmatprep.subr.bf16.mxu0 %v8975_v63 }
 0x148   : > { %v2359_v61 = vadd.f32 %v7768_v60, %v9152_v11  ;;  %v2353_v62 = vpop.f32.mrb[49].mxu1  ;;  %8316 = vmatmul.mubr.msk.f32.gmra.mrb[154].mxu1 %vm370_vm1, %v6962_v52  ;;  %8673 = vmatprep.subr.bf16.mxu1 %v8956_v58  ;;  %v2116_v6 = vmax.f32 %v2098_v48, %v2108_v57 }
 0x149   : > { %v2115_v0 = vmax.f32 %v2093_v1, %v2107_v59  ;;  %v2354_v2 = vadd.f32 %v2353_v62, %v9154_v14  ;;  %7759 = vmatmul.mubr.msk.f32.gmra.mrb[52].mxu0 %vm669_vm2, %v2114_v56  ;;  %8318 = vmatprep.mubr.msk.f32.mxu1 %vm370_vm1, %v6963_v54 }
 0x14a   : > { %8459 = vmatpush3.bf16.msra.mxu0 %v8975_v63  ;;  %8677 = vmatpush3.bf16.msra.mxu1 %v8956_v58  ;;  %v2393_v7 = vmul.f32 0.2, %v2359_v61 }
 0x14b   : > { %v2392_v8 = vmul.f32 0.2, %v2354_v2  ;;  %7761 = vmatprep.mubr.msk.f32.mxu0 %vm669_vm2, %v2115_v0  ;;  %v7771_v9 = vpop.f32.mrb[50].mxu1  ;;  %8461 = vmatprep.subr.bf16.mxu0 %v8988_v5 }
 0x14c   : > { %v2369_v10 = vadd.f32 %v7771_v9, %v9162_v22  ;;  %v2363_v12 = vpop.f32.mrb[51].mxu1  ;;  %8319 = vmatmul.mubr.msk.f32.gmra.mrb[156].mxu1 %vm370_vm1, %v6964_v3  ;;  %8674 = vmatprep.subr.bf16.mxu1 %v8975_v63  ;;  %v2401_v17 = vmax.f32 %v2359_v61, %v2393_v7 }
 0x14d   : > { %v2400_v13 = vmax.f32 %v2354_v2, %v2392_v8  ;;  %v2364_v15 = vadd.f32 %v2363_v12, %v9164_v26  ;;  %7762 = vmatmul.mubr.msk.f32.gmra.mrb[54].mxu0 %vm669_vm2, %v2116_v6  ;;  %8321 = vmatprep.mubr.msk.f32.mxu1 %vm370_vm1, %v6965_v4 }
 0x14e   : > { %8463 = vmatpush3.bf16.msra.mxu0 %v8988_v5  ;;  %8678 = vmatpush3.bf16.msra.mxu1 %v8975_v63  ;;  %v2395_v18 = vmul.f32 0.2, %v2369_v10 }
 0x14f   : > { %v2394_v19 = vmul.f32 0.2, %v2364_v15  ;;  %v7774_v20 = vpop.f32.mrb[52].mxu1  ;;  %7794 = vmatprep.mubr.msk.f32.mxu0 %vm669_vm2, %v2400_v13  ;;  %8465 = vmatprep.subr.bf16.mxu0 %v8942_v53 }
 0x150   : > { %v2379_v21 = vadd.f32 %v7774_v20, %v9172_v36  ;;  %v2373_v23 = vpop.f32.mrb[53].mxu1  ;;  %8322 = vmatmul.mubr.msk.f32.gmra.mrb[158].mxu1 %vm370_vm1, %v6966_v16  ;;  %8675 = vmatprep.subr.bf16.mxu1 %v8988_v5  ;;  %v2403_v27 = vmax.f32 %v2369_v10, %v2395_v18 }
 0x151   : > { %v2402_v24 = vmax.f32 %v2364_v15, %v2394_v19  ;;  %v2374_v25 = vadd.f32 %v2373_v23, %v9174_v40  ;;  %7795 = vmatmul.mubr.msk.f32.vlgmr.msra.gmra.mrb[56].mxu0 %vm669_vm2, %v2401_v17 }
 0x152   : > { %8467 = vmatpush3.bf16.msra.mxu0 %v8942_v53  ;;  %8679 = vmatpush3.bf16.msra.mxu1 %v8988_v5  ;;  %v2397_v28 = vmul.f32 0.2, %v2379_v21 }
 0x153   : > { %v2396_v29 = vmul.f32 0.2, %v2374_v25  ;;  %v7777_v30 = vpop.f32.mrb[54].mxu1  ;;  %7797 = vmatprep.mubr.msk.f32.mxu0 %vm669_vm2, %v2402_v24  ;;  %8469 = vmatprep.subr.bf16.mxu0 %v8956_v58 }
 0x154   : > { %v2389_v31 = vadd.f32 %v7777_v30, %v9184_v49  ;;  %v2383_v32 = vpop.f32.mrb[55].mxu1  ;;  %v2405_v35 = vmax.f32 %v2379_v21, %v2397_v28 }
 0x155   : > { %v2404_v33 = vmax.f32 %v2374_v25, %v2396_v29  ;;  %v2384_v34 = vadd.f32 %v2383_v32, %v9188_v55  ;;  %7798 = vmatmul.mubr.msk.f32.gmra.mrb[58].mxu0 %vm669_vm2, %v2403_v27 }
 0x156   : > { %8471 = vmatpush3.bf16.msra.mxu0 %v8956_v58  ;;  %v2399_v37 = vmul.f32 0.2, %v2389_v31 }
 0x157   : > { %v2398_v38 = vmul.f32 0.2, %v2384_v34  ;;  %7800 = vmatprep.mubr.msk.f32.mxu0 %vm669_vm2, %v2404_v33  ;;  %v7810_v39 = vpop.f32.mrb[56].mxu1  ;;  %8473 = vmatprep.subr.bf16.mxu0 %v8975_v63 }
 0x158   : > { %v2650_v41 = vadd.f32 %v7810_v39, %v9152_v11  ;;  %v2644_v42 = vpop.f32.mrb[57].mxu1  ;;  %v2407_v45 = vmax.f32 %v2389_v31, %v2399_v37 }
 0x159   : > { %v2406_v43 = vmax.f32 %v2384_v34, %v2398_v38  ;;  %v2645_v44 = vadd.f32 %v2644_v42, %v9154_v14  ;;  %7801 = vmatmul.mubr.msk.f32.gmra.mrb[60].mxu0 %vm669_vm2, %v2405_v35 }
 0x15a   : > { %8475 = vmatpush3.bf16.msra.mxu0 %v8975_v63  ;;  %v2684_v46 = vmul.f32 0.2, %v2650_v41 }
 0x15b   : > { %v2683_v47 = vmul.f32 0.2, %v2645_v44  ;;  %7803 = vmatprep.mubr.msk.f32.mxu0 %vm669_vm2, %v2406_v43  ;;  %v7813_v48 = vpop.f32.mrb[58].mxu1  ;;  %8477 = vmatprep.subr.bf16.mxu0 %v8988_v5 }
 0x15c   : > { %v2660_v50 = vadd.f32 %v7813_v48, %v9162_v22  ;;  %v2654_v51 = vpop.f32.mrb[59].mxu1  ;;  %v2692_v54 = vmax.f32 %v2650_v41, %v2684_v46 }
 0x15d   : > { %v2691_v1 = vmax.f32 %v2645_v44, %v2683_v47  ;;  %v2655_v52 = vadd.f32 %v2654_v51, %v9164_v26  ;;  %7804 = vmatmul.mubr.msk.f32.gmra.mrb[62].mxu0 %vm669_vm2, %v2407_v45 }
 0x15e   : > { %8479 = vmatpush3.bf16.msra.mxu0 %v8988_v5  ;;  %v2686_v56 = vmul.f32 0.2, %v2660_v50 }
 0x15f   : > { %v2685_v57 = vmul.f32 0.2, %v2655_v52  ;;  %v7816_v59 = vpop.f32.mrb[60].mxu1  ;;  %7836 = vmatprep.mubr.msk.f32.mxu0 %vm669_vm2, %v2691_v1  ;;  %8481 = vmatprep.subr.bf16.mxu0 %v8942_v53 }
 0x160   : > { %v2670_v60 = vadd.f32 %v7816_v59, %v9172_v36  ;;  %v2664_v61 = vpop.f32.mrb[61].mxu1  ;;  %v2694_v2 = vmax.f32 %v2660_v50, %v2686_v56 }
 0x161   : > { %v2693_v62 = vmax.f32 %v2655_v52, %v2685_v57  ;;  %v2665_v0 = vadd.f32 %v2664_v61, %v9174_v40  ;;  %7837 = vmatmul.mubr.msk.f32.vlgmr.msra.gmra.mrb[64].mxu0 %vm669_vm2, %v2692_v54 }
 0x162   : > { %8483 = vmatpush3.bf16.msra.mxu0 %v8942_v53  ;;  %v2688_v3 = vmul.f32 0.2, %v2670_v60 }
 0x163   : > { %v2687_v4 = vmul.f32 0.2, %v2665_v0  ;;  %v7819_v6 = vpop.f32.mrb[62].mxu1  ;;  %7839 = vmatprep.mubr.msk.f32.mxu0 %vm669_vm2, %v2693_v62  ;;  %8485 = vmatprep.subr.bf16.mxu0 %v8956_v58 }
 0x164   : > { %v2680_v7 = vadd.f32 %v7819_v6, %v9184_v49  ;;  %v2674_v8 = vpop.f32.mrb[63].mxu1  ;;  %v2696_v12 = vmax.f32 %v2670_v60, %v2688_v3 }
 0x165   : > { %v2695_v9 = vmax.f32 %v2665_v0, %v2687_v4  ;;  %v2675_v10 = vadd.f32 %v2674_v8, %v9188_v55  ;;  %7840 = vmatmul.mubr.msk.f32.gmra.mrb[66].mxu0 %vm669_vm2, %v2694_v2 }
 0x166   : > { %8487 = vmatpush3.bf16.msra.mxu0 %v8956_v58  ;;  %v2690_v13 = vmul.f32 0.2, %v2680_v7 }
 0x167   : > { %v2689_v15 = vmul.f32 0.2, %v2675_v10  ;;  %7842 = vmatprep.mubr.msk.f32.mxu0 %vm669_vm2, %v2695_v9  ;;  %v7852_v16 = vpop.f32.mrb[64].mxu1  ;;  %8489 = vmatprep.subr.bf16.mxu0 %v8975_v63 }
 0x168   : > { %v2941_v17 = vadd.f32 %v7852_v16, %v9152_v11  ;;  %v2935_v18 = vpop.f32.mrb[65].mxu1  ;;  %v2698_v21 = vmax.f32 %v2680_v7, %v2690_v13 }
 0x169   : > { %v2697_v19 = vmax.f32 %v2675_v10, %v2689_v15  ;;  %v2936_v20 = vadd.f32 %v2935_v18, %v9154_v14  ;;  %7843 = vmatmul.mubr.msk.f32.gmra.mrb[68].mxu0 %vm669_vm2, %v2696_v12 }
 0x16a   : > { %8491 = vmatpush3.bf16.msra.mxu0 %v8975_v63  ;;  %v2975_v23 = vmul.f32 0.2, %v2941_v17 }
 0x16b   : > { %v2974_v24 = vmul.f32 0.2, %v2936_v20  ;;  %7845 = vmatprep.mubr.msk.f32.mxu0 %vm669_vm2, %v2697_v19  ;;  %v7855_v25 = vpop.f32.mrb[66].mxu1  ;;  %8493 = vmatprep.subr.bf16.mxu0 %v8988_v5 }
 0x16c   : > { %v2951_v27 = vadd.f32 %v7855_v25, %v9162_v22  ;;  %v2945_v28 = vpop.f32.mrb[67].mxu1  ;;  %v2983_v31 = vmax.f32 %v2941_v17, %v2975_v23 }
 0x16d   : > { %v2982_v29 = vmax.f32 %v2936_v20, %v2974_v24  ;;  %v2946_v30 = vadd.f32 %v2945_v28, %v9164_v26  ;;  %7846 = vmatmul.mubr.msk.f32.gmra.mrb[70].mxu0 %vm669_vm2, %v2698_v21 }
 0x16e   : > { %8495 = vmatpush3.bf16.msra.mxu0 %v8988_v5  ;;  %v2977_v32 = vmul.f32 0.2, %v2951_v27 }
 0x16f   : > { %v2976_v33 = vmul.f32 0.2, %v2946_v30  ;;  %v7858_v34 = vpop.f32.mrb[68].mxu1  ;;  %7878 = vmatprep.mubr.msk.f32.mxu0 %vm669_vm2, %v2982_v29  ;;  %8497 = vmatprep.subr.bf16.mxu0 %v8942_v53 }
 0x170   : > { %v2961_v35 = vadd.f32 %v7858_v34, %v9172_v36  ;;  %v2955_v37 = vpop.f32.mrb[69].mxu1  ;;  %v2985_v41 = vmax.f32 %v2951_v27, %v2977_v32 }
 0x171   : > { %v2984_v38 = vmax.f32 %v2946_v30, %v2976_v33  ;;  %v2956_v39 = vadd.f32 %v2955_v37, %v9174_v40  ;;  %7879 = vmatmul.mubr.msk.f32.vlgmr.msra.gmra.mrb[72].mxu0 %vm669_vm2, %v2983_v31 }
 0x172   : > { %8499 = vmatpush3.bf16.msra.mxu0 %v8942_v53  ;;  %v2979_v42 = vmul.f32 0.2, %v2961_v35 }
 0x173   : > { %v2978_v43 = vmul.f32 0.2, %v2956_v39  ;;  %v7861_v44 = vpop.f32.mrb[70].mxu1  ;;  %7881 = vmatprep.mubr.msk.f32.mxu0 %vm669_vm2, %v2984_v38  ;;  %8501 = vmatprep.subr.bf16.mxu0 %v8956_v58 }
 0x174   : > { %v2971_v45 = vadd.f32 %v7861_v44, %v9184_v49  ;;  %v2965_v46 = vpop.f32.mrb[71].mxu1  ;;  %v2987_v50 = vmax.f32 %v2961_v35, %v2979_v42 }
 0x175   : > { %v2986_v47 = vmax.f32 %v2956_v39, %v2978_v43  ;;  %v2966_v48 = vadd.f32 %v2965_v46, %v9188_v55  ;;  %7882 = vmatmul.mubr.msk.f32.gmra.mrb[74].mxu0 %vm669_vm2, %v2985_v41 }
 0x176   : > { %8503 = vmatpush3.bf16.msra.mxu0 %v8956_v58  ;;  %v2981_v51 = vmul.f32 0.2, %v2971_v45 }
 0x177   : > { %v2980_v1 = vmul.f32 0.2, %v2966_v48  ;;  %7884 = vmatprep.mubr.msk.f32.mxu0 %vm669_vm2, %v2986_v47  ;;  %v7894_v52 = vpop.f32.mrb[72].mxu1  ;;  %8505 = vmatprep.subr.bf16.mxu0 %v8975_v63 }
 0x178   : > { %v3232_v54 = vadd.f32 %v7894_v52, %v9152_v11  ;;  %v3226_v56 = vpop.f32.mrb[73].mxu1  ;;  %v2989_v60 = vmax.f32 %v2971_v45, %v2981_v51 }
 0x179   : > { %v2988_v57 = vmax.f32 %v2966_v48, %v2980_v1  ;;  %v3227_v59 = vadd.f32 %v3226_v56, %v9154_v14  ;;  %7885 = vmatmul.mubr.msk.f32.gmra.mrb[76].mxu0 %vm669_vm2, %v2987_v50 }
 0x17a   : > { %8507 = vmatpush3.bf16.msra.mxu0 %v8975_v63  ;;  %v3266_v61 = vmul.f32 0.2, %v3232_v54 }
 0x17b   : > { %v3265_v62 = vmul.f32 0.2, %v3227_v59  ;;  %7887 = vmatprep.mubr.msk.f32.mxu0 %vm669_vm2, %v2988_v57  ;;  %v7897_v0 = vpop.f32.mrb[74].mxu1  ;;  %8509 = vmatprep.subr.bf16.mxu0 %v8988_v5 }
 0x17c   : > { %v3242_v2 = vadd.f32 %v7897_v0, %v9162_v22  ;;  %v3236_v3 = vpop.f32.mrb[75].mxu1  ;;  %v3274_v7 = vmax.f32 %v3232_v54, %v3266_v61 }
 0x17d   : > { %v3273_v4 = vmax.f32 %v3227_v59, %v3265_v62  ;;  %v3237_v6 = vadd.f32 %v3236_v3, %v9164_v26  ;;  %7888 = vmatmul.mubr.msk.f32.gmra.mrb[78].mxu0 %vm669_vm2, %v2989_v60 }
 0x17e   : > { %8511 = vmatpush3.bf16.msra.mxu0 %v8988_v5  ;;  %v3268_v8 = vmul.f32 0.2, %v3242_v2 }
 0x17f   : > { %v3267_v9 = vmul.f32 0.2, %v3237_v6  ;;  %v7900_v10 = vpop.f32.mrb[76].mxu1  ;;  %7920 = vmatprep.mubr.msk.f32.mxu0 %vm669_vm2, %v3273_v4  ;;  %8513 = vmatprep.subr.bf16.mxu0 %v8942_v53 }
 0x180   : > { %v3252_v12 = vadd.f32 %v7900_v10, %v9172_v36  ;;  %v3246_v13 = vpop.f32.mrb[77].mxu1  ;;  %v3276_v17 = vmax.f32 %v3242_v2, %v3268_v8 }
 0x181   : > { %v3275_v15 = vmax.f32 %v3237_v6, %v3267_v9  ;;  %v3247_v16 = vadd.f32 %v3246_v13, %v9174_v40  ;;  %7921 = vmatmul.mubr.msk.f32.vlgmr.msra.gmra.mrb[80].mxu0 %vm669_vm2, %v3274_v7 }
 0x182   : > { %8515 = vmatpush3.bf16.msra.mxu0 %v8942_v53  ;;  %v3270_v18 = vmul.f32 0.2, %v3252_v12 }
 0x183   : > { %v3269_v19 = vmul.f32 0.2, %v3247_v16  ;;  %v7903_v20 = vpop.f32.mrb[78].mxu1  ;;  %7923 = vmatprep.mubr.msk.f32.mxu0 %vm669_vm2, %v3275_v15  ;;  %8517 = vmatprep.subr.bf16.mxu0 %v8956_v58 }
 0x184   : > { %v3262_v21 = vadd.f32 %v7903_v20, %v9184_v49  ;;  %v3256_v23 = vpop.f32.mrb[79].mxu1  ;;  %v3278_v27 = vmax.f32 %v3252_v12, %v3270_v18 }
 0x185   : > { %v3277_v24 = vmax.f32 %v3247_v16, %v3269_v19  ;;  %v3257_v25 = vadd.f32 %v3256_v23, %v9188_v55  ;;  %7924 = vmatmul.mubr.msk.f32.gmra.mrb[82].mxu0 %vm669_vm2, %v3276_v17 }
 0x186   : > { %8519 = vmatpush3.bf16.msra.mxu0 %v8956_v58  ;;  %v3272_v28 = vmul.f32 0.2, %v3262_v21 }
 0x187   : > { %v3271_v29 = vmul.f32 0.2, %v3257_v25  ;;  %7926 = vmatprep.mubr.msk.f32.mxu0 %vm669_vm2, %v3277_v24  ;;  %v7936_v30 = vpop.f32.mrb[80].mxu1  ;;  %8521 = vmatprep.subr.bf16.mxu0 %v8975_v63 }
 0x188   : > { %v3523_v31 = vadd.f32 %v7936_v30, %v9152_v11  ;;  %v3517_v32 = vpop.f32.mrb[81].mxu1  ;;  %v3280_v35 = vmax.f32 %v3262_v21, %v3272_v28 }
 0x189   : > { %v3279_v33 = vmax.f32 %v3257_v25, %v3271_v29  ;;  %v3518_v34 = vadd.f32 %v3517_v32, %v9154_v14  ;;  %7927 = vmatmul.mubr.msk.f32.gmra.mrb[84].mxu0 %vm669_vm2, %v3278_v27 }
 0x18a   : > { %8523 = vmatpush3.bf16.msra.mxu0 %v8975_v63  ;;  %v3557_v37 = vmul.f32 0.2, %v3523_v31 }
 0x18b   : > { %v3556_v38 = vmul.f32 0.2, %v3518_v34  ;;  %7929 = vmatprep.mubr.msk.f32.mxu0 %vm669_vm2, %v3279_v33  ;;  %v7939_v39 = vpop.f32.mrb[82].mxu1  ;;  %8525 = vmatprep.subr.bf16.mxu0 %v8988_v5 }
 0x18c   : > { %v3533_v41 = vadd.f32 %v7939_v39, %v9162_v22  ;;  %v3527_v42 = vpop.f32.mrb[83].mxu1  ;;  %v3565_v45 = vmax.f32 %v3523_v31, %v3557_v37 }
 0x18d   : > { %v3564_v43 = vmax.f32 %v3518_v34, %v3556_v38  ;;  %v3528_v44 = vadd.f32 %v3527_v42, %v9164_v26  ;;  %7930 = vmatmul.mubr.msk.f32.gmra.mrb[86].mxu0 %vm669_vm2, %v3280_v35 }
 0x18e   : > { %8527 = vmatpush3.bf16.msra.mxu0 %v8988_v5  ;;  %v3559_v46 = vmul.f32 0.2, %v3533_v41 }
 0x18f   : > { %v3558_v47 = vmul.f32 0.2, %v3528_v44  ;;  %v7942_v48 = vpop.f32.mrb[84].mxu1  ;;  %7962 = vmatprep.mubr.msk.f32.mxu0 %vm669_vm2, %v3564_v43  ;;  %8529 = vmatprep.subr.bf16.mxu0 %v8942_v53 }
 0x190   : > { %v3543_v50 = vadd.f32 %v7942_v48, %v9172_v36  ;;  %v3537_v51 = vpop.f32.mrb[85].mxu1  ;;  %v3567_v54 = vmax.f32 %v3533_v41, %v3559_v46 }
 0x191   : > { %v3566_v1 = vmax.f32 %v3528_v44, %v3558_v47  ;;  %v3538_v52 = vadd.f32 %v3537_v51, %v9174_v40  ;;  %7963 = vmatmul.mubr.msk.f32.vlgmr.msra.gmra.mrb[88].mxu0 %vm669_vm2, %v3565_v45 }
 0x192   : > { %8531 = vmatpush3.bf16.msra.mxu0 %v8942_v53  ;;  %v3561_v56 = vmul.f32 0.2, %v3543_v50 }
 0x193   : > { %v3560_v57 = vmul.f32 0.2, %v3538_v52  ;;  %v7945_v59 = vpop.f32.mrb[86].mxu1  ;;  %7965 = vmatprep.mubr.msk.f32.mxu0 %vm669_vm2, %v3566_v1  ;;  %8533 = vmatprep.subr.bf16.mxu0 %v8956_v58 }
 0x194   : > { %v3553_v60 = vadd.f32 %v7945_v59, %v9184_v49  ;;  %v3547_v61 = vpop.f32.mrb[87].mxu1  ;;  %v3569_v2 = vmax.f32 %v3543_v50, %v3561_v56 }
 0x195   : > { %v3568_v62 = vmax.f32 %v3538_v52, %v3560_v57  ;;  %v3548_v0 = vadd.f32 %v3547_v61, %v9188_v55  ;;  %7966 = vmatmul.mubr.msk.f32.gmra.mrb[90].mxu0 %vm669_vm2, %v3567_v54 }
 0x196   : > { %8535 = vmatpush3.bf16.msra.mxu0 %v8956_v58  ;;  %v3563_v3 = vmul.f32 0.2, %v3553_v60 }
 0x197   : > { %v3562_v4 = vmul.f32 0.2, %v3548_v0  ;;  %7968 = vmatprep.mubr.msk.f32.mxu0 %vm669_vm2, %v3568_v62  ;;  %v7978_v6 = vpop.f32.mrb[88].mxu1  ;;  %8537 = vmatprep.subr.bf16.mxu0 %v8975_v63 }
 0x198   : > { %v3814_v7 = vadd.f32 %v7978_v6, %v9152_v11  ;;  %v3808_v8 = vpop.f32.mrb[89].mxu1  ;;  %v3571_v12 = vmax.f32 %v3553_v60, %v3563_v3 }
 0x199   : > { %v3570_v9 = vmax.f32 %v3548_v0, %v3562_v4  ;;  %v3809_v10 = vadd.f32 %v3808_v8, %v9154_v14  ;;  %7969 = vmatmul.mubr.msk.f32.gmra.mrb[92].mxu0 %vm669_vm2, %v3569_v2 }
 0x19a   : > { %8539 = vmatpush3.bf16.msra.mxu0 %v8975_v63  ;;  %v3848_v13 = vmul.f32 0.2, %v3814_v7 }
 0x19b   : > { %v3847_v15 = vmul.f32 0.2, %v3809_v10  ;;  %7971 = vmatprep.mubr.msk.f32.mxu0 %vm669_vm2, %v3570_v9  ;;  %v7981_v16 = vpop.f32.mrb[90].mxu1  ;;  %8541 = vmatprep.subr.bf16.mxu0 %v8988_v5 }
 0x19c   : > { %v3824_v17 = vadd.f32 %v7981_v16, %v9162_v22  ;;  %v3818_v18 = vpop.f32.mrb[91].mxu1  ;;  %v3856_v21 = vmax.f32 %v3814_v7, %v3848_v13 }
 0x19d   : > { %v3855_v19 = vmax.f32 %v3809_v10, %v3847_v15  ;;  %v3819_v20 = vadd.f32 %v3818_v18, %v9164_v26  ;;  %7972 = vmatmul.mubr.msk.f32.gmra.mrb[94].mxu0 %vm669_vm2, %v3571_v12 }
 0x19e   : > { %8543 = vmatpush3.bf16.msra.mxu0 %v8988_v5  ;;  %v3850_v23 = vmul.f32 0.2, %v3824_v17 }
 0x19f   : > { %v3849_v24 = vmul.f32 0.2, %v3819_v20  ;;  %v7984_v25 = vpop.f32.mrb[92].mxu1  ;;  %8004 = vmatprep.mubr.msk.f32.mxu0 %vm669_vm2, %v3855_v19  ;;  %8545 = vmatprep.subr.bf16.mxu0 %v8942_v53 }
 0x1a0   : > { %v3834_v27 = vadd.f32 %v7984_v25, %v9172_v36  ;;  %v3828_v28 = vpop.f32.mrb[93].mxu1  ;;  %v3858_v31 = vmax.f32 %v3824_v17, %v3850_v23 }
 0x1a1   : > { %v3857_v29 = vmax.f32 %v3819_v20, %v3849_v24  ;;  %v3829_v30 = vadd.f32 %v3828_v28, %v9174_v40  ;;  %8005 = vmatmul.mubr.msk.f32.vlgmr.msra.gmra.mrb[96].mxu0 %vm669_vm2, %v3856_v21 }
 0x1a2   : > { %8547 = vmatpush3.bf16.msra.mxu0 %v8942_v53  ;;  %v3852_v32 = vmul.f32 0.2, %v3834_v27 }
 0x1a3   : > { %v3851_v33 = vmul.f32 0.2, %v3829_v30  ;;  %v7987_v34 = vpop.f32.mrb[94].mxu1  ;;  %8007 = vmatprep.mubr.msk.f32.mxu0 %vm669_vm2, %v3857_v29  ;;  %8549 = vmatprep.subr.bf16.mxu0 %v8956_v58 }
 0x1a4   : > { %v3844_v35 = vadd.f32 %v7987_v34, %v9184_v49  ;;  %v3838_v37 = vpop.f32.mrb[95].mxu1  ;;  %v3860_v41 = vmax.f32 %v3834_v27, %v3852_v32 }
 0x1a5   : > { %v3859_v38 = vmax.f32 %v3829_v30, %v3851_v33  ;;  %v3839_v39 = vadd.f32 %v3838_v37, %v9188_v55  ;;  %8008 = vmatmul.mubr.msk.f32.gmra.mrb[98].mxu0 %vm669_vm2, %v3858_v31 }
 0x1a6   : > { %8551 = vmatpush3.bf16.msra.mxu0 %v8956_v58  ;;  %v3854_v42 = vmul.f32 0.2, %v3844_v35 }
 0x1a7   : > { %v3853_v43 = vmul.f32 0.2, %v3839_v39  ;;  %8010 = vmatprep.mubr.msk.f32.mxu0 %vm669_vm2, %v3859_v38  ;;  %v8020_v44 = vpop.f32.mrb[96].mxu1  ;;  %8553 = vmatprep.subr.bf16.mxu0 %v8975_v63 }
 0x1a8   : > { %v4105_v45 = vadd.f32 %v8020_v44, %v9152_v11  ;;  %v4099_v46 = vpop.f32.mrb[97].mxu1  ;;  %v3862_v50 = vmax.f32 %v3844_v35, %v3854_v42 }
 0x1a9   : > { %v3861_v47 = vmax.f32 %v3839_v39, %v3853_v43  ;;  %v4100_v48 = vadd.f32 %v4099_v46, %v9154_v14  ;;  %8011 = vmatmul.mubr.msk.f32.gmra.mrb[100].mxu0 %vm669_vm2, %v3860_v41 }
 0x1aa   : > { %8555 = vmatpush3.bf16.msra.mxu0 %v8975_v63  ;;  %v4139_v51 = vmul.f32 0.2, %v4105_v45 }
 0x1ab   : > { %v4138_v1 = vmul.f32 0.2, %v4100_v48  ;;  %8013 = vmatprep.mubr.msk.f32.mxu0 %vm669_vm2, %v3861_v47  ;;  %v8023_v52 = vpop.f32.mrb[98].mxu1  ;;  %8557 = vmatprep.subr.bf16.mxu0 %v8988_v5 }
 0x1ac   : > { %v4115_v54 = vadd.f32 %v8023_v52, %v9162_v22  ;;  %v4109_v56 = vpop.f32.mrb[99].mxu1  ;;  %v4147_v60 = vmax.f32 %v4105_v45, %v4139_v51 }
 0x1ad   : > { %v4146_v57 = vmax.f32 %v4100_v48, %v4138_v1  ;;  %v4110_v59 = vadd.f32 %v4109_v56, %v9164_v26  ;;  %8014 = vmatmul.mubr.msk.f32.gmra.mrb[102].mxu0 %vm669_vm2, %v3862_v50 }
 0x1ae   : > { %8559 = vmatpush3.bf16.msra.mxu0 %v8988_v5  ;;  %v4141_v61 = vmul.f32 0.2, %v4115_v54 }
 0x1af   : > { %v4140_v62 = vmul.f32 0.2, %v4110_v59  ;;  %v8026_v0 = vpop.f32.mrb[100].mxu1  ;;  %8046 = vmatprep.mubr.msk.f32.mxu0 %vm669_vm2, %v4146_v57  ;;  %8561 = vmatprep.subr.bf16.mxu0 %v8942_v53 }
 0x1b0   : > { %v4125_v2 = vadd.f32 %v8026_v0, %v9172_v36  ;;  %v4119_v3 = vpop.f32.mrb[101].mxu1  ;;  %v4149_v7 = vmax.f32 %v4115_v54, %v4141_v61 }
 0x1b1   : > { %v4148_v4 = vmax.f32 %v4110_v59, %v4140_v62  ;;  %v4120_v6 = vadd.f32 %v4119_v3, %v9174_v40  ;;  %8047 = vmatmul.mubr.msk.f32.vlgmr.msra.gmra.mrb[104].mxu0 %vm669_vm2, %v4147_v60 }
 0x1b2   : > { %8563 = vmatpush3.bf16.msra.mxu0 %v8942_v53  ;;  %v4143_v8 = vmul.f32 0.2, %v4125_v2 }
 0x1b3   : > { %v4142_v9 = vmul.f32 0.2, %v4120_v6  ;;  %v8029_v10 = vpop.f32.mrb[102].mxu1  ;;  %8049 = vmatprep.mubr.msk.f32.mxu0 %vm669_vm2, %v4148_v4  ;;  %8565 = vmatprep.subr.bf16.mxu0 %v8956_v58 }
 0x1b4   : > { %v4135_v12 = vadd.f32 %v8029_v10, %v9184_v49  ;;  %v4129_v13 = vpop.f32.mrb[103].mxu1  ;;  %v4151_v17 = vmax.f32 %v4125_v2, %v4143_v8 }
 0x1b5   : > { %v4150_v15 = vmax.f32 %v4120_v6, %v4142_v9  ;;  %v4130_v16 = vadd.f32 %v4129_v13, %v9188_v55  ;;  %8050 = vmatmul.mubr.msk.f32.gmra.mrb[106].mxu0 %vm669_vm2, %v4149_v7 }
 0x1b6   : > { %8567 = vmatpush3.bf16.msra.mxu0 %v8956_v58  ;;  %v4145_v18 = vmul.f32 0.2, %v4135_v12 }
 0x1b7   : > { %v4144_v19 = vmul.f32 0.2, %v4130_v16  ;;  %8052 = vmatprep.mubr.msk.f32.mxu0 %vm669_vm2, %v4150_v15  ;;  %v8062_v20 = vpop.f32.mrb[104].mxu1  ;;  %8569 = vmatprep.subr.bf16.mxu0 %v8975_v63 }
 0x1b8   : > { %v4396_v21 = vadd.f32 %v8062_v20, %v9152_v11  ;;  %v4390_v23 = vpop.f32.mrb[105].mxu1  ;;  %v4153_v27 = vmax.f32 %v4135_v12, %v4145_v18 }
 0x1b9   : > { %v4152_v24 = vmax.f32 %v4130_v16, %v4144_v19  ;;  %v4391_v25 = vadd.f32 %v4390_v23, %v9154_v14  ;;  %8053 = vmatmul.mubr.msk.f32.gmra.mrb[108].mxu0 %vm669_vm2, %v4151_v17 }
 0x1ba   : > { %8571 = vmatpush3.bf16.msra.mxu0 %v8975_v63  ;;  %v4430_v28 = vmul.f32 0.2, %v4396_v21 }
 0x1bb   : > { %v4429_v29 = vmul.f32 0.2, %v4391_v25  ;;  %8055 = vmatprep.mubr.msk.f32.mxu0 %vm669_vm2, %v4152_v24  ;;  %v8065_v30 = vpop.f32.mrb[106].mxu1  ;;  %8573 = vmatprep.subr.bf16.mxu0 %v8988_v5 }
 0x1bc   : > { %v4406_v31 = vadd.f32 %v8065_v30, %v9162_v22  ;;  %v4400_v32 = vpop.f32.mrb[107].mxu1  ;;  %v4438_v35 = vmax.f32 %v4396_v21, %v4430_v28 }
 0x1bd   : > { %v4437_v33 = vmax.f32 %v4391_v25, %v4429_v29  ;;  %v4401_v34 = vadd.f32 %v4400_v32, %v9164_v26  ;;  %8056 = vmatmul.mubr.msk.f32.gmra.mrb[110].mxu0 %vm669_vm2, %v4153_v27 }
 0x1be   : > { %8575 = vmatpush3.bf16.msra.mxu0 %v8988_v5  ;;  %v4432_v37 = vmul.f32 0.2, %v4406_v31 }
 0x1bf   : > { %v4431_v38 = vmul.f32 0.2, %v4401_v34  ;;  %v8068_v39 = vpop.f32.mrb[108].mxu1  ;;  %8088 = vmatprep.mubr.msk.f32.mxu0 %vm669_vm2, %v4437_v33  ;;  %8577 = vmatprep.subr.bf16.mxu0 %v8942_v53 }
 0x1c0   : > { %v4416_v41 = vadd.f32 %v8068_v39, %v9172_v36  ;;  %v4410_v42 = vpop.f32.mrb[109].mxu1  ;;  %v4440_v45 = vmax.f32 %v4406_v31, %v4432_v37 }
 0x1c1   : > { %v4439_v43 = vmax.f32 %v4401_v34, %v4431_v38  ;;  %v4411_v44 = vadd.f32 %v4410_v42, %v9174_v40  ;;  %8089 = vmatmul.mubr.msk.f32.vlgmr.msra.gmra.mrb[112].mxu0 %vm669_vm2, %v4438_v35 }
 0x1c2   : > { %8579 = vmatpush3.bf16.msra.mxu0 %v8942_v53  ;;  %v4434_v46 = vmul.f32 0.2, %v4416_v41 }
 0x1c3   : > { %v4433_v47 = vmul.f32 0.2, %v4411_v44  ;;  %v8071_v48 = vpop.f32.mrb[110].mxu1  ;;  %8091 = vmatprep.mubr.msk.f32.mxu0 %vm669_vm2, %v4439_v43  ;;  %8581 = vmatprep.subr.bf16.mxu0 %v8956_v58 }
 0x1c4   : > { %v4426_v50 = vadd.f32 %v8071_v48, %v9184_v49  ;;  %v9627_v51 = vpop.f32.mrb[8].mxu0  ;;  %v4420_v1 = vpop.f32.mrb[111].mxu1  ;;  %v4442_v57 = vmax.f32 %v4416_v41, %v4434_v46 }
 0x1c5   : > { %v4441_v52 = vmax.f32 %v4411_v44, %v4433_v47  ;;  %v4421_v54 = vadd.f32 %v4420_v1, %v9188_v55  ;;  %v9630_v56 = vpop.f32.mrb[9].mxu0  ;;  %8092 = vmatmul.mubr.msk.f32.gmra.mrb[114].mxu0 %vm669_vm2, %v4440_v45 }
 0x1c6   : > { %8583 = vmatpush3.bf16.msra.mxu0 %v8956_v58  ;;  %v4436_v59 = vmul.f32 0.2, %v4426_v50 }
 0x1c7   : > { %v4435_v60 = vmul.f32 0.2, %v4421_v54  ;;  %8094 = vmatprep.mubr.msk.f32.mxu0 %vm669_vm2, %v4441_v52  ;;  %v8104_v61 = vpop.f32.mrb[112].mxu1  ;;  %8585 = vmatprep.subr.bf16.mxu0 %v8975_v63 }
 0x1c8   : > { %v4687_v62 = vadd.f32 %v8104_v61, %v9152_v11  ;;  %v9637_v0 = vpop.f32.mrb[10].mxu0  ;;  %v4681_v2 = vpop.f32.mrb[113].mxu1  ;;  %v4444_v7 = vmax.f32 %v4426_v50, %v4436_v59 }
 0x1c9   : > { %v4443_v3 = vmax.f32 %v4421_v54, %v4435_v60  ;;  %v4682_v4 = vadd.f32 %v4681_v2, %v9154_v14  ;;  %v9640_v6 = vpop.f32.mrb[11].mxu0  ;;  %8095 = vmatmul.mubr.msk.f32.gmra.mrb[116].mxu0 %vm669_vm2, %v4442_v57 }
 0x1ca   : > { %8587 = vmatpush3.bf16.msra.mxu0 %v8975_v63  ;;  %v4721_v8 = vmul.f32 0.2, %v4687_v62 }
 0x1cb   : > { %v4720_v9 = vmul.f32 0.2, %v4682_v4  ;;  %8097 = vmatprep.mubr.msk.f32.mxu0 %vm669_vm2, %v4443_v3  ;;  %v8107_v10 = vpop.f32.mrb[114].mxu1  ;;  %8589 = vmatprep.subr.bf16.mxu0 %v8988_v5 }
 0x1cc   : > { %v4697_v12 = vadd.f32 %v8107_v10, %v9162_v22  ;;  %v9647_v13 = vpop.f32.mrb[12].mxu0  ;;  %v4691_v15 = vpop.f32.mrb[115].mxu1  ;;  %v4729_v19 = vmax.f32 %v4687_v62, %v4721_v8 }
 0x1cd   : > { %v4728_v16 = vmax.f32 %v4682_v4, %v4720_v9  ;;  %v4692_v17 = vadd.f32 %v4691_v15, %v9164_v26  ;;  %v9650_v18 = vpop.f32.mrb[13].mxu0  ;;  %8098 = vmatmul.mubr.msk.f32.gmra.mrb[118].mxu0 %vm669_vm2, %v4444_v7 }
 0x1ce   : > { %8591 = vmatpush3.bf16.msra.mxu0 %v8988_v5  ;;  %v4723_v20 = vmul.f32 0.2, %v4697_v12 }
 0x1cf   : > { %v4722_v21 = vmul.f32 0.2, %v4692_v17  ;;  %v8110_v23 = vpop.f32.mrb[116].mxu1  ;;  %8130 = vmatprep.mubr.msk.f32.mxu0 %vm669_vm2, %v4728_v16  ;;  %8593 = vmatprep.subr.bf16.mxu0 %v8942_v53 }
 0x1d0   : > { %v4707_v24 = vadd.f32 %v8110_v23, %v9172_v36  ;;  %v9657_v25 = vpop.f32.mrb[14].mxu0  ;;  %v4701_v27 = vpop.f32.mrb[117].mxu1  ;;  %v4731_v31 = vmax.f32 %v4697_v12, %v4723_v20 }
 0x1d1   : > { %v4730_v28 = vmax.f32 %v4692_v17, %v4722_v21  ;;  %v4702_v29 = vadd.f32 %v4701_v27, %v9174_v40  ;;  %v9660_v30 = vpop.f32.mrb[15].mxu0  ;;  %8131 = vmatmul.mubr.msk.f32.vlgmr.msra.gmra.mrb[120].mxu0 %vm669_vm2, %v4729_v19 }
 0x1d2   : > { %8595 = vmatpush3.bf16.msra.mxu0 %v8942_v53  ;;  %v4725_v32 = vmul.f32 0.2, %v4707_v24 }
 0x1d3   : > { %v4724_v33 = vmul.f32 0.2, %v4702_v29  ;;  %v8113_v34 = vpop.f32.mrb[118].mxu1  ;;  %8133 = vmatprep.mubr.msk.f32.mxu0 %vm669_vm2, %v4730_v28  ;;  %8597 = vmatprep.subr.bf16.mxu0 %v8956_v58 }
 0x1d4   : > { %v4717_v35 = vadd.f32 %v8113_v34, %v9184_v49  ;;  %v9667_v37 = vpop.f32.mrb[16].mxu0  ;;  %v4711_v38 = vpop.f32.mrb[119].mxu1  ;;  %v4733_v45 = vmax.f32 %v4707_v24, %v4725_v32 }
 0x1d5   : > { %v4732_v39 = vmax.f32 %v4702_v29, %v4724_v33  ;;  %v1083_v41 = vmax.f32 %v9627_v51, %v9667_v37  ;;  %v4712_v42 = vadd.f32 %v4711_v38, %v9188_v55  ;;  %v9672_v43 = vpop.f32.mrb[17].mxu0  ;;  %8134 = vmatmul.mubr.msk.f32.gmra.mrb[122].mxu0 %vm669_vm2, %v4731_v31 }
 0x1d6   : > { %v1082_v44 = vmax.f32 %v9630_v56, %v9672_v43  ;;  %8599 = vmatpush3.bf16.msra.mxu0 %v8956_v58  ;;  %v4727_v46 = vmul.f32 0.2, %v4717_v35 }
 0x1d7   : > { %v4726_v47 = vmul.f32 0.2, %v4712_v42  ;;  %8136 = vmatprep.mubr.msk.f32.mxu0 %vm669_vm2, %v4732_v39  ;;  %v8146_v48 = vpop.f32.mrb[120].mxu1  ;;  %8601 = vmatprep.subr.bf16.mxu0 %v8975_v63 }
 0x1d8   : > { %v4978_v50 = vadd.f32 %v8146_v48, %v9152_v11  ;;  %v9681_v1 = vpop.f32.mrb[18].mxu0  ;;  %v4972_v52 = vpop.f32.mrb[121].mxu1  ;;  %v4735_v62 = vmax.f32 %v4717_v35, %v4727_v46 }
 0x1d9   : > { %v4734_v54 = vmax.f32 %v4712_v42, %v4726_v47  ;;  %v1085_v57 = vmax.f32 %v9637_v0, %v9681_v1  ;;  %v4973_v59 = vadd.f32 %v4972_v52, %v9154_v14  ;;  %v9686_v60 = vpop.f32.mrb[19].mxu0  ;;  %8137 = vmatmul.mubr.msk.f32.gmra.mrb[124].mxu0 %vm669_vm2, %v4733_v45 }
 0x1da   : > { %v1084_v61 = vmax.f32 %v9640_v6, %v9686_v60  ;;  %8603 = vmatpush3.bf16.msra.mxu0 %v8975_v63  ;;  %v5012_v2 = vmul.f32 0.2, %v4978_v50 }
 0x1db   : > { %v5011_v3 = vmul.f32 0.2, %v4973_v59  ;;  %8139 = vmatprep.mubr.msk.f32.mxu0 %vm669_vm2, %v4734_v54  ;;  %v8149_v4 = vpop.f32.mrb[122].mxu1  ;;  %8605 = vmatprep.subr.bf16.mxu0 %v8988_v5 }
 0x1dc   : > { %v4988_v7 = vadd.f32 %v8149_v4, %v9162_v22  ;;  %v9695_v8 = vpop.f32.mrb[20].mxu0  ;;  %v4982_v9 = vpop.f32.mrb[123].mxu1  ;;  %v5020_v19 = vmax.f32 %v4978_v50, %v5012_v2 }
 0x1dd   : > { %v5019_v10 = vmax.f32 %v4973_v59, %v5011_v3  ;;  %v1087_v12 = vmax.f32 %v9647_v13, %v9695_v8  ;;  %v4983_v15 = vadd.f32 %v4982_v9, %v9164_v26  ;;  %v9700_v16 = vpop.f32.mrb[21].mxu0  ;;  %8140 = vmatmul.mubr.msk.f32.gmra.mrb[126].mxu0 %vm669_vm2, %v4735_v62 }
 0x1de   : > { %v1086_v17 = vmax.f32 %v9650_v18, %v9700_v16  ;;  %8607 = vmatpush3.bf16.msra.mxu0 %v8988_v5  ;;  %v5014_v20 = vmul.f32 0.2, %v4988_v7 }
 0x1df   : > { %v5013_v21 = vmul.f32 0.2, %v4983_v15  ;;  %v8152_v23 = vpop.f32.mrb[124].mxu1  ;;  %8172 = vmatprep.mubr.msk.f32.mxu0 %vm669_vm2, %v5019_v10  ;;  %8609 = vmatprep.subr.bf16.mxu0 %v8942_v53 }
 0x1e0   : > { %v4998_v24 = vadd.f32 %v8152_v23, %v9172_v36  ;;  %v9709_v27 = vpop.f32.mrb[22].mxu0  ;;  %v4992_v28 = vpop.f32.mrb[125].mxu1  ;;  %v5022_v35 = vmax.f32 %v4988_v7, %v5014_v20 }
 0x1e1   : > { %v5021_v29 = vmax.f32 %v4983_v15, %v5013_v21  ;;  %v1089_v31 = vmax.f32 %v9657_v25, %v9709_v27  ;;  %v4993_v32 = vadd.f32 %v4992_v28, %v9174_v40  ;;  %v9714_v33 = vpop.f32.mrb[23].mxu0  ;;  %8173 = vmatmul.mubr.msk.f32.vlgmr.msra.gmra.mrb[128].mxu0 %vm669_vm2, %v5020_v19 }
 0x1e2   : > { %v1088_v34 = vmax.f32 %v9660_v30, %v9714_v33  ;;  %8611 = vmatpush3.bf16.msra.mxu0 %v8942_v53  ;;  %v5016_v38 = vmul.f32 0.2, %v4998_v24 }
 0x1e3   : > { %v5015_v39 = vmul.f32 0.2, %v4993_v32  ;;  %v8155_v42 = vpop.f32.mrb[126].mxu1  ;;  %8175 = vmatprep.mubr.msk.f32.mxu0 %vm669_vm2, %v5021_v29  ;;  %8613 = vmatprep.subr.bf16.mxu0 %v8956_v58 }
 0x1e4   : > { %v5008_v45 = vadd.f32 %v8155_v42, %v9184_v49  ;;  %v7628_v46 = vpop.f32.mrb[24].mxu0  ;;  %v5002_v47 = vpop.f32.mrb[127].mxu1  ;;  %v5024_v62 = vmax.f32 %v4998_v24, %v5016_v38 }
 0x1e5   : > { %v5023_v48 = vmax.f32 %v4993_v32, %v5015_v39  ;;  %v9726_v50 = vmax.f32 %v1083_v41, %v7628_v46  ;;  %v5003_v52 = vadd.f32 %v5002_v47, %v9188_v55  ;;  %v1334_v54 = vpop.f32.mrb[25].mxu0  ;;  %8176 = vmatmul.mubr.msk.f32.gmra.mrb[130].mxu0 %vm669_vm2, %v5022_v35 }
 0x1e6   : > { %v9733_v59 = vmax.f32 %v1082_v44, %v1334_v54  ;;  %8615 = vmatpush3.bf16.msra.mxu0 %v8956_v58  ;;  %v5018_v2 = vmul.f32 0.2, %v5008_v45 }
 0x1e7   : > { %v5017_v3 = vmul.f32 0.2, %v5003_v52  ;;  %8178 = vmatprep.mubr.msk.f32.mxu0 %vm669_vm2, %v5023_v48  ;;  %v8188_v51 = vpop.f32.mrb[128].mxu1  ;;  %8617 = vmatprep.subr.bf16.mxu0 %v8975_v63 }
 0x1e8   : > { %v5269_v37 = vadd.f32 %v8188_v51, %v9152_v11  ;;  %v7631_v41 = vpop.f32.mrb[26].mxu0  ;;  %v5263_v4 = vpop.f32.mrb[129].mxu1  ;;  %v5026_v10 = vmax.f32 %v5008_v45, %v5018_v2 }
 0x1e9   : > { %v5025_v7 = vmax.f32 %v5003_v52, %v5017_v3  ;;  %v9742_v56 = vmax.f32 %v1085_v57, %v7631_v41  ;;  %v5264_v43 = vadd.f32 %v5263_v4, %v9154_v14  ;;  %v1344_v44 = vpop.f32.mrb[27].mxu0  ;;  %8179 = vmatmul.mubr.msk.f32.gmra.mrb[132].mxu0 %vm669_vm2, %v5024_v62 }
 0x1ea   : > { %v9749_v9 = vmax.f32 %v1084_v61, %v1344_v44  ;;  %8619 = vmatpush3.bf16.msra.mxu0 %v8975_v63  ;;  %v5303_v15 = vmul.f32 0.2, %v5269_v37 }
 0x1eb   : > { %v5302_v19 = vmul.f32 0.2, %v5264_v43  ;;  %8181 = vmatprep.mubr.msk.f32.mxu0 %vm669_vm2, %v5025_v7  ;;  %v8191_v0 = vpop.f32.mrb[130].mxu1  ;;  %8621 = vmatprep.subr.bf16.mxu0 %v8988_v5 }
 0x1ec   : > { %v5279_v1 = vadd.f32 %v8191_v0, %v9162_v22  ;;  %v7634_v57 = vpop.f32.mrb[28].mxu0  ;;  %v5273_v20 = vpop.f32.mrb[131].mxu1  ;;  %v5311_v24 = vmax.f32 %v5269_v37, %v5303_v15 }
 0x1ed   : > { %v5310_v21 = vmax.f32 %v5264_v43, %v5302_v19  ;;  %v9758_v6 = vmax.f32 %v1087_v12, %v7634_v57  ;;  %v5274_v60 = vadd.f32 %v5273_v20, %v9164_v26  ;;  %v1354_v61 = vpop.f32.mrb[29].mxu0  ;;  %8182 = vmatmul.mubr.msk.f32.gmra.mrb[134].mxu0 %vm669_vm2, %v5026_v10 }
 0x1ee   : > { %v9765_v23 = vmax.f32 %v1086_v17, %v1354_v61  ;;  %8623 = vmatpush3.bf16.msra.mxu0 %v8988_v5  ;;  %v5305_v28 = vmul.f32 0.2, %v5279_v1 }
 0x1ef   : > { %v5304_v29 = vmul.f32 0.2, %v5274_v60  ;;  %v8194_v32 = vpop.f32.mrb[132].mxu1  ;;  %8214 = vmatprep.mubr.msk.f32.mxu0 %vm669_vm2, %v5310_v21  ;;  %8625 = vmatprep.subr.bf16.mxu0 %v8942_v53 }
 0x1f0   : > { %v5289_v13 = vadd.f32 %v8194_v32, %v9172_v36  ;;  %v7637_v8 = vpop.f32.mrb[30].mxu0  ;;  %v5283_v12 = vpop.f32.mrb[133].mxu1  ;;  %v5313_v39 = vmax.f32 %v5279_v1, %v5305_v28 }
 0x1f1   : > { %v5312_v35 = vmax.f32 %v5274_v60, %v5304_v29  ;;  %v9774_v18 = vmax.f32 %v1089_v31, %v7637_v8  ;;  %v5284_v16 = vadd.f32 %v5283_v12, %v9174_v40  ;;  %v1364_v17 = vpop.f32.mrb[31].mxu0  ;;  %8215 = vmatmul.mubr.msk.f32.vlgmr.msra.gmra.mrb[136].mxu0 %vm669_vm2, %v5311_v24 }
 0x1f2   : > { %v9781_v38 = vmax.f32 %v1088_v34, %v1364_v17  ;;  %8627 = vmatpush3.bf16.msra.mxu0 %v8942_v53  ;;  %v5307_v42 = vmul.f32 0.2, %v5289_v13 }
 0x1f3   : > { %v5306_v45 = vmul.f32 0.2, %v5284_v16  ;;  %v8197_v46 = vpop.f32.mrb[134].mxu1  ;;  %8217 = vmatprep.mubr.msk.f32.mxu0 %vm669_vm2, %v5312_v35  ;;  %8629 = vmatprep.subr.bf16.mxu0 %v8956_v58 }
 0x1f4   : > { %v5299_v25 = vadd.f32 %v8197_v46, %v9184_v49  ;;  %v9787_v27 = vpop.f32.mrb[32].mxu0  ;;  %v5293_v31 = vpop.f32.mrb[135].mxu1  ;;  %v5315_v52 = vmax.f32 %v5289_v13, %v5307_v42 }
 0x1f5   : > { %v5314_v47 = vmax.f32 %v5284_v16, %v5306_v45  ;;  %v1665_v30 = vmax.f32 %v9726_v50, %v9787_v27  ;;  %v5294_v33 = vadd.f32 %v5293_v31, %v9188_v55  ;;  %v9792_v34 = vpop.f32.mrb[33].mxu0  ;;  %8218 = vmatmul.mubr.msk.f32.gmra.mrb[138].mxu0 %vm669_vm2, %v5313_v39 }
 0x1f6   : > { %v1664_v48 = vmax.f32 %v9733_v59, %v9792_v34  ;;  %8631 = vmatpush3.bf16.msra.mxu0 %v8956_v58  ;;  %v5309_v54 = vmul.f32 0.2, %v5299_v25 }
 0x1f7   : > { %v5308_v62 = vmul.f32 0.2, %v5294_v33  ;;  %8220 = vmatprep.mubr.msk.f32.mxu0 %vm669_vm2, %v5314_v47  ;;  %v8230_v2 = vpop.f32.mrb[136].mxu1  ;;  %8633 = vmatprep.subr.bf16.mxu0 %v8975_v63 }
 0x1f8   : > { %v5560_v3 = vadd.f32 %v8230_v2, %v9152_v11  ;;  %v9801_v51 = vpop.f32.mrb[34].mxu0  ;;  %v5554_v37 = vpop.f32.mrb[137].mxu1  ;;  %v5317_v10 = vmax.f32 %v5299_v25, %v5309_v54 }
 0x1f9   : > { %v5316_v41 = vmax.f32 %v5294_v33, %v5308_v62  ;;  %v1667_v4 = vmax.f32 %v9742_v56, %v9801_v51  ;;  %v5555_v7 = vadd.f32 %v5554_v37, %v9154_v14  ;;  %v9806_v43 = vpop.f32.mrb[35].mxu0  ;;  %8221 = vmatmul.mubr.msk.f32.gmra.mrb[140].mxu0 %vm669_vm2, %v5315_v52 }
 0x1fa   : > { %v1666_v44 = vmax.f32 %v9749_v9, %v9806_v43  ;;  %8635 = vmatpush3.bf16.msra.mxu0 %v8975_v63  ;;  %v5594_v15 = vmul.f32 0.2, %v5560_v3 }
 0x1fb   : > { %v5593_v19 = vmul.f32 0.2, %v5555_v7  ;;  %8223 = vmatprep.mubr.msk.f32.mxu0 %vm669_vm2, %v5316_v41  ;;  %v8233_v0 = vpop.f32.mrb[138].mxu1  ;;  %8637 = vmatprep.subr.bf16.mxu0 %v8988_v5 }
 0x1fc   : > { %v5570_v1 = vadd.f32 %v8233_v0, %v9162_v22  ;;  %v9815_v57 = vpop.f32.mrb[36].mxu0  ;;  %v5564_v20 = vpop.f32.mrb[139].mxu1  ;;  %v5602_v29 = vmax.f32 %v5560_v3, %v5594_v15 }
 0x1fd   : > { %v5601_v21 = vmax.f32 %v5555_v7, %v5593_v19  ;;  %v1669_v60 = vmax.f32 %v9758_v6, %v9815_v57  ;;  %v5565_v61 = vadd.f32 %v5564_v20, %v9164_v26  ;;  %v9820_v24 = vpop.f32.mrb[37].mxu0  ;;  %8224 = vmatmul.mubr.msk.f32.gmra.mrb[142].mxu0 %vm669_vm2, %v5317_v10 }
 0x1fe   : > { %v1668_v28 = vmax.f32 %v9765_v23, %v9820_v24  ;;  %8639 = vmatpush3.bf16.msra.mxu0 %v8988_v5  ;;  %v5596_v32 = vmul.f32 0.2, %v5570_v1 }
 0x1ff   : > { %v5595_v13 = vmul.f32 0.2, %v5565_v61  ;;  %v8236_v8 = vpop.f32.mrb[140].mxu1  ;;  %8256 = vmatprep.mubr.msk.f32.mxu0 %vm669_vm2, %v5601_v21  ;;  %8641 = vmatprep.subr.bf16.mxu0 %v8942_v53 }
 0x200   : > { %v5580_v12 = vadd.f32 %v8236_v8, %v9172_v36  ;;  %v9829_v35 = vpop.f32.mrb[38].mxu0  ;;  %v5574_v16 = vpop.f32.mrb[141].mxu1  ;;  %v5604_v25 = vmax.f32 %v5570_v1, %v5596_v32 }
 0x201   : > { %v5603_v17 = vmax.f32 %v5565_v61, %v5595_v13  ;;  %v1671_v39 = vmax.f32 %v9774_v18, %v9829_v35  ;;  %v5575_v42 = vadd.f32 %v5574_v16, %v9174_v40  ;;  %v9834_v45 = vpop.f32.mrb[39].mxu0  ;;  %8257 = vmatmul.mubr.msk.f32.vlgmr.msra.gmra.mrb[144].mxu0 %vm669_vm2, %v5602_v29 }
 0x202   : > { %v1670_v46 = vmax.f32 %v9781_v38, %v9834_v45  ;;  %8643 = vmatpush3.bf16.msra.mxu0 %v8942_v53  ;;  %v5598_v31 = vmul.f32 0.2, %v5580_v12 }
 0x203   : > { %v5597_v47 = vmul.f32 0.2, %v5575_v42  ;;  %v8239_v33 = vpop.f32.mrb[142].mxu1  ;;  %8259 = vmatprep.mubr.msk.f32.mxu0 %vm669_vm2, %v5603_v17  ;;  %8645 = vmatprep.subr.bf16.mxu0 %v8956_v58 }
 0x204   : > { %v5590_v52 = vadd.f32 %v8239_v33, %v9184_v49  ;;  %v7712_v54 = vpop.f32.mrb[40].mxu0  ;;  %v5584_v62 = vpop.f32.mrb[143].mxu1  ;;  %v5606_v10 = vmax.f32 %v5580_v12, %v5598_v31 }
 0x205   : > { %v5605_v2 = vmax.f32 %v5575_v42, %v5597_v47  ;;  %v9846_v3 = vmax.f32 %v1665_v30, %v7712_v54  ;;  %v5585_v37 = vadd.f32 %v5584_v62, %v9188_v55  ;;  %v1916_v41 = vpop.f32.mrb[41].mxu0  ;;  %8260 = vmatmul.mubr.msk.f32.gmra.mrb[146].mxu0 %vm669_vm2, %v5604_v25 }
 0x206   : > { %v9853_v7 = vmax.f32 %v1664_v48, %v1916_v41  ;;  %8647 = vmatpush3.bf16.msra.mxu0 %v8956_v58  ;;  %v5600_v15 = vmul.f32 0.2, %v5590_v52 }
 0x207   : > { %v5599_v19 = vmul.f32 0.2, %v5585_v37  ;;  %8262 = vmatprep.mubr.msk.f32.mxu0 %vm669_vm2, %v5605_v2  ;;  %v8272_v50 = vpop.f32.mrb[144].mxu1  ;;  %8649 = vmatprep.subr.bf16.mxu0 %v8975_v63 }
 0x208   : > { %v5851_v27 = vadd.f32 %v8272_v50, %v9152_v11  ;;  %v7715_v30 = vpop.f32.mrb[42].mxu0  ;;  %v5845_v0 = vpop.f32.mrb[145].mxu1  ;;  %v5608_v21 = vmax.f32 %v5590_v52, %v5600_v15 }
 0x209   : > { %v5607_v1 = vmax.f32 %v5585_v37, %v5599_v19  ;;  %v9862_v59 = vmax.f32 %v1667_v4, %v7715_v30  ;;  %v5846_v34 = vadd.f32 %v5845_v0, %v9154_v14  ;;  %v1926_v48 = vpop.f32.mrb[43].mxu0  ;;  %8263 = vmatmul.mubr.msk.f32.gmra.mrb[148].mxu0 %vm669_vm2, %v5606_v10 }
 0x20a   : > { %v9869_v20 = vmax.f32 %v1666_v44, %v1926_v48  ;;  %8651 = vmatpush3.bf16.msra.mxu0 %v8975_v63  ;;  %v5885_v61 = vmul.f32 0.2, %v5851_v27 }
 0x20b   : > { %v5884_v29 = vmul.f32 0.2, %v5846_v34  ;;  %8265 = vmatprep.mubr.msk.f32.mxu0 %vm669_vm2, %v5607_v1  ;;  %v8275_v56 = vpop.f32.mrb[146].mxu1  ;;  %8653 = vmatprep.subr.bf16.mxu0 %v8988_v5 }
 0x20c   : > { %v5861_v51 = vadd.f32 %v8275_v56, %v9162_v22  ;;  %v7718_v4 = vpop.f32.mrb[44].mxu0  ;;  %v5855_v32 = vpop.f32.mrb[147].mxu1  ;;  %v5893_v12 = vmax.f32 %v5851_v27, %v5885_v61 }
 0x20d   : > { %v5892_v13 = vmax.f32 %v5846_v34, %v5884_v29  ;;  %v9878_v9 = vmax.f32 %v1669_v60, %v7718_v4  ;;  %v5856_v43 = vadd.f32 %v5855_v32, %v9164_v26  ;;  %v1936_v44 = vpop.f32.mrb[45].mxu0  ;;  %8266 = vmatmul.mubr.msk.f32.gmra.mrb[150].mxu0 %vm669_vm2, %v5608_v21 }
 0x20e   : > { %v9885_v8 = vmax.f32 %v1668_v28, %v1936_v44  ;;  %8655 = vmatpush3.bf16.msra.mxu0 %v8988_v5  ;;  %v5887_v16 = vmul.f32 0.2, %v5861_v51 }
 0x20f   : > { %v5886_v17 = vmul.f32 0.2, %v5856_v43  ;;  %v8278_v42 = vpop.f32.mrb[148].mxu1  ;;  %8298 = vmatprep.mubr.msk.f32.mxu0 %vm669_vm2, %v5892_v13  ;;  %8657 = vmatprep.subr.bf16.mxu0 %v8942_v53 }
 0x210   : > { %v5871_v6 = vadd.f32 %v8278_v42, %v9172_v36  ;;  %v7721_v57 = vpop.f32.mrb[46].mxu0  ;;  %v5865_v60 = vpop.f32.mrb[149].mxu1  ;;  %v5895_v47 = vmax.f32 %v5861_v51, %v5887_v16 }
 0x211   : > { %v5894_v25 = vmax.f32 %v5856_v43, %v5886_v17  ;;  %v9894_v23 = vmax.f32 %v1671_v39, %v7721_v57  ;;  %v5866_v24 = vadd.f32 %v5865_v60, %v9174_v40  ;;  %v1946_v28 = vpop.f32.mrb[47].mxu0  ;;  %8299 = vmatmul.mubr.msk.f32.vlgmr.msra.gmra.mrb[152].mxu0 %vm669_vm2, %v5893_v12 }
 0x212   : > { %v9901_v31 = vmax.f32 %v1670_v46, %v1946_v28  ;;  %8659 = vmatpush3.bf16.msra.mxu0 %v8942_v53  ;;  %v5889_v33 = vmul.f32 0.2, %v5871_v6 }
 0x213   : > { %v5888_v52 = vmul.f32 0.2, %v5866_v24  ;;  %v8281_v54 = vpop.f32.mrb[150].mxu1  ;;  %8301 = vmatprep.mubr.msk.f32.mxu0 %vm669_vm2, %v5894_v25  ;;  %8661 = vmatprep.subr.bf16.mxu0 %v8956_v58 }
 0x214   : > { %v5881_v18 = vadd.f32 %v8281_v54, %v9184_v49  ;;  %v9907_v35 = vpop.f32.mrb[48].mxu0  ;;  %v5875_v39 = vpop.f32.mrb[151].mxu1  ;;  %v5897_v2 = vmax.f32 %v5871_v6, %v5889_v33 }
 0x215   : > { %v5896_v62 = vmax.f32 %v5866_v24, %v5888_v52  ;;  %v2247_v38 = vmax.f32 %v9846_v3, %v9907_v35  ;;  %v5876_v45 = vadd.f32 %v5875_v39, %v9188_v55  ;;  %v9912_v53 = vpop.f32.mrb[49].mxu0  ;;  %8302 = vmatmul.mubr.msk.f32.gmra.mrb[154].mxu0 %vm669_vm2, %v5895_v47 }
 0x216   : > { %v2246_v46 = vmax.f32 %v9853_v7, %v9912_v53  ;;  %8663 = vmatpush3.bf16.msra.mxu0 %v8956_v58  ;;  %v5891_v37 = vmul.f32 0.2, %v5881_v18 }
 0x217   : > { %v5890_v41 = vmul.f32 0.2, %v5876_v45  ;;  %8304 = vmatprep.mubr.msk.f32.mxu0 %vm669_vm2, %v5896_v62  ;;  %v8314_v10 = vpop.f32.mrb[152].mxu1  ;;  %8665 = vmatprep.subr.bf16.mxu0 %v8975_v63 }
 0x218   : > { %v6142_v3 = vadd.f32 %v8314_v10, %v9152_v11  ;;  %v7757_v15 = vpop.f32.mrb[50].mxu0  ;;  %v6136_v19 = vpop.f32.mrb[153].mxu1  ;;  %v5899_v1 = vmax.f32 %v5881_v18, %v5891_v37 }
 0x219   : > { %v5898_v50 = vmax.f32 %v5876_v45, %v5890_v41  ;;  %v2249_v27 = vmax.f32 %v9862_v59, %v7757_v15  ;;  %v6137_v30 = vadd.f32 %v6136_v19, %v9154_v14  ;;  %v2217_v0 = vpop.f32.mrb[51].mxu0  ;;  %8305 = vmatmul.mubr.msk.f32.gmra.mrb[156].mxu0 %vm669_vm2, %v5897_v2 }
 0x21a   : > { %v2248_v58 = vmax.f32 %v9869_v20, %v2217_v0  ;;  %8667 = vmatpush3.bf16.msra.mxu0 %v8975_v63  ;;  %v6176_v34 = vmul.f32 0.2, %v6142_v3 }
 0x21b   : > { %v6175_v48 = vmul.f32 0.2, %v6137_v30  ;;  %8307 = vmatprep.mubr.msk.f32.mxu0 %vm669_vm2, %v5898_v50  ;;  %v8317_v11 = vpop.f32.mrb[154].mxu1  ;;  %8669 = vmatprep.subr.bf16.mxu0 %v8988_v5 }
 0x21c   : > { %v6152_v21 = vadd.f32 %v8317_v11, %v9162_v22  ;;  %v7760_v59 = vpop.f32.mrb[52].mxu0  ;;  %v6146_v61 = vpop.f32.mrb[155].mxu1  ;;  %v6184_v51 = vmax.f32 %v6142_v3, %v6176_v34 }
 0x21d   : > { %v6183_v14 = vmax.f32 %v6137_v30, %v6175_v48  ;;  %v2251_v29 = vmax.f32 %v9878_v9, %v7760_v59  ;;  %v6147_v56 = vadd.f32 %v6146_v61, %v9164_v26  ;;  %v2227_v20 = vpop.f32.mrb[53].mxu0  ;;  %8308 = vmatmul.mubr.msk.f32.gmra.mrb[158].mxu0 %vm669_vm2, %v5899_v1 }
 0x21e   : > { %v2250_v63 = vmax.f32 %v9885_v8, %v2227_v20  ;;  %8671 = vmatpush3.bf16.msra.mxu0 %v8988_v5  ;;  %v6178_v4 = vmul.f32 0.2, %v6152_v21 }
 0x21f   : > { %v6177_v32 = vmul.f32 0.2, %v6147_v56  ;;  %v8320_v13 = vpop.f32.mrb[156].mxu1  ;;  %8340 = vmatprep.mubr.msk.f32.mxu0 %vm669_vm2, %v6183_v14 }
 0x220   : > { %v6162_v22 = vadd.f32 %v8320_v13, %v9172_v36  ;;  %v7763_v43 = vpop.f32.mrb[54].mxu0  ;;  %v6156_v44 = vpop.f32.mrb[157].mxu1  ;;  %v6186_v17 = vmax.f32 %v6152_v21, %v6178_v4 }
 0x221   : > { %v6185_v9 = vmax.f32 %v6147_v56, %v6177_v32  ;;  %v2253_v26 = vmax.f32 %v9894_v23, %v7763_v43  ;;  %v6157_v12 = vadd.f32 %v6156_v44, %v9174_v40  ;;  %v2237_v16 = vpop.f32.mrb[55].mxu0  ;;  %8341 = vmatmul.mubr.msk.f32.vlgmr.msra.gmra.mrb[160].mxu0 %vm669_vm2, %v6184_v51 }
 0x222   : > { %v6180_v8 = vmul.f32 0.2, %v6162_v22  ;;  %v2252_v5 = vmax.f32 %v9901_v31, %v2237_v16 }
 0x223   : > { %v6179_v42 = vmul.f32 0.2, %v6157_v12  ;;  %v8323_v6 = vpop.f32.mrb[158].mxu1  ;;  %8343 = vmatprep.mubr.msk.f32.mxu0 %vm669_vm2, %v6185_v9 }
 0x224   : > { %v6172_v36 = vadd.f32 %v8323_v6, %v9184_v49  ;;  %v7796_v57 = vpop.f32.mrb[56].mxu0  ;;  %v6166_v60 = vpop.f32.mrb[159].mxu1  ;;  %v6188_v28 = vmax.f32 %v6162_v22, %v6180_v8 }
 0x225   : > { %v6187_v25 = vmax.f32 %v6157_v12, %v6179_v42  ;;  %v2538_v24 = vmax.f32 %v2247_v38, %v7796_v57  ;;  %v6167_v23 = vadd.f32 %v6166_v60, %v9188_v55  ;;  %v2498_v40 = vpop.f32.mrb[57].mxu0  ;;  %8344 = vmatmul.mubr.msk.f32.gmra.mrb[162].mxu0 %vm669_vm2, %v6186_v17 }
 0x226   : > { %v6182_v47 = vmul.f32 0.2, %v6172_v36  ;;  %v2537_v31 = vmax.f32 %v2246_v46, %v2498_v40 }
 0x227   : > { %v6181_v33 = vmul.f32 0.2, %v6167_v23  ;;  %8346 = vmatprep.mubr.msk.f32.mxu1 %vm669_vm2, %v6187_v25 }
 0x228   : > { %v7799_v52 = vpop.f32.mrb[58].mxu0  ;;  %8347 = vmatmul.mubr.msk.f32.vlgmr.msra.gmra.mrb[160].mxu1 %vm669_vm2, %v6188_v28  ;;  %v6190_v35 = vmax.f32 %v6172_v36, %v6182_v47 }
 0x229   : > { %v6189_v49 = vmax.f32 %v6167_v23, %v6181_v33  ;;  %v2540_v54 = vmax.f32 %v2249_v27, %v7799_v52  ;;  %v2508_v18 = vpop.f32.mrb[59].mxu0 }
 0x22a   : > { %v2539_v55 = vmax.f32 %v2248_v58, %v2508_v18 }
 0x22b   : > { %8349 = vmatprep.mubr.msk.f32.mxu1 %vm669_vm2, %v6189_v49 }
 0x22c   : > { %v7802_v39 = vpop.f32.mrb[60].mxu0  ;;  %8350 = vmatmul.mubr.msk.f32.gmra.mrb[162].mxu1 %vm669_vm2, %v6190_v35 }
 0x22d   : > { %v2542_v62 = vmax.f32 %v2251_v29, %v7802_v39  ;;  %v2518_v38 = vpop.f32.mrb[61].mxu0 }
 0x22e   : > { %v2541_v7 = vmax.f32 %v2250_v63, %v2518_v38 }
 0x230   : > { %v7805_v45 = vpop.f32.mrb[62].mxu0 }
 0x231   : > { %v2544_v53 = vmax.f32 %v2253_v26, %v7805_v45  ;;  %v2528_v46 = vpop.f32.mrb[63].mxu0 }
 0x232   : > { %v2543_v2 = vmax.f32 %v2252_v5, %v2528_v46 }
 0x234   : > { %v7838_v37 = vpop.f32.mrb[64].mxu0 }
 0x235   : > { %v2829_v41 = vmax.f32 %v2538_v24, %v7838_v37  ;;  %v2789_v10 = vpop.f32.mrb[65].mxu0 }
 0x236   : > { %v2828_v3 = vmax.f32 %v2537_v31, %v2789_v10 }
 0x238   : > { %v7841_v15 = vpop.f32.mrb[66].mxu0 }
 0x239   : > { %v2831_v19 = vmax.f32 %v2540_v54, %v7841_v15  ;;  %v2799_v50 = vpop.f32.mrb[67].mxu0 }
 0x23a   : > { %v2830_v27 = vmax.f32 %v2539_v55, %v2799_v50 }
 0x23c   : > { %v7844_v30 = vpop.f32.mrb[68].mxu0 }
 0x23d   : > { %v2833_v0 = vmax.f32 %v2542_v62, %v7844_v30  ;;  %v2809_v58 = vpop.f32.mrb[69].mxu0 }
 0x23e   : > { %v2832_v1 = vmax.f32 %v2541_v7, %v2809_v58 }
 0x240   : > { %v7847_v34 = vpop.f32.mrb[70].mxu0 }
 0x241   : > { %v2835_v48 = vmax.f32 %v2544_v53, %v7847_v34  ;;  %v2819_v11 = vpop.f32.mrb[71].mxu0 }
 0x242   : > { %v2834_v21 = vmax.f32 %v2543_v2, %v2819_v11 }
 0x244   : > { %v7880_v59 = vpop.f32.mrb[72].mxu0 }
 0x245   : > { %v3120_v61 = vmax.f32 %v2829_v41, %v7880_v59  ;;  %v3080_v14 = vpop.f32.mrb[73].mxu0 }
 0x246   : > { %v3119_v29 = vmax.f32 %v2828_v3, %v3080_v14 }
 0x248   : > { %v7883_v56 = vpop.f32.mrb[74].mxu0 }
 0x249   : > { %v3122_v20 = vmax.f32 %v2831_v19, %v7883_v56  ;;  %v3090_v63 = vpop.f32.mrb[75].mxu0 }
 0x24a   : > { %v3121_v51 = vmax.f32 %v2830_v27, %v3090_v63 }
 0x24c   : > { %v7886_v4 = vpop.f32.mrb[76].mxu0 }
 0x24d   : > { %v3124_v32 = vmax.f32 %v2833_v0, %v7886_v4  ;;  %v3100_v13 = vpop.f32.mrb[77].mxu0 }
 0x24e   : > { %v3123_v22 = vmax.f32 %v2832_v1, %v3100_v13 }
 0x250   : > { %v7889_v43 = vpop.f32.mrb[78].mxu0 }
 0x251   : > { %v3126_v44 = vmax.f32 %v2835_v48, %v7889_v43  ;;  %v3110_v9 = vpop.f32.mrb[79].mxu0 }
 0x252   : > { %v3125_v26 = vmax.f32 %v2834_v21, %v3110_v9 }
 0x254   : > { %v7922_v12 = vpop.f32.mrb[80].mxu0 }
 0x255   : > { %v3411_v16 = vmax.f32 %v3120_v61, %v7922_v12  ;;  %v3371_v8 = vpop.f32.mrb[81].mxu0 }
 0x256   : > { %v3410_v5 = vmax.f32 %v3119_v29, %v3371_v8 }
 0x258   : > { %v7925_v17 = vpop.f32.mrb[82].mxu0 }
 0x259   : > { %v3413_v42 = vmax.f32 %v3122_v20, %v7925_v17  ;;  %v3381_v6 = vpop.f32.mrb[83].mxu0 }
 0x25a   : > { %v3412_v36 = vmax.f32 %v3121_v51, %v3381_v6 }
 0x25c   : > { %v7928_v57 = vpop.f32.mrb[84].mxu0 }
 0x25d   : > { %v3415_v60 = vmax.f32 %v3124_v32, %v7928_v57  ;;  %v3391_v25 = vpop.f32.mrb[85].mxu0 }
 0x25e   : > { %v3414_v24 = vmax.f32 %v3123_v22, %v3391_v25 }
 0x260   : > { %v7931_v23 = vpop.f32.mrb[86].mxu0 }
 0x261   : > { %v3417_v40 = vmax.f32 %v3126_v44, %v7931_v23  ;;  %v3401_v28 = vpop.f32.mrb[87].mxu0 }
 0x262   : > { %v3416_v47 = vmax.f32 %v3125_v26, %v3401_v28 }
 0x264   : > { %v7964_v31 = vpop.f32.mrb[88].mxu0 }
 0x265   : > { %v3702_v33 = vmax.f32 %v3411_v16, %v7964_v31  ;;  %v3662_v52 = vpop.f32.mrb[89].mxu0 }
 0x266   : > { %v3701_v49 = vmax.f32 %v3410_v5, %v3662_v52 }
 0x268   : > { %v7967_v54 = vpop.f32.mrb[90].mxu0 }
 0x269   : > { %v3704_v18 = vmax.f32 %v3413_v42, %v7967_v54  ;;  %v3672_v35 = vpop.f32.mrb[91].mxu0 }
 0x26a   : > { %v3703_v55 = vmax.f32 %v3412_v36, %v3672_v35 }
 0x26c   : > { %v7970_v39 = vpop.f32.mrb[92].mxu0 }
 0x26d   : > { %v3706_v62 = vmax.f32 %v3415_v60, %v7970_v39  ;;  %v3682_v38 = vpop.f32.mrb[93].mxu0 }
 0x26e   : > { %v3705_v7 = vmax.f32 %v3414_v24, %v3682_v38 }
 0x270   : > { %v7973_v45 = vpop.f32.mrb[94].mxu0 }
 0x271   : > { %v3708_v53 = vmax.f32 %v3417_v40, %v7973_v45  ;;  %v3692_v46 = vpop.f32.mrb[95].mxu0 }
 0x272   : > { %v3707_v2 = vmax.f32 %v3416_v47, %v3692_v46 }
 0x274   : > { %v8006_v37 = vpop.f32.mrb[96].mxu0 }
 0x275   : > { %v3993_v41 = vmax.f32 %v3702_v33, %v8006_v37  ;;  %v3953_v10 = vpop.f32.mrb[97].mxu0 }
 0x276   : > { %v3992_v3 = vmax.f32 %v3701_v49, %v3953_v10 }
 0x278   : > { %v8009_v15 = vpop.f32.mrb[98].mxu0 }
 0x279   : > { %v3995_v19 = vmax.f32 %v3704_v18, %v8009_v15  ;;  %v3963_v50 = vpop.f32.mrb[99].mxu0 }
 0x27a   : > { %v3994_v27 = vmax.f32 %v3703_v55, %v3963_v50 }
 0x27c   : > { %v8012_v30 = vpop.f32.mrb[100].mxu0 }
 0x27d   : > { %v3997_v0 = vmax.f32 %v3706_v62, %v8012_v30  ;;  %v3973_v58 = vpop.f32.mrb[101].mxu0 }
 0x27e   : > { %v3996_v1 = vmax.f32 %v3705_v7, %v3973_v58 }
 0x280   : > { %v8015_v34 = vpop.f32.mrb[102].mxu0 }
 0x281   : > { %v3999_v48 = vmax.f32 %v3708_v53, %v8015_v34  ;;  %v3983_v11 = vpop.f32.mrb[103].mxu0 }
 0x282   : > { %v3998_v21 = vmax.f32 %v3707_v2, %v3983_v11 }
 0x284   : > { %v8048_v59 = vpop.f32.mrb[104].mxu0 }
 0x285   : > { %v4284_v61 = vmax.f32 %v3993_v41, %v8048_v59  ;;  %v4244_v14 = vpop.f32.mrb[105].mxu0 }
 0x286   : > { %v4283_v29 = vmax.f32 %v3992_v3, %v4244_v14 }
 0x288   : > { %v8051_v56 = vpop.f32.mrb[106].mxu0 }
 0x289   : > { %v4286_v20 = vmax.f32 %v3995_v19, %v8051_v56  ;;  %v4254_v63 = vpop.f32.mrb[107].mxu0 }
 0x28a   : > { %v4285_v51 = vmax.f32 %v3994_v27, %v4254_v63 }
 0x28c   : > { %v8054_v4 = vpop.f32.mrb[108].mxu0 }
 0x28d   : > { %v4288_v32 = vmax.f32 %v3997_v0, %v8054_v4  ;;  %v4264_v13 = vpop.f32.mrb[109].mxu0 }
 0x28e   : > { %v4287_v22 = vmax.f32 %v3996_v1, %v4264_v13 }
 0x290   : > { %v8057_v43 = vpop.f32.mrb[110].mxu0 }
 0x291   : > { %v4290_v44 = vmax.f32 %v3999_v48, %v8057_v43  ;;  %v4274_v9 = vpop.f32.mrb[111].mxu0 }
 0x292   : > { %v4289_v26 = vmax.f32 %v3998_v21, %v4274_v9 }
 0x294   : > { %v8090_v12 = vpop.f32.mrb[112].mxu0 }
 0x295   : > { %v4575_v16 = vmax.f32 %v4284_v61, %v8090_v12  ;;  %v4535_v8 = vpop.f32.mrb[113].mxu0 }
 0x296   : > { %v4574_v5 = vmax.f32 %v4283_v29, %v4535_v8 }
 0x298   : > { %v8093_v17 = vpop.f32.mrb[114].mxu0 }
 0x299   : > { %v4577_v42 = vmax.f32 %v4286_v20, %v8093_v17  ;;  %v4545_v6 = vpop.f32.mrb[115].mxu0 }
 0x29a   : > { %v4576_v36 = vmax.f32 %v4285_v51, %v4545_v6 }
 0x29c   : > { %v8096_v57 = vpop.f32.mrb[116].mxu0 }
 0x29d   : > { %v4579_v60 = vmax.f32 %v4288_v32, %v8096_v57  ;;  %v4555_v25 = vpop.f32.mrb[117].mxu0 }
 0x29e   : > { %v4578_v24 = vmax.f32 %v4287_v22, %v4555_v25 }
 0x2a0   : > { %v8099_v23 = vpop.f32.mrb[118].mxu0 }
 0x2a1   : > { %v4581_v40 = vmax.f32 %v4290_v44, %v8099_v23  ;;  %v4565_v28 = vpop.f32.mrb[119].mxu0 }
 0x2a2   : > { %v4580_v47 = vmax.f32 %v4289_v26, %v4565_v28 }
 0x2a4   : > { %v8132_v31 = vpop.f32.mrb[120].mxu0 }
 0x2a5   : > { %v4866_v33 = vmax.f32 %v4575_v16, %v8132_v31  ;;  %v4826_v52 = vpop.f32.mrb[121].mxu0 }
 0x2a6   : > { %v4865_v49 = vmax.f32 %v4574_v5, %v4826_v52 }
 0x2a8   : > { %v8135_v54 = vpop.f32.mrb[122].mxu0 }
 0x2a9   : > { %v4868_v18 = vmax.f32 %v4577_v42, %v8135_v54  ;;  %v4836_v35 = vpop.f32.mrb[123].mxu0 }
 0x2aa   : > { %v4867_v55 = vmax.f32 %v4576_v36, %v4836_v35 }
 0x2ac   : > { %v8138_v39 = vpop.f32.mrb[124].mxu0 }
 0x2ad   : > { %v4870_v62 = vmax.f32 %v4579_v60, %v8138_v39  ;;  %v4846_v38 = vpop.f32.mrb[125].mxu0 }
 0x2ae   : > { %v4869_v7 = vmax.f32 %v4578_v24, %v4846_v38 }
 0x2b0   : > { %v8141_v45 = vpop.f32.mrb[126].mxu0 }
 0x2b1   : > { %v4872_v53 = vmax.f32 %v4581_v40, %v8141_v45  ;;  %v4856_v46 = vpop.f32.mrb[127].mxu0 }
 0x2b2   : > { %v4871_v2 = vmax.f32 %v4580_v47, %v4856_v46 }
 0x2b4   : > { %v8174_v37 = vpop.f32.mrb[128].mxu0 }
 0x2b5   : > { %v5157_v41 = vmax.f32 %v4866_v33, %v8174_v37  ;;  %v5117_v10 = vpop.f32.mrb[129].mxu0 }
 0x2b6   : > { %v5156_v3 = vmax.f32 %v4865_v49, %v5117_v10 }
 0x2b8   : > { %v8177_v15 = vpop.f32.mrb[130].mxu0 }
 0x2b9   : > { %v5159_v19 = vmax.f32 %v4868_v18, %v8177_v15  ;;  %v5127_v50 = vpop.f32.mrb[131].mxu0 }
 0x2ba   : > { %v5158_v27 = vmax.f32 %v4867_v55, %v5127_v50 }
 0x2bc   : > { %v8180_v30 = vpop.f32.mrb[132].mxu0 }
 0x2bd   : > { %v5161_v0 = vmax.f32 %v4870_v62, %v8180_v30  ;;  %v5137_v58 = vpop.f32.mrb[133].mxu0 }
 0x2be   : > { %v5160_v1 = vmax.f32 %v4869_v7, %v5137_v58 }
 0x2c0   : > { %v8183_v34 = vpop.f32.mrb[134].mxu0 }
 0x2c1   : > { %v5163_v48 = vmax.f32 %v4872_v53, %v8183_v34  ;;  %v5147_v11 = vpop.f32.mrb[135].mxu0 }
 0x2c2   : > { %v5162_v21 = vmax.f32 %v4871_v2, %v5147_v11 }
 0x2c4   : > { %v8216_v59 = vpop.f32.mrb[136].mxu0 }
 0x2c5   : > { %v5448_v61 = vmax.f32 %v5157_v41, %v8216_v59  ;;  %v5408_v14 = vpop.f32.mrb[137].mxu0  ;;  %v6984_v41 = vld [vmem:[%s9992_s6] ss:$0 sm:$0xff] }
 0x2c6   : > { %v5447_v29 = vmax.f32 %v5156_v3, %v5408_v14 }
 0x2c8   : > { %v8219_v56 = vpop.f32.mrb[138].mxu0 }
 0x2c9   : > { %v5450_v20 = vmax.f32 %v5159_v19, %v8219_v56  ;;  %v5418_v63 = vpop.f32.mrb[139].mxu0 }
 0x2ca   : > { %v5449_v51 = vmax.f32 %v5158_v27, %v5418_v63 }
 0x2cc   : > { %v8222_v4 = vpop.f32.mrb[140].mxu0 }
 0x2cd   : > { %v5452_v32 = vmax.f32 %v5161_v0, %v8222_v4  ;;  %v5428_v13 = vpop.f32.mrb[141].mxu0 }
 0x2ce   : > { %v5451_v22 = vmax.f32 %v5160_v1, %v5428_v13 }
 0x2d0   : > { %v8225_v43 = vpop.f32.mrb[142].mxu0 }
 0x2d1   : > { %v5454_v44 = vmax.f32 %v5163_v48, %v8225_v43  ;;  %v5438_v9 = vpop.f32.mrb[143].mxu0 }
 0x2d2   : > { %v5453_v26 = vmax.f32 %v5162_v21, %v5438_v9 }
 0x2d4   : > { %v8258_v12 = vpop.f32.mrb[144].mxu0 }
 0x2d5   : > { %v5739_v16 = vmax.f32 %v5448_v61, %v8258_v12  ;;  %v5699_v8 = vpop.f32.mrb[145].mxu0 }
 0x2d6   : > { %v5738_v5 = vmax.f32 %v5447_v29, %v5699_v8 }
 0x2d8   : > { %v8261_v17 = vpop.f32.mrb[146].mxu0 }
 0x2d9   : > { %v5741_v42 = vmax.f32 %v5450_v20, %v8261_v17  ;;  %v5709_v6 = vpop.f32.mrb[147].mxu0 }
 0x2da   : > { %v5740_v36 = vmax.f32 %v5449_v51, %v5709_v6 }
 0x2dc   : > { %v8264_v57 = vpop.f32.mrb[148].mxu0 }
 0x2dd   : > { %v5743_v60 = vmax.f32 %v5452_v32, %v8264_v57  ;;  %v5719_v25 = vpop.f32.mrb[149].mxu0 }
 0x2de   : > { %v5742_v24 = vmax.f32 %v5451_v22, %v5719_v25 }
 0x2e0   : > { %v8267_v23 = vpop.f32.mrb[150].mxu0 }
 0x2e1   : > { %v5745_v40 = vmax.f32 %v5454_v44, %v8267_v23  ;;  %v5729_v28 = vpop.f32.mrb[151].mxu0 }
 0x2e2   : > { %v5744_v47 = vmax.f32 %v5453_v26, %v5729_v28 }
 0x2e4   : > { %v8300_v31 = vpop.f32.mrb[152].mxu0 }
 0x2e5   : > { %v6030_v33 = vmax.f32 %v5739_v16, %v8300_v31  ;;  %v5990_v52 = vpop.f32.mrb[153].mxu0 }
 0x2e6   : > { %v6029_v49 = vmax.f32 %v5738_v5, %v5990_v52 }
 0x2e8   : > { %v8303_v54 = vpop.f32.mrb[154].mxu0 }
 0x2e9   : > { %v6032_v18 = vmax.f32 %v5741_v42, %v8303_v54  ;;  %v6000_v35 = vpop.f32.mrb[155].mxu0 }
 0x2ea   : > { %v6031_v55 = vmax.f32 %v5740_v36, %v6000_v35 }
 0x2ec   : > { %v8306_v39 = vpop.f32.mrb[156].mxu0 }
 0x2ed   : > { %v6034_v62 = vmax.f32 %v5743_v60, %v8306_v39  ;;  %v6010_v38 = vpop.f32.mrb[157].mxu0 }
 0x2ee   : > { %v6033_v7 = vmax.f32 %v5742_v24, %v6010_v38 }
 0x2f0   : > { %v8309_v45 = vpop.f32.mrb[158].mxu0 }
 0x2f1   : > { %v6036_v53 = vmax.f32 %v5745_v40, %v8309_v45  ;;  %v6020_v46 = vpop.f32.mrb[159].mxu0 }
 0x2f2   : > { %v6035_v2 = vmax.f32 %v5744_v47, %v6020_v46 }
 0x2f4   : > { %v8342_v37 = vpop.f32.mrb[160].mxu0 }
 0x2f5   : > { %v6321_v10 = vmax.f32 %v6030_v33, %v8342_v37  ;;  %v6281_v3 = vpop.f32.mrb[161].mxu0 }
 0x2f6   : > { %v6320_v15 = vmax.f32 %v6029_v49, %v6281_v3 }
 0x2f7   : > { %v6336_v19 = vadd.f32 %v6984_v41, %v6321_v10 }
 0x2f8   : > { %v6335_v50 = vadd.f32 %v6984_v41, %v6320_v15  ;;  %v8345_v27 = vpop.f32.mrb[162].mxu0 }
 0x2f9   : > { %v6344_v30 = vmul.f32 0.2, %v6336_v19  ;;  %v6323_v0 = vmax.f32 %v6032_v18, %v8345_v27  ;;  %v6291_v58 = vpop.f32.mrb[163].mxu0 }
 0x2fa   : > { %v6343_v1 = vmul.f32 0.2, %v6335_v50  ;;  %v6322_v34 = vmax.f32 %v6031_v55, %v6291_v58 }
 0x2fb   : > { %v6352_v48 = vmax.f32 %v6336_v19, %v6344_v30  ;;  %v6338_v11 = vadd.f32 %v6984_v41, %v6323_v0  ;;  %v8348_v21 = vpop.f32.mrb[160].mxu1 }
 0x2fc   : > { %v6351_v59 = vmax.f32 %v6335_v50, %v6343_v1  ;;  %v6337_v61 = vadd.f32 %v6984_v41, %v6322_v34  ;;  %v6325_v14 = vmax.f32 %v6034_v62, %v8348_v21  ;;  %v6301_v29 = vpop.f32.mrb[161].mxu1 }
 0x2fd   : > { %6360 = vst.msk [vmem:[%s9959_s23 + $0x8] sm:$0xff] %vm669_vm2, %v6352_v48  ;;  %v6346_v56 = vmul.f32 0.2, %v6338_v11  ;;  %v6324_v20 = vmax.f32 %v6033_v7, %v6301_v29 }
 0x2fe   : > { %6359 = vst.msk [vmem:[%s9959_s23] sm:$0xff] %vm669_vm2, %v6351_v59  ;;  %v6345_v63 = vmul.f32 0.2, %v6337_v61  ;;  %v6340_v51 = vadd.f32 %v6984_v41, %v6325_v14 }
 0x2ff   : > { %v6354_v4 = vmax.f32 %v6338_v11, %v6346_v56  ;;  %v6339_v32 = vadd.f32 %v6984_v41, %v6324_v20  ;;  %v8351_v13 = vpop.f32.mrb[162].mxu1 }
 0x300   : > { %v6353_v22 = vmax.f32 %v6337_v61, %v6345_v63  ;;  %v6348_v43 = vmul.f32 0.2, %v6340_v51  ;;  %v6327_v44 = vmax.f32 %v6036_v53, %v8351_v13  ;;  %v6311_v9 = vpop.f32.mrb[163].mxu1 }
 0x301   : > { %6362 = vst.msk [vmem:[%s9959_s23 + $0x18] sm:$0xff] %vm669_vm2, %v6354_v4  ;;  %v6347_v26 = vmul.f32 0.2, %v6339_v32  ;;  %v6326_v12 = vmax.f32 %v6035_v2, %v6311_v9 }
 0x302   : > { %6361 = vst.msk [vmem:[%s9959_s23 + $0x10] sm:$0xff] %vm669_vm2, %v6353_v22  ;;  %v6356_v16 = vmax.f32 %v6340_v51, %v6348_v43  ;;  %v6342_v8 = vadd.f32 %v6984_v41, %v6327_v44 }
 0x303   : > { %v6355_v5 = vmax.f32 %v6339_v32, %v6347_v26  ;;  %v6341_v17 = vadd.f32 %v6984_v41, %v6326_v12 }
 0x304   : > { %6364 = vst.msk [vmem:[%s9959_s23 + $0x28] sm:$0xff] %vm669_vm2, %v6356_v16  ;;  %v6350_v42 = vmul.f32 0.2, %v6342_v8 }
 0x305   : > { %6363 = vst.msk [vmem:[%s9959_s23 + $0x20] sm:$0xff] %vm669_vm2, %v6355_v5  ;;  %v6349_v6 = vmul.f32 0.2, %v6341_v17 }
 0x306   : > { %v6358_v36 = vmax.f32 %v6342_v8, %v6350_v42 }
 0x307   : > { %v6357_v57 = vmax.f32 %v6341_v17, %v6349_v6 }
 0x308   : > { %6366 = vst.msk [vmem:[%s9959_s23 + $0x38] sm:$0xff] %vm669_vm2, %v6358_v36 }
 0x309   : > { %6365 = vst.msk [vmem:[%s9959_s23 + $0x30] sm:$0xff] %vm669_vm2, %v6357_v57 }
 0x30a PF: > { %s17_s26 = sadd.s32 1, %s8728_s26   ;;  %s9994_s24 = smov %s8724_s25 }
 0x30b   : > { %p14_p5 = scmp.ge.s32.totalorder %s17_s26, 4   ;;  %s9995_s25 = smov %s9997_s27 }
 0x30d   :  { %16 = sbr.rel (!%p14_p5) target bundleno = 2 (0x2), region = 100 }

// kernel: dgcnn_forward.16
= control target key start
LH: loop header
LB: loop body
LE: loop exit
PB: predicated region body
PF: predicated region fallthrough
CT: control target
= control target key end

     0   :  { %s1078_s9 = smov 0   ;;  %s1080_s10 = smov 0   ;;  %s1668_s0 = inlined_call_operand.vmem [shape: f32[2,20,64,64], index: 0, kind: input, shape index: {}]   ;;  %s1669_s1 = inlined_call_operand.vmem [shape: f32[2,64,64], index: 1, kind: input, shape index: {}]   ;;  %s1670_s2 = inlined_call_operand.vmem [shape: f32[2,64,64], index: 2, kind: output, shape index: {}]  }
   0x1   :  { %s1082_s11 = smov 0  }
   0x2 LB: > { %s24_s12 = sadd.s32 1, %s1057_s10  ;;  %p852_p0 = scmp.ge.s32.totalorder %s1061_s11, 1  ;;  %s1061_s11 = sphi %s1082_s11, %s12_s11   ;;  %s1057_s10 = sphi %s1080_s10, %s1672_s10   ;;  %s1053_s9 = sphi %s1078_s9, %s1671_s9  }
   0x3   : > { %p26_p1 = scmp.ge.s32.totalorder %s24_s12, 2  ;;  %p150_p2 = scmp.lt.s32.totalorder %s1061_s11, 3 }
   0x5   : > { %s1674_s12 = smov (%p26_p1, %s24_s12), 0  ;;  %p151_p3 = pnand %p852_p0, %p150_p2 }
   0x6   : > { %p190_p4 = scmp.lt.s32.totalorder (!%p151_p3), %s1053_s9, 1  ;;  %vm734_vm0 = vcmask (!%p151_p3), 523264  }
   0x7   : > { %154 = sbr.rel (%p151_p3) target bundleno = 129 (0x81), region = 28 }
   0xe   : > { %s1676_s9 = smov (!%p190_p4, %s1053_s9), 1 }
   0xf   : > { %s1014_s13 = smul.u32 1280, %s1676_s9  ;;  %s1012_s14 = sshll.u32 %s1676_s9, 6 }
  0x10   : > { %s1105_s17 = scalar_lea.vmem %s1669_s1, %s1012_s14  ;;  %s1422_s23 = scalar_lea.vmem %s1670_s2, %s1012_s14 }
  0x11   : > { %s1110_s20 = scalar_lea.vmem %s1668_s0, %s1014_s13  ;;  %v1113_v0 = vld [vmem:[%s1105_s17] sm:$0xff]  ;;  %v1123_v8 = vld [vmem:[%s1105_s17 + $0x8] sm:$0xff]  ;;  %v1183_v55 = vld [vmem:[%s1105_s17 + $0x10] sm:$0xff] }
  0x12   : > { %v227_v1 = vld [vmem:[%s1110_s20] sm:$0xff]  ;;  %v228_v26 = vld [vmem:[%s1110_s20 + $0x8] sm:$0xff] }
  0x13   : > { %v235_v2 = vadd.f32 %v227_v1, %v1113_v0  ;;  %v858_v3 = vld [vmem:[%s1110_s20 + $0x40] sm:$0xff]  ;;  %v859_v27 = vld [vmem:[%s1110_s20 + $0x48] sm:$0xff]  ;;  %v236_v31 = vadd.f32 %v228_v26, %v1123_v8  ;;  %v884_v26 = vld [vmem:[%s1110_s20 + $0x110] sm:$0xff] }
  0x14   : > { %v866_v4 = vld [vmem:[%s1110_s20 + $0x80] sm:$0xff]  ;;  %v252_v6 = vadd.f32 %v858_v3, %v1113_v0  ;;  %v253_v32 = vadd.f32 %v859_v27, %v1123_v8  ;;  %v867_v33 = vld [vmem:[%s1110_s20 + $0x88] sm:$0xff] }
  0x15   : > { %v874_v5 = vld [vmem:[%s1110_s20 + $0xc0] sm:$0xff]  ;;  %v277_v7 = vadd.f32 %v866_v4, %v1113_v0  ;;  %v875_v34 = vld [vmem:[%s1110_s20 + $0xc8] sm:$0xff]  ;;  %v278_v40 = vadd.f32 %v867_v33, %v1123_v8 }
  0x16   : > { %v882_v9 = vld [vmem:[%s1110_s20 + $0x100] sm:$0xff]  ;;  %v260_v10 = vmax.f32 %v235_v2, %v252_v6  ;;  %v302_v11 = vadd.f32 %v874_v5, %v1113_v0  ;;  %v883_v41 = vld [vmem:[%s1110_s20 + $0x108] sm:$0xff]  ;;  %v261_v46 = vmax.f32 %v236_v31, %v253_v32  ;;  %v303_v47 = vadd.f32 %v875_v34, %v1123_v8 }
  0x17   : > { %v890_v12 = vld [vmem:[%s1110_s20 + $0x140] sm:$0xff]  ;;  %v327_v19 = vadd.f32 %v882_v9, %v1113_v0  ;;  %v891_v48 = vld [vmem:[%s1110_s20 + $0x148] sm:$0xff]  ;;  %v328_v59 = vadd.f32 %v883_v41, %v1123_v8  ;;  %v892_v41 = vld [vmem:[%s1110_s20 + $0x150] sm:$0xff] }
  0x18   : > { %v898_v13 = vld [vmem:[%s1110_s20 + $0x180] sm:$0xff]  ;;  %v285_v18 = vmax.f32 %v260_v10, %v277_v7  ;;  %v352_v23 = vadd.f32 %v890_v12, %v1113_v0  ;;  %v899_v53 = vld [vmem:[%s1110_s20 + $0x188] sm:$0xff]  ;;  %v286_v58 = vmax.f32 %v261_v46, %v278_v40  ;;  %v353_v2 = vadd.f32 %v891_v48, %v1123_v8  ;;  %v860_v12 = vld [vmem:[%s1110_s20 + $0x50] sm:$0xff] }
  0x19   : > { %v906_v14 = vld [vmem:[%s1110_s20 + $0x1c0] sm:$0xff]  ;;  %v377_v24 = vadd.f32 %v898_v13, %v1113_v0  ;;  %v907_v54 = vld [vmem:[%s1110_s20 + $0x1c8] sm:$0xff]  ;;  %v378_v9 = vadd.f32 %v899_v53, %v1123_v8  ;;  %v329_v46 = vadd.f32 %v884_v26, %v1183_v55  ;;  %v916_v48 = vld [vmem:[%s1110_s20 + $0x210] sm:$0xff] }
  0x1a   : > { %v914_v15 = vld [vmem:[%s1110_s20 + $0x200] sm:$0xff]  ;;  %v310_v28 = vmax.f32 %v285_v18, %v302_v11  ;;  %v1143_v29 = vadd.f32 %v906_v14, %v1113_v0  ;;  %v915_v60 = vld [vmem:[%s1110_s20 + $0x208] sm:$0xff]  ;;  %v311_v7 = vmax.f32 %v286_v58, %v303_v47  ;;  %v1206_v10 = vadd.f32 %v907_v54, %v1123_v8  ;;  %v229_v11 = vld [vmem:[%s1110_s20 + $0x10] sm:$0xff] }
  0x1b   : > { %v922_v16 = vld [vmem:[%s1110_s20 + $0x240] sm:$0xff]  ;;  %v427_v35 = vadd.f32 %v914_v15, %v1113_v0  ;;  %v923_v61 = vld [vmem:[%s1110_s20 + $0x248] sm:$0xff]  ;;  %v428_v13 = vadd.f32 %v915_v60, %v1123_v8  ;;  %v908_v47 = vld [vmem:[%s1110_s20 + $0x1d0] sm:$0xff] }
  0x1c   : > { %v930_v17 = vld [vmem:[%s1110_s20 + $0x280] sm:$0xff]  ;;  %v1152_v36 = vadd.f32 %v922_v16, %v1113_v0  ;;  %v335_v42 = vmax.f32 %v310_v28, %v327_v19  ;;  %v931_v3 = vld [vmem:[%s1110_s20 + $0x288] sm:$0xff]  ;;  %v237_v16 = vadd.f32 %v229_v11, %v1183_v55  ;;  %v876_v19 = vld [vmem:[%s1110_s20 + $0xd0] sm:$0xff] }
  0x1d   : > { %v938_v20 = vld [vmem:[%s1110_s20 + $0x2c0] sm:$0xff]  ;;  %v1155_v37 = vadd.f32 %v930_v17, %v1113_v0  ;;  %v939_v4 = vld [vmem:[%s1110_s20 + $0x2c8] sm:$0xff]  ;;  %v254_v17 = vadd.f32 %v860_v12, %v1183_v55  ;;  %v304_v32 = vadd.f32 %v876_v19, %v1183_v55  ;;  %v1256_v53 = vld [vmem:[%s1105_s17 + $0x18] sm:$0xff]  ;;  %v404_v12 = vadd.f32 %v908_v47, %v1183_v55 }
  0x1e   : > { %v946_v21 = vld [vmem:[%s1110_s20 + $0x300] sm:$0xff]  ;;  %v1162_v43 = vadd.f32 %v938_v20, %v1113_v0  ;;  %v360_v56 = vmax.f32 %v335_v42, %v352_v23  ;;  %v947_v5 = vld [vmem:[%s1110_s20 + $0x308] sm:$0xff]  ;;  %v1223_v23 = vadd.f32 %v931_v3, %v1123_v8  ;;  %v1229_v27 = vadd.f32 %v939_v4, %v1123_v8  ;;  %v900_v42 = vld [vmem:[%s1110_s20 + $0x190] sm:$0xff] }
  0x1f   : > { %v954_v22 = vld [vmem:[%s1110_s20 + $0x340] sm:$0xff]  ;;  %v1169_v49 = vadd.f32 %v946_v21, %v1113_v0  ;;  %v955_v14 = vld [vmem:[%s1110_s20 + $0x348] sm:$0xff]  ;;  %v336_v21 = vmax.f32 %v311_v7, %v328_v59  ;;  %v1232_v28 = vadd.f32 %v947_v5, %v1123_v8  ;;  %v262_v31 = vmax.f32 %v237_v16, %v254_v17  ;;  %v924_v60 = vld [vmem:[%s1110_s20 + $0x250] sm:$0xff] }
  0x20   : > { %v962_v25 = vld [vmem:[%s1110_s20 + $0x380] sm:$0xff]  ;;  %v1172_v50 = vadd.f32 %v954_v22, %v1113_v0  ;;  %v385_v6 = vmax.f32 %v360_v56, %v377_v24  ;;  %v963_v15 = vld [vmem:[%s1110_s20 + $0x388] sm:$0xff]  ;;  %v1220_v22 = vadd.f32 %v923_v61, %v1123_v8  ;;  %v230_v61 = vld [vmem:[%s1110_s20 + $0x18] sm:$0xff]  ;;  %v354_v4 = vadd.f32 %v892_v41, %v1183_v55 }
  0x21   : > { %v970_v30 = vld [vmem:[%s1110_s20 + $0x3c0] sm:$0xff]  ;;  %v1175_v51 = vadd.f32 %v962_v25, %v1113_v0  ;;  %v971_v24 = vld [vmem:[%s1110_s20 + $0x3c8] sm:$0xff]  ;;  %v361_v34 = vmax.f32 %v336_v21, %v353_v2  ;;  %v932_v5 = vld [vmem:[%s1110_s20 + $0x290] sm:$0xff]  ;;  %v1288_v21 = vadd.f32 %v924_v60, %v1183_v55 }
  0x22   : > { %v978_v38 = vld [vmem:[%s1110_s20 + $0x400] sm:$0xff]  ;;  %v1178_v52 = vadd.f32 %v970_v30, %v1113_v0  ;;  %v410_v20 = vmax.f32 %v385_v6, %v1143_v29  ;;  %v979_v25 = vld [vmem:[%s1110_s20 + $0x408] sm:$0xff]  ;;  %v861_v6 = vld [vmem:[%s1110_s20 + $0x58] sm:$0xff] }
  0x23   : > { %v986_v39 = vld [vmem:[%s1110_s20 + $0x440] sm:$0xff]  ;;  %v1186_v57 = vadd.f32 %v978_v38, %v1113_v0  ;;  %v987_v29 = vld [vmem:[%s1110_s20 + $0x448] sm:$0xff]  ;;  %v1238_v38 = vadd.f32 %v955_v14, %v1123_v8  ;;  %v386_v56 = vmax.f32 %v361_v34, %v378_v9  ;;  %v869_v7 = vld [vmem:[%s1110_s20 + $0x98] sm:$0xff]  ;;  %v255_v19 = vadd.f32 %v861_v6, %v1256_v53 }
  0x24   : > { %v994_v44 = vld [vmem:[%s1110_s20 + $0x480] sm:$0xff]  ;;  %v1192_v62 = vadd.f32 %v986_v39, %v1113_v0  ;;  %v995_v30 = vld [vmem:[%s1110_s20 + $0x488] sm:$0xff]  ;;  %v435_v33 = vmax.f32 %v410_v20, %v427_v35  ;;  %v1241_v39 = vadd.f32 %v963_v15, %v1123_v8  ;;  %v1260_v58 = vadd.f32 %v987_v29, %v1123_v8  ;;  %v877_v14 = vld [vmem:[%s1110_s20 + $0xd8] sm:$0xff] }
  0x25   : > { %v1002_v45 = vld [vmem:[%s1110_s20 + $0x4c0] sm:$0xff]  ;;  %v1195_v63 = vadd.f32 %v994_v44, %v1113_v0  ;;  %v1003_v40 = vld [vmem:[%s1110_s20 + $0x4c8] sm:$0xff]  ;;  %v1247_v44 = vadd.f32 %v971_v24, %v1123_v8  ;;  %v1263_v59 = vadd.f32 %v995_v30, %v1123_v8  ;;  %v411_v11 = vmax.f32 %v386_v56, %v1206_v10  ;;  %v948_v16 = vld [vmem:[%s1110_s20 + $0x310] sm:$0xff] }
  0x26   : > { %v1198_v1 = vadd.f32 %v1002_v45, %v1113_v0  ;;  %v868_v0 = vld [vmem:[%s1110_s20 + $0x90] sm:$0xff]  ;;  %v1250_v45 = vadd.f32 %v979_v25, %v1123_v8  ;;  %v460_v54 = vmax.f32 %v435_v33, %v1152_v36  ;;  %v1268_v2 = vadd.f32 %v1003_v40, %v1123_v8  ;;  %v885_v26 = vld [vmem:[%s1110_s20 + $0x118] sm:$0xff] }
  0x27   : > { %v279_v18 = vadd.f32 %v868_v0, %v1183_v55  ;;  %v379_v36 = vadd.f32 %v900_v42, %v1183_v55  ;;  %v429_v0 = vadd.f32 %v916_v48, %v1183_v55  ;;  %v940_v8 = vld [vmem:[%s1110_s20 + $0x2d0] sm:$0xff]  ;;  %v436_v20 = vmax.f32 %v411_v11, %v428_v13  ;;  %v231_v11 = vld [vmem:[%s1110_s20 + $0x20] sm:$0xff] }
  0x28   : > { %v485_v9 = vmax.f32 %v460_v54, %v1155_v37  ;;  %v956_v17 = vld [vmem:[%s1110_s20 + $0x350] sm:$0xff]  ;;  %v280_v37 = vadd.f32 %v869_v7, %v1256_v53  ;;  %v1291_v24 = vadd.f32 %v932_v5, %v1183_v55  ;;  %v1296_v30 = vadd.f32 %v940_v8, %v1183_v55  ;;  %v1328_v5 = vld [vmem:[%s1105_s17 + $0x20] sm:$0xff] }
  0x29   : > { %v287_v35 = vmax.f32 %v262_v31, %v279_v18  ;;  %v238_v18 = vadd.f32 %v230_v61, %v1256_v53  ;;  %v964_v25 = vld [vmem:[%s1110_s20 + $0x390] sm:$0xff]  ;;  %v305_v13 = vadd.f32 %v877_v14, %v1256_v53  ;;  %v461_v34 = vmax.f32 %v436_v20, %v1220_v22  ;;  %v933_v20 = vld [vmem:[%s1110_s20 + $0x298] sm:$0xff] }
  0x2a   : > { %v510_v10 = vmax.f32 %v485_v9, %v1162_v43  ;;  %v972_v31 = vld [vmem:[%s1110_s20 + $0x3d0] sm:$0xff]  ;;  %v1304_v40 = vadd.f32 %v948_v16, %v1183_v55  ;;  %v1307_v41 = vadd.f32 %v956_v17, %v1183_v55  ;;  %v1312_v47 = vadd.f32 %v964_v25, %v1183_v55  ;;  %v917_v9 = vld [vmem:[%s1110_s20 + $0x218] sm:$0xff]  ;;  %v862_v16 = vld [vmem:[%s1110_s20 + $0x60] sm:$0xff] }
  0x2b   : > { %v312_v3 = vmax.f32 %v287_v35, %v304_v32  ;;  %v980_v32 = vld [vmem:[%s1110_s20 + $0x410] sm:$0xff]  ;;  %v263_v43 = vmax.f32 %v238_v18, %v255_v19  ;;  %v893_v35 = vld [vmem:[%s1110_s20 + $0x158] sm:$0xff]  ;;  %v330_v22 = vadd.f32 %v885_v26, %v1256_v53  ;;  %v486_v60 = vmax.f32 %v461_v34, %v1223_v23  ;;  %v870_v17 = vld [vmem:[%s1110_s20 + $0xa0] sm:$0xff] }
  0x2c   : > { %v535_v33 = vmax.f32 %v510_v10, %v1169_v49  ;;  %v988_v42 = vld [vmem:[%s1110_s20 + $0x450] sm:$0xff]  ;;  %v1320_v61 = vadd.f32 %v972_v31, %v1183_v55  ;;  %v355_v23 = vadd.f32 %v893_v35, %v1256_v53  ;;  %v239_v26 = vadd.f32 %v231_v11, %v1328_v5  ;;  %v886_v35 = vld [vmem:[%s1110_s20 + $0x120] sm:$0xff] }
  0x2d   : > { %v337_v15 = vmax.f32 %v312_v3, %v329_v46  ;;  %v996_v48 = vld [vmem:[%s1110_s20 + $0x490] sm:$0xff]  ;;  %v288_v54 = vmax.f32 %v263_v43, %v280_v37  ;;  %v1323_v3 = vadd.f32 %v980_v32, %v1183_v55  ;;  %v1331_v7 = vadd.f32 %v988_v42, %v1183_v55  ;;  %v941_v32 = vld [vmem:[%s1110_s20 + $0x2d8] sm:$0xff] }
  0x2e   : > { %v1004_v49 = vld [vmem:[%s1110_s20 + $0x4d0] sm:$0xff]  ;;  %v560_v56 = vmax.f32 %v535_v33, %v1172_v50  ;;  %v511_v14 = vmax.f32 %v486_v60, %v1229_v27  ;;  %v949_v43 = vld [vmem:[%s1110_s20 + $0x318] sm:$0xff]  ;;  %v281_v33 = vadd.f32 %v870_v17, %v1328_v5  ;;  %v480_v42 = vadd.f32 %v933_v20, %v1256_v53 }
  0x2f   : > { %v362_v29 = vmax.f32 %v337_v15, %v354_v4  ;;  %v901_v4 = vld [vmem:[%s1110_s20 + $0x198] sm:$0xff]  ;;  %v313_v50 = vmax.f32 %v288_v54, %v305_v13  ;;  %v1339_v15 = vadd.f32 %v996_v48, %v1183_v55  ;;  %v256_v13 = vadd.f32 %v862_v16, %v1328_v5 }
  0x30   : > { %v585_v8 = vmax.f32 %v560_v56, %v1175_v51  ;;  %v380_v37 = vadd.f32 %v901_v4, %v1256_v53  ;;  %v925_v51 = vld [vmem:[%s1110_s20 + $0x258] sm:$0xff]  ;;  %v536_v25 = vmax.f32 %v511_v14, %v1232_v28  ;;  %v1372_v56 = vadd.f32 %v941_v32, %v1256_v53  ;;  %v894_v4 = vld [vmem:[%s1110_s20 + $0x160] sm:$0xff]  ;;  %v232_v32 = vld [vmem:[%s1110_s20 + $0x28] sm:$0xff] }
  0x31   : > { %v387_v46 = vmax.f32 %v362_v29, %v379_v36  ;;  %v909_v36 = vld [vmem:[%s1110_s20 + $0x1d8] sm:$0xff]  ;;  %v338_v19 = vmax.f32 %v313_v50, %v330_v22  ;;  %v878_v29 = vld [vmem:[%s1110_s20 + $0xe0] sm:$0xff]  ;;  %v455_v34 = vadd.f32 %v925_v51, %v1256_v53  ;;  %v264_v54 = vmax.f32 %v239_v26, %v256_v13 }
  0x32   : > { %v405_v10 = vadd.f32 %v909_v36, %v1256_v53  ;;  %v610_v27 = vmax.f32 %v585_v8, %v1178_v52  ;;  %v561_v28 = vmax.f32 %v536_v25, %v1238_v38  ;;  %v957_v48 = vld [vmem:[%s1110_s20 + $0x358] sm:$0xff]  ;;  %v306_v22 = vadd.f32 %v878_v29, %v1328_v5  ;;  %v902_v14 = vld [vmem:[%s1110_s20 + $0x1a0] sm:$0xff] }
  0x33   : > { %v412_v6 = vmax.f32 %v387_v46, %v404_v12  ;;  %v1342_v12 = vadd.f32 %v1004_v49, %v1183_v55  ;;  %v430_v55 = vadd.f32 %v917_v9, %v1256_v53  ;;  %v363_v31 = vmax.f32 %v338_v19, %v355_v23  ;;  %v965_v49 = vld [vmem:[%s1110_s20 + $0x398] sm:$0xff]  ;;  %v918_v26 = vld [vmem:[%s1110_s20 + $0x220] sm:$0xff] }
  0x34   : > { %v635_v52 = vmax.f32 %v610_v27, %v1186_v57  ;;  %v586_v38 = vmax.f32 %v561_v28, %v1241_v39  ;;  %v530_v60 = vadd.f32 %v949_v43, %v1256_v53  ;;  %v981_v50 = vld [vmem:[%s1110_s20 + $0x418] sm:$0xff]  ;;  %v289_v23 = vmax.f32 %v264_v54, %v281_v33  ;;  %v863_v28 = vld [vmem:[%s1110_s20 + $0x68] sm:$0xff] }
  0x35   : > { %v437_v18 = vmax.f32 %v412_v6, %v429_v0  ;;  %v388_v46 = vmax.f32 %v363_v31, %v380_v37  ;;  %v973_v6 = vld [vmem:[%s1110_s20 + $0x3d8] sm:$0xff]  ;;  %v331_v9 = vadd.f32 %v886_v35, %v1328_v5  ;;  %v1383_v11 = vadd.f32 %v957_v48, %v1256_v53 }
  0x36   : > { %v660_v57 = vmax.f32 %v635_v52, %v1192_v62  ;;  %v611_v39 = vmax.f32 %v586_v38, %v1247_v44  ;;  %v1386_v8 = vadd.f32 %v965_v49, %v1256_v53  ;;  %v989_v17 = vld [vmem:[%s1110_s20 + $0x458] sm:$0xff]  ;;  %v314_v19 = vmax.f32 %v289_v23, %v306_v22  ;;  %v926_v52 = vld [vmem:[%s1110_s20 + $0x260] sm:$0xff]  ;;  %v879_v38 = vld [vmem:[%s1110_s20 + $0xe8] sm:$0xff] }
  0x37   : > { %v462_v0 = vmax.f32 %v437_v18, %v1288_v21  ;;  %v413_v36 = vmax.f32 %v388_v46, %v405_v10  ;;  %v997_v18 = vld [vmem:[%s1110_s20 + $0x498] sm:$0xff]  ;;  %v1396_v10 = vadd.f32 %v973_v6, %v1256_v53  ;;  %v1399_v51 = vadd.f32 %v981_v50, %v1256_v53  ;;  %v934_v49 = vld [vmem:[%s1110_s20 + $0x2a0] sm:$0xff] }
  0x38   : > { %v685_v62 = vmax.f32 %v660_v57, %v1195_v63  ;;  %v356_v63 = vadd.f32 %v894_v4, %v1328_v5  ;;  %v636_v37 = vmax.f32 %v611_v39, %v1250_v45  ;;  %v1005_v25 = vld [vmem:[%s1110_s20 + $0x4d8] sm:$0xff]  ;;  %v1407_v45 = vld [vmem:[%s1105_s17 + $0x28] sm:$0xff]  ;;  %v1411_v31 = vadd.f32 %v989_v17, %v1256_v53  ;;  %v942_v22 = vld [vmem:[%s1110_s20 + $0x2e0] sm:$0xff] }
  0x39   : > { %v487_v21 = vmax.f32 %v462_v0, %v1291_v24  ;;  %v438_v16 = vmax.f32 %v413_v36, %v430_v55  ;;  %v339_v55 = vmax.f32 %v314_v19, %v331_v9  ;;  %v1431_v46 = vadd.f32 %v1005_v25, %v1256_v53  ;;  %v950_v4 = vld [vmem:[%s1110_s20 + $0x320] sm:$0xff]  ;;  %v887_v9 = vld [vmem:[%s1110_s20 + $0x128] sm:$0xff] }
  0x3a   : > { %v710_v44 = vmax.f32 %v685_v62, %v1198_v1  ;;  %v381_v1 = vadd.f32 %v902_v14, %v1328_v5  ;;  %v661_v0 = vmax.f32 %v636_v37, %v1260_v58  ;;  %v431_v48 = vadd.f32 %v918_v26, %v1328_v5  ;;  %v958_v23 = vld [vmem:[%s1110_s20 + $0x360] sm:$0xff] }
  0x3b   : > { %v512_v24 = vmax.f32 %v487_v21, %v1296_v30  ;;  %v463_v27 = vmax.f32 %v438_v16, %v455_v34  ;;  %v364_v58 = vmax.f32 %v339_v55, %v356_v63  ;;  %v871_v34 = vld [vmem:[%s1110_s20 + $0xa8] sm:$0xff]  ;;  %v240_v57 = vadd.f32 %v232_v32, %v1407_v45  ;;  %v966_v39 = vld [vmem:[%s1110_s20 + $0x3a0] sm:$0xff] }
  0x3c   : > { %v718_v29 = vmul.f32 0.2, %v710_v44  ;;  %v686_v21 = vmax.f32 %v661_v0, %v1263_v59  ;;  %v456_v59 = vadd.f32 %v926_v52, %v1328_v5  ;;  %v481_v50 = vadd.f32 %v934_v49, %v1328_v5  ;;  %v982_v19 = vld [vmem:[%s1110_s20 + $0x420] sm:$0xff]  ;;  %v895_v63 = vld [vmem:[%s1110_s20 + $0x168] sm:$0xff]  ;;  %v1472_v0 = vld [vmem:[%s1105_s17 + $0x30] sm:$0xff] }
  0x3d   : > { %v537_v30 = vmax.f32 %v512_v24, %v1304_v40  ;;  %v910_v40 = vld [vmem:[%s1110_s20 + $0x1e0] sm:$0xff]  ;;  %v488_v13 = vmax.f32 %v463_v27, %v480_v42  ;;  %v389_v54 = vmax.f32 %v364_v58, %v381_v1  ;;  %v257_v24 = vadd.f32 %v863_v28, %v1407_v45 }
  0x3e   : > { %v406_v33 = vadd.f32 %v910_v40, %v1328_v5  ;;  %v726_v35 = vmax.f32 %v710_v44, %v718_v29  ;;  %v506_v62 = vadd.f32 %v942_v22, %v1328_v5  ;;  %v531_v17 = vadd.f32 %v950_v4, %v1328_v5  ;;  %v990_v40 = vld [vmem:[%s1110_s20 + $0x460] sm:$0xff]  ;;  %v903_v29 = vld [vmem:[%s1110_s20 + $0x1a8] sm:$0xff] }
  0x3f   : > { %v562_v20 = vmax.f32 %v537_v30, %v1307_v41  ;;  %v1414_v41 = vadd.f32 %v997_v18, %v1256_v53  ;;  %v513_v42 = vmax.f32 %v488_v13, %v1372_v56  ;;  %v711_v53 = vmax.f32 %v686_v21, %v1268_v2  ;;  %v974_v18 = vld [vmem:[%s1110_s20 + $0x3e0] sm:$0xff]  ;;  %v911_v13 = vld [vmem:[%s1110_s20 + $0x1e8] sm:$0xff]  ;;  %v864_v21 = vld [vmem:[%s1110_s20 + $0x70] sm:$0xff] }
  0x40   : > { %735 = vst.msk [vmem:[%s1422_s23] sm:$0xff] %vm734_vm0, %v726_v35  ;;  %v414_v6 = vmax.f32 %v389_v54, %v406_v33  ;;  %v265_v14 = vmax.f32 %v240_v57, %v257_v24  ;;  %v307_v30 = vadd.f32 %v879_v38, %v1407_v45  ;;  %v1461_v37 = vadd.f32 %v958_v23, %v1328_v5  ;;  %v998_v1 = vld [vmem:[%s1110_s20 + $0x4a0] sm:$0xff]  ;;  %v233_v35 = vld [vmem:[%s1110_s20 + $0x30] sm:$0xff]  ;;  %v927_v38 = vld [vmem:[%s1110_s20 + $0x268] sm:$0xff] }
  0x41   : > { %v587_v43 = vmax.f32 %v562_v20, %v1312_v47  ;;  %v538_v36 = vmax.f32 %v513_v42, %v530_v60  ;;  %v719_v2 = vmul.f32 0.2, %v711_v53  ;;  %v332_v20 = vadd.f32 %v887_v9, %v1407_v45  ;;  %v1006_v26 = vld [vmem:[%s1110_s20 + $0x4e0] sm:$0xff]  ;;  %v935_v4 = vld [vmem:[%s1110_s20 + $0x2a8] sm:$0xff]  ;;  %v888_v9 = vld [vmem:[%s1110_s20 + $0x130] sm:$0xff] }
  0x42   : > { %v439_v60 = vmax.f32 %v414_v6, %v431_v48  ;;  %v581_v55 = vadd.f32 %v966_v39, %v1328_v5  ;;  %v1477_v32 = vadd.f32 %v974_v18, %v1328_v5  ;;  %v1487_v28 = vadd.f32 %v990_v40, %v1328_v5  ;;  %v943_v24 = vld [vmem:[%s1110_s20 + $0x2e8] sm:$0xff] }
  0x43   : > { %v612_v47 = vmax.f32 %v587_v43, %v1320_v61  ;;  %v282_v61 = vadd.f32 %v871_v34, %v1407_v45  ;;  %v727_v44 = vmax.f32 %v711_v53, %v719_v2  ;;  %v357_v43 = vadd.f32 %v895_v63, %v1407_v45  ;;  %v919_v34 = vld [vmem:[%s1110_s20 + $0x228] sm:$0xff]  ;;  %v880_v53 = vld [vmem:[%s1110_s20 + $0xf0] sm:$0xff] }
  0x44   : > { %v464_v25 = vmax.f32 %v439_v60, %v456_v59  ;;  %v1493_v48 = vadd.f32 %v998_v1, %v1328_v5  ;;  %v1496_v49 = vadd.f32 %v1006_v26, %v1328_v5  ;;  %v407_v57 = vadd.f32 %v911_v13, %v1407_v45  ;;  %v959_v39 = vld [vmem:[%s1110_s20 + $0x368] sm:$0xff]  ;;  %v912_v1 = vld [vmem:[%s1110_s20 + $0x1f0] sm:$0xff] }
  0x45   : > { %v637_v56 = vmax.f32 %v612_v47, %v1323_v3  ;;  %v563_v3 = vmax.f32 %v538_v36, %v1383_v11  ;;  %736 = vst.msk [vmem:[%s1422_s23 + $0x8] sm:$0xff] %vm734_vm0, %v727_v44  ;;  %v382_v47 = vadd.f32 %v903_v29, %v1407_v45  ;;  %v482_v60 = vadd.f32 %v935_v4, %v1407_v45  ;;  %v975_v18 = vld [vmem:[%s1110_s20 + $0x3e8] sm:$0xff]  ;;  %v920_v26 = vld [vmem:[%s1110_s20 + $0x230] sm:$0xff]  ;;  %v889_v4 = vld [vmem:[%s1110_s20 + $0x138] sm:$0xff] }
  0x46   : > { %v489_v52 = vmax.f32 %v464_v25, %v481_v50  ;;  %v951_v50 = vld [vmem:[%s1110_s20 + $0x328] sm:$0xff]  ;;  %v936_v13 = vld [vmem:[%s1110_s20 + $0x2b0] sm:$0xff] }
  0x47   : > { %v662_v16 = vmax.f32 %v637_v56, %v1331_v7  ;;  %v290_v7 = vmax.f32 %v265_v14, %v282_v61  ;;  %v588_v27 = vmax.f32 %v563_v3, %v1386_v8  ;;  %v241_v61 = vadd.f32 %v233_v35, %v1472_v0  ;;  %v967_v14 = vld [vmem:[%s1110_s20 + $0x3a8] sm:$0xff] }
  0x48   : > { %v514_v22 = vmax.f32 %v489_v52, %v506_v62  ;;  %v258_v56 = vadd.f32 %v864_v21, %v1472_v0  ;;  %v457_v62 = vadd.f32 %v927_v38, %v1407_v45  ;;  %v532_v44 = vadd.f32 %v951_v50, %v1407_v45  ;;  %v983_v40 = vld [vmem:[%s1110_s20 + $0x428] sm:$0xff]  ;;  %v944_v21 = vld [vmem:[%s1110_s20 + $0x2f0] sm:$0xff] }
  0x49   : > { %v687_v11 = vmax.f32 %v662_v16, %v1339_v15  ;;  %v1480_v15 = vadd.f32 %v982_v19, %v1328_v5  ;;  %v315_v8 = vmax.f32 %v290_v7, %v307_v30  ;;  %v613_v33 = vmax.f32 %v588_v27, %v1396_v10  ;;  %v872_v10 = vld [vmem:[%s1110_s20 + $0xb0] sm:$0xff] }
  0x4a   : > { %v432_v5 = vadd.f32 %v919_v34, %v1407_v45  ;;  %v539_v6 = vmax.f32 %v514_v22, %v531_v17  ;;  %v283_v23 = vadd.f32 %v872_v10, %v1472_v0  ;;  %v266_v30 = vmax.f32 %v241_v61, %v258_v56  ;;  %v896_v19 = vld [vmem:[%s1110_s20 + $0x170] sm:$0xff]  ;;  %v865_v22 = vld [vmem:[%s1110_s20 + $0x78] sm:$0xff] }
  0x4b   : > { %v712_v58 = vmax.f32 %v687_v11, %v1342_v12  ;;  %v340_v12 = vmax.f32 %v315_v8, %v332_v20  ;;  %v638_v54 = vmax.f32 %v613_v33, %v1399_v51  ;;  %v308_v16 = vadd.f32 %v880_v53, %v1472_v0  ;;  %v904_v20 = vld [vmem:[%s1110_s20 + $0x1b0] sm:$0xff] }
  0x4c   : > { %v564_v3 = vmax.f32 %v539_v6, %v1461_v37  ;;  %v1523_v17 = vadd.f32 %v943_v24, %v1407_v45  ;;  %v291_v7 = vmax.f32 %v266_v30, %v283_v23  ;;  %v1533_v27 = vadd.f32 %v959_v39, %v1407_v45  ;;  %v897_v24 = vld [vmem:[%s1110_s20 + $0x178] sm:$0xff] }
  0x4d   : > { %v720_v42 = vmul.f32 0.2, %v712_v58  ;;  %v365_v59 = vmax.f32 %v340_v12, %v357_v43  ;;  %v663_v51 = vmax.f32 %v638_v54, %v1411_v31  ;;  %v1536_v25 = vadd.f32 %v967_v14, %v1407_v45  ;;  %v234_v12 = vld [vmem:[%s1110_s20 + $0x38] sm:$0xff] }
  0x4e   : > { %v589_v11 = vmax.f32 %v564_v3, %v581_v55  ;;  %v1541_v8 = vadd.f32 %v975_v18, %v1407_v45  ;;  %v316_v43 = vmax.f32 %v291_v7, %v308_v16  ;;  %v928_v55 = vld [vmem:[%s1110_s20 + $0x270] sm:$0xff]  ;;  %v1551_v34 = vadd.f32 %v983_v40, %v1407_v45  ;;  %v913_v6 = vld [vmem:[%s1110_s20 + $0x1f8] sm:$0xff] }
  0x4f   : > { %v728_v36 = vmax.f32 %v712_v58, %v720_v42  ;;  %v390_v2 = vmax.f32 %v365_v59, %v382_v47  ;;  %v688_v31 = vmax.f32 %v663_v51, %v1414_v41  ;;  %v333_v41 = vadd.f32 %v888_v9, %v1472_v0  ;;  %v1547_v58 = vld [vmem:[%s1105_s17 + $0x38] sm:$0xff] }
  0x50   : > { %v614_v52 = vmax.f32 %v589_v11, %v1477_v32  ;;  %v383_v35 = vadd.f32 %v904_v20, %v1472_v0  ;;  %v408_v42 = vadd.f32 %v912_v1, %v1472_v0  ;;  %v433_v54 = vadd.f32 %v920_v26, %v1472_v0  ;;  %v873_v32 = vld [vmem:[%s1110_s20 + $0xb8] sm:$0xff] }
  0x51   : > { %737 = vst.msk [vmem:[%s1422_s23 + $0x10] sm:$0xff] %vm734_vm0, %v728_v36  ;;  %v415_v63 = vmax.f32 %v390_v2, %v407_v57  ;;  %v713_v37 = vmax.f32 %v688_v31, %v1431_v46  ;;  %v358_v46 = vadd.f32 %v896_v19, %v1472_v0  ;;  %v341_v10 = vmax.f32 %v316_v43, %v333_v41  ;;  %v881_v57 = vld [vmem:[%s1110_s20 + $0xf8] sm:$0xff] }
  0x52   : > { %v639_v53 = vmax.f32 %v614_v52, %v1480_v15  ;;  %v1563_v59 = vadd.f32 %v928_v55, %v1472_v0  ;;  %v1571_v36 = vadd.f32 %v944_v21, %v1472_v0  ;;  %v242_v51 = vadd.f32 %v234_v12, %v1547_v58  ;;  %v905_v15 = vld [vmem:[%s1110_s20 + $0x1b8] sm:$0xff]  ;;  %v991_v12 = vld [vmem:[%s1110_s20 + $0x468] sm:$0xff] }
  0x53   : > { %v440_v29 = vmax.f32 %v415_v63, %v432_v5  ;;  %v721_v33 = vmul.f32 0.2, %v713_v37  ;;  %v1566_v5 = vadd.f32 %v936_v13, %v1472_v0  ;;  %v366_v56 = vmax.f32 %v341_v10, %v358_v46  ;;  %v929_v39 = vld [vmem:[%s1110_s20 + $0x278] sm:$0xff] }
  0x54   : > { %v664_v50 = vmax.f32 %v639_v53, %v1487_v28  ;;  %v259_v23 = vadd.f32 %v865_v22, %v1547_v58  ;;  %v284_v9 = vadd.f32 %v873_v32, %v1547_v58  ;;  %v309_v2 = vadd.f32 %v881_v57, %v1547_v58  ;;  %v937_v28 = vld [vmem:[%s1110_s20 + $0x2b8] sm:$0xff]  ;;  %v999_v53 = vld [vmem:[%s1110_s20 + $0x4a8] sm:$0xff] }
  0x55   : > { %v465_v47 = vmax.f32 %v440_v29, %v457_v62  ;;  %v729_v38 = vmax.f32 %v713_v37, %v721_v33  ;;  %v921_v62 = vld [vmem:[%s1110_s20 + $0x238] sm:$0xff]  ;;  %v391_v30 = vmax.f32 %v366_v56, %v383_v35  ;;  %v334_v16 = vadd.f32 %v889_v4, %v1547_v58  ;;  %v960_v4 = vld [vmem:[%s1110_s20 + $0x370] sm:$0xff] }
  0x56   : > { %v359_v31 = vadd.f32 %v897_v24, %v1547_v58  ;;  %v945_v3 = vld [vmem:[%s1110_s20 + $0x2f8] sm:$0xff]  ;;  %v267_v18 = vmax.f32 %v242_v51, %v259_v23  ;;  %v384_v19 = vadd.f32 %v905_v15, %v1547_v58  ;;  %v409_v63 = vadd.f32 %v913_v6, %v1547_v58  ;;  %v1007_v6 = vld [vmem:[%s1110_s20 + $0x4e8] sm:$0xff] }
  0x57   : > { %v490_v61 = vmax.f32 %v465_v47, %v482_v60  ;;  %738 = vst.msk [vmem:[%s1422_s23 + $0x18] sm:$0xff] %vm734_vm0, %v729_v38  ;;  %v689_v60 = vmax.f32 %v664_v50, %v1493_v48  ;;  %v953_v40 = vld [vmem:[%s1110_s20 + $0x338] sm:$0xff]  ;;  %v416_v41 = vmax.f32 %v391_v30, %v408_v42  ;;  %v434_v20 = vadd.f32 %v921_v62, %v1547_v58  ;;  %v952_v47 = vld [vmem:[%s1110_s20 + $0x330] sm:$0xff] }
  0x58   : > { %v1596_v37 = vadd.f32 %v929_v39, %v1547_v58  ;;  %v969_v48 = vld [vmem:[%s1110_s20 + $0x3b8] sm:$0xff]  ;;  %v292_v26 = vmax.f32 %v267_v18, %v284_v9  ;;  %v484_v29 = vadd.f32 %v937_v28, %v1547_v58  ;;  %v1603_v43 = vadd.f32 %v945_v3, %v1547_v58  ;;  %v968_v50 = vld [vmem:[%s1110_s20 + $0x3b0] sm:$0xff] }
  0x59   : > { %v515_v14 = vmax.f32 %v490_v61, %v1523_v17  ;;  %v961_v17 = vld [vmem:[%s1110_s20 + $0x378] sm:$0xff]  ;;  %v714_v1 = vmax.f32 %v689_v60, %v1496_v49  ;;  %v441_v13 = vmax.f32 %v416_v41, %v433_v54  ;;  %v534_v33 = vadd.f32 %v953_v40, %v1547_v58  ;;  %v976_v62 = vld [vmem:[%s1110_s20 + $0x3f0] sm:$0xff] }
  0x5a   : > { %v977_v11 = vld [vmem:[%s1110_s20 + $0x3f8] sm:$0xff]  ;;  %v1610_v52 = vadd.f32 %v961_v17, %v1547_v58  ;;  %v317_v10 = vmax.f32 %v292_v26, %v309_v2  ;;  %v584_v42 = vadd.f32 %v969_v48, %v1547_v58  ;;  %v682_v2 = vadd.f32 %v999_v53, %v1407_v45  ;;  %v992_v18 = vld [vmem:[%s1110_s20 + $0x470] sm:$0xff] }
  0x5b   : > { %v540_v7 = vmax.f32 %v515_v14, %v532_v44  ;;  %v985_v44 = vld [vmem:[%s1110_s20 + $0x438] sm:$0xff]  ;;  %v722_v21 = vmul.f32 0.2, %v714_v1  ;;  %v609_v22 = vadd.f32 %v977_v11, %v1547_v58  ;;  %v466_v54 = vmax.f32 %v441_v13, %v1563_v59 }
  0x5c   : > { %v993_v46 = vld [vmem:[%s1110_s20 + $0x478] sm:$0xff]  ;;  %v634_v32 = vadd.f32 %v985_v44, %v1547_v58  ;;  %v342_v24 = vmax.f32 %v317_v10, %v334_v16  ;;  %v533_v59 = vadd.f32 %v952_v47, %v1472_v0  ;;  %v707_v14 = vadd.f32 %v1007_v6, %v1407_v45 }
  0x5d   : > { %v565_v55 = vmax.f32 %v540_v7, %v1533_v27  ;;  %v1001_v35 = vld [vmem:[%s1110_s20 + $0x4b8] sm:$0xff]  ;;  %v659_v57 = vadd.f32 %v993_v46, %v1547_v58  ;;  %v730_v38 = vmax.f32 %v714_v1, %v722_v21  ;;  %v491_v15 = vmax.f32 %v466_v54, %v1566_v5  ;;  %v1000_v7 = vld [vmem:[%s1110_s20 + $0x4b0] sm:$0xff] }
  0x5e   : > { %v1009_v49 = vld [vmem:[%s1110_s20 + $0x4f8] sm:$0xff]  ;;  %v684_v61 = vadd.f32 %v1001_v35, %v1547_v58  ;;  %v367_v23 = vmax.f32 %v342_v24, %v359_v31  ;;  %v583_v16 = vadd.f32 %v968_v50, %v1472_v0  ;;  %v984_v31 = vld [vmem:[%s1110_s20 + $0x430] sm:$0xff]  ;;  %v608_v60 = vadd.f32 %v976_v62, %v1472_v0 }
  0x5f   : > { %v590_v27 = vmax.f32 %v565_v55, %v1536_v25  ;;  %v709_v56 = vadd.f32 %v1009_v49, %v1547_v58  ;;  %v657_v25 = vadd.f32 %v991_v12, %v1407_v45  ;;  %739 = vst.msk [vmem:[%s1422_s23 + $0x20] sm:$0xff] %vm734_vm0, %v730_v38  ;;  %v516_v58 = vmax.f32 %v491_v15, %v1571_v36  ;;  %v1008_v1 = vld [vmem:[%s1110_s20 + $0x4f0] sm:$0xff] }
  0x60   : > { %v392_v5 = vmax.f32 %v367_v23, %v384_v19  ;;  %v633_v19 = vadd.f32 %v984_v31, %v1472_v0  ;;  %v658_v11 = vadd.f32 %v992_v18, %v1472_v0  ;;  %v683_v46 = vadd.f32 %v1000_v7, %v1472_v0 }
  0x61   : > { %v615_v51 = vmax.f32 %v590_v27, %v1541_v8  ;;  %v558_v8 = vadd.f32 %v960_v4, %v1472_v0  ;;  %v541_v30 = vmax.f32 %v516_v58, %v533_v59  ;;  %v708_v13 = vadd.f32 %v1008_v1, %v1472_v0 }
  0x62   : > { %v417_v28 = vmax.f32 %v392_v5, %v409_v63 }
  0x63   : > { %v640_v9 = vmax.f32 %v615_v51, %v1551_v34  ;;  %v566_v34 = vmax.f32 %v541_v30, %v558_v8 }
  0x64   : > { %v442_v36 = vmax.f32 %v417_v28, %v434_v20 }
  0x65   : > { %v665_v39 = vmax.f32 %v640_v9, %v657_v25  ;;  %v591_v17 = vmax.f32 %v566_v34, %v583_v16 }
  0x66   : > { %v467_v45 = vmax.f32 %v442_v36, %v1596_v37 }
  0x67   : > { %v690_v3 = vmax.f32 %v665_v39, %v682_v2  ;;  %v616_v48 = vmax.f32 %v591_v17, %v608_v60 }
  0x68   : > { %v492_v63 = vmax.f32 %v467_v45, %v484_v29 }
  0x69   : > { %v715_v40 = vmax.f32 %v690_v3, %v707_v14  ;;  %v641_v44 = vmax.f32 %v616_v48, %v633_v19 }
  0x6a   : > { %v517_v20 = vmax.f32 %v492_v63, %v1603_v43 }
  0x6b   : > { %v723_v41 = vmul.f32 0.2, %v715_v40  ;;  %v666_v55 = vmax.f32 %v641_v44, %v658_v11 }
  0x6c   : > { %v542_v37 = vmax.f32 %v517_v20, %v534_v33 }
  0x6d   : > { %v731_v26 = vmax.f32 %v715_v40, %v723_v41  ;;  %v691_v35 = vmax.f32 %v666_v55, %v683_v46 }
  0x6e   : > { %v567_v49 = vmax.f32 %v542_v37, %v1610_v52 }
  0x6f   : > { %740 = vst.msk [vmem:[%s1422_s23 + $0x28] sm:$0xff] %vm734_vm0, %v731_v26  ;;  %v716_v21 = vmax.f32 %v691_v35, %v708_v13 }
  0x70   : > { %v592_v12 = vmax.f32 %v567_v49, %v584_v42 }
  0x71   : > { %v724_v29 = vmul.f32 0.2, %v716_v21 }
  0x72   : > { %v617_v47 = vmax.f32 %v592_v12, %v609_v22 }
  0x73   : > { %v732_v10 = vmax.f32 %v716_v21, %v724_v29 }
  0x74   : > { %v642_v27 = vmax.f32 %v617_v47, %v634_v32 }
  0x75   : > { %741 = vst.msk [vmem:[%s1422_s23 + $0x30] sm:$0xff] %vm734_vm0, %v732_v10 }
  0x76   : > { %v667_v54 = vmax.f32 %v642_v27, %v659_v57 }
  0x78   : > { %v692_v43 = vmax.f32 %v667_v54, %v684_v61 }
  0x7a   : > { %v717_v38 = vmax.f32 %v692_v43, %v709_v56 }
  0x7c   : > { %v725_v53 = vmul.f32 0.2, %v717_v38 }
  0x7e   : > { %v733_v4 = vmax.f32 %v717_v38, %v725_v53 }
  0x80   : > { %742 = vst.msk [vmem:[%s1422_s23 + $0x38] sm:$0xff] %vm734_vm0, %v733_v4 }
  0x81 PF: > { %s12_s11 = sadd.s32 1, %s1061_s11   ;;  %s1671_s9 = smov %s1057_s10 }
  0x82   : > { %p9_p5 = scmp.ge.s32.totalorder %s12_s11, 4   ;;  %s1672_s10 = smov %s1674_s12 }
  0x84   :  { %11 = sbr.rel (!%p9_p5) target bundleno = 2 (0x2), region = 80 }

// kernel: dgcnn_forward.13
= control target key start
LH: loop header
LB: loop body
LE: loop exit
PB: predicated region body
PF: predicated region fallthrough
CT: control target
= control target key end

     0   :  { %s5434_s15 = smov 0   ;;  %s5436_s16 = smov 0   ;;  %s6803_s0 = inlined_call_operand.vmem [shape: f32[2,20,64,64], index: 0, kind: input, shape index: {}]   ;;  %s6804_s1 = inlined_call_operand.vmem [shape: f32[2,64,64], index: 1, kind: input, shape index: {}]   ;;  %s6805_s2 = inlined_call_operand.vmem [shape: f32[64,64], index: 2, kind: input, shape index: {}]   ;;  %s6806_s3 = inlined_call_operand.vmem [shape: f32[1,64], index: 3, kind: input, shape index: {}]   ;;  %s6807_s4 = inlined_call_operand.vmem [shape: f32[2,64,64], index: 4, kind: output, shape index: {}]  }
   0x1   :  { %s5438_s17 = smov 0  }
   0x2 LB: > { %s26_s18 = sadd.s32 1, %s5403_s16  ;;  %p3829_p0 = scmp.ge.s32.totalorder %s5407_s17, 1  ;;  %s5407_s17 = sphi %s5438_s17, %s14_s17   ;;  %s5403_s16 = sphi %s5436_s16, %s6809_s16   ;;  %s5399_s15 = sphi %s5434_s15, %s6808_s15  }
   0x3   : > { %p28_p1 = scmp.ge.s32.totalorder %s26_s18, 2  ;;  %p200_p2 = scmp.lt.s32.totalorder %s5407_s17, 3 }
   0x5   : > { %s6811_s18 = smov (%p28_p1, %s26_s18), 0  ;;  %p201_p3 = pnand %p3829_p0, %p200_p2 }
   0x6   : > { %v281_v0 = vld [vmem:[%s6805_s2] sm:$0xff] (!%p201_p3)  ;;  %v282_v1 = vld [vmem:[%s6805_s2 + $0x8] sm:$0xff] (!%p201_p3)  ;;  %v283_v2 = vld [vmem:[%s6805_s2 + $0x10] sm:$0xff] (!%p201_p3)  ;;  %p244_p4 = scmp.lt.s32.totalorder (!%p201_p3), %s5399_s15, 1  ;;  %vm321_vm0 = vcmask (!%p201_p3), 523264  }
   0x7   : > { %204 = sbr.rel (%p201_p3) target bundleno = 406 (0x196), region = 36  ;;  %v5461_v3 = vpack.c.bf16 (!%p201_p3), %v282_v1, %v281_v0  ;;  %v284_v4 = vld [vmem:[%s6805_s2 + $0x18] sm:$0xff] (!%p201_p3)  ;;  %v285_v6 = vld [vmem:[%s6805_s2 + $0x20] sm:$0xff] (!%p201_p3)  ;;  %v286_v7 = vld [vmem:[%s6805_s2 + $0x28] sm:$0xff] (!%p201_p3) }
   0x8   : > { %v5466_v5 = vpack.c.bf16 (!%p201_p3), %v284_v4, %v283_v2  ;;  %v287_v8 = vld [vmem:[%s6805_s2 + $0x30] sm:$0xff] (!%p201_p3)  ;;  %v288_v9 = vld [vmem:[%s6805_s2 + $0x38] sm:$0xff] (!%p201_p3)  ;;  %v5490_v10 = vpack.c.bf16 (!%p201_p3), %v286_v7, %v285_v6 }
   0x9   : > { %5033 = vmatprep.subr.bf16.mxu0 (!%p201_p3), %v5461_v3  ;;  %5049 = vmatprep.subr.bf16.mxu1 (!%p201_p3), %v5461_v3  ;;  %v5513_v14 = vpack.c.bf16 (!%p201_p3), %v288_v9, %v287_v8 }
   0xa   : > { %5035 = vmatpush3.bf16.msra.mxu0 (!%p201_p3), %v5461_v3  ;;  %5051 = vmatpush3.bf16.msra.mxu1 (!%p201_p3), %v5461_v3 }
   0xb   : > { %5037 = vmatprep.subr.bf16.mxu0 (!%p201_p3), %v5466_v5  ;;  %5053 = vmatprep.subr.bf16.mxu1 (!%p201_p3), %v5466_v5 }
   0xe   : > { %s6813_s15 = smov (!%p244_p4, %s5399_s15), 1  ;;  %5039 = vmatpush3.bf16.msra.mxu0 %v5466_v5  ;;  %5055 = vmatpush3.bf16.msra.mxu1 %v5466_v5 }
   0xf   : > { %s5352_s9 = smul.u32 1280, %s6813_s15  ;;  %s4150_s10 = sshll.u32 %s6813_s15, 6  ;;  %5041 = vmatprep.subr.bf16.mxu0 %v5490_v10  ;;  %5057 = vmatprep.subr.bf16.mxu1 %v5490_v10 }
  0x10   : > { %s5497_s13 = scalar_lea.vmem %s6804_s1, %s4150_s10  ;;  %s6776_s25 = scalar_lea.vmem %s6807_s4, %s4150_s10 }
  0x11   : > { %s5502_s20 = scalar_lea.vmem %s6803_s0, %s5352_s9  ;;  %v5505_v11 = vld [vmem:[%s5497_s13] sm:$0xff]  ;;  %v5508_v12 = vld [vmem:[%s5497_s13 + $0x8] sm:$0xff]  ;;  %v5511_v13 = vld [vmem:[%s5497_s13 + $0x10] sm:$0xff] }
  0x12   : > { %v289_v15 = vld [vmem:[%s5502_s20] sm:$0xff]  ;;  %v290_v17 = vld [vmem:[%s5502_s20 + $0x8] sm:$0xff]  ;;  %v291_v22 = vld [vmem:[%s5502_s20 + $0x10] sm:$0xff]  ;;  %5043 = vmatpush3.bf16.msra.mxu0 %v5490_v10  ;;  %5059 = vmatpush3.bf16.msra.mxu1 %v5490_v10 }
  0x13   : > { %v3843_v16 = vld [vmem:[%s5502_s20 + $0x40] sm:$0xff]  ;;  %v297_v18 = vadd.f32 %v289_v15, %v5505_v11  ;;  %v5523_v20 = vadd.f32 %v290_v17, %v5508_v12  ;;  %v3844_v21 = vld [vmem:[%s5502_s20 + $0x48] sm:$0xff]  ;;  %v3845_v23 = vld [vmem:[%s5502_s20 + $0x50] sm:$0xff]  ;;  %v5532_v25 = vadd.f32 %v291_v22, %v5511_v13  ;;  %5045 = vmatprep.subr.bf16.mxu0 %v5513_v14  ;;  %5061 = vmatprep.subr.bf16.mxu1 %v5513_v14 }
  0x14   : > { %v460_v19 = vadd.f32 %v3843_v16, %v5505_v11  ;;  %v461_v24 = vadd.f32 %v3844_v21, %v5508_v12  ;;  %v5535_v26 = vadd.f32 %v3845_v23, %v5511_v13  ;;  %v5538_v27 = vld [vmem:[%s5497_s13 + $0x18] sm:$0xff]  ;;  %v5553_v39 = vld [vmem:[%s5497_s13 + $0x20] sm:$0xff]  ;;  %v5561_v43 = vld [vmem:[%s5497_s13 + $0x28] sm:$0xff] }
  0x15   : > { %v292_v28 = vld [vmem:[%s5502_s20 + $0x18] sm:$0xff]  ;;  %v305_v30 = vmul.f32 0.2, %v297_v18  ;;  %v306_v32 = vmul.f32 0.2, %v5523_v20  ;;  %v293_v40 = vld [vmem:[%s5502_s20 + $0x20] sm:$0xff] }
  0x16   : > { %v3846_v29 = vld [vmem:[%s5502_s20 + $0x58] sm:$0xff]  ;;  %v468_v31 = vmul.f32 0.2, %v460_v19  ;;  %v5544_v33 = vadd.f32 %v292_v28, %v5538_v27  ;;  %v469_v34 = vmul.f32 0.2, %v461_v24  ;;  %v3847_v41 = vld [vmem:[%s5502_s20 + $0x60] sm:$0xff]  ;;  %v301_v48 = vadd.f32 %v293_v40, %v5553_v39  ;;  %5047 = vmatpush3.bf16.msra.mxu0 %v5513_v14  ;;  %5063 = vmatpush3.bf16.msra.mxu1 %v5513_v14 }
  0x17   : > { %v5547_v35 = vadd.f32 %v3846_v29, %v5538_v27  ;;  %v313_v36 = vmax.f32 %v297_v18, %v305_v30  ;;  %v307_v38 = vmul.f32 0.2, %v5532_v25  ;;  %v470_v42 = vmul.f32 0.2, %v5535_v26  ;;  %v294_v44 = vld [vmem:[%s5502_s20 + $0x28] sm:$0xff]  ;;  %v5572_v50 = vld [vmem:[%s5497_s13 + $0x30] sm:$0xff]  ;;  %5065 = vmatprep.subr.bf16.mxu0 %v5461_v3  ;;  %5081 = vmatprep.subr.bf16.mxu1 %v5461_v3 }
  0x18   : > { %v476_v37 = vmax.f32 %v460_v19, %v468_v31  ;;  %v3848_v45 = vld [vmem:[%s5502_s20 + $0x68] sm:$0xff]  ;;  %v314_v46 = vmax.f32 %v5523_v20, %v306_v32  ;;  %v308_v47 = vmul.f32 0.2, %v5544_v33  ;;  %v464_v49 = vadd.f32 %v3847_v41, %v5553_v39  ;;  %v295_v51 = vld [vmem:[%s5502_s20 + $0x30] sm:$0xff]  ;;  %v5584_v57 = vld [vmem:[%s5497_s13 + $0x38] sm:$0xff] }
  0x19   : > { %4488 = vmatprep.mubr.msk.f32.mxu0 %vm321_vm0, %v313_v36  ;;  %v3849_v52 = vld [vmem:[%s5502_s20 + $0x70] sm:$0xff]  ;;  %v477_v53 = vmax.f32 %v461_v24, %v469_v34  ;;  %v471_v54 = vmul.f32 0.2, %v5547_v35  ;;  %v5578_v55 = vadd.f32 %v294_v44, %v5561_v43  ;;  %v5581_v56 = vadd.f32 %v3848_v45, %v5561_v43  ;;  %v296_v58 = vld [vmem:[%s5502_s20 + $0x38] sm:$0xff]  ;;  %v3859_v2 = vld [vmem:[%s5502_s20 + $0x80] sm:$0xff] }
  0x1a   : > { %4516 = vmatprep.mubr.msk.f32.mxu1 %vm321_vm0, %v476_v37  ;;  %v315_v59 = vmax.f32 %v5532_v25, %v307_v38  ;;  %v309_v60 = vmul.f32 0.2, %v301_v48  ;;  %v5591_v61 = vadd.f32 %v295_v51, %v5572_v50  ;;  %v3850_v62 = vld [vmem:[%s5502_s20 + $0x78] sm:$0xff]  ;;  %v478_v63 = vmax.f32 %v5535_v26, %v470_v42  ;;  %4489 = vmatmul.mubr.msk.f32.vlgmr.msra.gmra.mrb[0].mxu0 %vm321_vm0, %v314_v46  ;;  %v3875_v16 = vld [vmem:[%s5502_s20 + $0xc0] sm:$0xff]  ;;  %v3860_v20 = vld [vmem:[%s5502_s20 + $0x88] sm:$0xff] }
  0x1b   : > { %v472_v0 = vmul.f32 0.2, %v464_v49  ;;  %v5598_v1 = vadd.f32 %v3849_v52, %v5572_v50  ;;  %v316_v4 = vmax.f32 %v5544_v33, %v308_v47  ;;  %v5603_v6 = vadd.f32 %v296_v58, %v5584_v57  ;;  %4517 = vmatmul.mubr.msk.f32.vlgmr.msra.gmra.mrb[0].mxu1 %vm321_vm0, %v477_v53  ;;  %5067 = vmatpush3.bf16.msra.mxu0 %v5461_v3  ;;  %v3876_v23 = vld [vmem:[%s5502_s20 + $0xc8] sm:$0xff]  ;;  %v3861_v26 = vld [vmem:[%s5502_s20 + $0x90] sm:$0xff]  ;;  %v3862_v36 = vld [vmem:[%s5502_s20 + $0x98] sm:$0xff] }
  0x1c   : > { %v479_v7 = vmax.f32 %v5547_v35, %v471_v54  ;;  %v310_v8 = vmul.f32 0.2, %v5578_v55  ;;  %v473_v9 = vmul.f32 0.2, %v5581_v56  ;;  %v5611_v15 = vadd.f32 %v3850_v62, %v5584_v57  ;;  %4491 = vmatprep.mubr.msk.f32.mxu0 %vm321_vm0, %v315_v59  ;;  %4519 = vmatprep.mubr.msk.f32.mxu1 %vm321_vm0, %v478_v63  ;;  %v3877_v32 = vld [vmem:[%s5502_s20 + $0xd0] sm:$0xff]  ;;  %v3878_v40 = vld [vmem:[%s5502_s20 + $0xd8] sm:$0xff] }
  0x1d   : > { %v317_v17 = vmax.f32 %v301_v48, %v309_v60  ;;  %v311_v18 = vmul.f32 0.2, %v5591_v61  ;;  %v5618_v19 = vadd.f32 %v3859_v2, %v5505_v11  ;;  %5083 = vmatpush3.bf16.msra.mxu1 %v5461_v3  ;;  %v480_v21 = vmax.f32 %v464_v49, %v472_v0  ;;  %5069 = vmatprep.subr.bf16.mxu0 %v5466_v5  ;;  %v3863_v44 = vld [vmem:[%s5502_s20 + $0xa0] sm:$0xff]  ;;  %v3864_v54 = vld [vmem:[%s5502_s20 + $0xa8] sm:$0xff]  ;;  %v3865_v62 = vld [vmem:[%s5502_s20 + $0xb0] sm:$0xff] }
  0x1e   : > { %v474_v22 = vmul.f32 0.2, %v5598_v1  ;;  %5085 = vmatprep.subr.bf16.mxu1 %v5466_v5  ;;  %v312_v24 = vmul.f32 0.2, %v5603_v6  ;;  %v5629_v25 = vadd.f32 %v3875_v16, %v5505_v11  ;;  %4492 = vmatmul.mubr.msk.f32.gmra.mrb[2].mxu0 %vm321_vm0, %v316_v4  ;;  %v318_v28 = vmax.f32 %v5578_v55, %v310_v8  ;;  %v3879_v49 = vld [vmem:[%s5502_s20 + $0xe0] sm:$0xff]  ;;  %v3880_v58 = vld [vmem:[%s5502_s20 + $0xe8] sm:$0xff] }
  0x1f   : > { %4520 = vmatmul.mubr.msk.f32.gmra.mrb[2].mxu1 %vm321_vm0, %v479_v7  ;;  %v481_v29 = vmax.f32 %v5581_v56, %v473_v9  ;;  %v475_v30 = vmul.f32 0.2, %v5611_v15  ;;  %v5638_v31 = vadd.f32 %v3860_v20, %v5508_v12  ;;  %5071 = vmatpush3.bf16.msra.mxu0 %v5466_v5  ;;  %v319_v33 = vmax.f32 %v5591_v61, %v311_v18  ;;  %v3881_v2 = vld [vmem:[%s5502_s20 + $0xf0] sm:$0xff]  ;;  %v3866_v8 = vld [vmem:[%s5502_s20 + $0xb8] sm:$0xff] }
  0x20   : > { %4494 = vmatprep.mubr.msk.f32.mxu0 %vm321_vm0, %v317_v17  ;;  %v638_v34 = vmul.f32 0.2, %v5618_v19  ;;  %v5646_v35 = vadd.f32 %v3876_v23, %v5508_v12  ;;  %4522 = vmatprep.mubr.msk.f32.mxu1 %vm321_vm0, %v480_v21  ;;  %v482_v37 = vmax.f32 %v5598_v1, %v474_v22  ;;  %v5653_v38 = vadd.f32 %v3861_v26, %v5511_v13  ;;  %v3882_v17 = vld [vmem:[%s5502_s20 + $0xf8] sm:$0xff]  ;;  %v3891_v21 = vld [vmem:[%s5502_s20 + $0x100] sm:$0xff] }
  0x21   : > { %5087 = vmatpush3.bf16.msra.mxu1 %v5466_v5  ;;  %5073 = vmatprep.subr.bf16.mxu0 %v5490_v10  ;;  %v808_v41 = vmul.f32 0.2, %v5629_v25  ;;  %v5660_v42 = vadd.f32 %v3877_v32, %v5511_v13  ;;  %v320_v45 = vmax.f32 %v5603_v6, %v312_v24  ;;  %v483_v46 = vmax.f32 %v5611_v15, %v475_v30  ;;  %v3892_v30 = vld [vmem:[%s5502_s20 + $0x108] sm:$0xff] }
  0x22   : > { %5089 = vmatprep.subr.bf16.mxu1 %v5490_v10  ;;  %4495 = vmatmul.mubr.msk.f32.gmra.mrb[4].mxu0 %vm321_vm0, %v318_v28  ;;  %v639_v47 = vmul.f32 0.2, %v5638_v31  ;;  %v5669_v48 = vadd.f32 %v3862_v36, %v5538_v27  ;;  %v646_v51 = vmax.f32 %v5618_v19, %v638_v34  ;;  %v809_v52 = vmul.f32 0.2, %v5646_v35  ;;  %v3908_v34 = vld [vmem:[%s5502_s20 + $0x148] sm:$0xff] }
  0x23   : > { %4523 = vmatmul.mubr.msk.f32.gmra.mrb[4].mxu1 %vm321_vm0, %v481_v29  ;;  %5075 = vmatpush3.bf16.msra.mxu0 %v5490_v10  ;;  %v5677_v53 = vadd.f32 %v3878_v40, %v5538_v27  ;;  %v640_v55 = vmul.f32 0.2, %v5653_v38  ;;  %v5684_v56 = vadd.f32 %v3863_v44, %v5553_v39  ;;  %v816_v59 = vmax.f32 %v5629_v25, %v808_v41  ;;  %v3907_v25 = vld [vmem:[%s5502_s20 + $0x140] sm:$0xff]  ;;  %v3909_v44 = vld [vmem:[%s5502_s20 + $0x150] sm:$0xff] }
  0x24   : > { %4497 = vmatprep.mubr.msk.f32.mxu0 %vm321_vm0, %v319_v33  ;;  %4525 = vmatprep.mubr.msk.f32.mxu1 %vm321_vm0, %v482_v37  ;;  %v810_v60 = vmul.f32 0.2, %v5660_v42  ;;  %v5692_v61 = vadd.f32 %v3879_v49, %v5553_v39  ;;  %v647_v63 = vmax.f32 %v5638_v31, %v639_v47  ;;  %v641_v0 = vmul.f32 0.2, %v5669_v48 }
  0x25   : > { %5091 = vmatpush3.bf16.msra.mxu1 %v5490_v10  ;;  %5077 = vmatprep.subr.bf16.mxu0 %v5513_v14  ;;  %v5700_v1 = vadd.f32 %v3864_v54, %v5561_v43  ;;  %v817_v4 = vmax.f32 %v5646_v35, %v809_v52  ;;  %v811_v6 = vmul.f32 0.2, %v5677_v53  ;;  %v5708_v7 = vadd.f32 %v3880_v58, %v5561_v43  ;;  %v3895_v58 = vld [vmem:[%s5502_s20 + $0x120] sm:$0xff] }
  0x26   : > { %5093 = vmatprep.subr.bf16.mxu1 %v5513_v14  ;;  %4498 = vmatmul.mubr.msk.f32.gmra.mrb[6].mxu0 %vm321_vm0, %v320_v45  ;;  %v648_v9 = vmax.f32 %v5653_v38, %v640_v55  ;;  %v642_v15 = vmul.f32 0.2, %v5684_v56  ;;  %v5716_v16 = vadd.f32 %v3865_v62, %v5572_v50  ;;  %v818_v18 = vmax.f32 %v5660_v42, %v810_v60  ;;  %v3893_v38 = vld [vmem:[%s5502_s20 + $0x110] sm:$0xff]  ;;  %v3911_v62 = vld [vmem:[%s5502_s20 + $0x160] sm:$0xff] }
  0x27   : > { %4526 = vmatmul.mubr.msk.f32.gmra.mrb[6].mxu1 %vm321_vm0, %v483_v46  ;;  %5079 = vmatpush3.bf16.msra.mxu0 %v5513_v14  ;;  %v812_v19 = vmul.f32 0.2, %v5692_v61  ;;  %v5724_v20 = vadd.f32 %v3881_v2, %v5572_v50  ;;  %v649_v22 = vmax.f32 %v5669_v48, %v641_v0  ;;  %v643_v23 = vmul.f32 0.2, %v5700_v1  ;;  %v3894_v48 = vld [vmem:[%s5502_s20 + $0x118] sm:$0xff]  ;;  %v3896_v2 = vld [vmem:[%s5502_s20 + $0x128] sm:$0xff] }
  0x28   : > { %4544 = vmatprep.mubr.msk.f32.mxu0 %vm321_vm0, %v646_v51  ;;  %5097 = vmatprep.subr.bf16.mxu0 %v5461_v3  ;;  %v5731_v24 = vadd.f32 %v3866_v8, %v5584_v57  ;;  %v819_v26 = vmax.f32 %v5677_v53, %v811_v6  ;;  %v813_v28 = vmul.f32 0.2, %v5708_v7  ;;  %v5739_v29 = vadd.f32 %v3882_v17, %v5584_v57  ;;  %v3910_v53 = vld [vmem:[%s5502_s20 + $0x158] sm:$0xff]  ;;  %v3912_v8 = vld [vmem:[%s5502_s20 + $0x168] sm:$0xff]  ;;  %v3897_v17 = vld [vmem:[%s5502_s20 + $0x130] sm:$0xff] }
  0x29   : > { %5095 = vmatpush3.bf16.msra.mxu1 %v5513_v14  ;;  %4572 = vmatprep.mubr.msk.f32.mxu1 %vm321_vm0, %v816_v59  ;;  %v650_v31 = vmax.f32 %v5684_v56, %v642_v15  ;;  %v644_v32 = vmul.f32 0.2, %v5716_v16  ;;  %v5747_v33 = vadd.f32 %v3891_v21, %v5505_v11  ;;  %v820_v35 = vmax.f32 %v5692_v61, %v812_v19  ;;  %v3913_v21 = vld [vmem:[%s5502_s20 + $0x170] sm:$0xff] }
  0x2a   : > { %5113 = vmatprep.subr.bf16.mxu1 %v5461_v3  ;;  %4545 = vmatmul.mubr.msk.f32.vlgmr.msra.gmra.mrb[8].mxu0 %vm321_vm0, %v647_v63  ;;  %v814_v36 = vmul.f32 0.2, %v5724_v20  ;;  %v5755_v37 = vadd.f32 %v3907_v25, %v5505_v11  ;;  %v651_v40 = vmax.f32 %v5700_v1, %v643_v23  ;;  %v645_v41 = vmul.f32 0.2, %v5731_v24  ;;  %v3898_v25 = vld [vmem:[%s5502_s20 + $0x138] sm:$0xff] }
  0x2b   : > { %5099 = vmatpush3.bf16.msra.mxu0 %v5461_v3  ;;  %4547 = vmatprep.mubr.msk.f32.mxu0 %vm321_vm0, %v648_v9  ;;  %v5763_v42 = vadd.f32 %v3892_v30, %v5508_v12  ;;  %v821_v45 = vmax.f32 %v5708_v7, %v813_v28  ;;  %v815_v46 = vmul.f32 0.2, %v5739_v29  ;;  %v5771_v47 = vadd.f32 %v3908_v34, %v5508_v12  ;;  %v3914_v30 = vld [vmem:[%s5502_s20 + $0x178] sm:$0xff]  ;;  %v3923_v34 = vld [vmem:[%s5502_s20 + $0x180] sm:$0xff] }
  0x2c   : > { %4573 = vmatmul.mubr.msk.f32.vlgmr.msra.gmra.mrb[8].mxu1 %vm321_vm0, %v817_v4  ;;  %5101 = vmatprep.subr.bf16.mxu0 %v5466_v5  ;;  %v652_v49 = vmax.f32 %v5716_v16, %v644_v32  ;;  %v978_v51 = vmul.f32 0.2, %v5747_v33  ;;  %v5779_v52 = vadd.f32 %v3893_v38, %v5511_v13  ;;  %v822_v54 = vmax.f32 %v5724_v20, %v814_v36  ;;  %v3939_v38 = vld [vmem:[%s5502_s20 + $0x1c0] sm:$0xff] }
  0x2d   : > { %5115 = vmatpush3.bf16.msra.mxu1 %v5461_v3  ;;  %4575 = vmatprep.mubr.msk.f32.mxu1 %vm321_vm0, %v818_v18  ;;  %v1148_v55 = vmul.f32 0.2, %v5755_v37  ;;  %v5787_v56 = vadd.f32 %v3909_v44, %v5511_v13  ;;  %v653_v59 = vmax.f32 %v5731_v24, %v645_v41  ;;  %v979_v60 = vmul.f32 0.2, %v5763_v42  ;;  %v3924_v44 = vld [vmem:[%s5502_s20 + $0x188] sm:$0xff] }
  0x2e   : > { %4548 = vmatmul.mubr.msk.f32.gmra.mrb[10].mxu0 %vm321_vm0, %v649_v22  ;;  %5117 = vmatprep.subr.bf16.mxu1 %v5466_v5  ;;  %v5795_v61 = vadd.f32 %v3894_v48, %v5538_v27  ;;  %v823_v63 = vmax.f32 %v5739_v29, %v815_v46  ;;  %v1149_v0 = vmul.f32 0.2, %v5771_v47  ;;  %v5803_v1 = vadd.f32 %v3910_v53, %v5538_v27  ;;  %v3940_v48 = vld [vmem:[%s5502_s20 + $0x1c8] sm:$0xff]  ;;  %v3925_v53 = vld [vmem:[%s5502_s20 + $0x190] sm:$0xff] }
  0x2f   : > { %5103 = vmatpush3.bf16.msra.mxu0 %v5466_v5  ;;  %4550 = vmatprep.mubr.msk.f32.mxu0 %vm321_vm0, %v650_v31  ;;  %v986_v4 = vmax.f32 %v5747_v33, %v978_v51  ;;  %v980_v6 = vmul.f32 0.2, %v5779_v52  ;;  %v5811_v7 = vadd.f32 %v3895_v58, %v5553_v39  ;;  %v1156_v9 = vmax.f32 %v5755_v37, %v1148_v55  ;;  %v3941_v58 = vld [vmem:[%s5502_s20 + $0x1d0] sm:$0xff] }
  0x30   : > { %4576 = vmatmul.mubr.msk.f32.gmra.mrb[10].mxu1 %vm321_vm0, %v819_v26  ;;  %5105 = vmatprep.subr.bf16.mxu0 %v5490_v10  ;;  %v1150_v15 = vmul.f32 0.2, %v5787_v56  ;;  %v5819_v16 = vadd.f32 %v3911_v62, %v5553_v39  ;;  %v987_v18 = vmax.f32 %v5763_v42, %v979_v60  ;;  %v981_v19 = vmul.f32 0.2, %v5795_v61  ;;  %v3926_v62 = vld [vmem:[%s5502_s20 + $0x198] sm:$0xff] }
  0x31   : > { %5119 = vmatpush3.bf16.msra.mxu1 %v5466_v5  ;;  %4578 = vmatprep.mubr.msk.f32.mxu1 %vm321_vm0, %v820_v35  ;;  %v5827_v20 = vadd.f32 %v3896_v2, %v5561_v43  ;;  %v1157_v22 = vmax.f32 %v5771_v47, %v1149_v0  ;;  %v1151_v23 = vmul.f32 0.2, %v5803_v1  ;;  %v5835_v24 = vadd.f32 %v3912_v8, %v5561_v43  ;;  %v3942_v2 = vld [vmem:[%s5502_s20 + $0x1d8] sm:$0xff]  ;;  %v3927_v8 = vld [vmem:[%s5502_s20 + $0x1a0] sm:$0xff] }
  0x32   : > { %4551 = vmatmul.mubr.msk.f32.gmra.mrb[12].mxu0 %vm321_vm0, %v651_v40  ;;  %5121 = vmatprep.subr.bf16.mxu1 %v5490_v10  ;;  %v988_v26 = vmax.f32 %v5779_v52, %v980_v6  ;;  %v982_v28 = vmul.f32 0.2, %v5811_v7  ;;  %v5843_v29 = vadd.f32 %v3897_v17, %v5572_v50  ;;  %v1158_v31 = vmax.f32 %v5787_v56, %v1150_v15  ;;  %v3943_v17 = vld [vmem:[%s5502_s20 + $0x1e0] sm:$0xff] }
  0x33   : > { %5107 = vmatpush3.bf16.msra.mxu0 %v5490_v10  ;;  %4553 = vmatprep.mubr.msk.f32.mxu0 %vm321_vm0, %v652_v49  ;;  %v1152_v32 = vmul.f32 0.2, %v5819_v16  ;;  %v5851_v33 = vadd.f32 %v3913_v21, %v5572_v50  ;;  %v989_v35 = vmax.f32 %v5795_v61, %v981_v19  ;;  %v983_v36 = vmul.f32 0.2, %v5827_v20  ;;  %v3928_v21 = vld [vmem:[%s5502_s20 + $0x1a8] sm:$0xff] }
  0x34   : > { %4579 = vmatmul.mubr.msk.f32.gmra.mrb[12].mxu1 %vm321_vm0, %v821_v45  ;;  %5109 = vmatprep.subr.bf16.mxu0 %v5513_v14  ;;  %v5859_v37 = vadd.f32 %v3898_v25, %v5584_v57  ;;  %v1159_v40 = vmax.f32 %v5803_v1, %v1151_v23  ;;  %v1153_v41 = vmul.f32 0.2, %v5835_v24  ;;  %v5867_v42 = vadd.f32 %v3914_v30, %v5584_v57  ;;  %v3944_v25 = vld [vmem:[%s5502_s20 + $0x1e8] sm:$0xff]  ;;  %v3929_v30 = vld [vmem:[%s5502_s20 + $0x1b0] sm:$0xff] }
  0x35   : > { %5123 = vmatpush3.bf16.msra.mxu1 %v5490_v10  ;;  %4581 = vmatprep.mubr.msk.f32.mxu1 %vm321_vm0, %v822_v54  ;;  %v990_v45 = vmax.f32 %v5811_v7, %v982_v28  ;;  %v984_v46 = vmul.f32 0.2, %v5843_v29  ;;  %v5875_v47 = vadd.f32 %v3923_v34, %v5505_v11  ;;  %v1160_v49 = vmax.f32 %v5819_v16, %v1152_v32  ;;  %v3945_v34 = vld [vmem:[%s5502_s20 + $0x1f0] sm:$0xff] }
  0x36   : > { %4554 = vmatmul.mubr.msk.f32.gmra.mrb[14].mxu0 %vm321_vm0, %v653_v59  ;;  %5125 = vmatprep.subr.bf16.mxu1 %v5513_v14  ;;  %v1154_v51 = vmul.f32 0.2, %v5851_v33  ;;  %v5883_v52 = vadd.f32 %v3939_v38, %v5505_v11  ;;  %v991_v54 = vmax.f32 %v5827_v20, %v983_v36  ;;  %v985_v55 = vmul.f32 0.2, %v5859_v37  ;;  %v3930_v38 = vld [vmem:[%s5502_s20 + $0x1b8] sm:$0xff] }
  0x37   : > { %5111 = vmatpush3.bf16.msra.mxu0 %v5513_v14  ;;  %4600 = vmatprep.mubr.msk.f32.mxu0 %vm321_vm0, %v986_v4  ;;  %v5891_v56 = vadd.f32 %v3924_v44, %v5508_v12  ;;  %v1161_v59 = vmax.f32 %v5835_v24, %v1153_v41  ;;  %v1155_v60 = vmul.f32 0.2, %v5867_v42  ;;  %v5899_v61 = vadd.f32 %v3940_v48, %v5508_v12  ;;  %v3946_v44 = vld [vmem:[%s5502_s20 + $0x1f8] sm:$0xff]  ;;  %v3955_v48 = vld [vmem:[%s5502_s20 + $0x200] sm:$0xff] }
  0x38   : > { %4582 = vmatmul.mubr.msk.f32.gmra.mrb[14].mxu1 %vm321_vm0, %v823_v63  ;;  %5129 = vmatprep.subr.bf16.mxu0 %v5461_v3  ;;  %v992_v63 = vmax.f32 %v5843_v29, %v984_v46  ;;  %v1318_v0 = vmul.f32 0.2, %v5875_v47  ;;  %v5907_v1 = vadd.f32 %v3925_v53, %v5511_v13  ;;  %v1162_v4 = vmax.f32 %v5851_v33, %v1154_v51  ;;  %v3971_v53 = vld [vmem:[%s5502_s20 + $0x240] sm:$0xff] }
  0x39   : > { %5127 = vmatpush3.bf16.msra.mxu1 %v5513_v14  ;;  %4628 = vmatprep.mubr.msk.f32.mxu1 %vm321_vm0, %v1156_v9  ;;  %v1488_v6 = vmul.f32 0.2, %v5883_v52  ;;  %v5915_v7 = vadd.f32 %v3941_v58, %v5511_v13  ;;  %v993_v9 = vmax.f32 %v5859_v37, %v985_v55  ;;  %v1319_v15 = vmul.f32 0.2, %v5891_v56  ;;  %v3956_v58 = vld [vmem:[%s5502_s20 + $0x208] sm:$0xff] }
  0x3a   : > { %4601 = vmatmul.mubr.msk.f32.vlgmr.msra.gmra.mrb[16].mxu0 %vm321_vm0, %v987_v18  ;;  %5145 = vmatprep.subr.bf16.mxu1 %v5461_v3  ;;  %v5923_v16 = vadd.f32 %v3926_v62, %v5538_v27  ;;  %v1163_v18 = vmax.f32 %v5867_v42, %v1155_v60  ;;  %v1489_v19 = vmul.f32 0.2, %v5899_v61  ;;  %v5931_v20 = vadd.f32 %v3942_v2, %v5538_v27  ;;  %v3972_v62 = vld [vmem:[%s5502_s20 + $0x248] sm:$0xff]  ;;  %v3957_v2 = vld [vmem:[%s5502_s20 + $0x210] sm:$0xff] }
  0x3b   : > { %5131 = vmatpush3.bf16.msra.mxu0 %v5461_v3  ;;  %4603 = vmatprep.mubr.msk.f32.mxu0 %vm321_vm0, %v988_v26  ;;  %v1320_v23 = vmul.f32 0.2, %v5907_v1  ;;  %v5939_v24 = vadd.f32 %v3927_v8, %v5553_v39  ;;  %v1496_v26 = vmax.f32 %v5883_v52, %v1488_v6  ;;  %v1490_v28 = vmul.f32 0.2, %v5915_v7  ;;  %v3973_v8 = vld [vmem:[%s5502_s20 + $0x250] sm:$0xff] }
  0x3c   : > { %4629 = vmatmul.mubr.msk.f32.vlgmr.msra.gmra.mrb[16].mxu1 %vm321_vm0, %v1157_v22  ;;  %5133 = vmatprep.subr.bf16.mxu0 %v5466_v5  ;;  %v1326_v22 = vmax.f32 %v5875_v47, %v1318_v0  ;;  %v5947_v29 = vadd.f32 %v3943_v17, %v5553_v39  ;;  %v1321_v32 = vmul.f32 0.2, %v5923_v16  ;;  %v5955_v33 = vadd.f32 %v3928_v21, %v5561_v43  ;;  %v3958_v17 = vld [vmem:[%s5502_s20 + $0x218] sm:$0xff] }
  0x3d   : > { %5147 = vmatpush3.bf16.msra.mxu1 %v5461_v3  ;;  %4631 = vmatprep.mubr.msk.f32.mxu1 %vm321_vm0, %v1158_v31  ;;  %v1327_v31 = vmax.f32 %v5891_v56, %v1319_v15  ;;  %v1491_v36 = vmul.f32 0.2, %v5931_v20  ;;  %v5963_v37 = vadd.f32 %v3944_v25, %v5561_v43  ;;  %v1322_v41 = vmul.f32 0.2, %v5939_v24  ;;  %v3974_v21 = vld [vmem:[%s5502_s20 + $0x258] sm:$0xff]  ;;  %v3959_v25 = vld [vmem:[%s5502_s20 + $0x220] sm:$0xff] }
  0x3e   : > { %4604 = vmatmul.mubr.msk.f32.gmra.mrb[18].mxu0 %vm321_vm0, %v989_v35  ;;  %5149 = vmatprep.subr.bf16.mxu1 %v5466_v5  ;;  %v1497_v35 = vmax.f32 %v5899_v61, %v1489_v19  ;;  %v5971_v42 = vadd.f32 %v3929_v30, %v5572_v50  ;;  %v1492_v46 = vmul.f32 0.2, %v5947_v29  ;;  %v5979_v47 = vadd.f32 %v3945_v34, %v5572_v50  ;;  %v3975_v30 = vld [vmem:[%s5502_s20 + $0x260] sm:$0xff]  ;;  %v3960_v34 = vld [vmem:[%s5502_s20 + $0x228] sm:$0xff] }
  0x3f   : > { %5135 = vmatpush3.bf16.msra.mxu0 %v5466_v5  ;;  %4606 = vmatprep.mubr.msk.f32.mxu0 %vm321_vm0, %v990_v45  ;;  %v1498_v45 = vmax.f32 %v5915_v7, %v1490_v28  ;;  %v1323_v51 = vmul.f32 0.2, %v5955_v33  ;;  %v5987_v52 = vadd.f32 %v3930_v38, %v5584_v57  ;;  %v1493_v55 = vmul.f32 0.2, %v5963_v37  ;;  %v3976_v38 = vld [vmem:[%s5502_s20 + $0x268] sm:$0xff] }
  0x40   : > { %4632 = vmatmul.mubr.msk.f32.gmra.mrb[18].mxu1 %vm321_vm0, %v1159_v40  ;;  %5137 = vmatprep.subr.bf16.mxu0 %v5490_v10  ;;  %v1328_v40 = vmax.f32 %v5907_v1, %v1320_v23  ;;  %v5995_v56 = vadd.f32 %v3946_v44, %v5584_v57  ;;  %v1324_v60 = vmul.f32 0.2, %v5971_v42  ;;  %v6003_v61 = vadd.f32 %v3955_v48, %v5505_v11  ;;  %v3961_v44 = vld [vmem:[%s5502_s20 + $0x230] sm:$0xff] }
  0x41   : > { %5151 = vmatpush3.bf16.msra.mxu1 %v5466_v5  ;;  %4634 = vmatprep.mubr.msk.f32.mxu1 %vm321_vm0, %v1160_v49  ;;  %v1329_v49 = vmax.f32 %v5923_v16, %v1321_v32  ;;  %v1494_v0 = vmul.f32 0.2, %v5979_v47  ;;  %v6011_v1 = vadd.f32 %v3971_v53, %v5505_v11  ;;  %v1325_v6 = vmul.f32 0.2, %v5987_v52  ;;  %v3977_v48 = vld [vmem:[%s5502_s20 + $0x270] sm:$0xff]  ;;  %v3962_v53 = vld [vmem:[%s5502_s20 + $0x238] sm:$0xff] }
  0x42   : > { %4607 = vmatmul.mubr.msk.f32.gmra.mrb[20].mxu0 %vm321_vm0, %v991_v54  ;;  %5153 = vmatprep.subr.bf16.mxu1 %v5490_v10  ;;  %v1499_v54 = vmax.f32 %v5931_v20, %v1491_v36  ;;  %v6019_v7 = vadd.f32 %v3956_v58, %v5508_v12  ;;  %v1495_v15 = vmul.f32 0.2, %v5995_v56  ;;  %v6027_v16 = vadd.f32 %v3972_v62, %v5508_v12  ;;  %v3978_v58 = vld [vmem:[%s5502_s20 + $0x278] sm:$0xff]  ;;  %v3987_v62 = vld [vmem:[%s5502_s20 + $0x280] sm:$0xff] }
  0x43   : > { %5139 = vmatpush3.bf16.msra.mxu0 %v5490_v10  ;;  %4609 = vmatprep.mubr.msk.f32.mxu0 %vm321_vm0, %v992_v63  ;;  %v1500_v63 = vmax.f32 %v5947_v29, %v1492_v46  ;;  %v1658_v19 = vmul.f32 0.2, %v6003_v61  ;;  %v6035_v20 = vadd.f32 %v3957_v2, %v5511_v13  ;;  %v1828_v23 = vmul.f32 0.2, %v6011_v1  ;;  %v4003_v2 = vld [vmem:[%s5502_s20 + $0x2c0] sm:$0xff] }
  0x44   : > { %4635 = vmatmul.mubr.msk.f32.gmra.mrb[20].mxu1 %vm321_vm0, %v1161_v59  ;;  %5141 = vmatprep.subr.bf16.mxu0 %v5513_v14  ;;  %v1330_v59 = vmax.f32 %v5939_v24, %v1322_v41  ;;  %v6043_v24 = vadd.f32 %v3973_v8, %v5511_v13  ;;  %v1659_v28 = vmul.f32 0.2, %v6019_v7  ;;  %v6051_v29 = vadd.f32 %v3958_v17, %v5538_v27  ;;  %v3988_v8 = vld [vmem:[%s5502_s20 + $0x288] sm:$0xff] }
  0x45   : > { %5155 = vmatpush3.bf16.msra.mxu1 %v5490_v10  ;;  %4637 = vmatprep.mubr.msk.f32.mxu1 %vm321_vm0, %v1162_v4  ;;  %v1331_v4 = vmax.f32 %v5955_v33, %v1323_v51  ;;  %v1829_v32 = vmul.f32 0.2, %v6027_v16  ;;  %v6059_v33 = vadd.f32 %v3974_v21, %v5538_v27  ;;  %v1660_v36 = vmul.f32 0.2, %v6035_v20  ;;  %v4004_v17 = vld [vmem:[%s5502_s20 + $0x2c8] sm:$0xff]  ;;  %v3989_v21 = vld [vmem:[%s5502_s20 + $0x290] sm:$0xff] }
  0x46   : > { %4610 = vmatmul.mubr.msk.f32.gmra.mrb[22].mxu0 %vm321_vm0, %v993_v9  ;;  %5157 = vmatprep.subr.bf16.mxu1 %v5513_v14  ;;  %v1501_v9 = vmax.f32 %v5963_v37, %v1493_v55  ;;  %v6067_v37 = vadd.f32 %v3959_v25, %v5553_v39  ;;  %v1830_v41 = vmul.f32 0.2, %v6043_v24  ;;  %v1661_v46 = vmul.f32 0.2, %v6051_v29  ;;  %v4005_v25 = vld [vmem:[%s5502_s20 + $0x2d0] sm:$0xff] }
  0x47   : > { %5143 = vmatpush3.bf16.msra.mxu0 %v5513_v14  ;;  %4656 = vmatprep.mubr.msk.f32.mxu0 %vm321_vm0, %v1326_v22  ;;  %v1502_v22 = vmax.f32 %v5979_v47, %v1494_v0  ;;  %v6083_v47 = vadd.f32 %v3960_v34, %v5561_v43  ;;  %v1831_v51 = vmul.f32 0.2, %v6059_v33 }
  0x48   : > { %4638 = vmatmul.mubr.msk.f32.gmra.mrb[22].mxu1 %vm321_vm0, %v1163_v18  ;;  %5161 = vmatprep.subr.bf16.mxu0 %v5461_v3  ;;  %v1332_v18 = vmax.f32 %v5971_v42, %v1324_v60  ;;  %v6075_v42 = vadd.f32 %v3975_v30, %v5553_v39  ;;  %v1662_v55 = vmul.f32 0.2, %v6067_v37 }
  0x49   : > { %5159 = vmatpush3.bf16.msra.mxu1 %v5513_v14  ;;  %4684 = vmatprep.mubr.msk.f32.mxu1 %vm321_vm0, %v1496_v26  ;;  %v1333_v26 = vmax.f32 %v5987_v52, %v1325_v6  ;;  %v6091_v52 = vadd.f32 %v3976_v38, %v5561_v43  ;;  %v1663_v0 = vmul.f32 0.2, %v6083_v47 }
  0x4a   : > { %4657 = vmatmul.mubr.msk.f32.vlgmr.msra.gmra.mrb[24].mxu0 %vm321_vm0, %v1327_v31  ;;  %5177 = vmatprep.subr.bf16.mxu1 %v5461_v3  ;;  %v1503_v31 = vmax.f32 %v5995_v56, %v1495_v15  ;;  %v6099_v56 = vadd.f32 %v3961_v44, %v5572_v50  ;;  %v1832_v60 = vmul.f32 0.2, %v6075_v42 }
  0x4b   : > { %5163 = vmatpush3.bf16.msra.mxu0 %v5461_v3  ;;  %4659 = vmatprep.mubr.msk.f32.mxu0 %vm321_vm0, %v1328_v40  ;;  %v1836_v40 = vmax.f32 %v6011_v1, %v1828_v23  ;;  %v6115_v1 = vadd.f32 %v3962_v53, %v5584_v57  ;;  %v1833_v6 = vmul.f32 0.2, %v6091_v52  ;;  %v3993_v53 = vld [vmem:[%s5502_s20 + $0x2b0] sm:$0xff] }
  0x4c   : > { %4685 = vmatmul.mubr.msk.f32.vlgmr.msra.gmra.mrb[24].mxu1 %vm321_vm0, %v1497_v35  ;;  %5165 = vmatprep.subr.bf16.mxu0 %v5466_v5  ;;  %v1666_v35 = vmax.f32 %v6003_v61, %v1658_v19  ;;  %v6107_v61 = vadd.f32 %v3977_v48, %v5572_v50  ;;  %v1664_v15 = vmul.f32 0.2, %v6099_v56 }
  0x4d   : > { %5179 = vmatpush3.bf16.msra.mxu1 %v5461_v3  ;;  %4687 = vmatprep.mubr.msk.f32.mxu1 %vm321_vm0, %v1498_v45  ;;  %v1667_v45 = vmax.f32 %v6019_v7, %v1659_v28  ;;  %v6123_v7 = vadd.f32 %v3978_v58, %v5584_v57  ;;  %v1665_v23 = vmul.f32 0.2, %v6115_v1  ;;  %v6155_v28 = vadd.f32 %v4004_v17, %v5508_v12  ;;  %v4009_v58 = vld [vmem:[%s5502_s20 + $0x2f0] sm:$0xff] }
  0x4e   : > { %4660 = vmatmul.mubr.msk.f32.gmra.mrb[26].mxu0 %vm321_vm0, %v1329_v49  ;;  %5181 = vmatprep.subr.bf16.mxu1 %v5466_v5  ;;  %v1837_v49 = vmax.f32 %v6027_v16, %v1829_v32  ;;  %v6131_v16 = vadd.f32 %v3987_v62, %v5505_v11  ;;  %v1834_v19 = vmul.f32 0.2, %v6107_v61  ;;  %v1672_v30 = vmax.f32 %v6099_v56, %v1664_v15  ;;  %v4035_v15 = vld [vmem:[%s5502_s20 + $0x340] sm:$0xff] }
  0x4f   : > { %5167 = vmatpush3.bf16.msra.mxu0 %v5466_v5  ;;  %4662 = vmatprep.mubr.msk.f32.mxu0 %vm321_vm0, %v1330_v59  ;;  %v1838_v59 = vmax.f32 %v6043_v24, %v1830_v41  ;;  %v6147_v24 = vadd.f32 %v3988_v8, %v5508_v12  ;;  %v6163_v32 = vadd.f32 %v3989_v21, %v5511_v13  ;;  %v4007_v41 = vld [vmem:[%s5502_s20 + $0x2e0] sm:$0xff] }
  0x50   : > { %4688 = vmatmul.mubr.msk.f32.gmra.mrb[26].mxu1 %vm321_vm0, %v1499_v54  ;;  %5169 = vmatprep.subr.bf16.mxu0 %v5490_v10  ;;  %v1668_v54 = vmax.f32 %v6035_v20, %v1660_v36  ;;  %v6139_v20 = vadd.f32 %v4003_v2, %v5505_v11  ;;  %v1841_v11 = vmax.f32 %v6091_v52, %v1833_v6  ;;  %v3991_v36 = vld [vmem:[%s5502_s20 + $0x2a0] sm:$0xff] }
  0x51   : > { %5183 = vmatpush3.bf16.msra.mxu1 %v5466_v5  ;;  %4690 = vmatprep.mubr.msk.f32.mxu1 %vm321_vm0, %v1500_v63  ;;  %v1669_v63 = vmax.f32 %v6051_v29, %v1661_v46  ;;  %v3990_v29 = vld [vmem:[%s5502_s20 + $0x298] sm:$0xff]  ;;  %v1842_v12 = vmax.f32 %v6107_v61, %v1834_v19  ;;  %v1999_v38 = vmul.f32 0.2, %v6147_v24  ;;  %v6195_v48 = vadd.f32 %v3991_v36, %v5553_v39  ;;  %v4019_v6 = vld [vmem:[%s5502_s20 + $0x300] sm:$0xff] }
  0x52   : > { %4663 = vmatmul.mubr.msk.f32.gmra.mrb[28].mxu0 %vm321_vm0, %v1331_v4  ;;  %5185 = vmatprep.subr.bf16.mxu1 %v5490_v10  ;;  %v1839_v4 = vmax.f32 %v6059_v33, %v1831_v51  ;;  %v4006_v33 = vld [vmem:[%s5502_s20 + $0x2d8] sm:$0xff]  ;;  %v2168_v34 = vmul.f32 0.2, %v6139_v20  ;;  %v6203_v52 = vadd.f32 %v4007_v41, %v5553_v39  ;;  %v6259_v21 = vld [vmem:[%s5497_s13] sm:$0xff] }
  0x53   : > { %5171 = vmatpush3.bf16.msra.mxu0 %v5490_v10  ;;  %4665 = vmatprep.mubr.msk.f32.mxu0 %vm321_vm0, %v1332_v18  ;;  %v1840_v18 = vmax.f32 %v6075_v42, %v1832_v60  ;;  %v2169_v42 = vmul.f32 0.2, %v6155_v28  ;;  %v6187_v44 = vadd.f32 %v4006_v33, %v5538_v27  ;;  %v3994_v61 = vld [vmem:[%s5502_s20 + $0x2b8] sm:$0xff] }
  0x54   : > { %4691 = vmatmul.mubr.msk.f32.gmra.mrb[28].mxu1 %vm321_vm0, %v1501_v9  ;;  %5173 = vmatprep.subr.bf16.mxu0 %v5513_v14  ;;  %v1670_v9 = vmax.f32 %v6067_v37, %v1662_v55  ;;  %v1673_v37 = vmax.f32 %v6115_v1, %v1665_v23  ;;  %v4010_v1 = vld [vmem:[%s5502_s20 + $0x2f8] sm:$0xff]  ;;  %v2172_v2 = vmul.f32 0.2, %v6203_v52  ;;  %v4036_v23 = vld [vmem:[%s5502_s20 + $0x348] sm:$0xff] }
  0x55   : > { %5187 = vmatpush3.bf16.msra.mxu1 %v5490_v10  ;;  %4693 = vmatprep.mubr.msk.f32.mxu1 %vm321_vm0, %v1502_v22  ;;  %v1671_v22 = vmax.f32 %v6083_v47, %v1663_v0  ;;  %v2000_v47 = vmul.f32 0.2, %v6163_v32  ;;  %v2177_v39 = vmax.f32 %v6155_v28, %v2169_v42  ;;  %v6227_v0 = vadd.f32 %v3993_v53, %v5572_v50  ;;  %v4024_v53 = vld [vmem:[%s5502_s20 + $0x328] sm:$0xff] }
  0x56   : > { %4666 = vmatmul.mubr.msk.f32.gmra.mrb[30].mxu0 %vm321_vm0, %v1333_v26  ;;  %5189 = vmatprep.subr.bf16.mxu1 %v5513_v14  ;;  %v1835_v26 = vmul.f32 0.2, %v6123_v7  ;;  %v6251_v17 = vadd.f32 %v4010_v1, %v5584_v57  ;;  %v6354_v1 = vld [vmem:[%s5497_s13 + $0x28] sm:$0xff] }
  0x57   : > { %5175 = vmatpush3.bf16.msra.mxu0 %v5513_v14  ;;  %4712 = vmatprep.mubr.msk.f32.mxu0 %vm321_vm0, %v1666_v35  ;;  %v6171_v35 = vadd.f32 %v4005_v25, %v5511_v13  ;;  %v2008_v62 = vmax.f32 %v6163_v32, %v2000_v47  ;;  %v6270_v25 = vadd.f32 %v6259_v21, %v4035_v15  ;;  %v6316_v47 = vld [vmem:[%s5497_s13 + $0x18] sm:$0xff] }
  0x58   : > { %4694 = vmatmul.mubr.msk.f32.gmra.mrb[30].mxu1 %vm321_vm0, %v1503_v31  ;;  %5193 = vmatprep.subr.bf16.mxu0 %v5461_v3  ;;  %v1998_v31 = vmul.f32 0.2, %v6131_v16  ;;  %v1843_v13 = vmax.f32 %v6123_v7, %v1835_v26  ;;  %v2175_v33 = vmul.f32 0.2, %v6251_v17 }
  0x59   : > { %5191 = vmatpush3.bf16.msra.mxu1 %v5513_v14  ;;  %4740 = vmatprep.mubr.msk.f32.mxu1 %vm321_vm0, %v1836_v40  ;;  %v6179_v40 = vadd.f32 %v3990_v29, %v5538_v27  ;;  %v2176_v27 = vmax.f32 %v6139_v20, %v2168_v34  ;;  %v2170_v51 = vmul.f32 0.2, %v6171_v35  ;;  %v2004_v20 = vmul.f32 0.2, %v6227_v0  ;;  %v6278_v29 = vld [vmem:[%s5497_s13 + $0x8] sm:$0xff]  ;;  %v4022_v34 = vld [vmem:[%s5502_s20 + $0x318] sm:$0xff] }
  0x5a   : > { %4713 = vmatmul.mubr.msk.f32.vlgmr.msra.gmra.mrb[32].mxu0 %vm321_vm0, %v1667_v45  ;;  %5209 = vmatprep.subr.bf16.mxu1 %v5461_v3  ;;  %v3992_v45 = vld [vmem:[%s5502_s20 + $0x2a8] sm:$0xff]  ;;  %v2006_v46 = vmax.f32 %v6131_v16, %v1998_v31  ;;  %v4037_v31 = vld [vmem:[%s5502_s20 + $0x350] sm:$0xff] }
  0x5b   : > { %5195 = vmatpush3.bf16.msra.mxu0 %v5461_v3  ;;  %4715 = vmatprep.mubr.msk.f32.mxu0 %vm321_vm0, %v1668_v54  ;;  %v2007_v54 = vmax.f32 %v6147_v24, %v1999_v38  ;;  %v2001_v55 = vmul.f32 0.2, %v6179_v40  ;;  %v6211_v56 = vadd.f32 %v3992_v45, %v5561_v43 }
  0x5c   : > { %4741 = vmatmul.mubr.msk.f32.vlgmr.msra.gmra.mrb[32].mxu1 %vm321_vm0, %v1837_v49  ;;  %5197 = vmatprep.subr.bf16.mxu0 %v5466_v5  ;;  %v4008_v49 = vld [vmem:[%s5502_s20 + $0x2e8] sm:$0xff] }
  0x5d   : > { %5211 = vmatpush3.bf16.msra.mxu1 %v5461_v3  ;;  %4743 = vmatprep.mubr.msk.f32.mxu1 %vm321_vm0, %v1838_v59  ;;  %v2171_v59 = vmul.f32 0.2, %v6187_v44  ;;  %v6219_v60 = vadd.f32 %v4008_v49, %v5561_v43  ;;  %v2178_v43 = vmax.f32 %v6171_v35, %v2170_v51  ;;  %v2009_v7 = vmax.f32 %v6179_v40, %v2001_v55  ;;  %v4038_v40 = vld [vmem:[%s5502_s20 + $0x358] sm:$0xff]  ;;  %v4039_v49 = vld [vmem:[%s5502_s20 + $0x360] sm:$0xff] }
  0x5e   : > { %4716 = vmatmul.mubr.msk.f32.gmra.mrb[34].mxu0 %vm321_vm0, %v1669_v63  ;;  %5213 = vmatprep.subr.bf16.mxu1 %v5466_v5  ;;  %v2002_v63 = vmul.f32 0.2, %v6195_v48  ;;  %v2003_v8 = vmul.f32 0.2, %v6211_v56  ;;  %v2012_v35 = vmax.f32 %v6227_v0, %v2004_v20 }
  0x5f   : > { %5199 = vmatpush3.bf16.msra.mxu0 %v5466_v5  ;;  %4718 = vmatprep.mubr.msk.f32.mxu0 %vm321_vm0, %v1670_v9  ;;  %v6243_v9 = vadd.f32 %v3994_v61, %v5584_v57  ;;  %v2173_v16 = vmul.f32 0.2, %v6219_v60  ;;  %v2180_v57 = vmax.f32 %v6203_v52, %v2172_v2  ;;  %v6327_v52 = vadd.f32 %v6316_v47, %v4038_v40  ;;  %v4041_v2 = vld [vmem:[%s5502_s20 + $0x370] sm:$0xff] }
  0x60   : > { %4744 = vmatmul.mubr.msk.f32.gmra.mrb[34].mxu1 %vm321_vm0, %v1839_v4  ;;  %5201 = vmatprep.subr.bf16.mxu0 %v5490_v10  ;;  %v6235_v4 = vadd.f32 %v4009_v58, %v5572_v50  ;;  %v2179_v50 = vmax.f32 %v6187_v44, %v2171_v59  ;;  %v2010_v19 = vmax.f32 %v6195_v48, %v2002_v63  ;;  %v4023_v44 = vld [vmem:[%s5502_s20 + $0x320] sm:$0xff]  ;;  %v4053_v40 = vld [vmem:[%s5502_s20 + $0x390] sm:$0xff] }
  0x61   : > { %5215 = vmatpush3.bf16.msra.mxu1 %v5466_v5  ;;  %4746 = vmatprep.mubr.msk.f32.mxu1 %vm321_vm0, %v1840_v18  ;;  %v4020_v18 = vld [vmem:[%s5502_s20 + $0x308] sm:$0xff]  ;;  %v2011_v26 = vmax.f32 %v6211_v56, %v2003_v8  ;;  %v2005_v28 = vmul.f32 0.2, %v6243_v9  ;;  %v2181_v32 = vmax.f32 %v6219_v60, %v2173_v16  ;;  %v6319_v48 = vadd.f32 %v6316_v47, %v4022_v34  ;;  %v6335_v56 = vld [vmem:[%s5497_s13 + $0x20] sm:$0xff]  ;;  %v4026_v8 = vld [vmem:[%s5502_s20 + $0x338] sm:$0xff] }
  0x62   : > { %4719 = vmatmul.mubr.msk.f32.gmra.mrb[36].mxu0 %vm321_vm0, %v1671_v22  ;;  %5217 = vmatprep.subr.bf16.mxu1 %v5490_v10  ;;  %v6262_v22 = vadd.f32 %v6259_v21, %v4019_v6  ;;  %v2174_v24 = vmul.f32 0.2, %v6235_v4  ;;  %v6338_v58 = vadd.f32 %v6335_v56, %v4023_v44  ;;  %v6346_v61 = vadd.f32 %v6335_v56, %v4039_v49  ;;  %v4068_v34 = vld [vmem:[%s5502_s20 + $0x3c8] sm:$0xff]  ;;  %v4069_v44 = vld [vmem:[%s5502_s20 + $0x3d0] sm:$0xff]  ;;  %v4054_v49 = vld [vmem:[%s5502_s20 + $0x398] sm:$0xff] }
  0x63   : > { %5203 = vmatpush3.bf16.msra.mxu0 %v5490_v10  ;;  %4721 = vmatprep.mubr.msk.f32.mxu0 %vm321_vm0, %v1672_v30  ;;  %v6281_v30 = vadd.f32 %v6278_v29, %v4020_v18  ;;  %v2013_v45 = vmax.f32 %v6243_v9, %v2005_v28  ;;  %v2341_v0 = vmul.f32 0.2, %v6319_v48  ;;  %v2511_v6 = vmul.f32 0.2, %v6327_v52 }
  0x64   : > { %4747 = vmatmul.mubr.msk.f32.gmra.mrb[36].mxu1 %vm321_vm0, %v1841_v11  ;;  %5205 = vmatprep.subr.bf16.mxu0 %v5513_v14  ;;  %v4021_v11 = vld [vmem:[%s5502_s20 + $0x310] sm:$0xff]  ;;  %v2338_v36 = vmul.f32 0.2, %v6262_v22  ;;  %v2182_v41 = vmax.f32 %v6235_v4, %v2174_v24  ;;  %v2342_v15 = vmul.f32 0.2, %v6338_v58  ;;  %v6392_v24 = vld [vmem:[%s5497_s13 + $0x38] sm:$0xff] }
  0x65   : > { %5219 = vmatpush3.bf16.msra.mxu1 %v5490_v10  ;;  %4749 = vmatprep.mubr.msk.f32.mxu1 %vm321_vm0, %v1842_v12  ;;  %v6289_v12 = vadd.f32 %v6278_v29, %v4036_v23  ;;  %v2349_v23 = vmax.f32 %v6319_v48, %v2341_v0  ;;  %v6435_v48 = vadd.f32 %v6278_v29, %v4068_v34  ;;  %v4083_v34 = vld [vmem:[%s5502_s20 + $0x400] sm:$0xff] }
  0x66   : > { %4722 = vmatmul.mubr.msk.f32.gmra.mrb[38].mxu0 %vm321_vm0, %v1673_v37  ;;  %5221 = vmatprep.subr.bf16.mxu1 %v5513_v14  ;;  %v6297_v37 = vld [vmem:[%s5497_s13 + $0x10] sm:$0xff] }
  0x67   : > { %5207 = vmatpush3.bf16.msra.mxu0 %v5513_v14  ;;  %4768 = vmatprep.mubr.msk.f32.mxu0 %vm321_vm0, %v2006_v46  ;;  %v6300_v38 = vadd.f32 %v6297_v37, %v4021_v11  ;;  %v6308_v42 = vadd.f32 %v6297_v37, %v4037_v31  ;;  %v2339_v46 = vmul.f32 0.2, %v6281_v30  ;;  %v2509_v51 = vmul.f32 0.2, %v6289_v12  ;;  %v4067_v11 = vld [vmem:[%s5502_s20 + $0x3c0] sm:$0xff]  ;;  %v4052_v31 = vld [vmem:[%s5502_s20 + $0x388] sm:$0xff] }
  0x68   : > { %4750 = vmatmul.mubr.msk.f32.gmra.mrb[38].mxu1 %vm321_vm0, %v1843_v13  ;;  %5225 = vmatprep.subr.bf16.mxu0 %v5461_v3  ;;  %v2508_v13 = vmul.f32 0.2, %v6270_v25  ;;  %v2849_v0 = vmul.f32 0.2, %v6435_v48 }
  0x69   : > { %5223 = vmatpush3.bf16.msra.mxu1 %v5513_v14  ;;  %4796 = vmatprep.mubr.msk.f32.mxu1 %vm321_vm0, %v2176_v27  ;;  %v2183_v27 = vmax.f32 %v6251_v17, %v2175_v33  ;;  %v2340_v55 = vmul.f32 0.2, %v6300_v38  ;;  %v2510_v60 = vmul.f32 0.2, %v6308_v42  ;;  %v2347_v63 = vmax.f32 %v6281_v30, %v2339_v46  ;;  %v4042_v17 = vld [vmem:[%s5502_s20 + $0x378] sm:$0xff] }
  0x6a   : > { %4769 = vmatmul.mubr.msk.f32.vlgmr.msra.gmra.mrb[40].mxu0 %vm321_vm0, %v2007_v54  ;;  %5241 = vmatprep.subr.bf16.mxu1 %v5461_v3  ;;  %v2346_v54 = vmax.f32 %v6262_v22, %v2338_v36  ;;  %v2516_v59 = vmax.f32 %v6270_v25, %v2508_v13  ;;  %v2517_v4 = vmax.f32 %v6289_v12, %v2509_v51  ;;  %v4051_v22 = vld [vmem:[%s5502_s20 + $0x380] sm:$0xff] }
  0x6b   : > { %5227 = vmatpush3.bf16.msra.mxu0 %v5461_v3  ;;  %4771 = vmatprep.mubr.msk.f32.mxu0 %vm321_vm0, %v2008_v62  ;;  %v4025_v62 = vld [vmem:[%s5502_s20 + $0x330] sm:$0xff]  ;;  %v2348_v9 = vmax.f32 %v6300_v38, %v2340_v55  ;;  %v2518_v18 = vmax.f32 %v6308_v42, %v2510_v60  ;;  %v6395_v25 = vadd.f32 %v6392_v24, %v4026_v8  ;;  %v4072_v8 = vld [vmem:[%s5502_s20 + $0x3e8] sm:$0xff] }
  0x6c   : > { %4797 = vmatmul.mubr.msk.f32.vlgmr.msra.gmra.mrb[40].mxu1 %vm321_vm0, %v2177_v39  ;;  %5229 = vmatprep.subr.bf16.mxu0 %v5466_v5  ;;  %v4040_v39 = vld [vmem:[%s5502_s20 + $0x368] sm:$0xff]  ;;  %v6403_v30 = vadd.f32 %v6392_v24, %v4042_v17  ;;  %v6411_v12 = vadd.f32 %v6259_v21, %v4051_v22  ;;  %v6419_v38 = vadd.f32 %v6259_v21, %v4067_v11  ;;  %v4057_v17 = vld [vmem:[%s5502_s20 + $0x3b0] sm:$0xff]  ;;  %v4058_v11 = vld [vmem:[%s5502_s20 + $0x3b8] sm:$0xff] }
  0x6d   : > { %5243 = vmatpush3.bf16.msra.mxu1 %v5461_v3  ;;  %4799 = vmatprep.mubr.msk.f32.mxu1 %vm321_vm0, %v2178_v43  ;;  %v6357_v43 = vadd.f32 %v6354_v1, %v4024_v53  ;;  %v2345_v13 = vmul.f32 0.2, %v6395_v25  ;;  %v6427_v42 = vadd.f32 %v6278_v29, %v4052_v31  ;;  %v4070_v53 = vld [vmem:[%s5502_s20 + $0x3d8] sm:$0xff]  ;;  %v4073_v22 = vld [vmem:[%s5502_s20 + $0x3f0] sm:$0xff] }
  0x6e   : > { %4772 = vmatmul.mubr.msk.f32.gmra.mrb[42].mxu0 %vm321_vm0, %v2009_v7  ;;  %5245 = vmatprep.subr.bf16.mxu1 %v5466_v5  ;;  %v6365_v7 = vadd.f32 %v6354_v1, %v4040_v39  ;;  %v2515_v46 = vmul.f32 0.2, %v6403_v30  ;;  %v2678_v51 = vmul.f32 0.2, %v6411_v12  ;;  %v2848_v55 = vmul.f32 0.2, %v6419_v38 }
  0x6f   : > { %5231 = vmatpush3.bf16.msra.mxu0 %v5466_v5  ;;  %4774 = vmatprep.mubr.msk.f32.mxu0 %vm321_vm0, %v2010_v19  ;;  %v2512_v19 = vmul.f32 0.2, %v6346_v61  ;;  %v4055_v39 = vld [vmem:[%s5502_s20 + $0x3a0] sm:$0xff]  ;;  %v2679_v60 = vmul.f32 0.2, %v6427_v42  ;;  %v4074_v31 = vld [vmem:[%s5502_s20 + $0x3f8] sm:$0xff] }
  0x70   : > { %4800 = vmatmul.mubr.msk.f32.gmra.mrb[42].mxu1 %vm321_vm0, %v2179_v50  ;;  %5233 = vmatprep.subr.bf16.mxu0 %v5490_v10  ;;  %v6373_v50 = vld [vmem:[%s5497_s13 + $0x30] sm:$0xff]  ;;  %v2513_v28 = vmul.f32 0.2, %v6365_v7 }
  0x71   : > { %5247 = vmatpush3.bf16.msra.mxu1 %v5466_v5  ;;  %4802 = vmatprep.mubr.msk.f32.mxu1 %vm321_vm0, %v2180_v57  ;;  %v6376_v16 = vadd.f32 %v6373_v50, %v4025_v62  ;;  %v6384_v20 = vadd.f32 %v6373_v50, %v4041_v2  ;;  %v2343_v57 = vmul.f32 0.2, %v6357_v43  ;;  %v4071_v62 = vld [vmem:[%s5502_s20 + $0x3e0] sm:$0xff]  ;;  %v4056_v2 = vld [vmem:[%s5502_s20 + $0x3a8] sm:$0xff] }
  0x72   : > { %4775 = vmatmul.mubr.msk.f32.gmra.mrb[44].mxu0 %vm321_vm0, %v2011_v26  ;;  %5249 = vmatprep.subr.bf16.mxu1 %v5490_v10  ;;  %v2519_v26 = vmax.f32 %v6327_v52, %v2511_v6  ;;  %v6443_v52 = vadd.f32 %v6297_v37, %v4053_v40  ;;  %v4099_v40 = vld [vmem:[%s5502_s20 + $0x440] sm:$0xff] }
  0x73   : > { %5235 = vmatpush3.bf16.msra.mxu0 %v5490_v10  ;;  %4777 = vmatprep.mubr.msk.f32.mxu0 %vm321_vm0, %v2012_v35  ;;  %v2344_v33 = vmul.f32 0.2, %v6376_v16  ;;  %v2520_v35 = vmax.f32 %v6346_v61, %v2512_v19  ;;  %v2514_v36 = vmul.f32 0.2, %v6384_v20  ;;  %v6459_v61 = vadd.f32 %v6316_v47, %v4054_v49  ;;  %v4100_v49 = vld [vmem:[%s5502_s20 + $0x448] sm:$0xff] }
  0x74   : > { %4803 = vmatmul.mubr.msk.f32.gmra.mrb[44].mxu1 %vm321_vm0, %v2181_v32  ;;  %5237 = vmatprep.subr.bf16.mxu0 %v5513_v14  ;;  %v2350_v32 = vmax.f32 %v6338_v58, %v2342_v15  ;;  %v6451_v58 = vadd.f32 %v6297_v37, %v4069_v44  ;;  %v2680_v6 = vmul.f32 0.2, %v6443_v52  ;;  %v4084_v44 = vld [vmem:[%s5502_s20 + $0x408] sm:$0xff] }
  0x75   : > { %5251 = vmatpush3.bf16.msra.mxu1 %v5490_v10  ;;  %4805 = vmatprep.mubr.msk.f32.mxu1 %vm321_vm0, %v2182_v41  ;;  %v2351_v41 = vmax.f32 %v6357_v43, %v2343_v57  ;;  %v6467_v43 = vadd.f32 %v6316_v47, %v4070_v53  ;;  %v2681_v19 = vmul.f32 0.2, %v6459_v61  ;;  %v4085_v53 = vld [vmem:[%s5502_s20 + $0x410] sm:$0xff] }
  0x76   : > { %4778 = vmatmul.mubr.msk.f32.gmra.mrb[46].mxu0 %vm321_vm0, %v2013_v45  ;;  %5253 = vmatprep.subr.bf16.mxu1 %v5513_v14  ;;  %v2521_v45 = vmax.f32 %v6365_v7, %v2513_v28  ;;  %v6475_v7 = vadd.f32 %v6335_v56, %v4055_v39  ;;  %v2850_v15 = vmul.f32 0.2, %v6451_v58  ;;  %v4101_v39 = vld [vmem:[%s5502_s20 + $0x450] sm:$0xff] }
  0x77   : > { %5239 = vmatpush3.bf16.msra.mxu0 %v5513_v14  ;;  %4824 = vmatprep.mubr.msk.f32.mxu0 %vm321_vm0, %v2346_v54  ;;  %v2522_v54 = vmax.f32 %v6384_v20, %v2514_v36  ;;  %v6491_v20 = vadd.f32 %v6354_v1, %v4056_v2  ;;  %v2851_v57 = vmul.f32 0.2, %v6467_v43  ;;  %v4102_v2 = vld [vmem:[%s5502_s20 + $0x458] sm:$0xff] }
  0x78   : > { %4806 = vmatmul.mubr.msk.f32.gmra.mrb[46].mxu1 %vm321_vm0, %v2183_v27  ;;  %5257 = vmatprep.subr.bf16.mxu0 %v5461_v3  ;;  %v2352_v27 = vmax.f32 %v6376_v16, %v2344_v33  ;;  %v6483_v16 = vadd.f32 %v6335_v56, %v4071_v62  ;;  %v2682_v28 = vmul.f32 0.2, %v6475_v7  ;;  %v4086_v62 = vld [vmem:[%s5502_s20 + $0x418] sm:$0xff] }
  0x79   : > { %5255 = vmatpush3.bf16.msra.mxu1 %v5513_v14  ;;  %4852 = vmatprep.mubr.msk.f32.mxu1 %vm321_vm0, %v2516_v59  ;;  %v2353_v59 = vmax.f32 %v6395_v25, %v2345_v13  ;;  %v6499_v25 = vadd.f32 %v6354_v1, %v4072_v8  ;;  %v2683_v36 = vmul.f32 0.2, %v6491_v20  ;;  %v4087_v8 = vld [vmem:[%s5502_s20 + $0x420] sm:$0xff] }
  0x7a   : > { %4825 = vmatmul.mubr.msk.f32.vlgmr.msra.gmra.mrb[48].mxu0 %vm321_vm0, %v2347_v63  ;;  %5273 = vmatprep.subr.bf16.mxu1 %v5461_v3  ;;  %v2523_v63 = vmax.f32 %v6403_v30, %v2515_v46  ;;  %v6507_v30 = vadd.f32 %v6373_v50, %v4057_v17  ;;  %v2852_v33 = vmul.f32 0.2, %v6483_v16  ;;  %v4103_v17 = vld [vmem:[%s5502_s20 + $0x460] sm:$0xff] }
  0x7b   : > { %5259 = vmatpush3.bf16.msra.mxu0 %v5461_v3  ;;  %4827 = vmatprep.mubr.msk.f32.mxu0 %vm321_vm0, %v2348_v9  ;;  %v2856_v9 = vmax.f32 %v6419_v38, %v2848_v55  ;;  %v6523_v38 = vadd.f32 %v6392_v24, %v4058_v11  ;;  %v2853_v13 = vmul.f32 0.2, %v6499_v25  ;;  %v4104_v11 = vld [vmem:[%s5502_s20 + $0x468] sm:$0xff] }
  0x7c   : > { %4853 = vmatmul.mubr.msk.f32.vlgmr.msra.gmra.mrb[48].mxu1 %vm321_vm0, %v2517_v4  ;;  %5261 = vmatprep.subr.bf16.mxu0 %v5466_v5  ;;  %v2686_v4 = vmax.f32 %v6411_v12, %v2678_v51  ;;  %v6515_v12 = vadd.f32 %v6373_v50, %v4073_v22  ;;  %v2684_v46 = vmul.f32 0.2, %v6507_v30  ;;  %v4088_v22 = vld [vmem:[%s5502_s20 + $0x428] sm:$0xff] }
  0x7d   : > { %5275 = vmatpush3.bf16.msra.mxu1 %v5461_v3  ;;  %4855 = vmatprep.mubr.msk.f32.mxu1 %vm321_vm0, %v2518_v18  ;;  %v2687_v18 = vmax.f32 %v6427_v42, %v2679_v60  ;;  %v6531_v42 = vadd.f32 %v6392_v24, %v4074_v31  ;;  %v2685_v55 = vmul.f32 0.2, %v6523_v38  ;;  %v4089_v31 = vld [vmem:[%s5502_s20 + $0x430] sm:$0xff] }
  0x7e   : > { %4828 = vmatmul.mubr.msk.f32.gmra.mrb[50].mxu0 %vm321_vm0, %v2349_v23  ;;  %5277 = vmatprep.subr.bf16.mxu1 %v5466_v5  ;;  %v2857_v23 = vmax.f32 %v6435_v48, %v2849_v0  ;;  %v6539_v48 = vadd.f32 %v6259_v21, %v4083_v34  ;;  %v2854_v51 = vmul.f32 0.2, %v6515_v12  ;;  %v4105_v34 = vld [vmem:[%s5502_s20 + $0x470] sm:$0xff] }
  0x7f   : > { %5263 = vmatpush3.bf16.msra.mxu0 %v5466_v5  ;;  %4830 = vmatprep.mubr.msk.f32.mxu0 %vm321_vm0, %v2350_v32  ;;  %v2858_v32 = vmax.f32 %v6451_v58, %v2850_v15  ;;  %v6555_v58 = vadd.f32 %v6278_v29, %v4084_v44  ;;  %v2855_v60 = vmul.f32 0.2, %v6531_v42  ;;  %v4106_v44 = vld [vmem:[%s5502_s20 + $0x478] sm:$0xff] }
  0x80   : > { %4856 = vmatmul.mubr.msk.f32.gmra.mrb[50].mxu1 %vm321_vm0, %v2519_v26  ;;  %5265 = vmatprep.subr.bf16.mxu0 %v5490_v10  ;;  %v2688_v26 = vmax.f32 %v6443_v52, %v2680_v6  ;;  %v6547_v52 = vadd.f32 %v6259_v21, %v4099_v40  ;;  %v3018_v0 = vmul.f32 0.2, %v6539_v48  ;;  %v4090_v40 = vld [vmem:[%s5502_s20 + $0x438] sm:$0xff] }
  0x81   : > { %5279 = vmatpush3.bf16.msra.mxu1 %v5466_v5  ;;  %4858 = vmatprep.mubr.msk.f32.mxu1 %vm321_vm0, %v2520_v35  ;;  %v2689_v35 = vmax.f32 %v6459_v61, %v2681_v19  ;;  %v6563_v61 = vadd.f32 %v6278_v29, %v4100_v49  ;;  %v3019_v15 = vmul.f32 0.2, %v6555_v58  ;;  %v4115_v49 = vld [vmem:[%s5502_s20 + $0x480] sm:$0xff] }
  0x82   : > { %4831 = vmatmul.mubr.msk.f32.gmra.mrb[52].mxu0 %vm321_vm0, %v2351_v41  ;;  %5281 = vmatprep.subr.bf16.mxu1 %v5490_v10  ;;  %v2859_v41 = vmax.f32 %v6467_v43, %v2851_v57  ;;  %v6571_v43 = vadd.f32 %v6297_v37, %v4085_v53  ;;  %v3188_v6 = vmul.f32 0.2, %v6547_v52  ;;  %v4116_v53 = vld [vmem:[%s5502_s20 + $0x488] sm:$0xff] }
  0x83   : > { %5267 = vmatpush3.bf16.msra.mxu0 %v5490_v10  ;;  %4833 = vmatprep.mubr.msk.f32.mxu0 %vm321_vm0, %v2352_v27  ;;  %v2860_v27 = vmax.f32 %v6483_v16, %v2852_v33  ;;  %v6587_v16 = vadd.f32 %v6316_v47, %v4086_v62  ;;  %v3189_v19 = vmul.f32 0.2, %v6563_v61  ;;  %v6668_v62 = vadd.f32 %v6259_v21, %v4115_v49 }
  0x84   : > { %4859 = vmatmul.mubr.msk.f32.gmra.mrb[52].mxu1 %vm321_vm0, %v2521_v45  ;;  %5269 = vmatprep.subr.bf16.mxu0 %v5513_v14  ;;  %v2690_v45 = vmax.f32 %v6475_v7, %v2682_v28  ;;  %v6579_v7 = vadd.f32 %v6297_v37, %v4101_v39  ;;  %v3020_v57 = vmul.f32 0.2, %v6571_v43  ;;  %v6660_v39 = vadd.f32 %v6392_v24, %v4106_v44 }
  0x85   : > { %5283 = vmatpush3.bf16.msra.mxu1 %v5490_v10  ;;  %4861 = vmatprep.mubr.msk.f32.mxu1 %vm321_vm0, %v2522_v54  ;;  %v2691_v54 = vmax.f32 %v6491_v20, %v2683_v36  ;;  %v6595_v20 = vadd.f32 %v6316_v47, %v4102_v2  ;;  %v3021_v33 = vmul.f32 0.2, %v6587_v16 }
  0x86   : > { %4834 = vmatmul.mubr.msk.f32.gmra.mrb[54].mxu0 %vm321_vm0, %v2353_v59  ;;  %5285 = vmatprep.subr.bf16.mxu1 %v5513_v14  ;;  %v2861_v59 = vmax.f32 %v6499_v25, %v2853_v13  ;;  %v6603_v25 = vadd.f32 %v6335_v56, %v4087_v8  ;;  %v3190_v28 = vmul.f32 0.2, %v6579_v7 }
  0x87   : > { %5271 = vmatpush3.bf16.msra.mxu0 %v5513_v14  ;;  %4880 = vmatprep.mubr.msk.f32.mxu0 %vm321_vm0, %v2686_v4  ;;  %v2862_v4 = vmax.f32 %v6515_v12, %v2854_v51  ;;  %v6619_v12 = vadd.f32 %v6354_v1, %v4088_v22  ;;  %v3191_v36 = vmul.f32 0.2, %v6595_v20 }
  0x88   : > { %4862 = vmatmul.mubr.msk.f32.gmra.mrb[54].mxu1 %vm321_vm0, %v2523_v63  ;;  %5289 = vmatprep.subr.bf16.mxu0 %v5461_v3  ;;  %v2692_v63 = vmax.f32 %v6507_v30, %v2684_v46  ;;  %v6611_v30 = vadd.f32 %v6335_v56, %v4103_v17  ;;  %v3022_v13 = vmul.f32 0.2, %v6603_v25  ;;  %v4134_v17 = vld [vmem:[%s5502_s20 + $0x4d8] sm:$0xff] }
  0x89   : > { %5287 = vmatpush3.bf16.msra.mxu1 %v5513_v14  ;;  %4908 = vmatprep.mubr.msk.f32.mxu1 %vm321_vm0, %v2856_v9  ;;  %v2693_v9 = vmax.f32 %v6523_v38, %v2685_v55  ;;  %v6627_v38 = vadd.f32 %v6354_v1, %v4104_v11  ;;  %v3023_v51 = vmul.f32 0.2, %v6619_v12  ;;  %v3199_v55 = vmax.f32 %v6595_v20, %v3191_v36  ;;  %v4119_v20 = vld [vmem:[%s5502_s20 + $0x4a0] sm:$0xff] }
  0x8a   : > { %4881 = vmatmul.mubr.msk.f32.vlgmr.msra.gmra.mrb[56].mxu0 %vm321_vm0, %v2687_v18  ;;  %5305 = vmatprep.subr.bf16.mxu1 %v5461_v3  ;;  %v2863_v18 = vmax.f32 %v6531_v42, %v2855_v60  ;;  %v6635_v42 = vadd.f32 %v6373_v50, %v4089_v31  ;;  %v3192_v46 = vmul.f32 0.2, %v6611_v30  ;;  %v3030_v60 = vmax.f32 %v6603_v25, %v3022_v13 }
  0x8b   : > { %5291 = vmatpush3.bf16.msra.mxu0 %v5461_v3  ;;  %4883 = vmatprep.mubr.msk.f32.mxu0 %vm321_vm0, %v2688_v26  ;;  %v3196_v26 = vmax.f32 %v6547_v52, %v3188_v6  ;;  %v6651_v52 = vadd.f32 %v6392_v24, %v4090_v40  ;;  %v3031_v6 = vmax.f32 %v6619_v12, %v3023_v51  ;;  %v4137_v40 = vld [vmem:[%s5502_s20 + $0x4f0] sm:$0xff] }
  0x8c   : > { %4909 = vmatmul.mubr.msk.f32.vlgmr.msra.gmra.mrb[56].mxu1 %vm321_vm0, %v2857_v23  ;;  %5293 = vmatprep.subr.bf16.mxu0 %v5466_v5  ;;  %v3026_v23 = vmax.f32 %v6539_v48, %v3018_v0  ;;  %v6643_v48 = vadd.f32 %v6373_v50, %v4105_v34  ;;  %v3200_v0 = vmax.f32 %v6611_v30, %v3192_v46  ;;  %v4136_v34 = vld [vmem:[%s5502_s20 + $0x4e8] sm:$0xff] }
  0x8d   : > { %5307 = vmatpush3.bf16.msra.mxu1 %v5461_v3  ;;  %4911 = vmatprep.mubr.msk.f32.mxu1 %vm321_vm0, %v2858_v32  ;;  %v3027_v32 = vmax.f32 %v6555_v58, %v3019_v15  ;;  %v3193_v58 = vmul.f32 0.2, %v6627_v38  ;;  %v3354_v31 = vadd.f32 %v6335_v56, %v4119_v20  ;;  %v3526_v51 = vadd.f32 %v6373_v50, %v4137_v40 }
  0x8e   : > { %4884 = vmatmul.mubr.msk.f32.gmra.mrb[58].mxu0 %vm321_vm0, %v2689_v35  ;;  %5309 = vmatprep.subr.bf16.mxu1 %v5466_v5  ;;  %v3197_v35 = vmax.f32 %v6563_v61, %v3189_v19  ;;  %v3024_v61 = vmul.f32 0.2, %v6635_v42 }
  0x8f   : > { %5295 = vmatpush3.bf16.msra.mxu0 %v5466_v5  ;;  %4886 = vmatprep.mubr.msk.f32.mxu0 %vm321_vm0, %v2690_v45  ;;  %v3198_v45 = vmax.f32 %v6579_v7, %v3190_v28  ;;  %v3025_v7 = vmul.f32 0.2, %v6651_v52  ;;  %v3362_v44 = vmul.f32 0.2, %v3354_v31 }
  0x90   : > { %4912 = vmatmul.mubr.msk.f32.gmra.mrb[58].mxu1 %vm321_vm0, %v2859_v41  ;;  %5297 = vmatprep.subr.bf16.mxu0 %v5490_v10  ;;  %v3028_v41 = vmax.f32 %v6571_v43, %v3020_v57  ;;  %v3194_v43 = vmul.f32 0.2, %v6643_v48 }
  0x91   : > { %5311 = vmatpush3.bf16.msra.mxu1 %v5466_v5  ;;  %4914 = vmatprep.mubr.msk.f32.mxu1 %vm321_vm0, %v2860_v27  ;;  %v3029_v27 = vmax.f32 %v6587_v16, %v3021_v33  ;;  %v4118_v16 = vld [vmem:[%s5502_s20 + $0x498] sm:$0xff] }
  0x92   : > { %4887 = vmatmul.mubr.msk.f32.gmra.mrb[60].mxu0 %vm321_vm0, %v2691_v54  ;;  %5313 = vmatprep.subr.bf16.mxu1 %v5490_v10  ;;  %v4131_v54 = vld [vmem:[%s5502_s20 + $0x4c0] sm:$0xff]  ;;  %v3202_v22 = vmax.f32 %v6643_v48, %v3194_v43  ;;  %v3353_v11 = vadd.f32 %v6316_v47, %v4118_v16  ;;  %v4122_v48 = vld [vmem:[%s5502_s20 + $0x4b8] sm:$0xff] }
  0x93   : > { %5299 = vmatpush3.bf16.msra.mxu0 %v5490_v10  ;;  %4889 = vmatprep.mubr.msk.f32.mxu0 %vm321_vm0, %v2692_v63  ;;  %v4117_v63 = vld [vmem:[%s5502_s20 + $0x490] sm:$0xff]  ;;  %v6679_v2 = vadd.f32 %v6259_v21, %v4131_v54  ;;  %v3201_v21 = vmax.f32 %v6627_v38, %v3193_v58 }
  0x94   : > { %4915 = vmatmul.mubr.msk.f32.gmra.mrb[60].mxu1 %vm321_vm0, %v2861_v59  ;;  %5301 = vmatprep.subr.bf16.mxu0 %v5513_v14  ;;  %v4132_v59 = vld [vmem:[%s5502_s20 + $0x4c8] sm:$0xff]  ;;  %v6694_v15 = vadd.f32 %v6297_v37, %v4117_v63 }
  0x95   : > { %5315 = vmatpush3.bf16.msra.mxu1 %v5490_v10  ;;  %4917 = vmatprep.mubr.msk.f32.mxu1 %vm321_vm0, %v2862_v4  ;;  %v4133_v4 = vld [vmem:[%s5502_s20 + $0x4d0] sm:$0xff]  ;;  %v6687_v8 = vadd.f32 %v6278_v29, %v4132_v59  ;;  %v3528_v57 = vmul.f32 0.2, %v6679_v2 }
  0x96   : > { %4890 = vmatmul.mubr.msk.f32.gmra.mrb[62].mxu0 %vm321_vm0, %v2693_v9  ;;  %5317 = vmatprep.subr.bf16.mxu1 %v5513_v14  ;;  %v3195_v9 = vmul.f32 0.2, %v6660_v39  ;;  %v6703_v19 = vadd.f32 %v6297_v37, %v4133_v4  ;;  %v3033_v37 = vmax.f32 %v6651_v52, %v3025_v7  ;;  %v3360_v30 = vmul.f32 0.2, %v6694_v15  ;;  %v4138_v52 = vld [vmem:[%s5502_s20 + $0x4f8] sm:$0xff] }
  0x97   : > { %5303 = vmatpush3.bf16.msra.mxu0 %v5513_v14  ;;  %4936 = vmatprep.mubr.msk.f32.mxu0 %vm321_vm0, %v3026_v23  ;;  %v3529_v25 = vmul.f32 0.2, %v6687_v8  ;;  %v3536_v38 = vmax.f32 %v6679_v2, %v3528_v57  ;;  %v3527_v59 = vadd.f32 %v6392_v24, %v4138_v52 }
  0x98   : > { %4918 = vmatmul.mubr.msk.f32.gmra.mrb[62].mxu1 %vm321_vm0, %v2863_v18  ;;  %5321 = vmatprep.subr.bf16.mxu0 %v5461_v3  ;;  %v3358_v18 = vmul.f32 0.2, %v6668_v62  ;;  %v3203_v28 = vmax.f32 %v6660_v39, %v3195_v9 }
  0x99   : > { %5319 = vmatpush3.bf16.msra.mxu1 %v5513_v14  ;;  %4964 = vmatprep.mubr.msk.f32.mxu1 %vm321_vm0, %v3196_v26  ;;  %v3523_v26 = vadd.f32 %v6316_v47, %v4134_v17  ;;  %v3530_v47 = vmul.f32 0.2, %v6703_v19  ;;  %v3535_v43 = vmul.f32 0.2, %v3527_v59 }
  0x9a   : > { %4937 = vmatmul.mubr.msk.f32.vlgmr.msra.gmra.mrb[64].mxu0 %vm321_vm0, %v3027_v32  ;;  %5337 = vmatprep.subr.bf16.mxu1 %v5461_v3  ;;  %v4120_v32 = vld [vmem:[%s5502_s20 + $0x4a8] sm:$0xff]  ;;  %v3366_v33 = vmax.f32 %v6668_v62, %v3358_v18 }
  0x9b   : > { %5323 = vmatpush3.bf16.msra.mxu0 %v5461_v3  ;;  %4939 = vmatprep.mubr.msk.f32.mxu0 %vm321_vm0, %v3028_v41  ;;  %v3531_v41 = vmul.f32 0.2, %v3523_v26  ;;  %v3355_v13 = vadd.f32 %v6354_v1, %v4120_v32  ;;  %v3538_v49 = vmax.f32 %v6703_v19, %v3530_v47  ;;  %v3543_v2 = vmax.f32 %v3527_v59, %v3535_v43 }
  0x9c   : > { %4965 = vmatmul.mubr.msk.f32.vlgmr.msra.gmra.mrb[64].mxu1 %vm321_vm0, %v3197_v35  ;;  %5325 = vmatprep.subr.bf16.mxu0 %v5466_v5  ;;  %v4121_v35 = vld [vmem:[%s5502_s20 + $0x4b0] sm:$0xff] }
  0x9d   : > { %5339 = vmatpush3.bf16.msra.mxu1 %v5461_v3  ;;  %4967 = vmatprep.mubr.msk.f32.mxu1 %vm321_vm0, %v3198_v45  ;;  %v6676_v3 = vadd.f32 %v6278_v29, %v4116_v53  ;;  %v3032_v29 = vmax.f32 %v6635_v42, %v3024_v61  ;;  %v3368_v42 = vmax.f32 %v6694_v15, %v3360_v30 }
  0x9e   : > { %4940 = vmatmul.mubr.msk.f32.gmra.mrb[66].mxu0 %vm321_vm0, %v3029_v27  ;;  %5341 = vmatprep.subr.bf16.mxu1 %v5466_v5  ;;  %v3525_v45 = vadd.f32 %v6354_v1, %v4136_v34  ;;  %v3356_v46 = vadd.f32 %v6373_v50, %v4121_v35  ;;  %v3539_v54 = vmax.f32 %v3523_v26, %v3531_v41  ;;  %v3363_v1 = vmul.f32 0.2, %v3355_v13 }
  0x9f   : > { %5327 = vmatpush3.bf16.msra.mxu0 %v5466_v5  ;;  %4942 = vmatprep.mubr.msk.f32.mxu0 %vm321_vm0, %v3030_v60  ;;  %v3359_v23 = vmul.f32 0.2, %v6676_v3  ;;  %v3534_v60 = vmul.f32 0.2, %v3526_v51 }
  0xa0   : > { %4968 = vmatmul.mubr.msk.f32.gmra.mrb[66].mxu1 %vm321_vm0, %v3199_v55  ;;  %5329 = vmatprep.subr.bf16.mxu0 %v5490_v10  ;;  %v3357_v55 = vadd.f32 %v6392_v24, %v4122_v48  ;;  %v3533_v58 = vmul.f32 0.2, %v3525_v45  ;;  %v3364_v39 = vmul.f32 0.2, %v3356_v46  ;;  %v3371_v61 = vmax.f32 %v3355_v13, %v3363_v1 }
  0xa1   : > { %5343 = vmatpush3.bf16.msra.mxu1 %v5466_v5  ;;  %4970 = vmatprep.mubr.msk.f32.mxu1 %vm321_vm0, %v3200_v0  ;;  %v4135_v5 = vld [vmem:[%s5502_s20 + $0x4e0] sm:$0xff]  ;;  %v3367_v36 = vmax.f32 %v6676_v3, %v3359_v23  ;;  %v3542_v3 = vmax.f32 %v3526_v51, %v3534_v60 }
  0xa2   : > { %4943 = vmatmul.mubr.msk.f32.gmra.mrb[68].mxu0 %vm321_vm0, %v3031_v6  ;;  %5345 = vmatprep.subr.bf16.mxu1 %v5490_v10  ;;  %v3524_v12 = vadd.f32 %v6335_v56, %v4135_v5  ;;  %v3361_v56 = vmul.f32 0.2, %v3353_v11  ;;  %v3365_v62 = vmul.f32 0.2, %v3357_v55  ;;  %v3541_v63 = vmax.f32 %v3525_v45, %v3533_v58 }
  0xa3   : > { %5331 = vmatpush3.bf16.msra.mxu0 %v5490_v10  ;;  %4945 = vmatprep.mubr.msk.f32.mxu0 %vm321_vm0, %v3032_v29  ;;  %v3372_v0 = vmax.f32 %v3356_v46, %v3364_v39 }
  0xa4   : > { %4971 = vmatmul.mubr.msk.f32.gmra.mrb[68].mxu1 %vm321_vm0, %v3201_v21  ;;  %5333 = vmatprep.subr.bf16.mxu0 %v5513_v14  ;;  %v3532_v27 = vmul.f32 0.2, %v3524_v12  ;;  %v3369_v53 = vmax.f32 %v3353_v11, %v3361_v56  ;;  %v3373_v24 = vmax.f32 %v3357_v55, %v3365_v62 }
  0xa5   : > { %5347 = vmatpush3.bf16.msra.mxu1 %v5490_v10  ;;  %4973 = vmatprep.mubr.msk.f32.mxu1 %vm321_vm0, %v3202_v22  ;;  %v3537_v10 = vmax.f32 %v6687_v8, %v3529_v25 }
  0xa6   : > { %4946 = vmatmul.mubr.msk.f32.gmra.mrb[70].mxu0 %vm321_vm0, %v3033_v37  ;;  %5349 = vmatprep.subr.bf16.mxu1 %v5513_v14  ;;  %v3540_v50 = vmax.f32 %v3524_v12, %v3532_v27 }
  0xa7   : > { %5335 = vmatpush3.bf16.msra.mxu0 %v5513_v14  ;;  %4992 = vmatprep.mubr.msk.f32.mxu0 %vm321_vm0, %v3366_v33 }
  0xa8   : > { %4974 = vmatmul.mubr.msk.f32.gmra.mrb[70].mxu1 %vm321_vm0, %v3203_v28 }
  0xa9   : > { %5351 = vmatpush3.bf16.msra.mxu1 %v5513_v14  ;;  %5020 = vmatprep.mubr.msk.f32.mxu1 %vm321_vm0, %v3536_v38  ;;  %v3370_v14 = vmax.f32 %v3354_v31, %v3362_v44 }
  0xaa   : > { %4993 = vmatmul.mubr.msk.f32.vlgmr.msra.gmra.mrb[72].mxu0 %vm321_vm0, %v3367_v36 }
  0xab   : > { %4995 = vmatprep.mubr.msk.f32.mxu0 %vm321_vm0, %v3368_v42 }
  0xac   : > { %5021 = vmatmul.mubr.msk.f32.vlgmr.msra.gmra.mrb[72].mxu1 %vm321_vm0, %v3537_v10 }
  0xad   : > { %5023 = vmatprep.mubr.msk.f32.mxu1 %vm321_vm0, %v3538_v49 }
  0xae   : > { %4996 = vmatmul.mubr.msk.f32.gmra.mrb[74].mxu0 %vm321_vm0, %v3369_v53 }
  0xaf   : > { %4998 = vmatprep.mubr.msk.f32.mxu0 %vm321_vm0, %v3370_v14 }
  0xb0   : > { %5024 = vmatmul.mubr.msk.f32.gmra.mrb[74].mxu1 %vm321_vm0, %v3539_v54 }
  0xb1   : > { %5026 = vmatprep.mubr.msk.f32.mxu1 %vm321_vm0, %v3540_v50 }
  0xb2   : > { %4999 = vmatmul.mubr.msk.f32.gmra.mrb[76].mxu0 %vm321_vm0, %v3371_v61 }
  0xb3   : > { %5001 = vmatprep.mubr.msk.f32.mxu0 %vm321_vm0, %v3372_v0 }
  0xb4   : > { %5027 = vmatmul.mubr.msk.f32.gmra.mrb[76].mxu1 %vm321_vm0, %v3541_v63 }
  0xb5   : > { %5029 = vmatprep.mubr.msk.f32.mxu1 %vm321_vm0, %v3542_v3 }
  0xb6   : > { %5002 = vmatmul.mubr.msk.f32.gmra.mrb[78].mxu0 %vm321_vm0, %v3373_v24 }
  0xb8   : > { %5030 = vmatmul.mubr.msk.f32.gmra.mrb[78].mxu1 %vm321_vm0, %v3543_v2 }
  0xed   : > { %v4490_v4 = vpop.f32.mrb[0].mxu0 }
  0xee   : > { %v4518_v6 = vpop.f32.mrb[0].mxu1  ;;  %v412_v8 = vpop.f32.mrb[1].mxu0 }
  0xef   : > { %v614_v7 = vmax.f32 %v4490_v4, %v4518_v6  ;;  %v574_v21 = vpop.f32.mrb[1].mxu1 }
  0xf0   : > { %v613_v9 = vmax.f32 %v412_v8, %v574_v21 }
  0xf1   : > { %v4493_v15 = vpop.f32.mrb[2].mxu0 }
  0xf2   : > { %v4521_v16 = vpop.f32.mrb[2].mxu1  ;;  %v422_v29 = vpop.f32.mrb[3].mxu0 }
  0xf3   : > { %v616_v17 = vmax.f32 %v4493_v15, %v4521_v16  ;;  %v584_v18 = vpop.f32.mrb[3].mxu1 }
  0xf4   : > { %v615_v19 = vmax.f32 %v422_v29, %v584_v18 }
  0xf5   : > { %v4496_v20 = vpop.f32.mrb[4].mxu0 }
  0xf6   : > { %v4524_v22 = vpop.f32.mrb[4].mxu1  ;;  %v432_v57 = vpop.f32.mrb[5].mxu0 }
  0xf7   : > { %v618_v23 = vmax.f32 %v4496_v20, %v4524_v22  ;;  %v594_v5 = vpop.f32.mrb[5].mxu1 }
  0xf8   : > { %v617_v37 = vmax.f32 %v432_v57, %v594_v5 }
  0xf9   : > { %v4499_v25 = vpop.f32.mrb[6].mxu0 }
  0xfa   : > { %v4527_v11 = vpop.f32.mrb[6].mxu1  ;;  %v442_v28 = vpop.f32.mrb[7].mxu0 }
  0xfb   : > { %v620_v26 = vmax.f32 %v4499_v25, %v4527_v11  ;;  %v604_v30 = vpop.f32.mrb[7].mxu1 }
  0xfc   : > { %v619_v31 = vmax.f32 %v442_v28, %v604_v30 }
  0xfd   : > { %v4546_v32 = vpop.f32.mrb[8].mxu0 }
  0xfe   : > { %v784_v33 = vmax.f32 %v614_v7, %v4546_v32  ;;  %v744_v47 = vpop.f32.mrb[9].mxu0 }
  0xff   : > { %v4574_v12 = vpop.f32.mrb[8].mxu1  ;;  %v783_v34 = vmax.f32 %v613_v9, %v744_v47 }
 0x100   : > { %v914_v35 = vpop.f32.mrb[9].mxu1  ;;  %v954_v36 = vmax.f32 %v784_v33, %v4574_v12 }
 0x101   : > { %v953_v38 = vmax.f32 %v783_v34, %v914_v35  ;;  %v4549_v40 = vpop.f32.mrb[10].mxu0 }
 0x102   : > { %v786_v10 = vmax.f32 %v616_v17, %v4549_v40  ;;  %v754_v56 = vpop.f32.mrb[11].mxu0 }
 0x103   : > { %v4577_v41 = vpop.f32.mrb[10].mxu1  ;;  %v785_v13 = vmax.f32 %v615_v19, %v754_v56 }
 0x104   : > { %v924_v42 = vpop.f32.mrb[11].mxu1  ;;  %v956_v44 = vmax.f32 %v786_v10, %v4577_v41 }
 0x105   : > { %v955_v45 = vmax.f32 %v785_v13, %v924_v42  ;;  %v4552_v46 = vpop.f32.mrb[12].mxu0 }
 0x106   : > { %v788_v48 = vmax.f32 %v618_v23, %v4552_v46  ;;  %v764_v49 = vpop.f32.mrb[13].mxu0 }
 0x107   : > { %v4580_v27 = vpop.f32.mrb[12].mxu1  ;;  %v787_v51 = vmax.f32 %v617_v37, %v764_v49 }
 0x108   : > { %v934_v52 = vpop.f32.mrb[13].mxu1  ;;  %v958_v53 = vmax.f32 %v788_v48, %v4580_v27 }
 0x109   : > { %v957_v54 = vmax.f32 %v787_v51, %v934_v52  ;;  %v4555_v1 = vpop.f32.mrb[14].mxu0 }
 0x10a   : > { %v790_v55 = vmax.f32 %v620_v26, %v4555_v1  ;;  %v774_v14 = vpop.f32.mrb[15].mxu0 }
 0x10b   : > { %v4583_v58 = vpop.f32.mrb[14].mxu1  ;;  %v789_v39 = vmax.f32 %v619_v31, %v774_v14 }
 0x10c   : > { %v944_v59 = vpop.f32.mrb[15].mxu1  ;;  %v960_v50 = vmax.f32 %v790_v55, %v4583_v58 }
 0x10d   : > { %v959_v60 = vmax.f32 %v789_v39, %v944_v59  ;;  %v4602_v61 = vpop.f32.mrb[16].mxu0 }
 0x10e   : > { %v1124_v62 = vmax.f32 %v954_v36, %v4602_v61  ;;  %v1084_v63 = vpop.f32.mrb[17].mxu0 }
 0x10f   : > { %v4630_v0 = vpop.f32.mrb[16].mxu1  ;;  %v1123_v43 = vmax.f32 %v953_v38, %v1084_v63 }
 0x110   : > { %v1254_v3 = vpop.f32.mrb[17].mxu1  ;;  %v1294_v24 = vmax.f32 %v1124_v62, %v4630_v0 }
 0x111   : > { %v1293_v2 = vmax.f32 %v1123_v43, %v1254_v3  ;;  %v4605_v4 = vpop.f32.mrb[18].mxu0 }
 0x112   : > { %v1126_v6 = vmax.f32 %v956_v44, %v4605_v4  ;;  %v1094_v7 = vpop.f32.mrb[19].mxu0 }
 0x113   : > { %v4633_v8 = vpop.f32.mrb[18].mxu1  ;;  %v1125_v21 = vmax.f32 %v955_v45, %v1094_v7 }
 0x114   : > { %v1264_v9 = vpop.f32.mrb[19].mxu1  ;;  %v1296_v15 = vmax.f32 %v1126_v6, %v4633_v8 }
 0x115   : > { %v1295_v16 = vmax.f32 %v1125_v21, %v1264_v9  ;;  %v4608_v17 = vpop.f32.mrb[20].mxu0 }
 0x116   : > { %v1128_v29 = vmax.f32 %v958_v53, %v4608_v17  ;;  %v1104_v18 = vpop.f32.mrb[21].mxu0 }
 0x117   : > { %v4636_v19 = vpop.f32.mrb[20].mxu1  ;;  %v1127_v20 = vmax.f32 %v957_v54, %v1104_v18 }
 0x118   : > { %v1274_v22 = vpop.f32.mrb[21].mxu1  ;;  %v1298_v23 = vmax.f32 %v1128_v29, %v4636_v19 }
 0x119   : > { %v1297_v57 = vmax.f32 %v1127_v20, %v1274_v22  ;;  %v4611_v5 = vpop.f32.mrb[22].mxu0 }
 0x11a   : > { %v1130_v37 = vmax.f32 %v960_v50, %v4611_v5  ;;  %v1114_v25 = vpop.f32.mrb[23].mxu0 }
 0x11b   : > { %v4639_v11 = vpop.f32.mrb[22].mxu1  ;;  %v1129_v26 = vmax.f32 %v959_v60, %v1114_v25 }
 0x11c   : > { %v1284_v28 = vpop.f32.mrb[23].mxu1  ;;  %v1300_v30 = vmax.f32 %v1130_v37, %v4639_v11 }
 0x11d   : > { %v1299_v31 = vmax.f32 %v1129_v26, %v1284_v28  ;;  %v4658_v32 = vpop.f32.mrb[24].mxu0 }
 0x11e   : > { %v1464_v33 = vmax.f32 %v1294_v24, %v4658_v32  ;;  %v1424_v47 = vpop.f32.mrb[25].mxu0 }
 0x11f   : > { %v4686_v12 = vpop.f32.mrb[24].mxu1  ;;  %v1463_v34 = vmax.f32 %v1293_v2, %v1424_v47 }
 0x120   : > { %v1594_v35 = vpop.f32.mrb[25].mxu1  ;;  %v1634_v36 = vmax.f32 %v1464_v33, %v4686_v12 }
 0x121   : > { %v1633_v38 = vmax.f32 %v1463_v34, %v1594_v35  ;;  %v4661_v40 = vpop.f32.mrb[26].mxu0 }
 0x122   : > { %v1466_v10 = vmax.f32 %v1296_v15, %v4661_v40  ;;  %v1434_v56 = vpop.f32.mrb[27].mxu0 }
 0x123   : > { %v4689_v41 = vpop.f32.mrb[26].mxu1  ;;  %v1465_v13 = vmax.f32 %v1295_v16, %v1434_v56 }
 0x124   : > { %v1604_v42 = vpop.f32.mrb[27].mxu1  ;;  %v1636_v44 = vmax.f32 %v1466_v10, %v4689_v41 }
 0x125   : > { %v1635_v45 = vmax.f32 %v1465_v13, %v1604_v42  ;;  %v4664_v46 = vpop.f32.mrb[28].mxu0 }
 0x126   : > { %v1468_v48 = vmax.f32 %v1298_v23, %v4664_v46  ;;  %v1444_v49 = vpop.f32.mrb[29].mxu0 }
 0x127   : > { %v4692_v27 = vpop.f32.mrb[28].mxu1  ;;  %v1467_v51 = vmax.f32 %v1297_v57, %v1444_v49 }
 0x128   : > { %v1614_v52 = vpop.f32.mrb[29].mxu1  ;;  %v1638_v53 = vmax.f32 %v1468_v48, %v4692_v27 }
 0x129   : > { %v1637_v54 = vmax.f32 %v1467_v51, %v1614_v52  ;;  %v4667_v1 = vpop.f32.mrb[30].mxu0 }
 0x12a   : > { %v1470_v55 = vmax.f32 %v1300_v30, %v4667_v1  ;;  %v1454_v14 = vpop.f32.mrb[31].mxu0 }
 0x12b   : > { %v4695_v58 = vpop.f32.mrb[30].mxu1  ;;  %v1469_v39 = vmax.f32 %v1299_v31, %v1454_v14 }
 0x12c   : > { %v1624_v59 = vpop.f32.mrb[31].mxu1  ;;  %v1640_v50 = vmax.f32 %v1470_v55, %v4695_v58 }
 0x12d   : > { %v1639_v60 = vmax.f32 %v1469_v39, %v1624_v59  ;;  %v4714_v61 = vpop.f32.mrb[32].mxu0 }
 0x12e   : > { %v1804_v62 = vmax.f32 %v1634_v36, %v4714_v61  ;;  %v1764_v63 = vpop.f32.mrb[33].mxu0 }
 0x12f   : > { %v4742_v0 = vpop.f32.mrb[32].mxu1  ;;  %v1803_v43 = vmax.f32 %v1633_v38, %v1764_v63 }
 0x130   : > { %v1934_v3 = vpop.f32.mrb[33].mxu1  ;;  %v1974_v24 = vmax.f32 %v1804_v62, %v4742_v0 }
 0x131   : > { %v1973_v2 = vmax.f32 %v1803_v43, %v1934_v3  ;;  %v4717_v4 = vpop.f32.mrb[34].mxu0 }
 0x132   : > { %v1806_v6 = vmax.f32 %v1636_v44, %v4717_v4  ;;  %v1774_v7 = vpop.f32.mrb[35].mxu0 }
 0x133   : > { %v4745_v8 = vpop.f32.mrb[34].mxu1  ;;  %v1805_v21 = vmax.f32 %v1635_v45, %v1774_v7 }
 0x134   : > { %v1944_v9 = vpop.f32.mrb[35].mxu1  ;;  %v1976_v15 = vmax.f32 %v1806_v6, %v4745_v8 }
 0x135   : > { %v1975_v16 = vmax.f32 %v1805_v21, %v1944_v9  ;;  %v4720_v17 = vpop.f32.mrb[36].mxu0 }
 0x136   : > { %v1808_v29 = vmax.f32 %v1638_v53, %v4720_v17  ;;  %v1784_v18 = vpop.f32.mrb[37].mxu0 }
 0x137   : > { %v4748_v19 = vpop.f32.mrb[36].mxu1  ;;  %v1807_v20 = vmax.f32 %v1637_v54, %v1784_v18 }
 0x138   : > { %v1954_v22 = vpop.f32.mrb[37].mxu1  ;;  %v1978_v23 = vmax.f32 %v1808_v29, %v4748_v19 }
 0x139   : > { %v1977_v57 = vmax.f32 %v1807_v20, %v1954_v22  ;;  %v4723_v5 = vpop.f32.mrb[38].mxu0 }
 0x13a   : > { %v1810_v37 = vmax.f32 %v1640_v50, %v4723_v5  ;;  %v1794_v25 = vpop.f32.mrb[39].mxu0 }
 0x13b   : > { %v4751_v11 = vpop.f32.mrb[38].mxu1  ;;  %v1809_v26 = vmax.f32 %v1639_v60, %v1794_v25 }
 0x13c   : > { %v1964_v28 = vpop.f32.mrb[39].mxu1  ;;  %v1980_v30 = vmax.f32 %v1810_v37, %v4751_v11 }
 0x13d   : > { %v1979_v31 = vmax.f32 %v1809_v26, %v1964_v28  ;;  %v4770_v32 = vpop.f32.mrb[40].mxu0 }
 0x13e   : > { %v2144_v33 = vmax.f32 %v1974_v24, %v4770_v32  ;;  %v2104_v47 = vpop.f32.mrb[41].mxu0 }
 0x13f   : > { %v4798_v12 = vpop.f32.mrb[40].mxu1  ;;  %v2143_v34 = vmax.f32 %v1973_v2, %v2104_v47 }
 0x140   : > { %v2274_v35 = vpop.f32.mrb[41].mxu1  ;;  %v2314_v36 = vmax.f32 %v2144_v33, %v4798_v12 }
 0x141   : > { %v2313_v38 = vmax.f32 %v2143_v34, %v2274_v35  ;;  %v4773_v40 = vpop.f32.mrb[42].mxu0 }
 0x142   : > { %v2146_v10 = vmax.f32 %v1976_v15, %v4773_v40  ;;  %v2114_v56 = vpop.f32.mrb[43].mxu0 }
 0x143   : > { %v4801_v41 = vpop.f32.mrb[42].mxu1  ;;  %v2145_v13 = vmax.f32 %v1975_v16, %v2114_v56 }
 0x144   : > { %v2284_v42 = vpop.f32.mrb[43].mxu1  ;;  %v2316_v44 = vmax.f32 %v2146_v10, %v4801_v41 }
 0x145   : > { %v2315_v45 = vmax.f32 %v2145_v13, %v2284_v42  ;;  %v4776_v46 = vpop.f32.mrb[44].mxu0 }
 0x146   : > { %v2148_v48 = vmax.f32 %v1978_v23, %v4776_v46  ;;  %v2124_v49 = vpop.f32.mrb[45].mxu0 }
 0x147   : > { %v4804_v27 = vpop.f32.mrb[44].mxu1  ;;  %v2147_v51 = vmax.f32 %v1977_v57, %v2124_v49 }
 0x148   : > { %v2294_v52 = vpop.f32.mrb[45].mxu1  ;;  %v2318_v53 = vmax.f32 %v2148_v48, %v4804_v27 }
 0x149   : > { %v2317_v54 = vmax.f32 %v2147_v51, %v2294_v52  ;;  %v4779_v1 = vpop.f32.mrb[46].mxu0 }
 0x14a   : > { %v2150_v55 = vmax.f32 %v1980_v30, %v4779_v1  ;;  %v2134_v14 = vpop.f32.mrb[47].mxu0 }
 0x14b   : > { %v4807_v58 = vpop.f32.mrb[46].mxu1  ;;  %v2149_v39 = vmax.f32 %v1979_v31, %v2134_v14 }
 0x14c   : > { %v2304_v59 = vpop.f32.mrb[47].mxu1  ;;  %v2320_v50 = vmax.f32 %v2150_v55, %v4807_v58 }
 0x14d   : > { %v2319_v60 = vmax.f32 %v2149_v39, %v2304_v59  ;;  %v4826_v61 = vpop.f32.mrb[48].mxu0 }
 0x14e   : > { %v2484_v62 = vmax.f32 %v2314_v36, %v4826_v61  ;;  %v2444_v63 = vpop.f32.mrb[49].mxu0 }
 0x14f   : > { %v4854_v0 = vpop.f32.mrb[48].mxu1  ;;  %v2483_v43 = vmax.f32 %v2313_v38, %v2444_v63 }
 0x150   : > { %v2614_v3 = vpop.f32.mrb[49].mxu1  ;;  %v2654_v24 = vmax.f32 %v2484_v62, %v4854_v0 }
 0x151   : > { %v2653_v2 = vmax.f32 %v2483_v43, %v2614_v3  ;;  %v4829_v4 = vpop.f32.mrb[50].mxu0 }
 0x152   : > { %v2486_v6 = vmax.f32 %v2316_v44, %v4829_v4  ;;  %v2454_v7 = vpop.f32.mrb[51].mxu0 }
 0x153   : > { %v4857_v8 = vpop.f32.mrb[50].mxu1  ;;  %v2485_v21 = vmax.f32 %v2315_v45, %v2454_v7 }
 0x154   : > { %v2624_v9 = vpop.f32.mrb[51].mxu1  ;;  %v2656_v15 = vmax.f32 %v2486_v6, %v4857_v8 }
 0x155   : > { %v2655_v16 = vmax.f32 %v2485_v21, %v2624_v9  ;;  %v4832_v17 = vpop.f32.mrb[52].mxu0 }
 0x156   : > { %v2488_v29 = vmax.f32 %v2318_v53, %v4832_v17  ;;  %v2464_v18 = vpop.f32.mrb[53].mxu0 }
 0x157   : > { %v4860_v19 = vpop.f32.mrb[52].mxu1  ;;  %v2487_v20 = vmax.f32 %v2317_v54, %v2464_v18 }
 0x158   : > { %v2634_v22 = vpop.f32.mrb[53].mxu1  ;;  %v2658_v23 = vmax.f32 %v2488_v29, %v4860_v19 }
 0x159   : > { %v2657_v57 = vmax.f32 %v2487_v20, %v2634_v22  ;;  %v4835_v5 = vpop.f32.mrb[54].mxu0 }
 0x15a   : > { %v2490_v37 = vmax.f32 %v2320_v50, %v4835_v5  ;;  %v2474_v25 = vpop.f32.mrb[55].mxu0 }
 0x15b   : > { %v4863_v11 = vpop.f32.mrb[54].mxu1  ;;  %v2489_v26 = vmax.f32 %v2319_v60, %v2474_v25 }
 0x15c   : > { %v2644_v28 = vpop.f32.mrb[55].mxu1  ;;  %v2660_v30 = vmax.f32 %v2490_v37, %v4863_v11 }
 0x15d   : > { %v2659_v31 = vmax.f32 %v2489_v26, %v2644_v28  ;;  %v4882_v32 = vpop.f32.mrb[56].mxu0 }
 0x15e   : > { %v2824_v33 = vmax.f32 %v2654_v24, %v4882_v32  ;;  %v2784_v47 = vpop.f32.mrb[57].mxu0 }
 0x15f   : > { %v4910_v12 = vpop.f32.mrb[56].mxu1  ;;  %v2823_v34 = vmax.f32 %v2653_v2, %v2784_v47 }
 0x160   : > { %v2954_v35 = vpop.f32.mrb[57].mxu1  ;;  %v2994_v36 = vmax.f32 %v2824_v33, %v4910_v12 }
 0x161   : > { %v2993_v38 = vmax.f32 %v2823_v34, %v2954_v35  ;;  %v4885_v40 = vpop.f32.mrb[58].mxu0  ;;  %v4147_v35 = vld [vmem:[%s6806_s3] ss:$0 sm:$0xff] }
 0x162   : > { %v2826_v10 = vmax.f32 %v2656_v15, %v4885_v40  ;;  %v2794_v56 = vpop.f32.mrb[59].mxu0 }
 0x163   : > { %v4913_v41 = vpop.f32.mrb[58].mxu1  ;;  %v2825_v13 = vmax.f32 %v2655_v16, %v2794_v56 }
 0x164   : > { %v2964_v42 = vpop.f32.mrb[59].mxu1  ;;  %v2996_v44 = vmax.f32 %v2826_v10, %v4913_v41 }
 0x165   : > { %v2995_v45 = vmax.f32 %v2825_v13, %v2964_v42  ;;  %v4888_v46 = vpop.f32.mrb[60].mxu0 }
 0x166   : > { %v2828_v48 = vmax.f32 %v2658_v23, %v4888_v46  ;;  %v2804_v49 = vpop.f32.mrb[61].mxu0 }
 0x167   : > { %v4916_v27 = vpop.f32.mrb[60].mxu1  ;;  %v2827_v51 = vmax.f32 %v2657_v57, %v2804_v49 }
 0x168   : > { %v2974_v52 = vpop.f32.mrb[61].mxu1  ;;  %v2998_v53 = vmax.f32 %v2828_v48, %v4916_v27 }
 0x169   : > { %v2997_v54 = vmax.f32 %v2827_v51, %v2974_v52  ;;  %v4891_v1 = vpop.f32.mrb[62].mxu0 }
 0x16a   : > { %v2830_v55 = vmax.f32 %v2660_v30, %v4891_v1  ;;  %v2814_v14 = vpop.f32.mrb[63].mxu0 }
 0x16b   : > { %v4919_v58 = vpop.f32.mrb[62].mxu1  ;;  %v2829_v39 = vmax.f32 %v2659_v31, %v2814_v14 }
 0x16c   : > { %v2984_v59 = vpop.f32.mrb[63].mxu1  ;;  %v3000_v50 = vmax.f32 %v2830_v55, %v4919_v58 }
 0x16d   : > { %v2999_v60 = vmax.f32 %v2829_v39, %v2984_v59  ;;  %v4938_v61 = vpop.f32.mrb[64].mxu0 }
 0x16e   : > { %v3164_v62 = vmax.f32 %v2994_v36, %v4938_v61  ;;  %v3124_v63 = vpop.f32.mrb[65].mxu0 }
 0x16f   : > { %v4966_v0 = vpop.f32.mrb[64].mxu1  ;;  %v3163_v43 = vmax.f32 %v2993_v38, %v3124_v63 }
 0x170   : > { %v3294_v3 = vpop.f32.mrb[65].mxu1  ;;  %v3334_v24 = vmax.f32 %v3164_v62, %v4966_v0 }
 0x171   : > { %v3333_v2 = vmax.f32 %v3163_v43, %v3294_v3  ;;  %v4941_v4 = vpop.f32.mrb[66].mxu0 }
 0x172   : > { %v3166_v6 = vmax.f32 %v2996_v44, %v4941_v4  ;;  %v3134_v7 = vpop.f32.mrb[67].mxu0 }
 0x173   : > { %v4969_v8 = vpop.f32.mrb[66].mxu1  ;;  %v3165_v21 = vmax.f32 %v2995_v45, %v3134_v7 }
 0x174   : > { %v3304_v9 = vpop.f32.mrb[67].mxu1  ;;  %v3336_v15 = vmax.f32 %v3166_v6, %v4969_v8 }
 0x175   : > { %v3335_v16 = vmax.f32 %v3165_v21, %v3304_v9  ;;  %v4944_v17 = vpop.f32.mrb[68].mxu0 }
 0x176   : > { %v3168_v29 = vmax.f32 %v2998_v53, %v4944_v17  ;;  %v3144_v18 = vpop.f32.mrb[69].mxu0 }
 0x177   : > { %v4972_v19 = vpop.f32.mrb[68].mxu1  ;;  %v3167_v20 = vmax.f32 %v2997_v54, %v3144_v18 }
 0x178   : > { %v3314_v22 = vpop.f32.mrb[69].mxu1  ;;  %v3338_v23 = vmax.f32 %v3168_v29, %v4972_v19 }
 0x179   : > { %v3337_v57 = vmax.f32 %v3167_v20, %v3314_v22  ;;  %v4947_v5 = vpop.f32.mrb[70].mxu0 }
 0x17a   : > { %v3170_v37 = vmax.f32 %v3000_v50, %v4947_v5  ;;  %v3154_v25 = vpop.f32.mrb[71].mxu0 }
 0x17b   : > { %v4975_v11 = vpop.f32.mrb[70].mxu1  ;;  %v3169_v26 = vmax.f32 %v2999_v60, %v3154_v25 }
 0x17c   : > { %v3324_v28 = vpop.f32.mrb[71].mxu1  ;;  %v3340_v30 = vmax.f32 %v3170_v37, %v4975_v11 }
 0x17d   : > { %v3339_v31 = vmax.f32 %v3169_v26, %v3324_v28  ;;  %v4994_v32 = vpop.f32.mrb[72].mxu0 }
 0x17e   : > { %v3504_v33 = vmax.f32 %v3334_v24, %v4994_v32  ;;  %v3464_v47 = vpop.f32.mrb[73].mxu0 }
 0x17f   : > { %v5022_v12 = vpop.f32.mrb[72].mxu1  ;;  %v3503_v34 = vmax.f32 %v3333_v2, %v3464_v47 }
 0x180   : > { %v3634_v36 = vpop.f32.mrb[73].mxu1  ;;  %v3674_v38 = vmax.f32 %v3504_v33, %v5022_v12 }
 0x181   : > { %v3673_v40 = vmax.f32 %v3503_v34, %v3634_v36  ;;  %v4997_v10 = vpop.f32.mrb[74].mxu0 }
 0x182   : > { %v3689_v56 = vadd.f32 %v4147_v35, %v3674_v38  ;;  %v3506_v41 = vmax.f32 %v3336_v15, %v4997_v10  ;;  %v3474_v13 = vpop.f32.mrb[75].mxu0 }
 0x183   : > { %v5025_v42 = vpop.f32.mrb[74].mxu1  ;;  %v3688_v44 = vadd.f32 %v4147_v35, %v3673_v40  ;;  %v3505_v45 = vmax.f32 %v3335_v16, %v3474_v13 }
 0x184   : > { %v3644_v46 = vpop.f32.mrb[75].mxu1  ;;  %v3697_v48 = vmul.f32 0.2, %v3689_v56  ;;  %v3676_v49 = vmax.f32 %v3506_v41, %v5025_v42 }
 0x185   : > { %v3696_v27 = vmul.f32 0.2, %v3688_v44  ;;  %v3675_v51 = vmax.f32 %v3505_v45, %v3644_v46  ;;  %v5000_v52 = vpop.f32.mrb[76].mxu0 }
 0x186   : > { %v3705_v53 = vmax.f32 %v3689_v56, %v3697_v48  ;;  %v3691_v54 = vadd.f32 %v4147_v35, %v3676_v49  ;;  %v3508_v1 = vmax.f32 %v3338_v23, %v5000_v52  ;;  %v3484_v55 = vpop.f32.mrb[77].mxu0 }
 0x187   : > { %v5028_v14 = vpop.f32.mrb[76].mxu1  ;;  %v3704_v58 = vmax.f32 %v3688_v44, %v3696_v27  ;;  %v3690_v39 = vadd.f32 %v4147_v35, %v3675_v51  ;;  %v3507_v59 = vmax.f32 %v3337_v57, %v3484_v55 }
 0x188   : > { %v3654_v50 = vpop.f32.mrb[77].mxu1  ;;  %3713 = vst.msk [vmem:[%s6776_s25 + $0x8] sm:$0xff] %vm321_vm0, %v3705_v53  ;;  %v3699_v60 = vmul.f32 0.2, %v3691_v54  ;;  %v3678_v61 = vmax.f32 %v3508_v1, %v5028_v14 }
 0x189   : > { %3712 = vst.msk [vmem:[%s6776_s25] sm:$0xff] %vm321_vm0, %v3704_v58  ;;  %v3698_v62 = vmul.f32 0.2, %v3690_v39  ;;  %v3677_v63 = vmax.f32 %v3507_v59, %v3654_v50  ;;  %v5003_v0 = vpop.f32.mrb[78].mxu0 }
 0x18a   : > { %v3707_v43 = vmax.f32 %v3691_v54, %v3699_v60  ;;  %v3693_v3 = vadd.f32 %v4147_v35, %v3678_v61  ;;  %v3510_v24 = vmax.f32 %v3340_v30, %v5003_v0  ;;  %v3494_v2 = vpop.f32.mrb[79].mxu0 }
 0x18b   : > { %v5031_v4 = vpop.f32.mrb[78].mxu1  ;;  %v3706_v6 = vmax.f32 %v3690_v39, %v3698_v62  ;;  %v3692_v7 = vadd.f32 %v4147_v35, %v3677_v63  ;;  %v3509_v8 = vmax.f32 %v3339_v31, %v3494_v2 }
 0x18c   : > { %v3664_v21 = vpop.f32.mrb[79].mxu1  ;;  %3715 = vst.msk [vmem:[%s6776_s25 + $0x18] sm:$0xff] %vm321_vm0, %v3707_v43  ;;  %v3701_v9 = vmul.f32 0.2, %v3693_v3  ;;  %v3680_v15 = vmax.f32 %v3510_v24, %v5031_v4 }
 0x18d   : > { %3714 = vst.msk [vmem:[%s6776_s25 + $0x10] sm:$0xff] %vm321_vm0, %v3706_v6  ;;  %v3700_v16 = vmul.f32 0.2, %v3692_v7  ;;  %v3679_v17 = vmax.f32 %v3509_v8, %v3664_v21 }
 0x18e   : > { %v3709_v29 = vmax.f32 %v3693_v3, %v3701_v9  ;;  %v3695_v18 = vadd.f32 %v4147_v35, %v3680_v15 }
 0x18f   : > { %v3708_v19 = vmax.f32 %v3692_v7, %v3700_v16  ;;  %v3694_v20 = vadd.f32 %v4147_v35, %v3679_v17 }
 0x190   : > { %3717 = vst.msk [vmem:[%s6776_s25 + $0x28] sm:$0xff] %vm321_vm0, %v3709_v29  ;;  %v3703_v22 = vmul.f32 0.2, %v3695_v18 }
 0x191   : > { %3716 = vst.msk [vmem:[%s6776_s25 + $0x20] sm:$0xff] %vm321_vm0, %v3708_v19  ;;  %v3702_v23 = vmul.f32 0.2, %v3694_v20 }
 0x192   : > { %v3711_v57 = vmax.f32 %v3695_v18, %v3703_v22 }
 0x193   : > { %v3710_v5 = vmax.f32 %v3694_v20, %v3702_v23 }
 0x194   : > { %3719 = vst.msk [vmem:[%s6776_s25 + $0x38] sm:$0xff] %vm321_vm0, %v3711_v57 }
 0x195   : > { %3718 = vst.msk [vmem:[%s6776_s25 + $0x30] sm:$0xff] %vm321_vm0, %v3710_v5 }
 0x196 PF: > { %s14_s17 = sadd.s32 1, %s5407_s17   ;;  %s6808_s15 = smov %s5403_s16 }
 0x197   : > { %p11_p5 = scmp.ge.s32.totalorder %s14_s17, 4   ;;  %s6809_s16 = smov %s6811_s18 }
 0x199   :  { %13 = sbr.rel (!%p11_p5) target bundleno = 2 (0x2), region = 88 }

// kernel: dgcnn_forward.17
= control target key start
LH: loop header
LB: loop body
LE: loop exit
PB: predicated region body
PF: predicated region fallthrough
CT: control target
= control target key end

     0   :  { %s2413_s0 = inlined_call_operand.vmem [shape: f32[2,64,64], index: 0, kind: input, shape index: {}]   ;;  %s2414_s1 = inlined_call_operand.vmem [shape: f32[2,64,64], index: 1, kind: input, shape index: {}]   ;;  %s2415_s2 = inlined_call_operand.vmem [shape: f32[2,64,64], index: 2, kind: input, shape index: {}]   ;;  %s2416_s3 = inlined_call_operand.vmem [shape: f32[64,64], index: 3, kind: input, shape index: {}]   ;;  %s2417_s4 = inlined_call_operand.vmem [shape: f32[64,64], index: 4, kind: input, shape index: {}]   ;;  %s2418_s5 = inlined_call_operand.vmem [shape: f32[64,64], index: 5, kind: input, shape index: {}]   ;;  %s2419_s6 = inlined_call_operand.vmem [shape: f32[1,64], index: 6, kind: input, shape index: {}]   ;;  %s2420_s7 = inlined_call_operand.vmem [shape: f32[64,64], index: 7, kind: input, shape index: {}]   ;;  %s2421_s8 = inlined_call_operand.vmem [shape: f32[1,64], index: 8, kind: input, shape index: {}]   ;;  %s2422_s9 = inlined_call_operand.vmem [shape: f32[1,64], index: 9, kind: input, shape index: {}]   ;;  %s2423_s10 = inlined_call_operand.vmem [shape: f32[1,64], index: 10, kind: input, shape index: {}]   ;;  %s2424_s11 = inlined_call_operand.vmem [shape: f32[64,64], index: 11, kind: input, shape index: {}]   ;;  %s2425_s12 = inlined_call_operand.vmem [shape: f32[1,64], index: 12, kind: input, shape index: {}]   ;;  %s2426_s13 = inlined_call_operand.hbm [shape: f32[2,64,64], index: 13, kind: output, shape index: {0}]   ;;  %s2427_s14 = inlined_call_operand.hbm [shape: f32[2,1,64], index: 14, kind: output, shape index: {1}]  }
   0x1   :  { %2433 = sst [smem:[#allocation15_spill]] %s2413_s0 }
   0x2   :  { %2434 = sst [smem:[#allocation16_spill]] %s2414_s1 }
   0x3   :  { %20 = vsyncpa [#allocation4], 0 }
   0x4   :  { %22 = vsyncpa [#allocation4 + $0x1], 0 }
   0x5   :  { %23 = vsyncpa [#allocation6], 0 }
   0x6   :  { %25 = vsyncpa [#allocation6 + $0x1], 0  ;;  %s2030_s29 = smov 0   ;;  %s2032_s30 = smov 0  }
   0x7   :  { %s2034_s15 = smov 0   ;;  %s2036_s16 = smov 0  }
   0x8   :  { %s2038_s17 = smov 0   ;;  %s2040_s18 = smov 0  }
   0x9 LB: > { %2435 = sst [smem:[#allocation9_spill]] %s1925_s29  ;;  %s1444_s19 = sadd.s32 4294967295, %s1945_s18   ;;  %s1945_s18 = sphi %s2040_s18, %s31_s18   ;;  %s1941_s17 = sphi %s2038_s17, %s2450_s17   ;;  %s1937_s16 = sphi %s2036_s16, %s2449_s16   ;;  %s1933_s15 = sphi %s2034_s15, %s2448_s15   ;;  %s1929_s30 = sphi %s2032_s30, %s2452_s30   ;;  %s1925_s29 = sphi %s2030_s29, %s2451_s29  }
   0xa   : > { %2436 = sst [smem:[#allocation10_spill]] %s1933_s15  ;;  %s1445_s20 = sadd.s32 4294967294, %s1945_s18  }
   0xb   : > { %2437 = sst [smem:[#allocation11_spill]] %s1941_s17  ;;  %s43_s21 = sadd.s32 1, %s1941_s17 }
   0xc   : > { %s346_s22 = sadd.s32 1, %s1933_s15  ;;  %p45_p0 = scmp.ge.s32.totalorder %s43_s21, 2 }
   0xd   : > { %p356_p1 = scmp.ne.s32.totalorder %s1933_s15, %s1929_s30  ;;  %p357_p2 = scmp.eq.s32.totalorder %s1444_s19, 1 }
   0xe   : > { %p362_p3 = scmp.ne.s32.totalorder %s1929_s30, %s1925_s29  ;;  %s2454_s21 = smov (%p45_p0, %s43_s21), 0 }
   0xf   : > { %2438 = sst [smem:[#allocation12_spill]] %s2454_s21  ;;  %p2070_p4 = por %p357_p2, %p356_p1 }
  0x10   : > { %p363_p5 = scmp.eq.s32.totalorder %s1445_s20, 1  ;;  %s341_s24 = ssub.s32 %s1941_s17, %s2454_s21 }
  0x11   : > { %p1448_p6 = scmp.ge.s32.totalorder %s1945_s18, 1  ;;  %p344_p7 = scmp.eq.s32.totalorder %s341_s24, 0 }
  0x12   : > { %p2077_p8 = por %p363_p5, %p362_p3  ;;  %p476_p9 = scmp.lt.s32.totalorder %s1945_s18, 3 }
  0x13   : > { %s2083_s26 = scalar_select %p344_p7, %s1933_s15, %s346_s22  }
  0x14   : > { %s2440_s25 = scalar_select %p2077_p8, 1, 0 }
  0x15   : > { %2442 = sst [smem:[#allocation14_spill]] %s2083_s26  ;;  %p477_p10 = pnand %p1448_p6, %p476_p9 }
  0x16   : > { %2441 = sst [smem:[#allocation13_spill]] %s2440_s25  ;;  %v587_v0 = vld [vmem:[%s2416_s3] sm:$0xff] (!%p477_p10)  ;;  %v588_v1 = vld [vmem:[%s2416_s3 + $0x8] sm:$0xff] (!%p477_p10)  ;;  %v589_v2 = vld [vmem:[%s2416_s3 + $0x10] sm:$0xff] (!%p477_p10)  ;;  %p549_p11 = scmp.lt.s32.totalorder (!%p477_p10), %s1937_s16, 1  ;;  %vm611_vm0 = vcmask (!%p477_p10), 523264  }
  0x17   : > { %480 = sbr.rel (%p477_p10) target bundleno = 769 (0x301), region = 72  ;;  %v1697_v3 = vpack.c.bf16 (!%p477_p10), %v588_v1, %v587_v0  ;;  %v590_v4 = vld [vmem:[%s2416_s3 + $0x18] sm:$0xff] (!%p477_p10)  ;;  %v591_v6 = vld [vmem:[%s2416_s3 + $0x20] sm:$0xff] (!%p477_p10)  ;;  %v592_v7 = vld [vmem:[%s2416_s3 + $0x28] sm:$0xff] (!%p477_p10)  ;;  %s2443_s0 = sld [smem:[#allocation15_spill]] (!%p477_p10)  ;;  %vm1066_vm1 = vcmask (!%p477_p10), 516096  }
  0x18   : > { %v1701_v5 = vpack.c.bf16 (!%p477_p10), %v590_v4, %v589_v2  ;;  %v603_v8 = vld [vmem:[%s2417_s4] sm:$0xff] (!%p477_p10)  ;;  %v604_v9 = vld [vmem:[%s2417_s4 + $0x8] sm:$0xff] (!%p477_p10)  ;;  %v605_v11 = vld [vmem:[%s2417_s4 + $0x10] sm:$0xff] (!%p477_p10)  ;;  %v1705_v13 = vpack.c.bf16 (!%p477_p10), %v592_v7, %v591_v6  ;;  %s2444_s1 = sld [smem:[#allocation16_spill]] (!%p477_p10)  ;;  %v1947_v60 = vmov (!%p477_p10), -inf   ;;  %v1948_v0 = vmov (!%p477_p10), 0.0|0.0  }
  0x19   : > { %1698 = vmatprep.subr.bf16.mxu0 (!%p477_p10), %v1697_v3  ;;  %v1681_v10 = vpack.c.bf16 (!%p477_p10), %v604_v9, %v603_v8  ;;  %v606_v12 = vld [vmem:[%s2417_s4 + $0x18] sm:$0xff] (!%p477_p10)  ;;  %v607_v15 = vld [vmem:[%s2417_s4 + $0x20] sm:$0xff] (!%p477_p10)  ;;  %v608_v16 = vld [vmem:[%s2417_s4 + $0x28] sm:$0xff] (!%p477_p10)  ;;  %1067 = vst.msk [vmem:[#allocation2] sm:$0x1] (!%p477_p10), %vm1066_vm1, %v1947_v60  ;;  %vm1949_vm2 = vmmov (!%p477_p10), 0  }
  0x1a   : > { %1700 = vmatpush3.bf16.msra.mxu0 (!%p477_p10), %v1697_v3  ;;  %v1685_v14 = vpack.c.bf16 (!%p477_p10), %v606_v12, %v605_v11  ;;  %v593_v17 = vld [vmem:[%s2416_s3 + $0x30] sm:$0xff] (!%p477_p10)  ;;  %v594_v18 = vld [vmem:[%s2416_s3 + $0x38] sm:$0xff] (!%p477_p10)  ;;  %v1689_v20 = vpack.c.bf16 (!%p477_p10), %v608_v16, %v607_v15  ;;  %v878_v24 = vld [vmem:[%s2418_s5] sm:$0xff] (!%p477_p10)  ;;  %s2250_s27 = sand.u32 (!%p477_p10), 1, %s1929_s30  }
  0x1b   : > { %1702 = vmatprep.subr.bf16.mxu0 (!%p477_p10), %v1701_v5  ;;  %1682 = vmatprep.subr.bf16.mxu1 (!%p477_p10), %v1681_v10  ;;  %v1709_v21 = vpack.c.bf16 (!%p477_p10), %v594_v18, %v593_v17  ;;  %v609_v22 = vld [vmem:[%s2417_s4 + $0x30] sm:$0xff] (!%p477_p10)  ;;  %v610_v23 = vld [vmem:[%s2417_s4 + $0x38] sm:$0xff] (!%p477_p10)  ;;  %v879_v25 = vld [vmem:[%s2418_s5 + $0x8] sm:$0xff] (!%p477_p10)  ;;  %s1449_s21 = sshll.u32 (!%p477_p10), %s2250_s27, 6  ;;  %s1269_s25 = scalar_lea.sflag (!%p477_p10), [#allocation4], %s2250_s27 }
  0x1c   : > { %1684 = vmatpush3.bf16.msra.mxu1 (!%p477_p10), %v1681_v10  ;;  %v1693_v27 = vpack.c.bf16 (!%p477_p10), %v610_v23, %v609_v22  ;;  %v1713_v28 = vpack.c.bf16 (!%p477_p10), %v879_v25, %v878_v24  ;;  %v880_v29 = vld [vmem:[%s2418_s5 + $0x10] sm:$0xff] (!%p477_p10)  ;;  %v881_v30 = vld [vmem:[%s2418_s5 + $0x18] sm:$0xff] (!%p477_p10)  ;;  %v882_v34 = vld [vmem:[%s2418_s5 + $0x20] sm:$0xff] (!%p477_p10)  ;;  %v1950_v10 = vmov (!%p477_p10), 0.0   ;;  %s2256_s24 = scalar_lea.vmem (!%p477_p10), [#allocation3], %s1449_s21  ;;  %s1951_s21 = smov (!%p477_p10), [#allocation3]  }
  0x1d   : > { %1686 = vmatprep.subr.bf16.mxu1 (!%p477_p10), %v1685_v14  ;;  %v1717_v33 = vpack.c.bf16 (!%p477_p10), %v881_v30, %v880_v29  ;;  %v883_v35 = vld [vmem:[%s2418_s5 + $0x28] sm:$0xff] (!%p477_p10)  ;;  %v884_v41 = vld [vmem:[%s2418_s5 + $0x30] sm:$0xff] (!%p477_p10)  ;;  %v885_v42 = vld [vmem:[%s2418_s5 + $0x38] sm:$0xff] (!%p477_p10)  ;;  %s1839_s29 = sshll.u32 (!%p477_p10), %s1951_s21, 4  ;;  %s1840_s29 = int_to_ptr.vmem [resolvable:$false] %s1839_s29 }
  0x1e   : > { %s550_s19 = scalar_select %p549_p11, %s1937_s16, 1  ;;  %1704 = vmatpush3.bf16.msra.mxu0 %v1701_v5  ;;  %v1721_v40 = vpack.c.bf16 %v883_v35, %v882_v34  ;;  %v1725_v47 = vpack.c.bf16 %v885_v42, %v884_v41  ;;  %v1097_v61 = vld [vmem:[%s2420_s7] sm:$0xff]  ;;  %v1098_v62 = vld [vmem:[%s2420_s7 + $0x8] sm:$0xff]  ;;  %v1099_v1 = vld [vmem:[%s2420_s7 + $0x10] sm:$0xff] }
  0x1f   : > { %1706 = vmatprep.subr.bf16.mxu0 %v1705_v13  ;;  %v1730_v63 = vpack.c.bf16 %v1098_v62, %v1097_v61  ;;  %v1100_v2 = vld [vmem:[%s2420_s7 + $0x18] sm:$0xff]  ;;  %v1101_v4 = vld [vmem:[%s2420_s7 + $0x20] sm:$0xff]  ;;  %v1102_v5 = vld [vmem:[%s2420_s7 + $0x28] sm:$0xff] }
  0x20   : > { %s2111_s17 = sshll.u32 %s550_s19, 6  ;;  %1688 = vmatpush3.bf16.msra.mxu1 %v1685_v14  ;;  %v1733_v3 = vpack.c.bf16 %v1100_v2, %v1099_v1  ;;  %v1736_v6 = vpack.c.bf16 %v1102_v5, %v1101_v4  ;;  %v1103_v7 = vld [vmem:[%s2420_s7 + $0x30] sm:$0xff]  ;;  %v1104_v8 = vld [vmem:[%s2420_s7 + $0x38] sm:$0xff] }
  0x21   : > { %s2123_s20 = scalar_lea.vmem %s2443_s0, %s2111_s17  ;;  %s2143_s19 = scalar_lea.vmem %s2444_s1, %s2111_s17  ;;  %1690 = vmatprep.subr.bf16.mxu1 %v1689_v20  ;;  %v1739_v9 = vpack.c.bf16 %v1104_v8, %v1103_v7 }
  0x22   : > { %v579_v19 = vld [vmem:[%s2123_s20] sm:$0xff]  ;;  %1708 = vmatpush3.bf16.msra.mxu0 %v1705_v13  ;;  %v580_v31 = vld [vmem:[%s2123_s20 + $0x8] sm:$0xff]  ;;  %v581_v32 = vld [vmem:[%s2123_s20 + $0x10] sm:$0xff]  ;;  %s576_s15 = scalar_lea.vmem %s2415_s2, %s2111_s17  ;;  %s1288_s17 = sshll.u32 %s2256_s24, 4  ;;  %s2330_s17 = int_to_ptr.vmem [resolvable:$true] %s1288_s17 }
  0x23   : > { %1603 = vmatprep.mubr.msk.f32.mxu0 %vm611_vm0, %v579_v19  ;;  %v595_v26 = vld [vmem:[%s2143_s19] sm:$0xff]  ;;  %1710 = vmatprep.subr.bf16.mxu0 %v1709_v21  ;;  %v596_v36 = vld [vmem:[%s2143_s19 + $0x8] sm:$0xff]  ;;  %v582_v37 = vld [vmem:[%s2123_s20 + $0x18] sm:$0xff]  ;;  %s1835_s28 = scalar_lea.vmem %s2330_s17, 1024  ;;  %p1842_p1 = scmp.lt.s32.totalorder %s2330_s17, %s1840_s29 }
  0x24   : > { %1575 = vmatprep.mubr.msk.f32.mxu1 %vm611_vm0, %v595_v26  ;;  %1692 = vmatpush3.bf16.msra.mxu1 %v1689_v20  ;;  %v597_v38 = vld [vmem:[%s2143_s19 + $0x10] sm:$0xff]  ;;  %v583_v39 = vld [vmem:[%s2123_s20 + $0x20] sm:$0xff]  ;;  %v598_v43 = vld [vmem:[%s2143_s19 + $0x18] sm:$0xff]  ;;  %p1836_p12 = scmp.ne.s32.totalorder %s2330_s17, %s1835_s28 }
  0x25   : > { %1694 = vmatprep.subr.bf16.mxu1 %v1693_v27  ;;  %v584_v44 = vld [vmem:[%s2123_s20 + $0x28] sm:$0xff]  ;;  %v599_v45 = vld [vmem:[%s2143_s19 + $0x20] sm:$0xff]  ;;  %v585_v46 = vld [vmem:[%s2123_s20 + $0x30] sm:$0xff] }
  0x26   : > { %1712 = vmatpush3.bf16.msra.mxu0 %v1709_v21  ;;  %v600_v48 = vld [vmem:[%s2143_s19 + $0x28] sm:$0xff]  ;;  %v586_v49 = vld [vmem:[%s2123_s20 + $0x38] sm:$0xff]  ;;  %v601_v50 = vld [vmem:[%s2143_s19 + $0x30] sm:$0xff]  ;;  %p1837_p13 = pnand %p1836_p12, %p2070_p4 }
  0x27   : > { %1714 = vmatprep.subr.bf16.mxu0 %v1713_v28  ;;  %v870_v51 = vld [vmem:[%s576_s15] sm:$0xff]  ;;  %v602_v52 = vld [vmem:[%s2143_s19 + $0x38] sm:$0xff]  ;;  %v871_v53 = vld [vmem:[%s576_s15 + $0x8] sm:$0xff] }
  0x28   : > { %1696 = vmatpush3.bf16.msra.mxu1 %v1693_v27  ;;  %v872_v54 = vld [vmem:[%s576_s15 + $0x10] sm:$0xff]  ;;  %v873_v55 = vld [vmem:[%s576_s15 + $0x18] sm:$0xff]  ;;  %v874_v56 = vld [vmem:[%s576_s15 + $0x20] sm:$0xff]  ;;  %p1838_p0 = pneg %p1837_p13 }
  0x29   : > { %1604 = vmatmul.mubr.msk.f32.vlgmr.msra.gmra.mrb[0].mxu0 %vm611_vm0, %v580_v31  ;;  %v875_v57 = vld [vmem:[%s576_s15 + $0x28] sm:$0xff]  ;;  %v876_v58 = vld [vmem:[%s576_s15 + $0x30] sm:$0xff]  ;;  %v877_v59 = vld [vmem:[%s576_s15 + $0x38] sm:$0xff]  ;;  %1729 = vmatprep.subr.bf16.mxu1 %v1948_v0  ;;  %s1492_s15 = sshll.u32 %s1937_s16, 10 }
  0x2a   : > { %1716 = vmatpush3.bf16.msra.mxu0 %v1713_v28  ;;  %1606 = vmatprep.mubr.msk.f32.mxu0 %vm611_vm0, %v581_v32  ;;  %v1480_v19 = vld [vmem:[%s2419_s6] ss:$0 sm:$0xff]  ;;  %s2328_s22 = scalar_lea.hbm %s2426_s13, %s1492_s15 }
  0x2b   : > { %1718 = vmatprep.subr.bf16.mxu0 %v1717_v33  ;;  %1576 = vmatmul.mubr.msk.f32.vlgmr.msra.gmra.mrb[0].mxu1 %vm611_vm0, %v596_v36 }
  0x2c   : > { %1578 = vmatprep.mubr.msk.f32.mxu1 %vm611_vm0, %v597_v38  ;;  %1731 = vmatpush3.bf16.msra.mxu1 %v1730_v63 }
  0x2d   : > { %1607 = vmatmul.mubr.msk.f32.gmra.mrb[2].mxu0 %vm611_vm0, %v582_v37  ;;  %1732 = vmatprep.subr.bf16.mxu1 %v1948_v0 }
  0x2e   : > { %1720 = vmatpush3.bf16.msra.mxu0 %v1717_v33  ;;  %1609 = vmatprep.mubr.msk.f32.mxu0 %vm611_vm0, %v583_v39 }
  0x2f   : > { %1722 = vmatprep.subr.bf16.mxu0 %v1721_v40  ;;  %1579 = vmatmul.mubr.msk.f32.gmra.mrb[2].mxu1 %vm611_vm0, %v598_v43 }
  0x30   : > { %1581 = vmatprep.mubr.msk.f32.mxu1 %vm611_vm0, %v599_v45  ;;  %1734 = vmatpush3.bf16.msra.mxu1 %v1733_v3 }
  0x31   : > { %1610 = vmatmul.mubr.msk.f32.gmra.mrb[4].mxu0 %vm611_vm0, %v584_v44  ;;  %1735 = vmatprep.subr.bf16.mxu1 %v1948_v0 }
  0x32   : > { %1724 = vmatpush3.bf16.msra.mxu0 %v1721_v40  ;;  %1612 = vmatprep.mubr.msk.f32.mxu0 %vm611_vm0, %v585_v46 }
  0x33   : > { %1726 = vmatprep.subr.bf16.mxu0 %v1725_v47  ;;  %1582 = vmatmul.mubr.msk.f32.gmra.mrb[4].mxu1 %vm611_vm0, %v600_v48 }
  0x34   : > { %1584 = vmatprep.mubr.msk.f32.mxu1 %vm611_vm0, %v601_v50  ;;  %1737 = vmatpush3.bf16.msra.mxu1 %v1736_v6 }
  0x35   : > { %1613 = vmatmul.mubr.msk.f32.gmra.mrb[6].mxu0 %vm611_vm0, %v586_v49  ;;  %1738 = vmatprep.subr.bf16.mxu1 %v1948_v0 }
  0x36   : > { %1728 = vmatpush3.bf16.msra.mxu0 %v1725_v47  ;;  %1631 = vmatprep.mubr.msk.f32.mxu0 %vm611_vm0, %v870_v51 }
  0x37   : > { %1585 = vmatmul.mubr.msk.f32.gmra.mrb[6].mxu1 %vm611_vm0, %v602_v52 }
  0x38   : > { %1659 = vmatprep.mubr.msk.f32.mxu1 %vm1949_vm2, %v1950_v10  ;;  %1740 = vmatpush3.bf16.msra.mxu1 %v1739_v9 }
  0x39   : > { %1632 = vmatmul.mubr.msk.f32.vlgmr.msra.gmra.mrb[0].mxu0 %vm611_vm0, %v871_v53  ;;  %1741 = vmatprep.subr.bf16.mxu1 %v1948_v0 }
  0x3a   : > { %1634 = vmatprep.mubr.msk.f32.mxu0 %vm611_vm0, %v872_v54 }
  0x3d   : > { %1635 = vmatmul.mubr.msk.f32.gmra.mrb[2].mxu0 %vm611_vm0, %v873_v55 }
  0x3e   : > { %1637 = vmatprep.mubr.msk.f32.mxu0 %vm611_vm0, %v874_v56 }
  0x41   : > { %1638 = vmatmul.mubr.msk.f32.gmra.mrb[4].mxu0 %vm611_vm0, %v875_v57 }
  0x42   : > { %1640 = vmatprep.mubr.msk.f32.mxu0 %vm611_vm0, %v876_v58 }
  0x45   : > { %1641 = vmatmul.mubr.msk.f32.gmra.mrb[6].mxu0 %vm611_vm0, %v877_v59 }
  0xfe   : > { %v1577_v11 = vpop.f32.mrb[0].mxu1 }
  0xff   : > { %v702_v12 = vpop.f32.mrb[1].mxu1 }
 0x102   : > { %v1580_v13 = vpop.f32.mrb[2].mxu1 }
 0x103   : > { %v712_v14 = vpop.f32.mrb[3].mxu1 }
 0x106   : > { %v1583_v15 = vpop.f32.mrb[4].mxu1 }
 0x107   : > { %v722_v16 = vpop.f32.mrb[5].mxu1 }
 0x10a   : > { %v1586_v17 = vpop.f32.mrb[6].mxu1 }
 0x10b   : > { %v732_v20 = vpop.f32.mrb[7].mxu1 }
 0x10c   : > { %v1633_v18 = vpop.f32.mrb[0].mxu0 }
 0x10d   : > { %v1753_v21 = vadd.f32 %v1633_v18, %v1577_v11  ;;  %v976_v22 = vpop.f32.mrb[1].mxu0  ;;  %v1068_v18 = vld [vmem:[#allocation2] sm:$0x1] }
 0x10e   : > { %v1754_v23 = vadd.f32 %v976_v22, %v702_v12  ;;  %v1186_v22 = vld [vmem:[%s2424_s11 + $0x8] sm:$0xff] }
 0x10f   : > { %v1031_v24 = vadd.f32 %v1753_v21, %v1480_v19  ;;  %v1185_v21 = vld [vmem:[%s2424_s11] sm:$0xff] }
 0x110   : > { %v1030_v25 = vadd.f32 %v1754_v23, %v1480_v19  ;;  %v1636_v26 = vpop.f32.mrb[2].mxu0  ;;  %v1742_v23 = vpack.c.bf16 %v1186_v22, %v1185_v21 }
 0x111   : > { %v1039_v27 = vmul.f32 0.2, %v1031_v24  ;;  %v1755_v28 = vadd.f32 %v1636_v26, %v1580_v13  ;;  %v986_v29 = vpop.f32.mrb[3].mxu0  ;;  %v1188_v26 = vld [vmem:[%s2424_s11 + $0x18] sm:$0xff] }
 0x112   : > { %v1038_v30 = vmul.f32 0.2, %v1030_v25  ;;  %v1756_v31 = vadd.f32 %v986_v29, %v712_v14 }
 0x113   : > { %v1047_v32 = vmax.f32 %v1031_v24, %v1039_v27  ;;  %v1033_v33 = vadd.f32 %v1755_v28, %v1480_v19  ;;  %v1189_v28 = vld [vmem:[%s2424_s11 + $0x20] sm:$0xff] }
 0x114   : > { %v1046_v34 = vmax.f32 %v1030_v25, %v1038_v30  ;;  %v1032_v35 = vadd.f32 %v1756_v31, %v1480_v19  ;;  %v1639_v36 = vpop.f32.mrb[4].mxu0  ;;  %v1187_v25 = vld [vmem:[%s2424_s11 + $0x10] sm:$0xff]  ;;  %v1192_v31 = vld [vmem:[%s2424_s11 + $0x38] sm:$0xff] }
 0x115   : > { %1055 = vst.msk [vmem:[%s2256_s24 + $0x8] sm:$0xff] %vm611_vm0, %v1047_v32  ;;  %v1041_v37 = vmul.f32 0.2, %v1033_v33  ;;  %v1757_v38 = vadd.f32 %v1639_v36, %v1583_v15  ;;  %v996_v39 = vpop.f32.mrb[5].mxu0  ;;  %v1070_v56 = vsel %vm611_vm0, %v1047_v32, -inf  ;;  %v1745_v27 = vpack.c.bf16 %v1188_v26, %v1187_v25  ;;  %v1191_v30 = vld [vmem:[%s2424_s11 + $0x30] sm:$0xff] }
 0x116   : > { %1054 = vst.msk [vmem:[%s2256_s24] sm:$0xff] %vm611_vm0, %v1046_v34  ;;  %v1040_v40 = vmul.f32 0.2, %v1032_v35  ;;  %v1758_v41 = vadd.f32 %v996_v39, %v722_v16  ;;  %v1069_v59 = vsel %vm611_vm0, %v1046_v34, -inf  ;;  %v1751_v32 = vpack.c.bf16 %v1192_v31, %v1191_v30 }
 0x117   : > { %v1049_v42 = vmax.f32 %v1033_v33, %v1041_v37  ;;  %v1035_v43 = vadd.f32 %v1757_v38, %v1480_v19  ;;  %v1105_v33 = vld [vmem:[%s2421_s8] sm:$0x1] }
 0x118   : > { %v1048_v44 = vmax.f32 %v1032_v35, %v1040_v40  ;;  %v1034_v45 = vadd.f32 %v1758_v41, %v1480_v19  ;;  %v1642_v46 = vpop.f32.mrb[6].mxu0  ;;  %v1181_v37 = vld [vmem:[%s2423_s10] sm:$0x1] }
 0x119   : > { %1057 = vst.msk [vmem:[%s2256_s24 + $0x18] sm:$0xff] %vm611_vm0, %v1049_v42  ;;  %v1043_v47 = vmul.f32 0.2, %v1035_v43  ;;  %v1759_v48 = vadd.f32 %v1642_v46, %v1586_v17  ;;  %v1006_v49 = vpop.f32.mrb[7].mxu0  ;;  %v1072_v3 = vsel %vm611_vm0, %v1049_v42, -inf }
 0x11a   : > { %1056 = vst.msk [vmem:[%s2256_s24 + $0x10] sm:$0xff] %vm611_vm0, %v1048_v44  ;;  %v1042_v50 = vmul.f32 0.2, %v1034_v45  ;;  %v1760_v51 = vadd.f32 %v1006_v49, %v732_v20  ;;  %v1071_v6 = vsel %vm611_vm0, %v1048_v44, -inf }
 0x11b   : > { %v1051_v52 = vmax.f32 %v1035_v43, %v1043_v47  ;;  %v1037_v53 = vadd.f32 %v1759_v48, %v1480_v19 }
 0x11c   : > { %v1050_v54 = vmax.f32 %v1034_v45, %v1042_v50  ;;  %v1036_v55 = vadd.f32 %v1760_v51, %v1480_v19 }
 0x11d   : > { %1059 = vst.msk [vmem:[%s2256_s24 + $0x28] sm:$0xff] %vm611_vm0, %v1051_v52  ;;  %v1075_v57 = vsel %vm611_vm0, %v1051_v52, -inf  ;;  %v1045_v58 = vmul.f32 0.2, %v1037_v53 }
 0x11e   : > { %v1076_v60 = vmax.f32 %v1070_v56, %v1075_v57  ;;  %1058 = vst.msk [vmem:[%s2256_s24 + $0x20] sm:$0xff] %vm611_vm0, %v1050_v54  ;;  %v1073_v61 = vsel %vm611_vm0, %v1050_v54, -inf  ;;  %v1044_v62 = vmul.f32 0.2, %v1036_v55 }
 0x11f   : > { %v1074_v63 = vmax.f32 %v1069_v59, %v1073_v61  ;;  %v1053_v1 = vmax.f32 %v1037_v53, %v1045_v58 }
 0x120   : > { %v1052_v2 = vmax.f32 %v1036_v55, %v1044_v62 }
 0x121   : > { %v1081_v4 = vmax.f32 %v1074_v63, %v1076_v60  ;;  %1061 = vst.msk [vmem:[%s2256_s24 + $0x38] sm:$0xff] %vm611_vm0, %v1053_v1  ;;  %v1079_v5 = vsel %vm611_vm0, %v1053_v1, -inf }
 0x122   : > { %v1080_v7 = vmax.f32 %v1072_v3, %v1079_v5  ;;  %1060 = vst.msk [vmem:[%s2256_s24 + $0x30] sm:$0xff] %vm611_vm0, %v1052_v2  ;;  %v1077_v8 = vsel %vm611_vm0, %v1052_v2, -inf  ;;  %s1841_s24 = scalar_lea.vmem %s1840_s29, 2048 }
 0x123   : > { %v1078_v9 = vmax.f32 %v1071_v6, %v1077_v8  ;;  %p1843_p2 = scmp.lt.s32.totalorder %s1841_s24, %s1835_s28 }
 0x125   : > { %v1082_v11 = vmax.f32 %v1078_v9, %v1080_v7  ;;  %p1844_p3 = por %p1843_p2, %p1842_p1 }
 0x127   : > { %v1083_v12 = vmax.f32 %v1081_v4, %v1082_v11  ;;  %p1845_p5 = pnand %p1844_p3, %p1838_p0 }
 0x129   : > { %v1084_v13 = vrot.slane %v1083_v12, 4 }
 0x12b   : > { %v1085_v14 = vmax.f32 %v1083_v12, %v1084_v13 }
 0x12d   : > { %v1086_v15 = vrot.slane %v1085_v14, 2 }
 0x12f   : > { %v1087_v16 = vmax.f32 %v1085_v14, %v1086_v15 }
 0x131   : > { %v1088_v17 = vrot.slane %v1087_v16, 1 }
 0x133   : > { %v1089_v19 = vmax.f32 %v1087_v16, %v1088_v17 }
 0x135   : > { %v1090_v20 = vmax.f32 %v1068_v18, %v1089_v19 }
 0x137   : > { %1092 = vst.msk [vmem:[#allocation2] sm:$0x1] %vm1066_vm1, %v1090_v20 }
 0x13e   : > { %v1096_v24 = vld [vmem:[#allocation2] sm:$0x1] }
 0x13f   : > { %1660 = vmatmul.mubr.msk.f32.vlgmr.msra.gmra.mrb[8].mxu1 %vm611_vm0, %v1096_v24 }
 0x140   : > { %1743 = vmatpush3.bf16.msra.mxu1 %v1742_v23  ;;  %1678 = vmatprep.mubr.msk.f32.mxu1 %vm1949_vm2, %v1950_v10  ;;  %v1190_v10 = vld [vmem:[%s2424_s11 + $0x28] sm:$0xff] }
 0x141   : > { %1744 = vmatprep.subr.bf16.mxu1 %v1948_v0  ;;  %v1748_v29 = vpack.c.bf16 %v1190_v10, %v1189_v28 }
 0x144   : > { %1746 = vmatpush3.bf16.msra.mxu1 %v1745_v27 }
 0x145   : > { %1747 = vmatprep.subr.bf16.mxu1 %v1948_v0 }
 0x148   : > { %1749 = vmatpush3.bf16.msra.mxu1 %v1748_v29 }
 0x149   : > { %1750 = vmatprep.subr.bf16.mxu1 %v1948_v0  ;;  %v1179_v0 = vld [vmem:[%s2422_s9] sm:$0x1] }
 0x14c   : > { %1752 = vmatpush3.bf16.msra.mxu1 %v1751_v32 }
 0x212   : > { %v1175_v34 = vpop.f32.mrb[8].mxu1 }
 0x213   : > { %v1176_v35 = vadd.f32 %v1175_v34, %v1105_v33  ;;  %v1661_v36 = vpop.f32.mrb[9].mxu1 }
 0x215   : > { %v1180_v38 = vmul.f32 %v1179_v0, %v1176_v35 }
 0x217   : > { %v1182_v39 = vadd.f32 %v1181_v37, %v1180_v38 }
 0x219   : > { %v1183_v40 = vmul.f32 0.01, %v1182_v39 }
 0x21b   : > { %v1184_v41 = vmax.f32 %v1182_v39, %v1183_v40 }
 0x21d   : > { %1679 = vmatmul.mubr.msk.f32.vlgmr.msra.gmra.mrb[10].mxu1 %vm611_vm0, %v1184_v41 }
 0x21e   : > { %1848 = shalt.err (!%p1845_p5)
}
 0x21f   : > { %s1849_s26 = scalar_lea.hbm %s2328_s22, 1024  ;;  %s1853_s19 = scalar_lea.hbm %s2426_s13, 2048 }
 0x220   : > { %p1850_p6 = scmp.ne.s32.totalorder %s2328_s22, %s1849_s26  ;;  %p1854_p10 = scmp.lt.u32.totalorder %s2328_s22, %s2426_s13 }
 0x221   : > { %p1855_p11 = scmp.lt.u32.totalorder %s1853_s19, %s1849_s26  ;;  %p1857_p13 = scmp.lt.u32.totalorder %s1849_s26, %s2328_s22 }
 0x222   : > { %p1851_p7 = pnand %p1850_p6, %p2070_p4 }
 0x223   : > { %p1856_p12 = por %p1855_p11, %p1854_p10 }
 0x224   : > { %p1852_p9 = pneg %p1851_p7 }
 0x225   : > { %p1858_p0 = por %p1857_p13, %p1856_p12 }
 0x227   : > { %p1859_p1 = pnand %p1858_p0, %p1852_p9 }
 0x229   : > { %1862 = shalt.err (!%p1859_p1)
}
 0x22a   : > { %s1952_s28 = smov 128   ;;  %s1953_s24 = smov 8   ;;  %v1193_v42 = vld [vmem:[%s2425_s12] sm:$0x1] }
 0x22b   : > { %1769 = dma.vmem_to_hbm [thread:$0]  (%p2070_p4), %s2330_s17, 1024, %s2328_s22, %s1269_s25, %s1952_s28, %s1952_s28, %s1953_s24  }
 0x22c   : > { %s1486_s26 = sshll.u32 %s1937_s16, 4  ;;  %s547_s19 = scalar_lea.vmem [#allocation5], %s2250_s27 }
 0x22d   : > { %s1304_s21 = sshll.u32 %s547_s19, 4  ;;  %s2364_s1 = scalar_lea.hbm %s2427_s14, %s1486_s26  ;;  %s2366_s21 = int_to_ptr.vmem [resolvable:$true] %s1304_s21 }
 0x22e   : > { %s1274_s17 = scalar_lea.sflag [#allocation6], %s2250_s27  ;;  %s1863_s22 = scalar_lea.vmem %s2366_s21, 16 }
 0x22f   : > { %p1864_p2 = scmp.ne.s32.totalorder %s2366_s21, %s1863_s22  ;;  %s1954_s16 = smov [#allocation5]  }
 0x230   : > { %s1867_s25 = sshll.u32 %s1954_s16, 4  ;;  %s1868_s25 = int_to_ptr.vmem [resolvable:$false] %s1867_s25 }
 0x231   : > { %p1865_p3 = pnand %p1864_p2, %p2070_p4  ;;  %s1869_s28 = scalar_lea.vmem %s1868_s25, 32 }
 0x232   : > { %p1870_p6 = scmp.lt.s32.totalorder %s2366_s21, %s1868_s25  ;;  %p1871_p7 = scmp.lt.s32.totalorder %s1869_s28, %s1863_s22 }
 0x233   : > { %p1866_p5 = pneg %p1865_p3 }
 0x234   : > { %p1872_p9 = por %p1871_p7, %p1870_p6 }
 0x236   : > { %p1873_p10 = pnand %p1872_p9, %p1866_p5 }
 0x2f0   : > { %v1263_v43 = vpop.f32.mrb[10].mxu1 }
 0x2f1   : > { %v1264_v44 = vadd.f32 %v1263_v43, %v1193_v42  ;;  %v1680_v45 = vpop.f32.mrb[11].mxu1 }
 0x2f3   : > { %1267 = vst.msk [vmem:[%s547_s19] sm:$0x1] %vm1066_vm1, %v1264_v44 }
 0x2f4   : > { %1876 = shalt.err (!%p1873_p10)
}
 0x2f5   : > { %s1877_s0 = scalar_lea.hbm %s2364_s1, 16  ;;  %s1881_s15 = scalar_lea.hbm %s2427_s14, 32 }
 0x2f6   : > { %p1878_p11 = scmp.ne.s32.totalorder %s2364_s1, %s1877_s0  ;;  %p1882_p0 = scmp.lt.u32.totalorder %s2364_s1, %s2427_s14 }
 0x2f7   : > { %p1883_p1 = scmp.lt.u32.totalorder %s1881_s15, %s1877_s0  ;;  %p1885_p3 = scmp.lt.u32.totalorder %s1877_s0, %s2364_s1 }
 0x2f8   : > { %p1879_p12 = pnand %p1878_p11, %p2070_p4 }
 0x2f9   : > { %p1884_p2 = por %p1883_p1, %p1882_p0 }
 0x2fa   : > { %p1880_p13 = pneg %p1879_p12 }
 0x2fb   : > { %p1886_p5 = por %p1885_p3, %p1884_p2 }
 0x2fd   : > { %p1887_p6 = pnand %p1886_p5, %p1880_p13 }
 0x2ff   : > { %1890 = shalt.err (!%p1887_p6)
}
 0x300   : > { %1770 = dma.vmem_to_hbm [thread:$0]  (%p2070_p4), %s2366_s21, 16, %s2364_s1, %s1274_s17  }
 0x301 PF: > { %s2445_s19 = sld [smem:[#allocation9_spill]]  ;;  %p1780_p7 = scmp.ge.s32.totalorder %s1945_s18, 2 }
 0x303   : > { %p1774_p9 = pnand %p1780_p7, %p2077_p8 }
 0x307   : > { %s1316_s22 = sand.u32 1, %s2445_s19  }
 0x308   : > { %s1317_s16 = scalar_lea.sflag [#allocation4], %s1316_s22 }
 0x309   : > { %1916 = dma.done.wait (!%p1774_p9), %s1317_s16, 1024  }
 0x30a   : > { %1918 = vsyncadd (!%p1774_p9), %s1317_s16, 4294966272  ;;  %s1326_s25 = scalar_lea.sflag [#allocation6], %s1316_s22 }
 0x30b   : > { %1920 = dma.done.wait (!%p1774_p9), %s1326_s25, 16  }
 0x30c   : > { %1922 = vsyncadd (!%p1774_p9), %s1326_s25, 4294967280  ;;  %s31_s18 = sadd.s32 1, %s1945_s18   ;;  %s2447_s23 = sld [smem:[#allocation10_spill]] }
 0x30d   : > { %p28_p10 = scmp.ge.s32.totalorder %s31_s18, 4   ;;  %s2448_s15 = sld [smem:[#allocation14_spill]] }
 0x30e   : > { %s2449_s16 = sld [smem:[#allocation11_spill]]  ;;  %s2450_s17 = sld [smem:[#allocation12_spill]] }
 0x30f   : > { %s2451_s29 = smov %s1929_s30  ;;  %30 = sbr.rel (!%p28_p10) target bundleno = 9 (0x9), region = 138 }
 0x312   : > { %s2452_s30 = smov %s2447_s23 }
 0x316   :  { %1330 = vsyncpa [#allocation4], 1 }
 0x317   :  { %1332 = vsyncpa [#allocation4 + $0x1], 1 }
 0x318   :  { %1333 = vsyncpa [#allocation6], 1 }
 0x319   :  { %1335 = vsyncpa [#allocation6 + $0x1], 1 }

</bundles_post_ra>
